<compile_context>
chip_gen: v5e
topology: v5e:2x2
jax: 0.10.0
libtpu: 0.0.40
codegen_flags: <defaults>
</compile_context>

<pallas_src>
import functools
import math

import jax
import jax.numpy as jnp
from jax.experimental import pallas as pl
from jax.experimental.pallas import tpu as pltpu

# ----------------------------- test configuration ---------------------------
BS = 2            # batch size
D_MODEL = 32      # model width (lanes)
NHEAD = 4         # attention heads  (head_dim = 8)
H_SP = 4          # spatial H of the src feature map
W_SP = 4          # spatial W of the src feature map
DIM_FF = 64       # feed-forward width
NUM_ENC = 2       # encoder layers
NUM_DEC = 2       # decoder layers
NUM_QUERIES = 8   # object queries
LN_EPS = 1e-5
NEG_INF = -1e30   # additive key-padding bias


def _row_tile(m):
    # Whole-array rows for small problems; 256-row tiles (multiple of 8,
    # ~0.5-4 MiB blocks at DETR-scale widths, safe on v7x's 64 MiB VMEM)
    # otherwise.
    return m if m <= 512 else 256


# ------------------------------- linear kernel ------------------------------
def _make_linear_kernel(activation, has_add):
    def _finish(x, w_ref, b_ref, o_ref):
        y = jnp.dot(x, w_ref[...].astype(jnp.float32),
                    preferred_element_type=jnp.float32)
        y = y + b_ref[...].astype(jnp.float32)
        if activation == "relu":
            y = jnp.maximum(y, 0.0)
        o_ref[...] = y.astype(o_ref.dtype)

    if has_add:
        def kernel(x_ref, a_ref, w_ref, b_ref, o_ref):
            x = x_ref[...].astype(jnp.float32) + a_ref[...].astype(jnp.float32)
            _finish(x, w_ref, b_ref, o_ref)
    else:
        def kernel(x_ref, w_ref, b_ref, o_ref):
            _finish(x_ref[...].astype(jnp.float32), w_ref, b_ref, o_ref)
    return kernel


def _linear(x, w, b, *, pre_add=None, activation=None):
    """y = (x [+ pre_add]) @ w + b [+ relu].  x:(M,K)  w:(K,N)  b:(N,)."""
    m, k = x.shape
    n = w.shape[1]
    tm = _row_tile(m)
    grid = (pl.cdiv(m, tm),)

    in_specs = [pl.BlockSpec((tm, k), lambda i: (i, 0))]
    args = [x]
    if pre_add is not None:
        in_specs.append(pl.BlockSpec((tm, k), lambda i: (i, 0)))
        args.append(pre_add)
    in_specs += [pl.BlockSpec((k, n), lambda i: (0, 0)),
                 pl.BlockSpec((1, n), lambda i: (0, 0))]
    args += [w, b.reshape(1, n)]

    return pl.pallas_call(
        _make_linear_kernel(activation, pre_add is not None),
        out_shape=jax.ShapeDtypeStruct((m, n), x.dtype),
        grid_spec=pltpu.PrefetchScalarGridSpec(
            num_scalar_prefetch=0,
            grid=grid,
            in_specs=in_specs,
            out_specs=pl.BlockSpec((tm, n), lambda i: (i, 0)),
        ),
        compiler_params=pltpu.CompilerParams(
            dimension_semantics=("parallel",)),
    )(*args)


# --------------------------- residual + layernorm ----------------------------
def _make_layernorm_kernel(has_residual):
    def _ln(v, g_ref, b_ref, o_ref):
        mu = jnp.mean(v, axis=-1, keepdims=True)
        c = v - mu
        var = jnp.mean(c * c, axis=-1, keepdims=True)
        y = c * jax.lax.rsqrt(var + LN_EPS)
        y = y * g_ref[...].astype(jnp.float32) + b_ref[...].astype(jnp.float32)
        o_ref[...] = y.astype(o_ref.dtype)

    if has_residual:
        def kernel(x_ref, r_ref, g_ref, b_ref, o_ref):
            _ln(x_ref[...].astype(jnp.float32) + r_ref[...].astype(jnp.float32),
                g_ref, b_ref, o_ref)
    else:
        def kernel(x_ref, g_ref, b_ref, o_ref):
            _ln(x_ref[...].astype(jnp.float32), g_ref, b_ref, o_ref)
    return kernel


def _layernorm(x, gamma, beta, *, residual=None):
    """LayerNorm(x [+ residual]) over the last dim.  x:(M,D)."""
    m, d = x.shape
    tm = _row_tile(m)
    grid = (pl.cdiv(m, tm),)

    in_specs = [pl.BlockSpec((tm, d), lambda i: (i, 0))]
    args = [x]
    if residual is not None:
        in_specs.append(pl.BlockSpec((tm, d), lambda i: (i, 0)))
        args.append(residual)
    in_specs += [pl.BlockSpec((1, d), lambda i: (0, 0)),
                 pl.BlockSpec((1, d), lambda i: (0, 0))]
    args += [gamma.reshape(1, d), beta.reshape(1, d)]

    return pl.pallas_call(
        _make_layernorm_kernel(residual is not None),
        out_shape=jax.ShapeDtypeStruct((m, d), x.dtype),
        grid_spec=pltpu.PrefetchScalarGridSpec(
            num_scalar_prefetch=0,
            grid=grid,
            in_specs=in_specs,
            out_specs=pl.BlockSpec((tm, d), lambda i: (i, 0)),
        ),
        compiler_params=pltpu.CompilerParams(
            dimension_semantics=("parallel",)),
    )(*args)


# ----------------------- fused multi-head attention core --------------------
def _make_mha_kernel(nhead, scale):
    def kernel(q_ref, k_ref, v_ref, bias_ref, wo_ref, bo_ref, o_ref):
        q = q_ref[0].astype(jnp.float32)          # (Lq, D)
        k = k_ref[0].astype(jnp.float32)          # (Lk, D)
        v = v_ref[0].astype(jnp.float32)          # (Lk, D)
        bias = bias_ref[0].astype(jnp.float32)    # (1, Lk) additive key bias
        lq, d = q.shape
        dh = d // nhead

        acc = jnp.zeros((lq, d), jnp.float32)
        for h in range(nhead):
            sl = slice(h * dh, (h + 1) * dh)
            # scores = q_h @ k_h^T * scale + key_padding_bias
            s = jax.lax.dot_general(
                q[:, sl], k[:, sl], (((1,), (1,)), ((), ())),
                preferred_element_type=jnp.float32)
            s = s * scale + bias
            s = s - jnp.max(s, axis=-1, keepdims=True)
            p = jnp.exp(s)
            p = p / jnp.sum(p, axis=-1, keepdims=True)
            ctx_h = jnp.dot(p, v[:, sl], preferred_element_type=jnp.float32)
            # accumulate this head's slice of the output projection
            acc = acc + jnp.dot(ctx_h, wo_ref[sl, :].astype(jnp.float32),
                                preferred_element_type=jnp.float32)
        out = acc + bo_ref[...].astype(jnp.float32)
        o_ref[0] = out.astype(o_ref.dtype)
    return kernel


def _mha(q, k, v, key_bias, wo, bo, nhead):
    """q:(B,Lq,D) k,v:(B,Lk,D) key_bias:(B,1,Lk) wo:(D,D) bo:(D,) -> (B,Lq,D)."""
    b, lq, d = q.shape
    lk = k.shape[1]
    scale = 1.0 / math.sqrt(d // nhead)
    return pl.pallas_call(
        _make_mha_kernel(nhead, scale),
        out_shape=jax.ShapeDtypeStruct((b, lq, d), q.dtype),
        grid_spec=pltpu.PrefetchScalarGridSpec(
            num_scalar_prefetch=0,
            grid=(b,),
            in_specs=[
                pl.BlockSpec((1, lq, d), lambda i: (i, 0, 0)),
                pl.BlockSpec((1, lk, d), lambda i: (i, 0, 0)),
                pl.BlockSpec((1, lk, d), lambda i: (i, 0, 0)),
                pl.BlockSpec((1, 1, lk), lambda i: (i, 0, 0)),
                pl.BlockSpec((d, d), lambda i: (0, 0)),
                pl.BlockSpec((1, d), lambda i: (0, 0)),
            ],
            out_specs=pl.BlockSpec((1, lq, d), lambda i: (i, 0, 0)),
        ),
        compiler_params=pltpu.CompilerParams(
            dimension_semantics=("parallel",)),
    )(q, k, v, key_bias, wo, bo.reshape(1, d))


# ------------------------------ layer assembly -------------------------------
def _attention_block(xq2, xkv2, posq2, poskv2, shape_q, shape_kv,
                     key_bias, p, prefix, nhead):
    """nn.MultiheadAttention: q/k/v projections (+pos), attention, out proj."""
    b, lq, d = shape_q
    lk = shape_kv[1]
    q = _linear(xq2, p[prefix + "wq"], p[prefix + "bq"], pre_add=posq2)
    k = _linear(xkv2, p[prefix + "wk"], p[prefix + "bk"], pre_add=poskv2)
    v = _linear(xkv2, p[prefix + "wv"], p[prefix + "bv"])
    a = _mha(q.reshape(b, lq, d), k.reshape(b, lk, d), v.reshape(b, lk, d),
             key_bias, p[prefix + "wo"], p[prefix + "bo"], nhead)
    return a.reshape(b * lq, d)


def _encoder_layer(x, pos, key_bias, p, nhead):
    b, s, d = x.shape
    x2 = x.reshape(b * s, d)
    pos2 = pos.reshape(b * s, d)
    a = _attention_block(x2, x2, pos2, pos2, (b, s, d), (b, s, d),
                         key_bias, p, "sa_", nhead)
    x2 = _layernorm(a, p["ln1_g"], p["ln1_b"], residual=x2)
    h = _linear(x2, p["w1"], p["b1"], activation="relu")
    h = _linear(h, p["w2"], p["b2"])
    x2 = _layernorm(h, p["ln2_g"], p["ln2_b"], residual=x2)
    return x2.reshape(b, s, d)


def _decoder_layer(tgt, memory, qpos, pos, mem_key_bias, p, nhead):
    b, nq, d = tgt.shape
    s = memory.shape[1]
    t2 = tgt.reshape(b * nq, d)
    qp2 = qpos.reshape(b * nq, d)
    m2 = memory.reshape(b * s, d)
    pos2 = pos.reshape(b * s, d)

    # self-attention (no tgt mask / padding in this module's forward)
    zero_bias = jnp.zeros((b, 1, nq), jnp.float32)
    a = _attention_block(t2, t2, qp2, qp2, (b, nq, d), (b, nq, d),
                         zero_bias, p, "sa_", nhead)
    t2 = _layernorm(a, p["ln1_g"], p["ln1_b"], residual=t2)

    # cross-attention over encoder memory (with memory key padding mask)
    a = _attention_block(t2, m2, qp2, pos2, (b, nq, d), (b, s, d),
                         mem_key_bias, p, "ca_", nhead)
    t2 = _layernorm(a, p["ln2_g"], p["ln2_b"], residual=t2)

    # feed-forward
    h = _linear(t2, p["w1"], p["b1"], activation="relu")
    h = _linear(h, p["w2"], p["b2"])
    t2 = _layernorm(h, p["ln3_g"], p["ln3_b"], residual=t2)
    return t2.reshape(b, nq, d)


@functools.partial(jax.jit, static_argnames=("nhead",))
def transformer_forward(params, src, mask, query_embed, pos_embed, *, nhead):
    """Mirrors Transformer.forward (normalize_before=False,
    return_intermediate_dec=False, dropout in eval)."""
    bs, c, h, w = src.shape
    s = h * w
    nq = query_embed.shape[0]

    # Module-boundary layout changes (the PyTorch module does the same
    # flatten/permute); internally we stay (batch, seq, d_model).
    x = jnp.transpose(src.reshape(bs, c, s), (0, 2, 1))          # (bs, HW, C)
    pos = jnp.transpose(pos_embed.reshape(bs, c, s), (0, 2, 1))  # (bs, HW, C)
    qpos = jnp.broadcast_to(query_embed[None, :, :], (bs, nq, c))
    key_bias = jnp.where(mask.reshape(bs, s), NEG_INF, 0.0).astype(jnp.float32)
    key_bias = key_bias[:, None, :]                              # (bs, 1, HW)
    tgt = jnp.zeros((bs, nq, c), src.dtype)

    memory = x
    for p in params["enc"]:
        memory = _encoder_layer(memory, pos, key_bias, p, nhead)

    out = tgt
    for p in params["dec"]:
        out = _decoder_layer(out, memory, qpos, pos, key_bias, p, nhead)
    out = _layernorm(out.reshape(bs * nq, c),
                     params["dec_norm_g"], params["dec_norm_b"]).reshape(bs, nq, c)

    hs = jnp.transpose(out, (1, 2, 0))                  # == hs.transpose(1, 2)
    mem_out = jnp.transpose(memory, (0, 2, 1)).reshape(bs, c, h, w)
    return hs, mem_out


# ------------------------------ parameter init -------------------------------
def _dense(key, fan_in, fan_out):
    # stored pre-transposed: (in, out), ready for x @ W
    return jax.random.normal(key, (fan_in, fan_out), jnp.float32) / math.sqrt(fan_in)


def _vec(key, n):
    return 0.02 * jax.random.normal(key, (n,), jnp.float32)


def _init_mha(key, d, prefix):
    ks = jax.random.split(key, 8)
    return {prefix + "wq": _dense(ks[0], d, d), prefix + "bq": _vec(ks[1], d),
            prefix + "wk": _dense(ks[2], d, d), prefix + "bk": _vec(ks[3], d),
            prefix + "wv": _dense(ks[4], d, d), prefix + "bv": _vec(ks[5], d),
            prefix + "wo": _dense(ks[6], d, d), prefix + "bo": _vec(ks[7], d)}


def _init_ln(key, d, prefix):
    k1, k2 = jax.random.split(key)
    return {prefix + "g": 1.0 + 0.05 * jax.random.normal(k1, (d,), jnp.float32),
            prefix + "b": 0.05 * jax.random.normal(k2, (d,), jnp.float32)}


def _init_ffn(key, d, dff):
    ks = jax.random.split(key, 4)
    return {"w1": _dense(ks[0], d, dff), "b1": _vec(ks[1], dff),
            "w2": _dense(ks[2], dff, d), "b2": _vec(ks[3], d)}


def _init_encoder_layer_params(key, d, dff):
    ks = jax.random.split(key, 4)
    p = {}
    p.update(_init_mha(ks[0], d, "sa_"))
    p.update(_init_ffn(ks[1], d, dff))
    p.update(_init_ln(ks[2], d, "ln1_"))
    p.update(_init_ln(ks[3], d, "ln2_"))
    return p


def _init_decoder_layer_params(key, d, dff):
    ks = jax.random.split(key, 6)
    p = {}
    p.update(_init_mha(ks[0], d, "sa_"))
    p.update(_init_mha(ks[1], d, "ca_"))
    p.update(_init_ffn(ks[2], d, dff))
    p.update(_init_ln(ks[3], d, "ln1_"))
    p.update(_init_ln(ks[4], d, "ln2_"))
    p.update(_init_ln(ks[5], d, "ln3_"))
    return p


def init_transformer_params(key, d, dff, n_enc, n_dec):
    keys = jax.random.split(key, n_enc + n_dec + 1)
    enc = [_init_encoder_layer_params(keys[i], d, dff) for i in range(n_enc)]
    dec = [_init_decoder_layer_params(keys[n_enc + i], d, dff) for i in range(n_dec)]
    ln = _init_ln(keys[-1], d, "")
    return {"enc": enc, "dec": dec, "dec_norm_g": ln["g"], "dec_norm_b": ln["b"]}


# ------------------------------ pure-JAX reference ---------------------------
def _ref_layernorm(x, g, b):
    mu = jnp.mean(x, axis=-1, keepdims=True)
    c = x - mu
    var = jnp.mean(c * c, axis=-1, keepdims=True)
    return c * jax.lax.rsqrt(var + LN_EPS) * g + b


def _ref_mha(q_in, k_in, v_in, key_bias, p, prefix, nhead):
    b, lq, d = q_in.shape
    lk = k_in.shape[1]
    dh = d // nhead
    q = q_in @ p[prefix + "wq"] + p[prefix + "bq"]
    k = k_in @ p[prefix + "wk"] + p[prefix + "bk"]
    v = v_in @ p[prefix + "wv"] + p[prefix + "bv"]
    q = q.reshape(b, lq, nhead, dh).transpose(0, 2, 1, 3)
    k = k.reshape(b, lk, nhead, dh).transpose(0, 2, 1, 3)
    v = v.reshape(b, lk, nhead, dh).transpose(0, 2, 1, 3)
    s = jnp.einsum("bhqd,bhkd->bhqk", q, k) / math.sqrt(dh)
    s = s + key_bias[:, :, None, :]
    a = jax.nn.softmax(s, axis=-1)
    o = jnp.einsum("bhqk,bhkd->bhqd", a, v).transpose(0, 2, 1, 3).reshape(b, lq, d)
    return o @ p[prefix + "wo"] + p[prefix + "bo"]


def _ref_encoder_layer(x, pos, key_bias, p, nhead):
    a = _ref_mha(x + pos, x + pos, x, key_bias, p, "sa_", nhead)
    x = _ref_layernorm(x + a, p["ln1_g"], p["ln1_b"])
    h = jnp.maximum(x @ p["w1"] + p["b1"], 0.0) @ p["w2"] + p["b2"]
    x = _ref_layernorm(x + h, p["ln2_g"], p["ln2_b"])
    return x


def _ref_decoder_layer(t, mem, qpos, pos, mem_bias, p, nhead):
    b, nq, _ = t.shape
    zero_bias = jnp.zeros((b, 1, nq), jnp.float32)
    a = _ref_mha(t + qpos, t + qpos, t, zero_bias, p, "sa_", nhead)
    t = _ref_layernorm(t + a, p["ln1_g"], p["ln1_b"])
    a = _ref_mha(t + qpos, mem + pos, mem, mem_bias, p, "ca_", nhead)
    t = _ref_layernorm(t + a, p["ln2_g"], p["ln2_b"])
    h = jnp.maximum(t @ p["w1"] + p["b1"], 0.0) @ p["w2"] + p["b2"]
    t = _ref_layernorm(t + h, p["ln3_g"], p["ln3_b"])
    return t


def _ref_transformer_forward(params, src, mask, query_embed, pos_embed, nhead):
    bs, c, h, w = src.shape
    s = h * w
    nq = query_embed.shape[0]
    x = jnp.transpose(src.reshape(bs, c, s), (0, 2, 1))
    pos = jnp.transpose(pos_embed.reshape(bs, c, s), (0, 2, 1))
    qpos = jnp.broadcast_to(query_embed[None, :, :], (bs, nq, c))
    key_bias = jnp.where(mask.reshape(bs, s), NEG_INF, 0.0).astype(jnp.float32)
    key_bias = key_bias[:, None, :]
    tgt = jnp.zeros((bs, nq, c), src.dtype)

    memory = x
    for p in params["enc"]:
        memory = _ref_encoder_layer(memory, pos, key_bias, p, nhead)
    out = tgt
    for p in params["dec"]:
        out = _ref_decoder_layer(out, memory, qpos, pos, key_bias, p, nhead)
    out = _ref_layernorm(out, params["dec_norm_g"], params["dec_norm_b"])
    hs = jnp.transpose(out, (1, 2, 0))
    mem_out = jnp.transpose(memory, (0, 2, 1)).reshape(bs, c, h, w)
    return hs, mem_out


# ------------------------------------ main -----------------------------------
if __name__ == "__main__":
    key = jax.random.PRNGKey(0)
    k_params, k_src, k_pos, k_query = jax.random.split(key, 4)

    params = init_transformer_params(k_params, D_MODEL, DIM_FF, NUM_ENC, NUM_DEC)

    src = jax.random.normal(k_src, (BS, D_MODEL, H_SP, W_SP), jnp.float32)
    pos_embed = 0.5 * jax.random.normal(k_pos, (BS, D_MODEL, H_SP, W_SP), jnp.float32)
    query_embed = jax.random.normal(k_query, (NUM_QUERIES, D_MODEL), jnp.float32)
    # key padding mask (True = padded): pad the last spatial column of batch 1.
    mask = jnp.zeros((BS, H_SP, W_SP), dtype=bool).at[1, :, W_SP - 1].set(True)

    hs, mem_out = transformer_forward(params, src, mask, query_embed, pos_embed,
                                      nhead=NHEAD)
    hs = jax.block_until_ready(hs)
    mem_out = jax.block_until_ready(mem_out)

    hs_ref, mem_ref = _ref_transformer_forward(params, src, mask, query_embed,
                                               pos_embed, NHEAD)

    assert hs.shape == (NUM_QUERIES, D_MODEL, BS), hs.shape
    assert mem_out.shape == (BS, D_MODEL, H_SP, W_SP), mem_out.shape
    assert jnp.allclose(hs, hs_ref, atol=2e-3, rtol=2e-3), "hs mismatch vs reference"
    assert jnp.allclose(mem_out, mem_ref, atol=2e-3, rtol=2e-3), "memory mismatch vs reference"

    print("KERNEL_OK")
</pallas_src>

<mosaic_0001>
module attributes {stable_mosaic.version = 11 : i64} {
  func.func @kernel(%arg0: i32, %arg1: memref<32x32xf32, #tpu.memory_space<vmem>>, %arg2: memref<32x32xf32, #tpu.memory_space<vmem>>, %arg3: memref<32x32xf32, #tpu.memory_space<vmem>>, %arg4: memref<1x32xf32, #tpu.memory_space<vmem>>, %arg5: memref<32x32xf32, #tpu.memory_space<vmem>>) attributes {dimension_semantics = [#tpu.dimension_semantics<parallel>], iteration_bounds = array<i64: 1>, scalar_prefetch = 0 : i64, scratch_operands = 0 : i64, tpu.core_type = #tpu.core_type<tc>, window_params = [{transform_indices = @transform_0, window_bounds = array<i64: 32, 32>}, {transform_indices = @transform_1, window_bounds = array<i64: 32, 32>}, {pipeline_mode = #tpu.pipeline_mode<synchronous>, transform_indices = @transform_2, window_bounds = array<i64: 32, 32>}, {pipeline_mode = #tpu.pipeline_mode<synchronous>, transform_indices = @transform_3, window_bounds = array<i64: 1, 32>}, {transform_indices = @transform_4, window_bounds = array<i64: 32, 32>}]} {
    %c0 = arith.constant 0 : index
    %c0_0 = arith.constant 0 : index
    %0 = vector.load %arg1[%c0, %c0_0] : memref<32x32xf32, #tpu.memory_space<vmem>>, vector<32x32xf32>
    %c0_1 = arith.constant 0 : index
    %c0_2 = arith.constant 0 : index
    %1 = vector.load %arg2[%c0_1, %c0_2] : memref<32x32xf32, #tpu.memory_space<vmem>>, vector<32x32xf32>
    %2 = arith.addf %0, %1 : vector<32x32xf32>
    %c0_3 = arith.constant 0 : index
    %c0_4 = arith.constant 0 : index
    %3 = vector.load %arg3[%c0_3, %c0_4] : memref<32x32xf32, #tpu.memory_space<vmem>>, vector<32x32xf32>
    %cst = arith.constant dense<0.000000e+00> : vector<32x32xf32>
    %4 = tpu.matmul %2, %3, %cst {dimension_numbers = #tpu.dot_dimension_numbers<[1], [0], [0], [1], [0, 0, 1, 1], [], []>} : vector<32x32xf32>, vector<32x32xf32>, vector<32x32xf32> -> vector<32x32xf32>
    %c0_5 = arith.constant 0 : index
    %c0_6 = arith.constant 0 : index
    %5 = vector.load %arg4[%c0_5, %c0_6] : memref<1x32xf32, #tpu.memory_space<vmem>>, vector<1x32xf32>
    %6 = vector.broadcast %5 : vector<1x32xf32> to vector<32x32xf32>
    %7 = arith.addf %4, %6 : vector<32x32xf32>
    %c0_7 = arith.constant 0 : index
    %c0_8 = arith.constant 0 : index
    %8 = vector.load %arg5[%c0_7, %c0_8] : memref<32x32xf32, #tpu.memory_space<vmem>>, vector<32x32xf32>
    tpu.vector_store %arg5[%c0_7, %c0_8], %7 {strides = array<i32>} : memref<32x32xf32, #tpu.memory_space<vmem>>, vector<32x32xf32>,
    return
  }
  func.func @transform_0(%arg0: i32) -> (i32, i32) {
    %c0_i32 = arith.constant 0 : i32
    %c0_i32_0 = arith.constant 0 : i32
    return %arg0, %c0_i32 : i32, i32
  }
  func.func @transform_1(%arg0: i32) -> (i32, i32) {
    %c0_i32 = arith.constant 0 : i32
    %c0_i32_0 = arith.constant 0 : i32
    return %arg0, %c0_i32 : i32, i32
  }
  func.func @transform_2(%arg0: i32) -> (i32, i32) {
    %c0_i32 = arith.constant 0 : i32
    %c0_i32_0 = arith.constant 0 : i32
    %c0_i32_1 = arith.constant 0 : i32
    return %c0_i32, %c0_i32_0 : i32, i32
  }
  func.func @transform_3(%arg0: i32) -> (i32, i32) {
    %c0_i32 = arith.constant 0 : i32
    %c0_i32_0 = arith.constant 0 : i32
    %c0_i32_1 = arith.constant 0 : i32
    return %c0_i32, %c0_i32_0 : i32, i32
  }
  func.func @transform_4(%arg0: i32) -> (i32, i32) {
    %c0_i32 = arith.constant 0 : i32
    %c0_i32_0 = arith.constant 0 : i32
    return %arg0, %c0_i32 : i32, i32
  }
}

module attributes {stable_mosaic.version = 11 : i64} {
  func.func @kernel(%arg0: i32, %arg1: memref<32x32xf32, #tpu.memory_space<vmem>>, %arg2: memref<32x32xf32, #tpu.memory_space<vmem>>, %arg3: memref<1x32xf32, #tpu.memory_space<vmem>>, %arg4: memref<32x32xf32, #tpu.memory_space<vmem>>) attributes {dimension_semantics = [#tpu.dimension_semantics<parallel>], iteration_bounds = array<i64: 1>, scalar_prefetch = 0 : i64, scratch_operands = 0 : i64, tpu.core_type = #tpu.core_type<tc>, window_params = [{transform_indices = @transform_0, window_bounds = array<i64: 32, 32>}, {pipeline_mode = #tpu.pipeline_mode<synchronous>, transform_indices = @transform_1, window_bounds = array<i64: 32, 32>}, {pipeline_mode = #tpu.pipeline_mode<synchronous>, transform_indices = @transform_2, window_bounds = array<i64: 1, 32>}, {transform_indices = @transform_3, window_bounds = array<i64: 32, 32>}]} {
    %c0 = arith.constant 0 : index
    %c0_0 = arith.constant 0 : index
    %0 = vector.load %arg1[%c0, %c0_0] : memref<32x32xf32, #tpu.memory_space<vmem>>, vector<32x32xf32>
    %c0_1 = arith.constant 0 : index
    %c0_2 = arith.constant 0 : index
    %1 = vector.load %arg2[%c0_1, %c0_2] : memref<32x32xf32, #tpu.memory_space<vmem>>, vector<32x32xf32>
    %cst = arith.constant dense<0.000000e+00> : vector<32x32xf32>
    %2 = tpu.matmul %0, %1, %cst {dimension_numbers = #tpu.dot_dimension_numbers<[1], [0], [0], [1], [0, 0, 1, 1], [], []>} : vector<32x32xf32>, vector<32x32xf32>, vector<32x32xf32> -> vector<32x32xf32>
    %c0_3 = arith.constant 0 : index
    %c0_4 = arith.constant 0 : index
    %3 = vector.load %arg3[%c0_3, %c0_4] : memref<1x32xf32, #tpu.memory_space<vmem>>, vector<1x32xf32>
    %4 = vector.broadcast %3 : vector<1x32xf32> to vector<32x32xf32>
    %5 = arith.addf %2, %4 : vector<32x32xf32>
    %c0_5 = arith.constant 0 : index
    %c0_6 = arith.constant 0 : index
    %6 = vector.load %arg4[%c0_5, %c0_6] : memref<32x32xf32, #tpu.memory_space<vmem>>, vector<32x32xf32>
    tpu.vector_store %arg4[%c0_5, %c0_6], %5 {strides = array<i32>} : memref<32x32xf32, #tpu.memory_space<vmem>>, vector<32x32xf32>,
    return
  }
  func.func @transform_0(%arg0: i32) -> (i32, i32) {
    %c0_i32 = arith.constant 0 : i32
    %c0_i32_0 = arith.constant 0 : i32
    return %arg0, %c0_i32 : i32, i32
  }
  func.func @transform_1(%arg0: i32) -> (i32, i32) {
    %c0_i32 = arith.constant 0 : i32
    %c0_i32_0 = arith.constant 0 : i32
    %c0_i32_1 = arith.constant 0 : i32
    return %c0_i32, %c0_i32_0 : i32, i32
  }
  func.func @transform_2(%arg0: i32) -> (i32, i32) {
    %c0_i32 = arith.constant 0 : i32
    %c0_i32_0 = arith.constant 0 : i32
    %c0_i32_1 = arith.constant 0 : i32
    return %c0_i32, %c0_i32_0 : i32, i32
  }
  func.func @transform_3(%arg0: i32) -> (i32, i32) {
    %c0_i32 = arith.constant 0 : i32
    %c0_i32_0 = arith.constant 0 : i32
    return %arg0, %c0_i32 : i32, i32
  }
}

module attributes {stable_mosaic.version = 11 : i64} {
  func.func @kernel(%arg0: i32, %arg1: memref<32x32xf32, #tpu.memory_space<vmem>>, %arg2: memref<32x32xf32, #tpu.memory_space<vmem>>, %arg3: memref<32x32xf32, #tpu.memory_space<vmem>>, %arg4: memref<1x32xf32, #tpu.memory_space<vmem>>, %arg5: memref<32x32xf32, #tpu.memory_space<vmem>>) attributes {dimension_semantics = [#tpu.dimension_semantics<parallel>], iteration_bounds = array<i64: 1>, scalar_prefetch = 0 : i64, scratch_operands = 0 : i64, tpu.core_type = #tpu.core_type<tc>, window_params = [{transform_indices = @transform_0, window_bounds = array<i64: 32, 32>}, {transform_indices = @transform_1, window_bounds = array<i64: 32, 32>}, {pipeline_mode = #tpu.pipeline_mode<synchronous>, transform_indices = @transform_2, window_bounds = array<i64: 32, 32>}, {pipeline_mode = #tpu.pipeline_mode<synchronous>, transform_indices = @transform_3, window_bounds = array<i64: 1, 32>}, {transform_indices = @transform_4, window_bounds = array<i64: 32, 32>}]} {
    %c0 = arith.constant 0 : index
    %c0_0 = arith.constant 0 : index
    %0 = vector.load %arg1[%c0, %c0_0] : memref<32x32xf32, #tpu.memory_space<vmem>>, vector<32x32xf32>
    %c0_1 = arith.constant 0 : index
    %c0_2 = arith.constant 0 : index
    %1 = vector.load %arg2[%c0_1, %c0_2] : memref<32x32xf32, #tpu.memory_space<vmem>>, vector<32x32xf32>
    %2 = arith.addf %0, %1 : vector<32x32xf32>
    %c0_3 = arith.constant 0 : index
    %c0_4 = arith.constant 0 : index
    %3 = vector.load %arg3[%c0_3, %c0_4] : memref<32x32xf32, #tpu.memory_space<vmem>>, vector<32x32xf32>
    %cst = arith.constant dense<0.000000e+00> : vector<32x32xf32>
    %4 = tpu.matmul %2, %3, %cst {dimension_numbers = #tpu.dot_dimension_numbers<[1], [0], [0], [1], [0, 0, 1, 1], [], []>} : vector<32x32xf32>, vector<32x32xf32>, vector<32x32xf32> -> vector<32x32xf32>
    %c0_5 = arith.constant 0 : index
    %c0_6 = arith.constant 0 : index
    %5 = vector.load %arg4[%c0_5, %c0_6] : memref<1x32xf32, #tpu.memory_space<vmem>>, vector<1x32xf32>
    %6 = vector.broadcast %5 : vector<1x32xf32> to vector<32x32xf32>
    %7 = arith.addf %4, %6 : vector<32x32xf32>
    %c0_7 = arith.constant 0 : index
    %c0_8 = arith.constant 0 : index
    %8 = vector.load %arg5[%c0_7, %c0_8] : memref<32x32xf32, #tpu.memory_space<vmem>>, vector<32x32xf32>
    tpu.vector_store %arg5[%c0_7, %c0_8], %7 {strides = array<i32>} : memref<32x32xf32, #tpu.memory_space<vmem>>, vector<32x32xf32>,
    return
  }
  func.func @transform_0(%arg0: i32) -> (i32, i32) {
    %c0_i32 = arith.constant 0 : i32
    %c0_i32_0 = arith.constant 0 : i32
    return %arg0, %c0_i32 : i32, i32
  }
  func.func @transform_1(%arg0: i32) -> (i32, i32) {
    %c0_i32 = arith.constant 0 : i32
    %c0_i32_0 = arith.constant 0 : i32
    return %arg0, %c0_i32 : i32, i32
  }
  func.func @transform_2(%arg0: i32) -> (i32, i32) {
    %c0_i32 = arith.constant 0 : i32
    %c0_i32_0 = arith.constant 0 : i32
    %c0_i32_1 = arith.constant 0 : i32
    return %c0_i32, %c0_i32_0 : i32, i32
  }
  func.func @transform_3(%arg0: i32) -> (i32, i32) {
    %c0_i32 = arith.constant 0 : i32
    %c0_i32_0 = arith.constant 0 : i32
    %c0_i32_1 = arith.constant 0 : i32
    return %c0_i32, %c0_i32_0 : i32, i32
  }
  func.func @transform_4(%arg0: i32) -> (i32, i32) {
    %c0_i32 = arith.constant 0 : i32
    %c0_i32_0 = arith.constant 0 : i32
    return %arg0, %c0_i32 : i32, i32
  }
}

module attributes {stable_mosaic.version = 11 : i64} {
  func.func @kernel(%arg0: i32, %arg1: memref<32x32xf32, #tpu.memory_space<vmem>>, %arg2: memref<32x64xf32, #tpu.memory_space<vmem>>, %arg3: memref<1x64xf32, #tpu.memory_space<vmem>>, %arg4: memref<32x64xf32, #tpu.memory_space<vmem>>) attributes {dimension_semantics = [#tpu.dimension_semantics<parallel>], iteration_bounds = array<i64: 1>, scalar_prefetch = 0 : i64, scratch_operands = 0 : i64, tpu.core_type = #tpu.core_type<tc>, window_params = [{transform_indices = @transform_0, window_bounds = array<i64: 32, 32>}, {pipeline_mode = #tpu.pipeline_mode<synchronous>, transform_indices = @transform_1, window_bounds = array<i64: 32, 64>}, {pipeline_mode = #tpu.pipeline_mode<synchronous>, transform_indices = @transform_2, window_bounds = array<i64: 1, 64>}, {transform_indices = @transform_3, window_bounds = array<i64: 32, 64>}]} {
    %c0 = arith.constant 0 : index
    %c0_0 = arith.constant 0 : index
    %0 = vector.load %arg1[%c0, %c0_0] : memref<32x32xf32, #tpu.memory_space<vmem>>, vector<32x32xf32>
    %c0_1 = arith.constant 0 : index
    %c0_2 = arith.constant 0 : index
    %1 = vector.load %arg2[%c0_1, %c0_2] : memref<32x64xf32, #tpu.memory_space<vmem>>, vector<32x64xf32>
    %cst = arith.constant dense<0.000000e+00> : vector<32x64xf32>
    %2 = tpu.matmul %0, %1, %cst {dimension_numbers = #tpu.dot_dimension_numbers<[1], [0], [0], [1], [0, 0, 1, 1], [], []>} : vector<32x32xf32>, vector<32x64xf32>, vector<32x64xf32> -> vector<32x64xf32>
    %c0_3 = arith.constant 0 : index
    %c0_4 = arith.constant 0 : index
    %3 = vector.load %arg3[%c0_3, %c0_4] : memref<1x64xf32, #tpu.memory_space<vmem>>, vector<1x64xf32>
    %4 = vector.broadcast %3 : vector<1x64xf32> to vector<32x64xf32>
    %5 = arith.addf %2, %4 : vector<32x64xf32>
    %cst_5 = arith.constant 0.000000e+00 : f32
    %6 = vector.broadcast %cst_5 : f32 to vector<32x64xf32>
    %7 = arith.maximumf %5, %6 : vector<32x64xf32>
    %c0_6 = arith.constant 0 : index
    %c0_7 = arith.constant 0 : index
    %8 = vector.load %arg4[%c0_6, %c0_7] : memref<32x64xf32, #tpu.memory_space<vmem>>, vector<32x64xf32>
    tpu.vector_store %arg4[%c0_6, %c0_7], %7 {strides = array<i32>} : memref<32x64xf32, #tpu.memory_space<vmem>>, vector<32x64xf32>,
    return
  }
  func.func @transform_0(%arg0: i32) -> (i32, i32) {
    %c0_i32 = arith.constant 0 : i32
    %c0_i32_0 = arith.constant 0 : i32
    return %arg0, %c0_i32 : i32, i32
  }
  func.func @transform_1(%arg0: i32) -> (i32, i32) {
    %c0_i32 = arith.constant 0 : i32
    %c0_i32_0 = arith.constant 0 : i32
    %c0_i32_1 = arith.constant 0 : i32
    return %c0_i32, %c0_i32_0 : i32, i32
  }
  func.func @transform_2(%arg0: i32) -> (i32, i32) {
    %c0_i32 = arith.constant 0 : i32
    %c0_i32_0 = arith.constant 0 : i32
    %c0_i32_1 = arith.constant 0 : i32
    return %c0_i32, %c0_i32_0 : i32, i32
  }
  func.func @transform_3(%arg0: i32) -> (i32, i32) {
    %c0_i32 = arith.constant 0 : i32
    %c0_i32_0 = arith.constant 0 : i32
    return %arg0, %c0_i32 : i32, i32
  }
}

module attributes {stable_mosaic.version = 11 : i64} {
  func.func @kernel(%arg0: i32, %arg1: memref<1x16x32xf32, #tpu.memory_space<vmem>>, %arg2: memref<1x16x32xf32, #tpu.memory_space<vmem>>, %arg3: memref<1x16x32xf32, #tpu.memory_space<vmem>>, %arg4: memref<1x1x16xf32, #tpu.memory_space<vmem>>, %arg5: memref<32x32xf32, #tpu.memory_space<vmem>>, %arg6: memref<1x32xf32, #tpu.memory_space<vmem>>, %arg7: memref<1x16x32xf32, #tpu.memory_space<vmem>>) attributes {dimension_semantics = [#tpu.dimension_semantics<parallel>], iteration_bounds = array<i64: 2>, scalar_prefetch = 0 : i64, scratch_operands = 0 : i64, tpu.core_type = #tpu.core_type<tc>, window_params = [{transform_indices = @transform_0, window_bounds = array<i64: 1, 16, 32>}, {transform_indices = @transform_1, window_bounds = array<i64: 1, 16, 32>}, {transform_indices = @transform_2, window_bounds = array<i64: 1, 16, 32>}, {transform_indices = @transform_3, window_bounds = array<i64: 1, 1, 16>}, {pipeline_mode = #tpu.pipeline_mode<synchronous>, transform_indices = @transform_4, window_bounds = array<i64: 32, 32>}, {pipeline_mode = #tpu.pipeline_mode<synchronous>, transform_indices = @transform_5, window_bounds = array<i64: 1, 32>}, {transform_indices = @transform_6, window_bounds = array<i64: 1, 16, 32>}]} {
    %c0 = arith.constant 0 : index
    %c0_0 = arith.constant 0 : index
    %c0_1 = arith.constant 0 : index
    %0 = vector.load %arg1[%c0, %c0_0, %c0_1] : memref<1x16x32xf32, #tpu.memory_space<vmem>>, vector<1x16x32xf32>
    %1 = vector.shape_cast %0 : vector<1x16x32xf32> to vector<16x32xf32>
    %c0_2 = arith.constant 0 : index
    %c0_3 = arith.constant 0 : index
    %c0_4 = arith.constant 0 : index
    %2 = vector.load %arg2[%c0_2, %c0_3, %c0_4] : memref<1x16x32xf32, #tpu.memory_space<vmem>>, vector<1x16x32xf32>
    %3 = vector.shape_cast %2 : vector<1x16x32xf32> to vector<16x32xf32>
    %c0_5 = arith.constant 0 : index
    %c0_6 = arith.constant 0 : index
    %c0_7 = arith.constant 0 : index
    %4 = vector.load %arg3[%c0_5, %c0_6, %c0_7] : memref<1x16x32xf32, #tpu.memory_space<vmem>>, vector<1x16x32xf32>
    %5 = vector.shape_cast %4 : vector<1x16x32xf32> to vector<16x32xf32>
    %c0_8 = arith.constant 0 : index
    %c0_9 = arith.constant 0 : index
    %c0_10 = arith.constant 0 : index
    %6 = vector.load %arg4[%c0_8, %c0_9, %c0_10] : memref<1x1x16xf32, #tpu.memory_space<vmem>>, vector<1x1x16xf32>
    %7 = vector.shape_cast %6 : vector<1x1x16xf32> to vector<1x16xf32>
    %cst = arith.constant 0.000000e+00 : f32
    %8 = vector.broadcast %cst : f32 to vector<16x32xf32>
    %9 = vector.extract_strided_slice %1 {offsets = [0, 0], sizes = [16, 8], strides = [1, 1]} : vector<16x32xf32> to vector<16x8xf32>
    %10 = vector.extract_strided_slice %3 {offsets = [0, 0], sizes = [16, 8], strides = [1, 1]} : vector<16x32xf32> to vector<16x8xf32>
    %cst_11 = arith.constant dense<0.000000e+00> : vector<16x16xf32>
    %11 = tpu.matmul %9, %10, %cst_11 {dimension_numbers = #tpu.dot_dimension_numbers<[1], [1], [0], [0], [0, 0, 1, 0], [], []>} : vector<16x8xf32>, vector<16x8xf32>, vector<16x16xf32> -> vector<16x16xf32>
    %cst_12 = arith.constant 0.353553385 : f32
    %12 = vector.broadcast %cst_12 : f32 to vector<16x16xf32>
    %13 = arith.mulf %11, %12 : vector<16x16xf32>
    %14 = vector.broadcast %7 : vector<1x16xf32> to vector<16x16xf32>
    %15 = arith.addf %13, %14 : vector<16x16xf32>
    %cst_13 = arith.constant dense<0xFF800000> : vector<16xf32>
    %16 = vector.multi_reduction <maximumf>, %15, %cst_13 [1] : vector<16x16xf32> to vector<16xf32>
    %17 = vector.shape_cast %16 : vector<16xf32> to vector<16x1xf32>
    %18 = vector.broadcast %17 : vector<16x1xf32> to vector<16x16xf32>
    %19 = arith.subf %15, %18 : vector<16x16xf32>
    %20 = math.exp %19 : vector<16x16xf32>
    %cst_14 = arith.constant dense<0.000000e+00> : vector<16xf32>
    %21 = vector.multi_reduction <add>, %20, %cst_14 [1] : vector<16x16xf32> to vector<16xf32>
    %22 = vector.shape_cast %21 : vector<16xf32> to vector<16x1xf32>
    %23 = vector.broadcast %22 : vector<16x1xf32> to vector<16x16xf32>
    %24 = arith.divf %20, %23 : vector<16x16xf32>
    %25 = vector.extract_strided_slice %5 {offsets = [0, 0], sizes = [16, 8], strides = [1, 1]} : vector<16x32xf32> to vector<16x8xf32>
    %cst_15 = arith.constant dense<0.000000e+00> : vector<16x8xf32>
    %26 = tpu.matmul %24, %25, %cst_15 {dimension_numbers = #tpu.dot_dimension_numbers<[1], [0], [0], [1], [0, 0, 1, 1], [], []>} : vector<16x16xf32>, vector<16x8xf32>, vector<16x8xf32> -> vector<16x8xf32>
    %c0_16 = arith.constant 0 : index
    %c0_17 = arith.constant 0 : index
    %27 = vector.load %arg5[%c0_16, %c0_17] : memref<32x32xf32, #tpu.memory_space<vmem>>, vector<8x32xf32>
    %cst_18 = arith.constant dense<0.000000e+00> : vector<16x32xf32>
    %28 = tpu.matmul %26, %27, %cst_18 {dimension_numbers = #tpu.dot_dimension_numbers<[1], [0], [0], [1], [0, 0, 1, 1], [], []>} : vector<16x8xf32>, vector<8x32xf32>, vector<16x32xf32> -> vector<16x32xf32>
    %29 = arith.addf %8, %28 : vector<16x32xf32>
    %30 = vector.extract_strided_slice %1 {offsets = [0, 8], sizes = [16, 8], strides = [1, 1]} : vector<16x32xf32> to vector<16x8xf32>
    %31 = vector.extract_strided_slice %3 {offsets = [0, 8], sizes = [16, 8], strides = [1, 1]} : vector<16x32xf32> to vector<16x8xf32>
    %cst_19 = arith.constant dense<0.000000e+00> : vector<16x16xf32>
    %32 = tpu.matmul %30, %31, %cst_19 {dimension_numbers = #tpu.dot_dimension_numbers<[1], [1], [0], [0], [0, 0, 1, 0], [], []>} : vector<16x8xf32>, vector<16x8xf32>, vector<16x16xf32> -> vector<16x16xf32>
    %cst_20 = arith.constant 0.353553385 : f32
    %33 = vector.broadcast %cst_20 : f32 to vector<16x16xf32>
    %34 = arith.mulf %32, %33 : vector<16x16xf32>
    %35 = vector.broadcast %7 : vector<1x16xf32> to vector<16x16xf32>
    %36 = arith.addf %34, %35 : vector<16x16xf32>
    %cst_21 = arith.constant dense<0xFF800000> : vector<16xf32>
    %37 = vector.multi_reduction <maximumf>, %36, %cst_21 [1] : vector<16x16xf32> to vector<16xf32>
    %38 = vector.shape_cast %37 : vector<16xf32> to vector<16x1xf32>
    %39 = vector.broadcast %38 : vector<16x1xf32> to vector<16x16xf32>
    %40 = arith.subf %36, %39 : vector<16x16xf32>
    %41 = math.exp %40 : vector<16x16xf32>
    %cst_22 = arith.constant dense<0.000000e+00> : vector<16xf32>
    %42 = vector.multi_reduction <add>, %41, %cst_22 [1] : vector<16x16xf32> to vector<16xf32>
    %43 = vector.shape_cast %42 : vector<16xf32> to vector<16x1xf32>
    %44 = vector.broadcast %43 : vector<16x1xf32> to vector<16x16xf32>
    %45 = arith.divf %41, %44 : vector<16x16xf32>
    %46 = vector.extract_strided_slice %5 {offsets = [0, 8], sizes = [16, 8], strides = [1, 1]} : vector<16x32xf32> to vector<16x8xf32>
    %cst_23 = arith.constant dense<0.000000e+00> : vector<16x8xf32>
    %47 = tpu.matmul %45, %46, %cst_23 {dimension_numbers = #tpu.dot_dimension_numbers<[1], [0], [0], [1], [0, 0, 1, 1], [], []>} : vector<16x16xf32>, vector<16x8xf32>, vector<16x8xf32> -> vector<16x8xf32>
    %c8 = arith.constant 8 : index
    %c0_24 = arith.constant 0 : index
    %48 = vector.load %arg5[%c8, %c0_24] : memref<32x32xf32, #tpu.memory_space<vmem>>, vector<8x32xf32>
    %cst_25 = arith.constant dense<0.000000e+00> : vector<16x32xf32>
    %49 = tpu.matmul %47, %48, %cst_25 {dimension_numbers = #tpu.dot_dimension_numbers<[1], [0], [0], [1], [0, 0, 1, 1], [], []>} : vector<16x8xf32>, vector<8x32xf32>, vector<16x32xf32> -> vector<16x32xf32>
    %50 = arith.addf %29, %49 : vector<16x32xf32>
    %51 = vector.extract_strided_slice %1 {offsets = [0, 16], sizes = [16, 8], strides = [1, 1]} : vector<16x32xf32> to vector<16x8xf32>
    %52 = vector.extract_strided_slice %3 {offsets = [0, 16], sizes = [16, 8], strides = [1, 1]} : vector<16x32xf32> to vector<16x8xf32>
    %cst_26 = arith.constant dense<0.000000e+00> : vector<16x16xf32>
    %53 = tpu.matmul %51, %52, %cst_26 {dimension_numbers = #tpu.dot_dimension_numbers<[1], [1], [0], [0], [0, 0, 1, 0], [], []>} : vector<16x8xf32>, vector<16x8xf32>, vector<16x16xf32> -> vector<16x16xf32>
    %cst_27 = arith.constant 0.353553385 : f32
    %54 = vector.broadcast %cst_27 : f32 to vector<16x16xf32>
    %55 = arith.mulf %53, %54 : vector<16x16xf32>
    %56 = vector.broadcast %7 : vector<1x16xf32> to vector<16x16xf32>
    %57 = arith.addf %55, %56 : vector<16x16xf32>
    %cst_28 = arith.constant dense<0xFF800000> : vector<16xf32>
    %58 = vector.multi_reduction <maximumf>, %57, %cst_28 [1] : vector<16x16xf32> to vector<16xf32>
    %59 = vector.shape_cast %58 : vector<16xf32> to vector<16x1xf32>
    %60 = vector.broadcast %59 : vector<16x1xf32> to vector<16x16xf32>
    %61 = arith.subf %57, %60 : vector<16x16xf32>
    %62 = math.exp %61 : vector<16x16xf32>
    %cst_29 = arith.constant dense<0.000000e+00> : vector<16xf32>
    %63 = vector.multi_reduction <add>, %62, %cst_29 [1] : vector<16x16xf32> to vector<16xf32>
    %64 = vector.shape_cast %63 : vector<16xf32> to vector<16x1xf32>
    %65 = vector.broadcast %64 : vector<16x1xf32> to vector<16x16xf32>
    %66 = arith.divf %62, %65 : vector<16x16xf32>
    %67 = vector.extract_strided_slice %5 {offsets = [0, 16], sizes = [16, 8], strides = [1, 1]} : vector<16x32xf32> to vector<16x8xf32>
    %cst_30 = arith.constant dense<0.000000e+00> : vector<16x8xf32>
    %68 = tpu.matmul %66, %67, %cst_30 {dimension_numbers = #tpu.dot_dimension_numbers<[1], [0], [0], [1], [0, 0, 1, 1], [], []>} : vector<16x16xf32>, vector<16x8xf32>, vector<16x8xf32> -> vector<16x8xf32>
    %c16 = arith.constant 16 : index
    %c0_31 = arith.constant 0 : index
    %69 = vector.load %arg5[%c16, %c0_31] : memref<32x32xf32, #tpu.memory_space<vmem>>, vector<8x32xf32>
    %cst_32 = arith.constant dense<0.000000e+00> : vector<16x32xf32>
    %70 = tpu.matmul %68, %69, %cst_32 {dimension_numbers = #tpu.dot_dimension_numbers<[1], [0], [0], [1], [0, 0, 1, 1], [], []>} : vector<16x8xf32>, vector<8x32xf32>, vector<16x32xf32> -> vector<16x32xf32>
    %71 = arith.addf %50, %70 : vector<16x32xf32>
    %72 = vector.extract_strided_slice %1 {offsets = [0, 24], sizes = [16, 8], strides = [1, 1]} : vector<16x32xf32> to vector<16x8xf32>
    %73 = vector.extract_strided_slice %3 {offsets = [0, 24], sizes = [16, 8], strides = [1, 1]} : vector<16x32xf32> to vector<16x8xf32>
    %cst_33 = arith.constant dense<0.000000e+00> : vector<16x16xf32>
    %74 = tpu.matmul %72, %73, %cst_33 {dimension_numbers = #tpu.dot_dimension_numbers<[1], [1], [0], [0], [0, 0, 1, 0], [], []>} : vector<16x8xf32>, vector<16x8xf32>, vector<16x16xf32> -> vector<16x16xf32>
    %cst_34 = arith.constant 0.353553385 : f32
    %75 = vector.broadcast %cst_34 : f32 to vector<16x16xf32>
    %76 = arith.mulf %74, %75 : vector<16x16xf32>
    %77 = vector.broadcast %7 : vector<1x16xf32> to vector<16x16xf32>
    %78 = arith.addf %76, %77 : vector<16x16xf32>
    %cst_35 = arith.constant dense<0xFF800000> : vector<16xf32>
    %79 = vector.multi_reduction <maximumf>, %78, %cst_35 [1] : vector<16x16xf32> to vector<16xf32>
    %80 = vector.shape_cast %79 : vector<16xf32> to vector<16x1xf32>
    %81 = vector.broadcast %80 : vector<16x1xf32> to vector<16x16xf32>
    %82 = arith.subf %78, %81 : vector<16x16xf32>
    %83 = math.exp %82 : vector<16x16xf32>
    %cst_36 = arith.constant dense<0.000000e+00> : vector<16xf32>
    %84 = vector.multi_reduction <add>, %83, %cst_36 [1] : vector<16x16xf32> to vector<16xf32>
    %85 = vector.shape_cast %84 : vector<16xf32> to vector<16x1xf32>
    %86 = vector.broadcast %85 : vector<16x1xf32> to vector<16x16xf32>
    %87 = arith.divf %83, %86 : vector<16x16xf32>
    %88 = vector.extract_strided_slice %5 {offsets = [0, 24], sizes = [16, 8], strides = [1, 1]} : vector<16x32xf32> to vector<16x8xf32>
    %cst_37 = arith.constant dense<0.000000e+00> : vector<16x8xf32>
    %89 = tpu.matmul %87, %88, %cst_37 {dimension_numbers = #tpu.dot_dimension_numbers<[1], [0], [0], [1], [0, 0, 1, 1], [], []>} : vector<16x16xf32>, vector<16x8xf32>, vector<16x8xf32> -> vector<16x8xf32>
    %c24 = arith.constant 24 : index
    %c0_38 = arith.constant 0 : index
    %90 = vector.load %arg5[%c24, %c0_38] : memref<32x32xf32, #tpu.memory_space<vmem>>, vector<8x32xf32>
    %cst_39 = arith.constant dense<0.000000e+00> : vector<16x32xf32>
    %91 = tpu.matmul %89, %90, %cst_39 {dimension_numbers = #tpu.dot_dimension_numbers<[1], [0], [0], [1], [0, 0, 1, 1], [], []>} : vector<16x8xf32>, vector<8x32xf32>, vector<16x32xf32> -> vector<16x32xf32>
    %92 = arith.addf %71, %91 : vector<16x32xf32>
    %c0_40 = arith.constant 0 : index
    %c0_41 = arith.constant 0 : index
    %93 = vector.load %arg6[%c0_40, %c0_41] : memref<1x32xf32, #tpu.memory_space<vmem>>, vector<1x32xf32>
    %94 = vector.broadcast %93 : vector<1x32xf32> to vector<16x32xf32>
    %95 = arith.addf %92, %94 : vector<16x32xf32>
    %c0_42 = arith.constant 0 : index
    %c0_43 = arith.constant 0 : index
    %c0_44 = arith.constant 0 : index
    %96 = vector.load %arg7[%c0_42, %c0_43, %c0_44] : memref<1x16x32xf32, #tpu.memory_space<vmem>>, vector<1x16x32xf32>
    %97 = vector.shape_cast %96 : vector<1x16x32xf32> to vector<16x32xf32>
    %98 = vector.shape_cast %95 : vector<16x32xf32> to vector<1x16x32xf32>
    tpu.vector_store %arg7[%c0_42, %c0_43, %c0_44], %98 {strides = array<i32>} : memref<1x16x32xf32, #tpu.memory_space<vmem>>, vector<1x16x32xf32>,
    return
  }
  func.func @transform_0(%arg0: i32) -> (i32, i32, i32) {
    %c0_i32 = arith.constant 0 : i32
    %c0_i32_0 = arith.constant 0 : i32
    %c0_i32_1 = arith.constant 0 : i32
    return %arg0, %c0_i32, %c0_i32_0 : i32, i32, i32
  }
  func.func @transform_1(%arg0: i32) -> (i32, i32, i32) {
    %c0_i32 = arith.constant 0 : i32
    %c0_i32_0 = arith.constant 0 : i32
    %c0_i32_1 = arith.constant 0 : i32
    return %arg0, %c0_i32, %c0_i32_0 : i32, i32, i32
  }
  func.func @transform_2(%arg0: i32) -> (i32, i32, i32) {
    %c0_i32 = arith.constant 0 : i32
    %c0_i32_0 = arith.constant 0 : i32
    %c0_i32_1 = arith.constant 0 : i32
    return %arg0, %c0_i32, %c0_i32_0 : i32, i32, i32
  }
  func.func @transform_3(%arg0: i32) -> (i32, i32, i32) {
    %c0_i32 = arith.constant 0 : i32
    %c0_i32_0 = arith.constant 0 : i32
    %c0_i32_1 = arith.constant 0 : i32
    return %arg0, %c0_i32, %c0_i32_0 : i32, i32, i32
  }
  func.func @transform_4(%arg0: i32) -> (i32, i32) {
    %c0_i32 = arith.constant 0 : i32
    %c0_i32_0 = arith.constant 0 : i32
    %c0_i32_1 = arith.constant 0 : i32
    return %c0_i32, %c0_i32_0 : i32, i32
  }
  func.func @transform_5(%arg0: i32) -> (i32, i32) {
    %c0_i32 = arith.constant 0 : i32
    %c0_i32_0 = arith.constant 0 : i32
    %c0_i32_1 = arith.constant 0 : i32
    return %c0_i32, %c0_i32_0 : i32, i32
  }
  func.func @transform_6(%arg0: i32) -> (i32, i32, i32) {
    %c0_i32 = arith.constant 0 : i32
    %c0_i32_0 = arith.constant 0 : i32
    %c0_i32_1 = arith.constant 0 : i32
    return %arg0, %c0_i32, %c0_i32_0 : i32, i32, i32
  }
}

module attributes {stable_mosaic.version = 11 : i64} {
  func.func @kernel(%arg0: i32, %arg1: memref<32x64xf32, #tpu.memory_space<vmem>>, %arg2: memref<64x32xf32, #tpu.memory_space<vmem>>, %arg3: memref<1x32xf32, #tpu.memory_space<vmem>>, %arg4: memref<32x32xf32, #tpu.memory_space<vmem>>) attributes {dimension_semantics = [#tpu.dimension_semantics<parallel>], iteration_bounds = array<i64: 1>, scalar_prefetch = 0 : i64, scratch_operands = 0 : i64, tpu.core_type = #tpu.core_type<tc>, window_params = [{transform_indices = @transform_0, window_bounds = array<i64: 32, 64>}, {pipeline_mode = #tpu.pipeline_mode<synchronous>, transform_indices = @transform_1, window_bounds = array<i64: 64, 32>}, {pipeline_mode = #tpu.pipeline_mode<synchronous>, transform_indices = @transform_2, window_bounds = array<i64: 1, 32>}, {transform_indices = @transform_3, window_bounds = array<i64: 32, 32>}]} {
    %c0 = arith.constant 0 : index
    %c0_0 = arith.constant 0 : index
    %0 = vector.load %arg1[%c0, %c0_0] : memref<32x64xf32, #tpu.memory_space<vmem>>, vector<32x64xf32>
    %c0_1 = arith.constant 0 : index
    %c0_2 = arith.constant 0 : index
    %1 = vector.load %arg2[%c0_1, %c0_2] : memref<64x32xf32, #tpu.memory_space<vmem>>, vector<64x32xf32>
    %cst = arith.constant dense<0.000000e+00> : vector<32x32xf32>
    %2 = tpu.matmul %0, %1, %cst {dimension_numbers = #tpu.dot_dimension_numbers<[1], [0], [0], [1], [0, 0, 1, 1], [], []>} : vector<32x64xf32>, vector<64x32xf32>, vector<32x32xf32> -> vector<32x32xf32>
    %c0_3 = arith.constant 0 : index
    %c0_4 = arith.constant 0 : index
    %3 = vector.load %arg3[%c0_3, %c0_4] : memref<1x32xf32, #tpu.memory_space<vmem>>, vector<1x32xf32>
    %4 = vector.broadcast %3 : vector<1x32xf32> to vector<32x32xf32>
    %5 = arith.addf %2, %4 : vector<32x32xf32>
    %c0_5 = arith.constant 0 : index
    %c0_6 = arith.constant 0 : index
    %6 = vector.load %arg4[%c0_5, %c0_6] : memref<32x32xf32, #tpu.memory_space<vmem>>, vector<32x32xf32>
    tpu.vector_store %arg4[%c0_5, %c0_6], %5 {strides = array<i32>} : memref<32x32xf32, #tpu.memory_space<vmem>>, vector<32x32xf32>,
    return
  }
  func.func @transform_0(%arg0: i32) -> (i32, i32) {
    %c0_i32 = arith.constant 0 : i32
    %c0_i32_0 = arith.constant 0 : i32
    return %arg0, %c0_i32 : i32, i32
  }
  func.func @transform_1(%arg0: i32) -> (i32, i32) {
    %c0_i32 = arith.constant 0 : i32
    %c0_i32_0 = arith.constant 0 : i32
    %c0_i32_1 = arith.constant 0 : i32
    return %c0_i32, %c0_i32_0 : i32, i32
  }
  func.func @transform_2(%arg0: i32) -> (i32, i32) {
    %c0_i32 = arith.constant 0 : i32
    %c0_i32_0 = arith.constant 0 : i32
    %c0_i32_1 = arith.constant 0 : i32
    return %c0_i32, %c0_i32_0 : i32, i32
  }
  func.func @transform_3(%arg0: i32) -> (i32, i32) {
    %c0_i32 = arith.constant 0 : i32
    %c0_i32_0 = arith.constant 0 : i32
    return %arg0, %c0_i32 : i32, i32
  }
}

module attributes {stable_mosaic.version = 11 : i64} {
  func.func @kernel(%arg0: i32, %arg1: memref<32x32xf32, #tpu.memory_space<vmem>>, %arg2: memref<32x32xf32, #tpu.memory_space<vmem>>, %arg3: memref<1x32xf32, #tpu.memory_space<vmem>>, %arg4: memref<1x32xf32, #tpu.memory_space<vmem>>, %arg5: memref<32x32xf32, #tpu.memory_space<vmem>>) attributes {dimension_semantics = [#tpu.dimension_semantics<parallel>], iteration_bounds = array<i64: 1>, scalar_prefetch = 0 : i64, scratch_operands = 0 : i64, tpu.core_type = #tpu.core_type<tc>, window_params = [{transform_indices = @transform_0, window_bounds = array<i64: 32, 32>}, {transform_indices = @transform_1, window_bounds = array<i64: 32, 32>}, {pipeline_mode = #tpu.pipeline_mode<synchronous>, transform_indices = @transform_2, window_bounds = array<i64: 1, 32>}, {pipeline_mode = #tpu.pipeline_mode<synchronous>, transform_indices = @transform_3, window_bounds = array<i64: 1, 32>}, {transform_indices = @transform_4, window_bounds = array<i64: 32, 32>}]} {
    %c0 = arith.constant 0 : index
    %c0_0 = arith.constant 0 : index
    %0 = vector.load %arg1[%c0, %c0_0] : memref<32x32xf32, #tpu.memory_space<vmem>>, vector<32x32xf32>
    %c0_1 = arith.constant 0 : index
    %c0_2 = arith.constant 0 : index
    %1 = vector.load %arg2[%c0_1, %c0_2] : memref<32x32xf32, #tpu.memory_space<vmem>>, vector<32x32xf32>
    %2 = arith.addf %0, %1 : vector<32x32xf32>
    %cst = arith.constant dense<0.000000e+00> : vector<32xf32>
    %3 = vector.multi_reduction <add>, %2, %cst [1] : vector<32x32xf32> to vector<32xf32>
    %4 = vector.shape_cast %3 : vector<32xf32> to vector<32x1xf32>
    %cst_3 = arith.constant 3.200000e+01 : f32
    %5 = vector.broadcast %cst_3 : f32 to vector<32x1xf32>
    %6 = arith.divf %4, %5 : vector<32x1xf32>
    %7 = vector.broadcast %6 : vector<32x1xf32> to vector<32x32xf32>
    %8 = arith.subf %2, %7 : vector<32x32xf32>
    %9 = arith.mulf %8, %8 : vector<32x32xf32>
    %cst_4 = arith.constant dense<0.000000e+00> : vector<32xf32>
    %10 = vector.multi_reduction <add>, %9, %cst_4 [1] : vector<32x32xf32> to vector<32xf32>
    %11 = vector.shape_cast %10 : vector<32xf32> to vector<32x1xf32>
    %cst_5 = arith.constant 3.200000e+01 : f32
    %12 = vector.broadcast %cst_5 : f32 to vector<32x1xf32>
    %13 = arith.divf %11, %12 : vector<32x1xf32>
    %cst_6 = arith.constant 9.99999974E-6 : f32
    %14 = vector.broadcast %cst_6 : f32 to vector<32x1xf32>
    %15 = arith.addf %13, %14 : vector<32x1xf32>
    %16 = math.rsqrt %15 : vector<32x1xf32>
    %17 = vector.broadcast %16 : vector<32x1xf32> to vector<32x32xf32>
    %18 = arith.mulf %8, %17 : vector<32x32xf32>
    %c0_7 = arith.constant 0 : index
    %c0_8 = arith.constant 0 : index
    %19 = vector.load %arg3[%c0_7, %c0_8] : memref<1x32xf32, #tpu.memory_space<vmem>>, vector<1x32xf32>
    %20 = vector.broadcast %19 : vector<1x32xf32> to vector<32x32xf32>
    %21 = arith.mulf %18, %20 : vector<32x32xf32>
    %c0_9 = arith.constant 0 : index
    %c0_10 = arith.constant 0 : index
    %22 = vector.load %arg4[%c0_9, %c0_10] : memref<1x32xf32, #tpu.memory_space<vmem>>, vector<1x32xf32>
    %23 = vector.broadcast %22 : vector<1x32xf32> to vector<32x32xf32>
    %24 = arith.addf %21, %23 : vector<32x32xf32>
    %c0_11 = arith.constant 0 : index
    %c0_12 = arith.constant 0 : index
    %25 = vector.load %arg5[%c0_11, %c0_12] : memref<32x32xf32, #tpu.memory_space<vmem>>, vector<32x32xf32>
    tpu.vector_store %arg5[%c0_11, %c0_12], %24 {strides = array<i32>} : memref<32x32xf32, #tpu.memory_space<vmem>>, vector<32x32xf32>,
    return
  }
  func.func @transform_0(%arg0: i32) -> (i32, i32) {
    %c0_i32 = arith.constant 0 : i32
    %c0_i32_0 = arith.constant 0 : i32
    return %arg0, %c0_i32 : i32, i32
  }
  func.func @transform_1(%arg0: i32) -> (i32, i32) {
    %c0_i32 = arith.constant 0 : i32
    %c0_i32_0 = arith.constant 0 : i32
    return %arg0, %c0_i32 : i32, i32
  }
  func.func @transform_2(%arg0: i32) -> (i32, i32) {
    %c0_i32 = arith.constant 0 : i32
    %c0_i32_0 = arith.constant 0 : i32
    %c0_i32_1 = arith.constant 0 : i32
    return %c0_i32, %c0_i32_0 : i32, i32
  }
  func.func @transform_3(%arg0: i32) -> (i32, i32) {
    %c0_i32 = arith.constant 0 : i32
    %c0_i32_0 = arith.constant 0 : i32
    %c0_i32_1 = arith.constant 0 : i32
    return %c0_i32, %c0_i32_0 : i32, i32
  }
  func.func @transform_4(%arg0: i32) -> (i32, i32) {
    %c0_i32 = arith.constant 0 : i32
    %c0_i32_0 = arith.constant 0 : i32
    return %arg0, %c0_i32 : i32, i32
  }
}

module attributes {stable_mosaic.version = 11 : i64} {
  func.func @kernel(%arg0: i32, %arg1: memref<32x32xf32, #tpu.memory_space<vmem>>, %arg2: memref<32x32xf32, #tpu.memory_space<vmem>>, %arg3: memref<1x32xf32, #tpu.memory_space<vmem>>, %arg4: memref<1x32xf32, #tpu.memory_space<vmem>>, %arg5: memref<32x32xf32, #tpu.memory_space<vmem>>) attributes {dimension_semantics = [#tpu.dimension_semantics<parallel>], iteration_bounds = array<i64: 1>, scalar_prefetch = 0 : i64, scratch_operands = 0 : i64, tpu.core_type = #tpu.core_type<tc>, window_params = [{transform_indices = @transform_0, window_bounds = array<i64: 32, 32>}, {transform_indices = @transform_1, window_bounds = array<i64: 32, 32>}, {pipeline_mode = #tpu.pipeline_mode<synchronous>, transform_indices = @transform_2, window_bounds = array<i64: 1, 32>}, {pipeline_mode = #tpu.pipeline_mode<synchronous>, transform_indices = @transform_3, window_bounds = array<i64: 1, 32>}, {transform_indices = @transform_4, window_bounds = array<i64: 32, 32>}]} {
    %c0 = arith.constant 0 : index
    %c0_0 = arith.constant 0 : index
    %0 = vector.load %arg1[%c0, %c0_0] : memref<32x32xf32, #tpu.memory_space<vmem>>, vector<32x32xf32>
    %c0_1 = arith.constant 0 : index
    %c0_2 = arith.constant 0 : index
    %1 = vector.load %arg2[%c0_1, %c0_2] : memref<32x32xf32, #tpu.memory_space<vmem>>, vector<32x32xf32>
    %2 = arith.addf %0, %1 : vector<32x32xf32>
    %cst = arith.constant dense<0.000000e+00> : vector<32xf32>
    %3 = vector.multi_reduction <add>, %2, %cst [1] : vector<32x32xf32> to vector<32xf32>
    %4 = vector.shape_cast %3 : vector<32xf32> to vector<32x1xf32>
    %cst_3 = arith.constant 3.200000e+01 : f32
    %5 = vector.broadcast %cst_3 : f32 to vector<32x1xf32>
    %6 = arith.divf %4, %5 : vector<32x1xf32>
    %7 = vector.broadcast %6 : vector<32x1xf32> to vector<32x32xf32>
    %8 = arith.subf %2, %7 : vector<32x32xf32>
    %9 = arith.mulf %8, %8 : vector<32x32xf32>
    %cst_4 = arith.constant dense<0.000000e+00> : vector<32xf32>
    %10 = vector.multi_reduction <add>, %9, %cst_4 [1] : vector<32x32xf32> to vector<32xf32>
    %11 = vector.shape_cast %10 : vector<32xf32> to vector<32x1xf32>
    %cst_5 = arith.constant 3.200000e+01 : f32
    %12 = vector.broadcast %cst_5 : f32 to vector<32x1xf32>
    %13 = arith.divf %11, %12 : vector<32x1xf32>
    %cst_6 = arith.constant 9.99999974E-6 : f32
    %14 = vector.broadcast %cst_6 : f32 to vector<32x1xf32>
    %15 = arith.addf %13, %14 : vector<32x1xf32>
    %16 = math.rsqrt %15 : vector<32x1xf32>
    %17 = vector.broadcast %16 : vector<32x1xf32> to vector<32x32xf32>
    %18 = arith.mulf %8, %17 : vector<32x32xf32>
    %c0_7 = arith.constant 0 : index
    %c0_8 = arith.constant 0 : index
    %19 = vector.load %arg3[%c0_7, %c0_8] : memref<1x32xf32, #tpu.memory_space<vmem>>, vector<1x32xf32>
    %20 = vector.broadcast %19 : vector<1x32xf32> to vector<32x32xf32>
    %21 = arith.mulf %18, %20 : vector<32x32xf32>
    %c0_9 = arith.constant 0 : index
    %c0_10 = arith.constant 0 : index
    %22 = vector.load %arg4[%c0_9, %c0_10] : memref<1x32xf32, #tpu.memory_space<vmem>>, vector<1x32xf32>
    %23 = vector.broadcast %22 : vector<1x32xf32> to vector<32x32xf32>
    %24 = arith.addf %21, %23 : vector<32x32xf32>
    %c0_11 = arith.constant 0 : index
    %c0_12 = arith.constant 0 : index
    %25 = vector.load %arg5[%c0_11, %c0_12] : memref<32x32xf32, #tpu.memory_space<vmem>>, vector<32x32xf32>
    tpu.vector_store %arg5[%c0_11, %c0_12], %24 {strides = array<i32>} : memref<32x32xf32, #tpu.memory_space<vmem>>, vector<32x32xf32>,
    return
  }
  func.func @transform_0(%arg0: i32) -> (i32, i32) {
    %c0_i32 = arith.constant 0 : i32
    %c0_i32_0 = arith.constant 0 : i32
    return %arg0, %c0_i32 : i32, i32
  }
  func.func @transform_1(%arg0: i32) -> (i32, i32) {
    %c0_i32 = arith.constant 0 : i32
    %c0_i32_0 = arith.constant 0 : i32
    return %arg0, %c0_i32 : i32, i32
  }
  func.func @transform_2(%arg0: i32) -> (i32, i32) {
    %c0_i32 = arith.constant 0 : i32
    %c0_i32_0 = arith.constant 0 : i32
    %c0_i32_1 = arith.constant 0 : i32
    return %c0_i32, %c0_i32_0 : i32, i32
  }
  func.func @transform_3(%arg0: i32) -> (i32, i32) {
    %c0_i32 = arith.constant 0 : i32
    %c0_i32_0 = arith.constant 0 : i32
    %c0_i32_1 = arith.constant 0 : i32
    return %c0_i32, %c0_i32_0 : i32, i32
  }
  func.func @transform_4(%arg0: i32) -> (i32, i32) {
    %c0_i32 = arith.constant 0 : i32
    %c0_i32_0 = arith.constant 0 : i32
    return %arg0, %c0_i32 : i32, i32
  }
}

module attributes {stable_mosaic.version = 11 : i64} {
  func.func @kernel(%arg0: i32, %arg1: memref<32x32xf32, #tpu.memory_space<vmem>>, %arg2: memref<32x32xf32, #tpu.memory_space<vmem>>, %arg3: memref<32x32xf32, #tpu.memory_space<vmem>>, %arg4: memref<1x32xf32, #tpu.memory_space<vmem>>, %arg5: memref<32x32xf32, #tpu.memory_space<vmem>>) attributes {dimension_semantics = [#tpu.dimension_semantics<parallel>], iteration_bounds = array<i64: 1>, scalar_prefetch = 0 : i64, scratch_operands = 0 : i64, tpu.core_type = #tpu.core_type<tc>, window_params = [{transform_indices = @transform_0, window_bounds = array<i64: 32, 32>}, {transform_indices = @transform_1, window_bounds = array<i64: 32, 32>}, {pipeline_mode = #tpu.pipeline_mode<synchronous>, transform_indices = @transform_2, window_bounds = array<i64: 32, 32>}, {pipeline_mode = #tpu.pipeline_mode<synchronous>, transform_indices = @transform_3, window_bounds = array<i64: 1, 32>}, {transform_indices = @transform_4, window_bounds = array<i64: 32, 32>}]} {
    %c0 = arith.constant 0 : index
    %c0_0 = arith.constant 0 : index
    %0 = vector.load %arg1[%c0, %c0_0] : memref<32x32xf32, #tpu.memory_space<vmem>>, vector<32x32xf32>
    %c0_1 = arith.constant 0 : index
    %c0_2 = arith.constant 0 : index
    %1 = vector.load %arg2[%c0_1, %c0_2] : memref<32x32xf32, #tpu.memory_space<vmem>>, vector<32x32xf32>
    %2 = arith.addf %0, %1 : vector<32x32xf32>
    %c0_3 = arith.constant 0 : index
    %c0_4 = arith.constant 0 : index
    %3 = vector.load %arg3[%c0_3, %c0_4] : memref<32x32xf32, #tpu.memory_space<vmem>>, vector<32x32xf32>
    %cst = arith.constant dense<0.000000e+00> : vector<32x32xf32>
    %4 = tpu.matmul %2, %3, %cst {dimension_numbers = #tpu.dot_dimension_numbers<[1], [0], [0], [1], [0, 0, 1, 1], [], []>} : vector<32x32xf32>, vector<32x32xf32>, vector<32x32xf32> -> vector<32x32xf32>
    %c0_5 = arith.constant 0 : index
    %c0_6 = arith.constant 0 : index
    %5 = vector.load %arg4[%c0_5, %c0_6] : memref<1x32xf32, #tpu.memory_space<vmem>>, vector<1x32xf32>
    %6 = vector.broadcast %5 : vector<1x32xf32> to vector<32x32xf32>
    %7 = arith.addf %4, %6 : vector<32x32xf32>
    %c0_7 = arith.constant 0 : index
    %c0_8 = arith.constant 0 : index
    %8 = vector.load %arg5[%c0_7, %c0_8] : memref<32x32xf32, #tpu.memory_space<vmem>>, vector<32x32xf32>
    tpu.vector_store %arg5[%c0_7, %c0_8], %7 {strides = array<i32>} : memref<32x32xf32, #tpu.memory_space<vmem>>, vector<32x32xf32>,
    return
  }
  func.func @transform_0(%arg0: i32) -> (i32, i32) {
    %c0_i32 = arith.constant 0 : i32
    %c0_i32_0 = arith.constant 0 : i32
    return %arg0, %c0_i32 : i32, i32
  }
  func.func @transform_1(%arg0: i32) -> (i32, i32) {
    %c0_i32 = arith.constant 0 : i32
    %c0_i32_0 = arith.constant 0 : i32
    return %arg0, %c0_i32 : i32, i32
  }
  func.func @transform_2(%arg0: i32) -> (i32, i32) {
    %c0_i32 = arith.constant 0 : i32
    %c0_i32_0 = arith.constant 0 : i32
    %c0_i32_1 = arith.constant 0 : i32
    return %c0_i32, %c0_i32_0 : i32, i32
  }
  func.func @transform_3(%arg0: i32) -> (i32, i32) {
    %c0_i32 = arith.constant 0 : i32
    %c0_i32_0 = arith.constant 0 : i32
    %c0_i32_1 = arith.constant 0 : i32
    return %c0_i32, %c0_i32_0 : i32, i32
  }
  func.func @transform_4(%arg0: i32) -> (i32, i32) {
    %c0_i32 = arith.constant 0 : i32
    %c0_i32_0 = arith.constant 0 : i32
    return %arg0, %c0_i32 : i32, i32
  }
}

module attributes {stable_mosaic.version = 11 : i64} {
  func.func @kernel(%arg0: i32, %arg1: memref<32x32xf32, #tpu.memory_space<vmem>>, %arg2: memref<32x32xf32, #tpu.memory_space<vmem>>, %arg3: memref<32x32xf32, #tpu.memory_space<vmem>>, %arg4: memref<1x32xf32, #tpu.memory_space<vmem>>, %arg5: memref<32x32xf32, #tpu.memory_space<vmem>>) attributes {dimension_semantics = [#tpu.dimension_semantics<parallel>], iteration_bounds = array<i64: 1>, scalar_prefetch = 0 : i64, scratch_operands = 0 : i64, tpu.core_type = #tpu.core_type<tc>, window_params = [{transform_indices = @transform_0, window_bounds = array<i64: 32, 32>}, {transform_indices = @transform_1, window_bounds = array<i64: 32, 32>}, {pipeline_mode = #tpu.pipeline_mode<synchronous>, transform_indices = @transform_2, window_bounds = array<i64: 32, 32>}, {pipeline_mode = #tpu.pipeline_mode<synchronous>, transform_indices = @transform_3, window_bounds = array<i64: 1, 32>}, {transform_indices = @transform_4, window_bounds = array<i64: 32, 32>}]} {
    %c0 = arith.constant 0 : index
    %c0_0 = arith.constant 0 : index
    %0 = vector.load %arg1[%c0, %c0_0] : memref<32x32xf32, #tpu.memory_space<vmem>>, vector<32x32xf32>
    %c0_1 = arith.constant 0 : index
    %c0_2 = arith.constant 0 : index
    %1 = vector.load %arg2[%c0_1, %c0_2] : memref<32x32xf32, #tpu.memory_space<vmem>>, vector<32x32xf32>
    %2 = arith.addf %0, %1 : vector<32x32xf32>
    %c0_3 = arith.constant 0 : index
    %c0_4 = arith.constant 0 : index
    %3 = vector.load %arg3[%c0_3, %c0_4] : memref<32x32xf32, #tpu.memory_space<vmem>>, vector<32x32xf32>
    %cst = arith.constant dense<0.000000e+00> : vector<32x32xf32>
    %4 = tpu.matmul %2, %3, %cst {dimension_numbers = #tpu.dot_dimension_numbers<[1], [0], [0], [1], [0, 0, 1, 1], [], []>} : vector<32x32xf32>, vector<32x32xf32>, vector<32x32xf32> -> vector<32x32xf32>
    %c0_5 = arith.constant 0 : index
    %c0_6 = arith.constant 0 : index
    %5 = vector.load %arg4[%c0_5, %c0_6] : memref<1x32xf32, #tpu.memory_space<vmem>>, vector<1x32xf32>
    %6 = vector.broadcast %5 : vector<1x32xf32> to vector<32x32xf32>
    %7 = arith.addf %4, %6 : vector<32x32xf32>
    %c0_7 = arith.constant 0 : index
    %c0_8 = arith.constant 0 : index
    %8 = vector.load %arg5[%c0_7, %c0_8] : memref<32x32xf32, #tpu.memory_space<vmem>>, vector<32x32xf32>
    tpu.vector_store %arg5[%c0_7, %c0_8], %7 {strides = array<i32>} : memref<32x32xf32, #tpu.memory_space<vmem>>, vector<32x32xf32>,
    return
  }
  func.func @transform_0(%arg0: i32) -> (i32, i32) {
    %c0_i32 = arith.constant 0 : i32
    %c0_i32_0 = arith.constant 0 : i32
    return %arg0, %c0_i32 : i32, i32
  }
  func.func @transform_1(%arg0: i32) -> (i32, i32) {
    %c0_i32 = arith.constant 0 : i32
    %c0_i32_0 = arith.constant 0 : i32
    return %arg0, %c0_i32 : i32, i32
  }
  func.func @transform_2(%arg0: i32) -> (i32, i32) {
    %c0_i32 = arith.constant 0 : i32
    %c0_i32_0 = arith.constant 0 : i32
    %c0_i32_1 = arith.constant 0 : i32
    return %c0_i32, %c0_i32_0 : i32, i32
  }
  func.func @transform_3(%arg0: i32) -> (i32, i32) {
    %c0_i32 = arith.constant 0 : i32
    %c0_i32_0 = arith.constant 0 : i32
    %c0_i32_1 = arith.constant 0 : i32
    return %c0_i32, %c0_i32_0 : i32, i32
  }
  func.func @transform_4(%arg0: i32) -> (i32, i32) {
    %c0_i32 = arith.constant 0 : i32
    %c0_i32_0 = arith.constant 0 : i32
    return %arg0, %c0_i32 : i32, i32
  }
}

module attributes {stable_mosaic.version = 11 : i64} {
  func.func @kernel(%arg0: i32, %arg1: memref<32x32xf32, #tpu.memory_space<vmem>>, %arg2: memref<32x32xf32, #tpu.memory_space<vmem>>, %arg3: memref<1x32xf32, #tpu.memory_space<vmem>>, %arg4: memref<32x32xf32, #tpu.memory_space<vmem>>) attributes {dimension_semantics = [#tpu.dimension_semantics<parallel>], iteration_bounds = array<i64: 1>, scalar_prefetch = 0 : i64, scratch_operands = 0 : i64, tpu.core_type = #tpu.core_type<tc>, window_params = [{transform_indices = @transform_0, window_bounds = array<i64: 32, 32>}, {pipeline_mode = #tpu.pipeline_mode<synchronous>, transform_indices = @transform_1, window_bounds = array<i64: 32, 32>}, {pipeline_mode = #tpu.pipeline_mode<synchronous>, transform_indices = @transform_2, window_bounds = array<i64: 1, 32>}, {transform_indices = @transform_3, window_bounds = array<i64: 32, 32>}]} {
    %c0 = arith.constant 0 : index
    %c0_0 = arith.constant 0 : index
    %0 = vector.load %arg1[%c0, %c0_0] : memref<32x32xf32, #tpu.memory_space<vmem>>, vector<32x32xf32>
    %c0_1 = arith.constant 0 : index
    %c0_2 = arith.constant 0 : index
    %1 = vector.load %arg2[%c0_1, %c0_2] : memref<32x32xf32, #tpu.memory_space<vmem>>, vector<32x32xf32>
    %cst = arith.constant dense<0.000000e+00> : vector<32x32xf32>
    %2 = tpu.matmul %0, %1, %cst {dimension_numbers = #tpu.dot_dimension_numbers<[1], [0], [0], [1], [0, 0, 1, 1], [], []>} : vector<32x32xf32>, vector<32x32xf32>, vector<32x32xf32> -> vector<32x32xf32>
    %c0_3 = arith.constant 0 : index
    %c0_4 = arith.constant 0 : index
    %3 = vector.load %arg3[%c0_3, %c0_4] : memref<1x32xf32, #tpu.memory_space<vmem>>, vector<1x32xf32>
    %4 = vector.broadcast %3 : vector<1x32xf32> to vector<32x32xf32>
    %5 = arith.addf %2, %4 : vector<32x32xf32>
    %c0_5 = arith.constant 0 : index
    %c0_6 = arith.constant 0 : index
    %6 = vector.load %arg4[%c0_5, %c0_6] : memref<32x32xf32, #tpu.memory_space<vmem>>, vector<32x32xf32>
    tpu.vector_store %arg4[%c0_5, %c0_6], %5 {strides = array<i32>} : memref<32x32xf32, #tpu.memory_space<vmem>>, vector<32x32xf32>,
    return
  }
  func.func @transform_0(%arg0: i32) -> (i32, i32) {
    %c0_i32 = arith.constant 0 : i32
    %c0_i32_0 = arith.constant 0 : i32
    return %arg0, %c0_i32 : i32, i32
  }
  func.func @transform_1(%arg0: i32) -> (i32, i32) {
    %c0_i32 = arith.constant 0 : i32
    %c0_i32_0 = arith.constant 0 : i32
    %c0_i32_1 = arith.constant 0 : i32
    return %c0_i32, %c0_i32_0 : i32, i32
  }
  func.func @transform_2(%arg0: i32) -> (i32, i32) {
    %c0_i32 = arith.constant 0 : i32
    %c0_i32_0 = arith.constant 0 : i32
    %c0_i32_1 = arith.constant 0 : i32
    return %c0_i32, %c0_i32_0 : i32, i32
  }
  func.func @transform_3(%arg0: i32) -> (i32, i32) {
    %c0_i32 = arith.constant 0 : i32
    %c0_i32_0 = arith.constant 0 : i32
    return %arg0, %c0_i32 : i32, i32
  }
}

module attributes {stable_mosaic.version = 11 : i64} {
  func.func @kernel(%arg0: i32, %arg1: memref<1x16x32xf32, #tpu.memory_space<vmem>>, %arg2: memref<1x16x32xf32, #tpu.memory_space<vmem>>, %arg3: memref<1x16x32xf32, #tpu.memory_space<vmem>>, %arg4: memref<1x1x16xf32, #tpu.memory_space<vmem>>, %arg5: memref<32x32xf32, #tpu.memory_space<vmem>>, %arg6: memref<1x32xf32, #tpu.memory_space<vmem>>, %arg7: memref<1x16x32xf32, #tpu.memory_space<vmem>>) attributes {dimension_semantics = [#tpu.dimension_semantics<parallel>], iteration_bounds = array<i64: 2>, scalar_prefetch = 0 : i64, scratch_operands = 0 : i64, tpu.core_type = #tpu.core_type<tc>, window_params = [{transform_indices = @transform_0, window_bounds = array<i64: 1, 16, 32>}, {transform_indices = @transform_1, window_bounds = array<i64: 1, 16, 32>}, {transform_indices = @transform_2, window_bounds = array<i64: 1, 16, 32>}, {transform_indices = @transform_3, window_bounds = array<i64: 1, 1, 16>}, {pipeline_mode = #tpu.pipeline_mode<synchronous>, transform_indices = @transform_4, window_bounds = array<i64: 32, 32>}, {pipeline_mode = #tpu.pipeline_mode<synchronous>, transform_indices = @transform_5, window_bounds = array<i64: 1, 32>}, {transform_indices = @transform_6, window_bounds = array<i64: 1, 16, 32>}]} {
    %c0 = arith.constant 0 : index
    %c0_0 = arith.constant 0 : index
    %c0_1 = arith.constant 0 : index
    %0 = vector.load %arg1[%c0, %c0_0, %c0_1] : memref<1x16x32xf32, #tpu.memory_space<vmem>>, vector<1x16x32xf32>
    %1 = vector.shape_cast %0 : vector<1x16x32xf32> to vector<16x32xf32>
    %c0_2 = arith.constant 0 : index
    %c0_3 = arith.constant 0 : index
    %c0_4 = arith.constant 0 : index
    %2 = vector.load %arg2[%c0_2, %c0_3, %c0_4] : memref<1x16x32xf32, #tpu.memory_space<vmem>>, vector<1x16x32xf32>
    %3 = vector.shape_cast %2 : vector<1x16x32xf32> to vector<16x32xf32>
    %c0_5 = arith.constant 0 : index
    %c0_6 = arith.constant 0 : index
    %c0_7 = arith.constant 0 : index
    %4 = vector.load %arg3[%c0_5, %c0_6, %c0_7] : memref<1x16x32xf32, #tpu.memory_space<vmem>>, vector<1x16x32xf32>
    %5 = vector.shape_cast %4 : vector<1x16x32xf32> to vector<16x32xf32>
    %c0_8 = arith.constant 0 : index
    %c0_9 = arith.constant 0 : index
    %c0_10 = arith.constant 0 : index
    %6 = vector.load %arg4[%c0_8, %c0_9, %c0_10] : memref<1x1x16xf32, #tpu.memory_space<vmem>>, vector<1x1x16xf32>
    %7 = vector.shape_cast %6 : vector<1x1x16xf32> to vector<1x16xf32>
    %cst = arith.constant 0.000000e+00 : f32
    %8 = vector.broadcast %cst : f32 to vector<16x32xf32>
    %9 = vector.extract_strided_slice %1 {offsets = [0, 0], sizes = [16, 8], strides = [1, 1]} : vector<16x32xf32> to vector<16x8xf32>
    %10 = vector.extract_strided_slice %3 {offsets = [0, 0], sizes = [16, 8], strides = [1, 1]} : vector<16x32xf32> to vector<16x8xf32>
    %cst_11 = arith.constant dense<0.000000e+00> : vector<16x16xf32>
    %11 = tpu.matmul %9, %10, %cst_11 {dimension_numbers = #tpu.dot_dimension_numbers<[1], [1], [0], [0], [0, 0, 1, 0], [], []>} : vector<16x8xf32>, vector<16x8xf32>, vector<16x16xf32> -> vector<16x16xf32>
    %cst_12 = arith.constant 0.353553385 : f32
    %12 = vector.broadcast %cst_12 : f32 to vector<16x16xf32>
    %13 = arith.mulf %11, %12 : vector<16x16xf32>
    %14 = vector.broadcast %7 : vector<1x16xf32> to vector<16x16xf32>
    %15 = arith.addf %13, %14 : vector<16x16xf32>
    %cst_13 = arith.constant dense<0xFF800000> : vector<16xf32>
    %16 = vector.multi_reduction <maximumf>, %15, %cst_13 [1] : vector<16x16xf32> to vector<16xf32>
    %17 = vector.shape_cast %16 : vector<16xf32> to vector<16x1xf32>
    %18 = vector.broadcast %17 : vector<16x1xf32> to vector<16x16xf32>
    %19 = arith.subf %15, %18 : vector<16x16xf32>
    %20 = math.exp %19 : vector<16x16xf32>
    %cst_14 = arith.constant dense<0.000000e+00> : vector<16xf32>
    %21 = vector.multi_reduction <add>, %20, %cst_14 [1] : vector<16x16xf32> to vector<16xf32>
    %22 = vector.shape_cast %21 : vector<16xf32> to vector<16x1xf32>
    %23 = vector.broadcast %22 : vector<16x1xf32> to vector<16x16xf32>
    %24 = arith.divf %20, %23 : vector<16x16xf32>
    %25 = vector.extract_strided_slice %5 {offsets = [0, 0], sizes = [16, 8], strides = [1, 1]} : vector<16x32xf32> to vector<16x8xf32>
    %cst_15 = arith.constant dense<0.000000e+00> : vector<16x8xf32>
    %26 = tpu.matmul %24, %25, %cst_15 {dimension_numbers = #tpu.dot_dimension_numbers<[1], [0], [0], [1], [0, 0, 1, 1], [], []>} : vector<16x16xf32>, vector<16x8xf32>, vector<16x8xf32> -> vector<16x8xf32>
    %c0_16 = arith.constant 0 : index
    %c0_17 = arith.constant 0 : index
    %27 = vector.load %arg5[%c0_16, %c0_17] : memref<32x32xf32, #tpu.memory_space<vmem>>, vector<8x32xf32>
    %cst_18 = arith.constant dense<0.000000e+00> : vector<16x32xf32>
    %28 = tpu.matmul %26, %27, %cst_18 {dimension_numbers = #tpu.dot_dimension_numbers<[1], [0], [0], [1], [0, 0, 1, 1], [], []>} : vector<16x8xf32>, vector<8x32xf32>, vector<16x32xf32> -> vector<16x32xf32>
    %29 = arith.addf %8, %28 : vector<16x32xf32>
    %30 = vector.extract_strided_slice %1 {offsets = [0, 8], sizes = [16, 8], strides = [1, 1]} : vector<16x32xf32> to vector<16x8xf32>
    %31 = vector.extract_strided_slice %3 {offsets = [0, 8], sizes = [16, 8], strides = [1, 1]} : vector<16x32xf32> to vector<16x8xf32>
    %cst_19 = arith.constant dense<0.000000e+00> : vector<16x16xf32>
    %32 = tpu.matmul %30, %31, %cst_19 {dimension_numbers = #tpu.dot_dimension_numbers<[1], [1], [0], [0], [0, 0, 1, 0], [], []>} : vector<16x8xf32>, vector<16x8xf32>, vector<16x16xf32> -> vector<16x16xf32>
    %cst_20 = arith.constant 0.353553385 : f32
    %33 = vector.broadcast %cst_20 : f32 to vector<16x16xf32>
    %34 = arith.mulf %32, %33 : vector<16x16xf32>
    %35 = vector.broadcast %7 : vector<1x16xf32> to vector<16x16xf32>
    %36 = arith.addf %34, %35 : vector<16x16xf32>
    %cst_21 = arith.constant dense<0xFF800000> : vector<16xf32>
    %37 = vector.multi_reduction <maximumf>, %36, %cst_21 [1] : vector<16x16xf32> to vector<16xf32>
    %38 = vector.shape_cast %37 : vector<16xf32> to vector<16x1xf32>
    %39 = vector.broadcast %38 : vector<16x1xf32> to vector<16x16xf32>
    %40 = arith.subf %36, %39 : vector<16x16xf32>
    %41 = math.exp %40 : vector<16x16xf32>
    %cst_22 = arith.constant dense<0.000000e+00> : vector<16xf32>
    %42 = vector.multi_reduction <add>, %41, %cst_22 [1] : vector<16x16xf32> to vector<16xf32>
    %43 = vector.shape_cast %42 : vector<16xf32> to vector<16x1xf32>
    %44 = vector.broadcast %43 : vector<16x1xf32> to vector<16x16xf32>
    %45 = arith.divf %41, %44 : vector<16x16xf32>
    %46 = vector.extract_strided_slice %5 {offsets = [0, 8], sizes = [16, 8], strides = [1, 1]} : vector<16x32xf32> to vector<16x8xf32>
    %cst_23 = arith.constant dense<0.000000e+00> : vector<16x8xf32>
    %47 = tpu.matmul %45, %46, %cst_23 {dimension_numbers = #tpu.dot_dimension_numbers<[1], [0], [0], [1], [0, 0, 1, 1], [], []>} : vector<16x16xf32>, vector<16x8xf32>, vector<16x8xf32> -> vector<16x8xf32>
    %c8 = arith.constant 8 : index
    %c0_24 = arith.constant 0 : index
    %48 = vector.load %arg5[%c8, %c0_24] : memref<32x32xf32, #tpu.memory_space<vmem>>, vector<8x32xf32>
    %cst_25 = arith.constant dense<0.000000e+00> : vector<16x32xf32>
    %49 = tpu.matmul %47, %48, %cst_25 {dimension_numbers = #tpu.dot_dimension_numbers<[1], [0], [0], [1], [0, 0, 1, 1], [], []>} : vector<16x8xf32>, vector<8x32xf32>, vector<16x32xf32> -> vector<16x32xf32>
    %50 = arith.addf %29, %49 : vector<16x32xf32>
    %51 = vector.extract_strided_slice %1 {offsets = [0, 16], sizes = [16, 8], strides = [1, 1]} : vector<16x32xf32> to vector<16x8xf32>
    %52 = vector.extract_strided_slice %3 {offsets = [0, 16], sizes = [16, 8], strides = [1, 1]} : vector<16x32xf32> to vector<16x8xf32>
    %cst_26 = arith.constant dense<0.000000e+00> : vector<16x16xf32>
    %53 = tpu.matmul %51, %52, %cst_26 {dimension_numbers = #tpu.dot_dimension_numbers<[1], [1], [0], [0], [0, 0, 1, 0], [], []>} : vector<16x8xf32>, vector<16x8xf32>, vector<16x16xf32> -> vector<16x16xf32>
    %cst_27 = arith.constant 0.353553385 : f32
    %54 = vector.broadcast %cst_27 : f32 to vector<16x16xf32>
    %55 = arith.mulf %53, %54 : vector<16x16xf32>
    %56 = vector.broadcast %7 : vector<1x16xf32> to vector<16x16xf32>
    %57 = arith.addf %55, %56 : vector<16x16xf32>
    %cst_28 = arith.constant dense<0xFF800000> : vector<16xf32>
    %58 = vector.multi_reduction <maximumf>, %57, %cst_28 [1] : vector<16x16xf32> to vector<16xf32>
    %59 = vector.shape_cast %58 : vector<16xf32> to vector<16x1xf32>
    %60 = vector.broadcast %59 : vector<16x1xf32> to vector<16x16xf32>
    %61 = arith.subf %57, %60 : vector<16x16xf32>
    %62 = math.exp %61 : vector<16x16xf32>
    %cst_29 = arith.constant dense<0.000000e+00> : vector<16xf32>
    %63 = vector.multi_reduction <add>, %62, %cst_29 [1] : vector<16x16xf32> to vector<16xf32>
    %64 = vector.shape_cast %63 : vector<16xf32> to vector<16x1xf32>
    %65 = vector.broadcast %64 : vector<16x1xf32> to vector<16x16xf32>
    %66 = arith.divf %62, %65 : vector<16x16xf32>
    %67 = vector.extract_strided_slice %5 {offsets = [0, 16], sizes = [16, 8], strides = [1, 1]} : vector<16x32xf32> to vector<16x8xf32>
    %cst_30 = arith.constant dense<0.000000e+00> : vector<16x8xf32>
    %68 = tpu.matmul %66, %67, %cst_30 {dimension_numbers = #tpu.dot_dimension_numbers<[1], [0], [0], [1], [0, 0, 1, 1], [], []>} : vector<16x16xf32>, vector<16x8xf32>, vector<16x8xf32> -> vector<16x8xf32>
    %c16 = arith.constant 16 : index
    %c0_31 = arith.constant 0 : index
    %69 = vector.load %arg5[%c16, %c0_31] : memref<32x32xf32, #tpu.memory_space<vmem>>, vector<8x32xf32>
    %cst_32 = arith.constant dense<0.000000e+00> : vector<16x32xf32>
    %70 = tpu.matmul %68, %69, %cst_32 {dimension_numbers = #tpu.dot_dimension_numbers<[1], [0], [0], [1], [0, 0, 1, 1], [], []>} : vector<16x8xf32>, vector<8x32xf32>, vector<16x32xf32> -> vector<16x32xf32>
    %71 = arith.addf %50, %70 : vector<16x32xf32>
    %72 = vector.extract_strided_slice %1 {offsets = [0, 24], sizes = [16, 8], strides = [1, 1]} : vector<16x32xf32> to vector<16x8xf32>
    %73 = vector.extract_strided_slice %3 {offsets = [0, 24], sizes = [16, 8], strides = [1, 1]} : vector<16x32xf32> to vector<16x8xf32>
    %cst_33 = arith.constant dense<0.000000e+00> : vector<16x16xf32>
    %74 = tpu.matmul %72, %73, %cst_33 {dimension_numbers = #tpu.dot_dimension_numbers<[1], [1], [0], [0], [0, 0, 1, 0], [], []>} : vector<16x8xf32>, vector<16x8xf32>, vector<16x16xf32> -> vector<16x16xf32>
    %cst_34 = arith.constant 0.353553385 : f32
    %75 = vector.broadcast %cst_34 : f32 to vector<16x16xf32>
    %76 = arith.mulf %74, %75 : vector<16x16xf32>
    %77 = vector.broadcast %7 : vector<1x16xf32> to vector<16x16xf32>
    %78 = arith.addf %76, %77 : vector<16x16xf32>
    %cst_35 = arith.constant dense<0xFF800000> : vector<16xf32>
    %79 = vector.multi_reduction <maximumf>, %78, %cst_35 [1] : vector<16x16xf32> to vector<16xf32>
    %80 = vector.shape_cast %79 : vector<16xf32> to vector<16x1xf32>
    %81 = vector.broadcast %80 : vector<16x1xf32> to vector<16x16xf32>
    %82 = arith.subf %78, %81 : vector<16x16xf32>
    %83 = math.exp %82 : vector<16x16xf32>
    %cst_36 = arith.constant dense<0.000000e+00> : vector<16xf32>
    %84 = vector.multi_reduction <add>, %83, %cst_36 [1] : vector<16x16xf32> to vector<16xf32>
    %85 = vector.shape_cast %84 : vector<16xf32> to vector<16x1xf32>
    %86 = vector.broadcast %85 : vector<16x1xf32> to vector<16x16xf32>
    %87 = arith.divf %83, %86 : vector<16x16xf32>
    %88 = vector.extract_strided_slice %5 {offsets = [0, 24], sizes = [16, 8], strides = [1, 1]} : vector<16x32xf32> to vector<16x8xf32>
    %cst_37 = arith.constant dense<0.000000e+00> : vector<16x8xf32>
    %89 = tpu.matmul %87, %88, %cst_37 {dimension_numbers = #tpu.dot_dimension_numbers<[1], [0], [0], [1], [0, 0, 1, 1], [], []>} : vector<16x16xf32>, vector<16x8xf32>, vector<16x8xf32> -> vector<16x8xf32>
    %c24 = arith.constant 24 : index
    %c0_38 = arith.constant 0 : index
    %90 = vector.load %arg5[%c24, %c0_38] : memref<32x32xf32, #tpu.memory_space<vmem>>, vector<8x32xf32>
    %cst_39 = arith.constant dense<0.000000e+00> : vector<16x32xf32>
    %91 = tpu.matmul %89, %90, %cst_39 {dimension_numbers = #tpu.dot_dimension_numbers<[1], [0], [0], [1], [0, 0, 1, 1], [], []>} : vector<16x8xf32>, vector<8x32xf32>, vector<16x32xf32> -> vector<16x32xf32>
    %92 = arith.addf %71, %91 : vector<16x32xf32>
    %c0_40 = arith.constant 0 : index
    %c0_41 = arith.constant 0 : index
    %93 = vector.load %arg6[%c0_40, %c0_41] : memref<1x32xf32, #tpu.memory_space<vmem>>, vector<1x32xf32>
    %94 = vector.broadcast %93 : vector<1x32xf32> to vector<16x32xf32>
    %95 = arith.addf %92, %94 : vector<16x32xf32>
    %c0_42 = arith.constant 0 : index
    %c0_43 = arith.constant 0 : index
    %c0_44 = arith.constant 0 : index
    %96 = vector.load %arg7[%c0_42, %c0_43, %c0_44] : memref<1x16x32xf32, #tpu.memory_space<vmem>>, vector<1x16x32xf32>
    %97 = vector.shape_cast %96 : vector<1x16x32xf32> to vector<16x32xf32>
    %98 = vector.shape_cast %95 : vector<16x32xf32> to vector<1x16x32xf32>
    tpu.vector_store %arg7[%c0_42, %c0_43, %c0_44], %98 {strides = array<i32>} : memref<1x16x32xf32, #tpu.memory_space<vmem>>, vector<1x16x32xf32>,
    return
  }
  func.func @transform_0(%arg0: i32) -> (i32, i32, i32) {
    %c0_i32 = arith.constant 0 : i32
    %c0_i32_0 = arith.constant 0 : i32
    %c0_i32_1 = arith.constant 0 : i32
    return %arg0, %c0_i32, %c0_i32_0 : i32, i32, i32
  }
  func.func @transform_1(%arg0: i32) -> (i32, i32, i32) {
    %c0_i32 = arith.constant 0 : i32
    %c0_i32_0 = arith.constant 0 : i32
    %c0_i32_1 = arith.constant 0 : i32
    return %arg0, %c0_i32, %c0_i32_0 : i32, i32, i32
  }
  func.func @transform_2(%arg0: i32) -> (i32, i32, i32) {
    %c0_i32 = arith.constant 0 : i32
    %c0_i32_0 = arith.constant 0 : i32
    %c0_i32_1 = arith.constant 0 : i32
    return %arg0, %c0_i32, %c0_i32_0 : i32, i32, i32
  }
  func.func @transform_3(%arg0: i32) -> (i32, i32, i32) {
    %c0_i32 = arith.constant 0 : i32
    %c0_i32_0 = arith.constant 0 : i32
    %c0_i32_1 = arith.constant 0 : i32
    return %arg0, %c0_i32, %c0_i32_0 : i32, i32, i32
  }
  func.func @transform_4(%arg0: i32) -> (i32, i32) {
    %c0_i32 = arith.constant 0 : i32
    %c0_i32_0 = arith.constant 0 : i32
    %c0_i32_1 = arith.constant 0 : i32
    return %c0_i32, %c0_i32_0 : i32, i32
  }
  func.func @transform_5(%arg0: i32) -> (i32, i32) {
    %c0_i32 = arith.constant 0 : i32
    %c0_i32_0 = arith.constant 0 : i32
    %c0_i32_1 = arith.constant 0 : i32
    return %c0_i32, %c0_i32_0 : i32, i32
  }
  func.func @transform_6(%arg0: i32) -> (i32, i32, i32) {
    %c0_i32 = arith.constant 0 : i32
    %c0_i32_0 = arith.constant 0 : i32
    %c0_i32_1 = arith.constant 0 : i32
    return %arg0, %c0_i32, %c0_i32_0 : i32, i32, i32
  }
}

module attributes {stable_mosaic.version = 11 : i64} {
  func.func @kernel(%arg0: i32, %arg1: memref<32x32xf32, #tpu.memory_space<vmem>>, %arg2: memref<32x32xf32, #tpu.memory_space<vmem>>, %arg3: memref<1x32xf32, #tpu.memory_space<vmem>>, %arg4: memref<1x32xf32, #tpu.memory_space<vmem>>, %arg5: memref<32x32xf32, #tpu.memory_space<vmem>>) attributes {dimension_semantics = [#tpu.dimension_semantics<parallel>], iteration_bounds = array<i64: 1>, scalar_prefetch = 0 : i64, scratch_operands = 0 : i64, tpu.core_type = #tpu.core_type<tc>, window_params = [{transform_indices = @transform_0, window_bounds = array<i64: 32, 32>}, {transform_indices = @transform_1, window_bounds = array<i64: 32, 32>}, {pipeline_mode = #tpu.pipeline_mode<synchronous>, transform_indices = @transform_2, window_bounds = array<i64: 1, 32>}, {pipeline_mode = #tpu.pipeline_mode<synchronous>, transform_indices = @transform_3, window_bounds = array<i64: 1, 32>}, {transform_indices = @transform_4, window_bounds = array<i64: 32, 32>}]} {
    %c0 = arith.constant 0 : index
    %c0_0 = arith.constant 0 : index
    %0 = vector.load %arg1[%c0, %c0_0] : memref<32x32xf32, #tpu.memory_space<vmem>>, vector<32x32xf32>
    %c0_1 = arith.constant 0 : index
    %c0_2 = arith.constant 0 : index
    %1 = vector.load %arg2[%c0_1, %c0_2] : memref<32x32xf32, #tpu.memory_space<vmem>>, vector<32x32xf32>
    %2 = arith.addf %0, %1 : vector<32x32xf32>
    %cst = arith.constant dense<0.000000e+00> : vector<32xf32>
    %3 = vector.multi_reduction <add>, %2, %cst [1] : vector<32x32xf32> to vector<32xf32>
    %4 = vector.shape_cast %3 : vector<32xf32> to vector<32x1xf32>
    %cst_3 = arith.constant 3.200000e+01 : f32
    %5 = vector.broadcast %cst_3 : f32 to vector<32x1xf32>
    %6 = arith.divf %4, %5 : vector<32x1xf32>
    %7 = vector.broadcast %6 : vector<32x1xf32> to vector<32x32xf32>
    %8 = arith.subf %2, %7 : vector<32x32xf32>
    %9 = arith.mulf %8, %8 : vector<32x32xf32>
    %cst_4 = arith.constant dense<0.000000e+00> : vector<32xf32>
    %10 = vector.multi_reduction <add>, %9, %cst_4 [1] : vector<32x32xf32> to vector<32xf32>
    %11 = vector.shape_cast %10 : vector<32xf32> to vector<32x1xf32>
    %cst_5 = arith.constant 3.200000e+01 : f32
    %12 = vector.broadcast %cst_5 : f32 to vector<32x1xf32>
    %13 = arith.divf %11, %12 : vector<32x1xf32>
    %cst_6 = arith.constant 9.99999974E-6 : f32
    %14 = vector.broadcast %cst_6 : f32 to vector<32x1xf32>
    %15 = arith.addf %13, %14 : vector<32x1xf32>
    %16 = math.rsqrt %15 : vector<32x1xf32>
    %17 = vector.broadcast %16 : vector<32x1xf32> to vector<32x32xf32>
    %18 = arith.mulf %8, %17 : vector<32x32xf32>
    %c0_7 = arith.constant 0 : index
    %c0_8 = arith.constant 0 : index
    %19 = vector.load %arg3[%c0_7, %c0_8] : memref<1x32xf32, #tpu.memory_space<vmem>>, vector<1x32xf32>
    %20 = vector.broadcast %19 : vector<1x32xf32> to vector<32x32xf32>
    %21 = arith.mulf %18, %20 : vector<32x32xf32>
    %c0_9 = arith.constant 0 : index
    %c0_10 = arith.constant 0 : index
    %22 = vector.load %arg4[%c0_9, %c0_10] : memref<1x32xf32, #tpu.memory_space<vmem>>, vector<1x32xf32>
    %23 = vector.broadcast %22 : vector<1x32xf32> to vector<32x32xf32>
    %24 = arith.addf %21, %23 : vector<32x32xf32>
    %c0_11 = arith.constant 0 : index
    %c0_12 = arith.constant 0 : index
    %25 = vector.load %arg5[%c0_11, %c0_12] : memref<32x32xf32, #tpu.memory_space<vmem>>, vector<32x32xf32>
    tpu.vector_store %arg5[%c0_11, %c0_12], %24 {strides = array<i32>} : memref<32x32xf32, #tpu.memory_space<vmem>>, vector<32x32xf32>,
    return
  }
  func.func @transform_0(%arg0: i32) -> (i32, i32) {
    %c0_i32 = arith.constant 0 : i32
    %c0_i32_0 = arith.constant 0 : i32
    return %arg0, %c0_i32 : i32, i32
  }
  func.func @transform_1(%arg0: i32) -> (i32, i32) {
    %c0_i32 = arith.constant 0 : i32
    %c0_i32_0 = arith.constant 0 : i32
    return %arg0, %c0_i32 : i32, i32
  }
  func.func @transform_2(%arg0: i32) -> (i32, i32) {
    %c0_i32 = arith.constant 0 : i32
    %c0_i32_0 = arith.constant 0 : i32
    %c0_i32_1 = arith.constant 0 : i32
    return %c0_i32, %c0_i32_0 : i32, i32
  }
  func.func @transform_3(%arg0: i32) -> (i32, i32) {
    %c0_i32 = arith.constant 0 : i32
    %c0_i32_0 = arith.constant 0 : i32
    %c0_i32_1 = arith.constant 0 : i32
    return %c0_i32, %c0_i32_0 : i32, i32
  }
  func.func @transform_4(%arg0: i32) -> (i32, i32) {
    %c0_i32 = arith.constant 0 : i32
    %c0_i32_0 = arith.constant 0 : i32
    return %arg0, %c0_i32 : i32, i32
  }
}

module attributes {stable_mosaic.version = 11 : i64} {
  func.func @kernel(%arg0: i32, %arg1: memref<32x32xf32, #tpu.memory_space<vmem>>, %arg2: memref<32x64xf32, #tpu.memory_space<vmem>>, %arg3: memref<1x64xf32, #tpu.memory_space<vmem>>, %arg4: memref<32x64xf32, #tpu.memory_space<vmem>>) attributes {dimension_semantics = [#tpu.dimension_semantics<parallel>], iteration_bounds = array<i64: 1>, scalar_prefetch = 0 : i64, scratch_operands = 0 : i64, tpu.core_type = #tpu.core_type<tc>, window_params = [{transform_indices = @transform_0, window_bounds = array<i64: 32, 32>}, {pipeline_mode = #tpu.pipeline_mode<synchronous>, transform_indices = @transform_1, window_bounds = array<i64: 32, 64>}, {pipeline_mode = #tpu.pipeline_mode<synchronous>, transform_indices = @transform_2, window_bounds = array<i64: 1, 64>}, {transform_indices = @transform_3, window_bounds = array<i64: 32, 64>}]} {
    %c0 = arith.constant 0 : index
    %c0_0 = arith.constant 0 : index
    %0 = vector.load %arg1[%c0, %c0_0] : memref<32x32xf32, #tpu.memory_space<vmem>>, vector<32x32xf32>
    %c0_1 = arith.constant 0 : index
    %c0_2 = arith.constant 0 : index
    %1 = vector.load %arg2[%c0_1, %c0_2] : memref<32x64xf32, #tpu.memory_space<vmem>>, vector<32x64xf32>
    %cst = arith.constant dense<0.000000e+00> : vector<32x64xf32>
    %2 = tpu.matmul %0, %1, %cst {dimension_numbers = #tpu.dot_dimension_numbers<[1], [0], [0], [1], [0, 0, 1, 1], [], []>} : vector<32x32xf32>, vector<32x64xf32>, vector<32x64xf32> -> vector<32x64xf32>
    %c0_3 = arith.constant 0 : index
    %c0_4 = arith.constant 0 : index
    %3 = vector.load %arg3[%c0_3, %c0_4] : memref<1x64xf32, #tpu.memory_space<vmem>>, vector<1x64xf32>
    %4 = vector.broadcast %3 : vector<1x64xf32> to vector<32x64xf32>
    %5 = arith.addf %2, %4 : vector<32x64xf32>
    %cst_5 = arith.constant 0.000000e+00 : f32
    %6 = vector.broadcast %cst_5 : f32 to vector<32x64xf32>
    %7 = arith.maximumf %5, %6 : vector<32x64xf32>
    %c0_6 = arith.constant 0 : index
    %c0_7 = arith.constant 0 : index
    %8 = vector.load %arg4[%c0_6, %c0_7] : memref<32x64xf32, #tpu.memory_space<vmem>>, vector<32x64xf32>
    tpu.vector_store %arg4[%c0_6, %c0_7], %7 {strides = array<i32>} : memref<32x64xf32, #tpu.memory_space<vmem>>, vector<32x64xf32>,
    return
  }
  func.func @transform_0(%arg0: i32) -> (i32, i32) {
    %c0_i32 = arith.constant 0 : i32
    %c0_i32_0 = arith.constant 0 : i32
    return %arg0, %c0_i32 : i32, i32
  }
  func.func @transform_1(%arg0: i32) -> (i32, i32) {
    %c0_i32 = arith.constant 0 : i32
    %c0_i32_0 = arith.constant 0 : i32
    %c0_i32_1 = arith.constant 0 : i32
    return %c0_i32, %c0_i32_0 : i32, i32
  }
  func.func @transform_2(%arg0: i32) -> (i32, i32) {
    %c0_i32 = arith.constant 0 : i32
    %c0_i32_0 = arith.constant 0 : i32
    %c0_i32_1 = arith.constant 0 : i32
    return %c0_i32, %c0_i32_0 : i32, i32
  }
  func.func @transform_3(%arg0: i32) -> (i32, i32) {
    %c0_i32 = arith.constant 0 : i32
    %c0_i32_0 = arith.constant 0 : i32
    return %arg0, %c0_i32 : i32, i32
  }
}

module attributes {stable_mosaic.version = 11 : i64} {
  func.func @kernel(%arg0: i32, %arg1: memref<32x64xf32, #tpu.memory_space<vmem>>, %arg2: memref<64x32xf32, #tpu.memory_space<vmem>>, %arg3: memref<1x32xf32, #tpu.memory_space<vmem>>, %arg4: memref<32x32xf32, #tpu.memory_space<vmem>>) attributes {dimension_semantics = [#tpu.dimension_semantics<parallel>], iteration_bounds = array<i64: 1>, scalar_prefetch = 0 : i64, scratch_operands = 0 : i64, tpu.core_type = #tpu.core_type<tc>, window_params = [{transform_indices = @transform_0, window_bounds = array<i64: 32, 64>}, {pipeline_mode = #tpu.pipeline_mode<synchronous>, transform_indices = @transform_1, window_bounds = array<i64: 64, 32>}, {pipeline_mode = #tpu.pipeline_mode<synchronous>, transform_indices = @transform_2, window_bounds = array<i64: 1, 32>}, {transform_indices = @transform_3, window_bounds = array<i64: 32, 32>}]} {
    %c0 = arith.constant 0 : index
    %c0_0 = arith.constant 0 : index
    %0 = vector.load %arg1[%c0, %c0_0] : memref<32x64xf32, #tpu.memory_space<vmem>>, vector<32x64xf32>
    %c0_1 = arith.constant 0 : index
    %c0_2 = arith.constant 0 : index
    %1 = vector.load %arg2[%c0_1, %c0_2] : memref<64x32xf32, #tpu.memory_space<vmem>>, vector<64x32xf32>
    %cst = arith.constant dense<0.000000e+00> : vector<32x32xf32>
    %2 = tpu.matmul %0, %1, %cst {dimension_numbers = #tpu.dot_dimension_numbers<[1], [0], [0], [1], [0, 0, 1, 1], [], []>} : vector<32x64xf32>, vector<64x32xf32>, vector<32x32xf32> -> vector<32x32xf32>
    %c0_3 = arith.constant 0 : index
    %c0_4 = arith.constant 0 : index
    %3 = vector.load %arg3[%c0_3, %c0_4] : memref<1x32xf32, #tpu.memory_space<vmem>>, vector<1x32xf32>
    %4 = vector.broadcast %3 : vector<1x32xf32> to vector<32x32xf32>
    %5 = arith.addf %2, %4 : vector<32x32xf32>
    %c0_5 = arith.constant 0 : index
    %c0_6 = arith.constant 0 : index
    %6 = vector.load %arg4[%c0_5, %c0_6] : memref<32x32xf32, #tpu.memory_space<vmem>>, vector<32x32xf32>
    tpu.vector_store %arg4[%c0_5, %c0_6], %5 {strides = array<i32>} : memref<32x32xf32, #tpu.memory_space<vmem>>, vector<32x32xf32>,
    return
  }
  func.func @transform_0(%arg0: i32) -> (i32, i32) {
    %c0_i32 = arith.constant 0 : i32
    %c0_i32_0 = arith.constant 0 : i32
    return %arg0, %c0_i32 : i32, i32
  }
  func.func @transform_1(%arg0: i32) -> (i32, i32) {
    %c0_i32 = arith.constant 0 : i32
    %c0_i32_0 = arith.constant 0 : i32
    %c0_i32_1 = arith.constant 0 : i32
    return %c0_i32, %c0_i32_0 : i32, i32
  }
  func.func @transform_2(%arg0: i32) -> (i32, i32) {
    %c0_i32 = arith.constant 0 : i32
    %c0_i32_0 = arith.constant 0 : i32
    %c0_i32_1 = arith.constant 0 : i32
    return %c0_i32, %c0_i32_0 : i32, i32
  }
  func.func @transform_3(%arg0: i32) -> (i32, i32) {
    %c0_i32 = arith.constant 0 : i32
    %c0_i32_0 = arith.constant 0 : i32
    return %arg0, %c0_i32 : i32, i32
  }
}

module attributes {stable_mosaic.version = 11 : i64} {
  func.func @kernel(%arg0: i32, %arg1: memref<16x32xf32, #tpu.memory_space<vmem>>, %arg2: memref<16x32xf32, #tpu.memory_space<vmem>>, %arg3: memref<32x32xf32, #tpu.memory_space<vmem>>, %arg4: memref<1x32xf32, #tpu.memory_space<vmem>>, %arg5: memref<16x32xf32, #tpu.memory_space<vmem>>) attributes {dimension_semantics = [#tpu.dimension_semantics<parallel>], iteration_bounds = array<i64: 1>, scalar_prefetch = 0 : i64, scratch_operands = 0 : i64, tpu.core_type = #tpu.core_type<tc>, window_params = [{transform_indices = @transform_0, window_bounds = array<i64: 16, 32>}, {transform_indices = @transform_1, window_bounds = array<i64: 16, 32>}, {pipeline_mode = #tpu.pipeline_mode<synchronous>, transform_indices = @transform_2, window_bounds = array<i64: 32, 32>}, {pipeline_mode = #tpu.pipeline_mode<synchronous>, transform_indices = @transform_3, window_bounds = array<i64: 1, 32>}, {transform_indices = @transform_4, window_bounds = array<i64: 16, 32>}]} {
    %c0 = arith.constant 0 : index
    %c0_0 = arith.constant 0 : index
    %0 = vector.load %arg1[%c0, %c0_0] : memref<16x32xf32, #tpu.memory_space<vmem>>, vector<16x32xf32>
    %c0_1 = arith.constant 0 : index
    %c0_2 = arith.constant 0 : index
    %1 = vector.load %arg2[%c0_1, %c0_2] : memref<16x32xf32, #tpu.memory_space<vmem>>, vector<16x32xf32>
    %2 = arith.addf %0, %1 : vector<16x32xf32>
    %c0_3 = arith.constant 0 : index
    %c0_4 = arith.constant 0 : index
    %3 = vector.load %arg3[%c0_3, %c0_4] : memref<32x32xf32, #tpu.memory_space<vmem>>, vector<32x32xf32>
    %cst = arith.constant dense<0.000000e+00> : vector<16x32xf32>
    %4 = tpu.matmul %2, %3, %cst {dimension_numbers = #tpu.dot_dimension_numbers<[1], [0], [0], [1], [0, 0, 1, 1], [], []>} : vector<16x32xf32>, vector<32x32xf32>, vector<16x32xf32> -> vector<16x32xf32>
    %c0_5 = arith.constant 0 : index
    %c0_6 = arith.constant 0 : index
    %5 = vector.load %arg4[%c0_5, %c0_6] : memref<1x32xf32, #tpu.memory_space<vmem>>, vector<1x32xf32>
    %6 = vector.broadcast %5 : vector<1x32xf32> to vector<16x32xf32>
    %7 = arith.addf %4, %6 : vector<16x32xf32>
    %c0_7 = arith.constant 0 : index
    %c0_8 = arith.constant 0 : index
    %8 = vector.load %arg5[%c0_7, %c0_8] : memref<16x32xf32, #tpu.memory_space<vmem>>, vector<16x32xf32>
    tpu.vector_store %arg5[%c0_7, %c0_8], %7 {strides = array<i32>} : memref<16x32xf32, #tpu.memory_space<vmem>>, vector<16x32xf32>,
    return
  }
  func.func @transform_0(%arg0: i32) -> (i32, i32) {
    %c0_i32 = arith.constant 0 : i32
    %c0_i32_0 = arith.constant 0 : i32
    return %arg0, %c0_i32 : i32, i32
  }
  func.func @transform_1(%arg0: i32) -> (i32, i32) {
    %c0_i32 = arith.constant 0 : i32
    %c0_i32_0 = arith.constant 0 : i32
    return %arg0, %c0_i32 : i32, i32
  }
  func.func @transform_2(%arg0: i32) -> (i32, i32) {
    %c0_i32 = arith.constant 0 : i32
    %c0_i32_0 = arith.constant 0 : i32
    %c0_i32_1 = arith.constant 0 : i32
    return %c0_i32, %c0_i32_0 : i32, i32
  }
  func.func @transform_3(%arg0: i32) -> (i32, i32) {
    %c0_i32 = arith.constant 0 : i32
    %c0_i32_0 = arith.constant 0 : i32
    %c0_i32_1 = arith.constant 0 : i32
    return %c0_i32, %c0_i32_0 : i32, i32
  }
  func.func @transform_4(%arg0: i32) -> (i32, i32) {
    %c0_i32 = arith.constant 0 : i32
    %c0_i32_0 = arith.constant 0 : i32
    return %arg0, %c0_i32 : i32, i32
  }
}

module attributes {stable_mosaic.version = 11 : i64} {
  func.func @kernel(%arg0: i32, %arg1: memref<16x32xf32, #tpu.memory_space<vmem>>, %arg2: memref<32x32xf32, #tpu.memory_space<vmem>>, %arg3: memref<1x32xf32, #tpu.memory_space<vmem>>, %arg4: memref<16x32xf32, #tpu.memory_space<vmem>>) attributes {dimension_semantics = [#tpu.dimension_semantics<parallel>], iteration_bounds = array<i64: 1>, scalar_prefetch = 0 : i64, scratch_operands = 0 : i64, tpu.core_type = #tpu.core_type<tc>, window_params = [{transform_indices = @transform_0, window_bounds = array<i64: 16, 32>}, {pipeline_mode = #tpu.pipeline_mode<synchronous>, transform_indices = @transform_1, window_bounds = array<i64: 32, 32>}, {pipeline_mode = #tpu.pipeline_mode<synchronous>, transform_indices = @transform_2, window_bounds = array<i64: 1, 32>}, {transform_indices = @transform_3, window_bounds = array<i64: 16, 32>}]} {
    %c0 = arith.constant 0 : index
    %c0_0 = arith.constant 0 : index
    %0 = vector.load %arg1[%c0, %c0_0] : memref<16x32xf32, #tpu.memory_space<vmem>>, vector<16x32xf32>
    %c0_1 = arith.constant 0 : index
    %c0_2 = arith.constant 0 : index
    %1 = vector.load %arg2[%c0_1, %c0_2] : memref<32x32xf32, #tpu.memory_space<vmem>>, vector<32x32xf32>
    %cst = arith.constant dense<0.000000e+00> : vector<16x32xf32>
    %2 = tpu.matmul %0, %1, %cst {dimension_numbers = #tpu.dot_dimension_numbers<[1], [0], [0], [1], [0, 0, 1, 1], [], []>} : vector<16x32xf32>, vector<32x32xf32>, vector<16x32xf32> -> vector<16x32xf32>
    %c0_3 = arith.constant 0 : index
    %c0_4 = arith.constant 0 : index
    %3 = vector.load %arg3[%c0_3, %c0_4] : memref<1x32xf32, #tpu.memory_space<vmem>>, vector<1x32xf32>
    %4 = vector.broadcast %3 : vector<1x32xf32> to vector<16x32xf32>
    %5 = arith.addf %2, %4 : vector<16x32xf32>
    %c0_5 = arith.constant 0 : index
    %c0_6 = arith.constant 0 : index
    %6 = vector.load %arg4[%c0_5, %c0_6] : memref<16x32xf32, #tpu.memory_space<vmem>>, vector<16x32xf32>
    tpu.vector_store %arg4[%c0_5, %c0_6], %5 {strides = array<i32>} : memref<16x32xf32, #tpu.memory_space<vmem>>, vector<16x32xf32>,
    return
  }
  func.func @transform_0(%arg0: i32) -> (i32, i32) {
    %c0_i32 = arith.constant 0 : i32
    %c0_i32_0 = arith.constant 0 : i32
    return %arg0, %c0_i32 : i32, i32
  }
  func.func @transform_1(%arg0: i32) -> (i32, i32) {
    %c0_i32 = arith.constant 0 : i32
    %c0_i32_0 = arith.constant 0 : i32
    %c0_i32_1 = arith.constant 0 : i32
    return %c0_i32, %c0_i32_0 : i32, i32
  }
  func.func @transform_2(%arg0: i32) -> (i32, i32) {
    %c0_i32 = arith.constant 0 : i32
    %c0_i32_0 = arith.constant 0 : i32
    %c0_i32_1 = arith.constant 0 : i32
    return %c0_i32, %c0_i32_0 : i32, i32
  }
  func.func @transform_3(%arg0: i32) -> (i32, i32) {
    %c0_i32 = arith.constant 0 : i32
    %c0_i32_0 = arith.constant 0 : i32
    return %arg0, %c0_i32 : i32, i32
  }
}

module attributes {stable_mosaic.version = 11 : i64} {
  func.func @kernel(%arg0: i32, %arg1: memref<1x8x32xf32, #tpu.memory_space<vmem>>, %arg2: memref<1x8x32xf32, #tpu.memory_space<vmem>>, %arg3: memref<1x8x32xf32, #tpu.memory_space<vmem>>, %arg4: memref<1x1x8xf32, #tpu.memory_space<vmem>>, %arg5: memref<32x32xf32, #tpu.memory_space<vmem>>, %arg6: memref<1x32xf32, #tpu.memory_space<vmem>>, %arg7: memref<1x8x32xf32, #tpu.memory_space<vmem>>) attributes {dimension_semantics = [#tpu.dimension_semantics<parallel>], iteration_bounds = array<i64: 2>, scalar_prefetch = 0 : i64, scratch_operands = 0 : i64, tpu.core_type = #tpu.core_type<tc>, window_params = [{transform_indices = @transform_0, window_bounds = array<i64: 1, 8, 32>}, {transform_indices = @transform_1, window_bounds = array<i64: 1, 8, 32>}, {transform_indices = @transform_2, window_bounds = array<i64: 1, 8, 32>}, {transform_indices = @transform_3, window_bounds = array<i64: 1, 1, 8>}, {pipeline_mode = #tpu.pipeline_mode<synchronous>, transform_indices = @transform_4, window_bounds = array<i64: 32, 32>}, {pipeline_mode = #tpu.pipeline_mode<synchronous>, transform_indices = @transform_5, window_bounds = array<i64: 1, 32>}, {transform_indices = @transform_6, window_bounds = array<i64: 1, 8, 32>}]} {
    %c0 = arith.constant 0 : index
    %c0_0 = arith.constant 0 : index
    %c0_1 = arith.constant 0 : index
    %0 = vector.load %arg1[%c0, %c0_0, %c0_1] : memref<1x8x32xf32, #tpu.memory_space<vmem>>, vector<1x8x32xf32>
    %1 = vector.shape_cast %0 : vector<1x8x32xf32> to vector<8x32xf32>
    %c0_2 = arith.constant 0 : index
    %c0_3 = arith.constant 0 : index
    %c0_4 = arith.constant 0 : index
    %2 = vector.load %arg2[%c0_2, %c0_3, %c0_4] : memref<1x8x32xf32, #tpu.memory_space<vmem>>, vector<1x8x32xf32>
    %3 = vector.shape_cast %2 : vector<1x8x32xf32> to vector<8x32xf32>
    %c0_5 = arith.constant 0 : index
    %c0_6 = arith.constant 0 : index
    %c0_7 = arith.constant 0 : index
    %4 = vector.load %arg3[%c0_5, %c0_6, %c0_7] : memref<1x8x32xf32, #tpu.memory_space<vmem>>, vector<1x8x32xf32>
    %5 = vector.shape_cast %4 : vector<1x8x32xf32> to vector<8x32xf32>
    %c0_8 = arith.constant 0 : index
    %c0_9 = arith.constant 0 : index
    %c0_10 = arith.constant 0 : index
    %6 = vector.load %arg4[%c0_8, %c0_9, %c0_10] : memref<1x1x8xf32, #tpu.memory_space<vmem>>, vector<1x1x8xf32>
    %7 = vector.shape_cast %6 : vector<1x1x8xf32> to vector<1x8xf32>
    %cst = arith.constant 0.000000e+00 : f32
    %8 = vector.broadcast %cst : f32 to vector<8x32xf32>
    %9 = vector.extract_strided_slice %1 {offsets = [0, 0], sizes = [8, 8], strides = [1, 1]} : vector<8x32xf32> to vector<8x8xf32>
    %10 = vector.extract_strided_slice %3 {offsets = [0, 0], sizes = [8, 8], strides = [1, 1]} : vector<8x32xf32> to vector<8x8xf32>
    %cst_11 = arith.constant dense<0.000000e+00> : vector<8x8xf32>
    %11 = tpu.matmul %9, %10, %cst_11 {dimension_numbers = #tpu.dot_dimension_numbers<[1], [1], [0], [0], [0, 0, 1, 0], [], []>} : vector<8x8xf32>, vector<8x8xf32>, vector<8x8xf32> -> vector<8x8xf32>
    %cst_12 = arith.constant 0.353553385 : f32
    %12 = vector.broadcast %cst_12 : f32 to vector<8x8xf32>
    %13 = arith.mulf %11, %12 : vector<8x8xf32>
    %14 = vector.broadcast %7 : vector<1x8xf32> to vector<8x8xf32>
    %15 = arith.addf %13, %14 : vector<8x8xf32>
    %cst_13 = arith.constant dense<0xFF800000> : vector<8xf32>
    %16 = vector.multi_reduction <maximumf>, %15, %cst_13 [1] : vector<8x8xf32> to vector<8xf32>
    %17 = vector.shape_cast %16 : vector<8xf32> to vector<8x1xf32>
    %18 = vector.broadcast %17 : vector<8x1xf32> to vector<8x8xf32>
    %19 = arith.subf %15, %18 : vector<8x8xf32>
    %20 = math.exp %19 : vector<8x8xf32>
    %cst_14 = arith.constant dense<0.000000e+00> : vector<8xf32>
    %21 = vector.multi_reduction <add>, %20, %cst_14 [1] : vector<8x8xf32> to vector<8xf32>
    %22 = vector.shape_cast %21 : vector<8xf32> to vector<8x1xf32>
    %23 = vector.broadcast %22 : vector<8x1xf32> to vector<8x8xf32>
    %24 = arith.divf %20, %23 : vector<8x8xf32>
    %25 = vector.extract_strided_slice %5 {offsets = [0, 0], sizes = [8, 8], strides = [1, 1]} : vector<8x32xf32> to vector<8x8xf32>
    %cst_15 = arith.constant dense<0.000000e+00> : vector<8x8xf32>
    %26 = tpu.matmul %24, %25, %cst_15 {dimension_numbers = #tpu.dot_dimension_numbers<[1], [0], [0], [1], [0, 0, 1, 1], [], []>} : vector<8x8xf32>, vector<8x8xf32>, vector<8x8xf32> -> vector<8x8xf32>
    %c0_16 = arith.constant 0 : index
    %c0_17 = arith.constant 0 : index
    %27 = vector.load %arg5[%c0_16, %c0_17] : memref<32x32xf32, #tpu.memory_space<vmem>>, vector<8x32xf32>
    %cst_18 = arith.constant dense<0.000000e+00> : vector<8x32xf32>
    %28 = tpu.matmul %26, %27, %cst_18 {dimension_numbers = #tpu.dot_dimension_numbers<[1], [0], [0], [1], [0, 0, 1, 1], [], []>} : vector<8x8xf32>, vector<8x32xf32>, vector<8x32xf32> -> vector<8x32xf32>
    %29 = arith.addf %8, %28 : vector<8x32xf32>
    %30 = vector.extract_strided_slice %1 {offsets = [0, 8], sizes = [8, 8], strides = [1, 1]} : vector<8x32xf32> to vector<8x8xf32>
    %31 = vector.extract_strided_slice %3 {offsets = [0, 8], sizes = [8, 8], strides = [1, 1]} : vector<8x32xf32> to vector<8x8xf32>
    %cst_19 = arith.constant dense<0.000000e+00> : vector<8x8xf32>
    %32 = tpu.matmul %30, %31, %cst_19 {dimension_numbers = #tpu.dot_dimension_numbers<[1], [1], [0], [0], [0, 0, 1, 0], [], []>} : vector<8x8xf32>, vector<8x8xf32>, vector<8x8xf32> -> vector<8x8xf32>
    %cst_20 = arith.constant 0.353553385 : f32
    %33 = vector.broadcast %cst_20 : f32 to vector<8x8xf32>
    %34 = arith.mulf %32, %33 : vector<8x8xf32>
    %35 = vector.broadcast %7 : vector<1x8xf32> to vector<8x8xf32>
    %36 = arith.addf %34, %35 : vector<8x8xf32>
    %cst_21 = arith.constant dense<0xFF800000> : vector<8xf32>
    %37 = vector.multi_reduction <maximumf>, %36, %cst_21 [1] : vector<8x8xf32> to vector<8xf32>
    %38 = vector.shape_cast %37 : vector<8xf32> to vector<8x1xf32>
    %39 = vector.broadcast %38 : vector<8x1xf32> to vector<8x8xf32>
    %40 = arith.subf %36, %39 : vector<8x8xf32>
    %41 = math.exp %40 : vector<8x8xf32>
    %cst_22 = arith.constant dense<0.000000e+00> : vector<8xf32>
    %42 = vector.multi_reduction <add>, %41, %cst_22 [1] : vector<8x8xf32> to vector<8xf32>
    %43 = vector.shape_cast %42 : vector<8xf32> to vector<8x1xf32>
    %44 = vector.broadcast %43 : vector<8x1xf32> to vector<8x8xf32>
    %45 = arith.divf %41, %44 : vector<8x8xf32>
    %46 = vector.extract_strided_slice %5 {offsets = [0, 8], sizes = [8, 8], strides = [1, 1]} : vector<8x32xf32> to vector<8x8xf32>
    %cst_23 = arith.constant dense<0.000000e+00> : vector<8x8xf32>
    %47 = tpu.matmul %45, %46, %cst_23 {dimension_numbers = #tpu.dot_dimension_numbers<[1], [0], [0], [1], [0, 0, 1, 1], [], []>} : vector<8x8xf32>, vector<8x8xf32>, vector<8x8xf32> -> vector<8x8xf32>
    %c8 = arith.constant 8 : index
    %c0_24 = arith.constant 0 : index
    %48 = vector.load %arg5[%c8, %c0_24] : memref<32x32xf32, #tpu.memory_space<vmem>>, vector<8x32xf32>
    %cst_25 = arith.constant dense<0.000000e+00> : vector<8x32xf32>
    %49 = tpu.matmul %47, %48, %cst_25 {dimension_numbers = #tpu.dot_dimension_numbers<[1], [0], [0], [1], [0, 0, 1, 1], [], []>} : vector<8x8xf32>, vector<8x32xf32>, vector<8x32xf32> -> vector<8x32xf32>
    %50 = arith.addf %29, %49 : vector<8x32xf32>
    %51 = vector.extract_strided_slice %1 {offsets = [0, 16], sizes = [8, 8], strides = [1, 1]} : vector<8x32xf32> to vector<8x8xf32>
    %52 = vector.extract_strided_slice %3 {offsets = [0, 16], sizes = [8, 8], strides = [1, 1]} : vector<8x32xf32> to vector<8x8xf32>
    %cst_26 = arith.constant dense<0.000000e+00> : vector<8x8xf32>
    %53 = tpu.matmul %51, %52, %cst_26 {dimension_numbers = #tpu.dot_dimension_numbers<[1], [1], [0], [0], [0, 0, 1, 0], [], []>} : vector<8x8xf32>, vector<8x8xf32>, vector<8x8xf32> -> vector<8x8xf32>
    %cst_27 = arith.constant 0.353553385 : f32
    %54 = vector.broadcast %cst_27 : f32 to vector<8x8xf32>
    %55 = arith.mulf %53, %54 : vector<8x8xf32>
    %56 = vector.broadcast %7 : vector<1x8xf32> to vector<8x8xf32>
    %57 = arith.addf %55, %56 : vector<8x8xf32>
    %cst_28 = arith.constant dense<0xFF800000> : vector<8xf32>
    %58 = vector.multi_reduction <maximumf>, %57, %cst_28 [1] : vector<8x8xf32> to vector<8xf32>
    %59 = vector.shape_cast %58 : vector<8xf32> to vector<8x1xf32>
    %60 = vector.broadcast %59 : vector<8x1xf32> to vector<8x8xf32>
    %61 = arith.subf %57, %60 : vector<8x8xf32>
    %62 = math.exp %61 : vector<8x8xf32>
    %cst_29 = arith.constant dense<0.000000e+00> : vector<8xf32>
    %63 = vector.multi_reduction <add>, %62, %cst_29 [1] : vector<8x8xf32> to vector<8xf32>
    %64 = vector.shape_cast %63 : vector<8xf32> to vector<8x1xf32>
    %65 = vector.broadcast %64 : vector<8x1xf32> to vector<8x8xf32>
    %66 = arith.divf %62, %65 : vector<8x8xf32>
    %67 = vector.extract_strided_slice %5 {offsets = [0, 16], sizes = [8, 8], strides = [1, 1]} : vector<8x32xf32> to vector<8x8xf32>
    %cst_30 = arith.constant dense<0.000000e+00> : vector<8x8xf32>
    %68 = tpu.matmul %66, %67, %cst_30 {dimension_numbers = #tpu.dot_dimension_numbers<[1], [0], [0], [1], [0, 0, 1, 1], [], []>} : vector<8x8xf32>, vector<8x8xf32>, vector<8x8xf32> -> vector<8x8xf32>
    %c16 = arith.constant 16 : index
    %c0_31 = arith.constant 0 : index
    %69 = vector.load %arg5[%c16, %c0_31] : memref<32x32xf32, #tpu.memory_space<vmem>>, vector<8x32xf32>
    %cst_32 = arith.constant dense<0.000000e+00> : vector<8x32xf32>
    %70 = tpu.matmul %68, %69, %cst_32 {dimension_numbers = #tpu.dot_dimension_numbers<[1], [0], [0], [1], [0, 0, 1, 1], [], []>} : vector<8x8xf32>, vector<8x32xf32>, vector<8x32xf32> -> vector<8x32xf32>
    %71 = arith.addf %50, %70 : vector<8x32xf32>
    %72 = vector.extract_strided_slice %1 {offsets = [0, 24], sizes = [8, 8], strides = [1, 1]} : vector<8x32xf32> to vector<8x8xf32>
    %73 = vector.extract_strided_slice %3 {offsets = [0, 24], sizes = [8, 8], strides = [1, 1]} : vector<8x32xf32> to vector<8x8xf32>
    %cst_33 = arith.constant dense<0.000000e+00> : vector<8x8xf32>
    %74 = tpu.matmul %72, %73, %cst_33 {dimension_numbers = #tpu.dot_dimension_numbers<[1], [1], [0], [0], [0, 0, 1, 0], [], []>} : vector<8x8xf32>, vector<8x8xf32>, vector<8x8xf32> -> vector<8x8xf32>
    %cst_34 = arith.constant 0.353553385 : f32
    %75 = vector.broadcast %cst_34 : f32 to vector<8x8xf32>
    %76 = arith.mulf %74, %75 : vector<8x8xf32>
    %77 = vector.broadcast %7 : vector<1x8xf32> to vector<8x8xf32>
    %78 = arith.addf %76, %77 : vector<8x8xf32>
    %cst_35 = arith.constant dense<0xFF800000> : vector<8xf32>
    %79 = vector.multi_reduction <maximumf>, %78, %cst_35 [1] : vector<8x8xf32> to vector<8xf32>
    %80 = vector.shape_cast %79 : vector<8xf32> to vector<8x1xf32>
    %81 = vector.broadcast %80 : vector<8x1xf32> to vector<8x8xf32>
    %82 = arith.subf %78, %81 : vector<8x8xf32>
    %83 = math.exp %82 : vector<8x8xf32>
    %cst_36 = arith.constant dense<0.000000e+00> : vector<8xf32>
    %84 = vector.multi_reduction <add>, %83, %cst_36 [1] : vector<8x8xf32> to vector<8xf32>
    %85 = vector.shape_cast %84 : vector<8xf32> to vector<8x1xf32>
    %86 = vector.broadcast %85 : vector<8x1xf32> to vector<8x8xf32>
    %87 = arith.divf %83, %86 : vector<8x8xf32>
    %88 = vector.extract_strided_slice %5 {offsets = [0, 24], sizes = [8, 8], strides = [1, 1]} : vector<8x32xf32> to vector<8x8xf32>
    %cst_37 = arith.constant dense<0.000000e+00> : vector<8x8xf32>
    %89 = tpu.matmul %87, %88, %cst_37 {dimension_numbers = #tpu.dot_dimension_numbers<[1], [0], [0], [1], [0, 0, 1, 1], [], []>} : vector<8x8xf32>, vector<8x8xf32>, vector<8x8xf32> -> vector<8x8xf32>
    %c24 = arith.constant 24 : index
    %c0_38 = arith.constant 0 : index
    %90 = vector.load %arg5[%c24, %c0_38] : memref<32x32xf32, #tpu.memory_space<vmem>>, vector<8x32xf32>
    %cst_39 = arith.constant dense<0.000000e+00> : vector<8x32xf32>
    %91 = tpu.matmul %89, %90, %cst_39 {dimension_numbers = #tpu.dot_dimension_numbers<[1], [0], [0], [1], [0, 0, 1, 1], [], []>} : vector<8x8xf32>, vector<8x32xf32>, vector<8x32xf32> -> vector<8x32xf32>
    %92 = arith.addf %71, %91 : vector<8x32xf32>
    %c0_40 = arith.constant 0 : index
    %c0_41 = arith.constant 0 : index
    %93 = vector.load %arg6[%c0_40, %c0_41] : memref<1x32xf32, #tpu.memory_space<vmem>>, vector<1x32xf32>
    %94 = vector.broadcast %93 : vector<1x32xf32> to vector<8x32xf32>
    %95 = arith.addf %92, %94 : vector<8x32xf32>
    %c0_42 = arith.constant 0 : index
    %c0_43 = arith.constant 0 : index
    %c0_44 = arith.constant 0 : index
    %96 = vector.load %arg7[%c0_42, %c0_43, %c0_44] : memref<1x8x32xf32, #tpu.memory_space<vmem>>, vector<1x8x32xf32>
    %97 = vector.shape_cast %96 : vector<1x8x32xf32> to vector<8x32xf32>
    %98 = vector.shape_cast %95 : vector<8x32xf32> to vector<1x8x32xf32>
    tpu.vector_store %arg7[%c0_42, %c0_43, %c0_44], %98 {strides = array<i32>} : memref<1x8x32xf32, #tpu.memory_space<vmem>>, vector<1x8x32xf32>,
    return
  }
  func.func @transform_0(%arg0: i32) -> (i32, i32, i32) {
    %c0_i32 = arith.constant 0 : i32
    %c0_i32_0 = arith.constant 0 : i32
    %c0_i32_1 = arith.constant 0 : i32
    return %arg0, %c0_i32, %c0_i32_0 : i32, i32, i32
  }
  func.func @transform_1(%arg0: i32) -> (i32, i32, i32) {
    %c0_i32 = arith.constant 0 : i32
    %c0_i32_0 = arith.constant 0 : i32
    %c0_i32_1 = arith.constant 0 : i32
    return %arg0, %c0_i32, %c0_i32_0 : i32, i32, i32
  }
  func.func @transform_2(%arg0: i32) -> (i32, i32, i32) {
    %c0_i32 = arith.constant 0 : i32
    %c0_i32_0 = arith.constant 0 : i32
    %c0_i32_1 = arith.constant 0 : i32
    return %arg0, %c0_i32, %c0_i32_0 : i32, i32, i32
  }
  func.func @transform_3(%arg0: i32) -> (i32, i32, i32) {
    %c0_i32 = arith.constant 0 : i32
    %c0_i32_0 = arith.constant 0 : i32
    %c0_i32_1 = arith.constant 0 : i32
    return %arg0, %c0_i32, %c0_i32_0 : i32, i32, i32
  }
  func.func @transform_4(%arg0: i32) -> (i32, i32) {
    %c0_i32 = arith.constant 0 : i32
    %c0_i32_0 = arith.constant 0 : i32
    %c0_i32_1 = arith.constant 0 : i32
    return %c0_i32, %c0_i32_0 : i32, i32
  }
  func.func @transform_5(%arg0: i32) -> (i32, i32) {
    %c0_i32 = arith.constant 0 : i32
    %c0_i32_0 = arith.constant 0 : i32
    %c0_i32_1 = arith.constant 0 : i32
    return %c0_i32, %c0_i32_0 : i32, i32
  }
  func.func @transform_6(%arg0: i32) -> (i32, i32, i32) {
    %c0_i32 = arith.constant 0 : i32
    %c0_i32_0 = arith.constant 0 : i32
    %c0_i32_1 = arith.constant 0 : i32
    return %arg0, %c0_i32, %c0_i32_0 : i32, i32, i32
  }
}

module attributes {stable_mosaic.version = 11 : i64} {
  func.func @kernel(%arg0: i32, %arg1: memref<16x32xf32, #tpu.memory_space<vmem>>, %arg2: memref<16x32xf32, #tpu.memory_space<vmem>>, %arg3: memref<32x32xf32, #tpu.memory_space<vmem>>, %arg4: memref<1x32xf32, #tpu.memory_space<vmem>>, %arg5: memref<16x32xf32, #tpu.memory_space<vmem>>) attributes {dimension_semantics = [#tpu.dimension_semantics<parallel>], iteration_bounds = array<i64: 1>, scalar_prefetch = 0 : i64, scratch_operands = 0 : i64, tpu.core_type = #tpu.core_type<tc>, window_params = [{transform_indices = @transform_0, window_bounds = array<i64: 16, 32>}, {transform_indices = @transform_1, window_bounds = array<i64: 16, 32>}, {pipeline_mode = #tpu.pipeline_mode<synchronous>, transform_indices = @transform_2, window_bounds = array<i64: 32, 32>}, {pipeline_mode = #tpu.pipeline_mode<synchronous>, transform_indices = @transform_3, window_bounds = array<i64: 1, 32>}, {transform_indices = @transform_4, window_bounds = array<i64: 16, 32>}]} {
    %c0 = arith.constant 0 : index
    %c0_0 = arith.constant 0 : index
    %0 = vector.load %arg1[%c0, %c0_0] : memref<16x32xf32, #tpu.memory_space<vmem>>, vector<16x32xf32>
    %c0_1 = arith.constant 0 : index
    %c0_2 = arith.constant 0 : index
    %1 = vector.load %arg2[%c0_1, %c0_2] : memref<16x32xf32, #tpu.memory_space<vmem>>, vector<16x32xf32>
    %2 = arith.addf %0, %1 : vector<16x32xf32>
    %c0_3 = arith.constant 0 : index
    %c0_4 = arith.constant 0 : index
    %3 = vector.load %arg3[%c0_3, %c0_4] : memref<32x32xf32, #tpu.memory_space<vmem>>, vector<32x32xf32>
    %cst = arith.constant dense<0.000000e+00> : vector<16x32xf32>
    %4 = tpu.matmul %2, %3, %cst {dimension_numbers = #tpu.dot_dimension_numbers<[1], [0], [0], [1], [0, 0, 1, 1], [], []>} : vector<16x32xf32>, vector<32x32xf32>, vector<16x32xf32> -> vector<16x32xf32>
    %c0_5 = arith.constant 0 : index
    %c0_6 = arith.constant 0 : index
    %5 = vector.load %arg4[%c0_5, %c0_6] : memref<1x32xf32, #tpu.memory_space<vmem>>, vector<1x32xf32>
    %6 = vector.broadcast %5 : vector<1x32xf32> to vector<16x32xf32>
    %7 = arith.addf %4, %6 : vector<16x32xf32>
    %c0_7 = arith.constant 0 : index
    %c0_8 = arith.constant 0 : index
    %8 = vector.load %arg5[%c0_7, %c0_8] : memref<16x32xf32, #tpu.memory_space<vmem>>, vector<16x32xf32>
    tpu.vector_store %arg5[%c0_7, %c0_8], %7 {strides = array<i32>} : memref<16x32xf32, #tpu.memory_space<vmem>>, vector<16x32xf32>,
    return
  }
  func.func @transform_0(%arg0: i32) -> (i32, i32) {
    %c0_i32 = arith.constant 0 : i32
    %c0_i32_0 = arith.constant 0 : i32
    return %arg0, %c0_i32 : i32, i32
  }
  func.func @transform_1(%arg0: i32) -> (i32, i32) {
    %c0_i32 = arith.constant 0 : i32
    %c0_i32_0 = arith.constant 0 : i32
    return %arg0, %c0_i32 : i32, i32
  }
  func.func @transform_2(%arg0: i32) -> (i32, i32) {
    %c0_i32 = arith.constant 0 : i32
    %c0_i32_0 = arith.constant 0 : i32
    %c0_i32_1 = arith.constant 0 : i32
    return %c0_i32, %c0_i32_0 : i32, i32
  }
  func.func @transform_3(%arg0: i32) -> (i32, i32) {
    %c0_i32 = arith.constant 0 : i32
    %c0_i32_0 = arith.constant 0 : i32
    %c0_i32_1 = arith.constant 0 : i32
    return %c0_i32, %c0_i32_0 : i32, i32
  }
  func.func @transform_4(%arg0: i32) -> (i32, i32) {
    %c0_i32 = arith.constant 0 : i32
    %c0_i32_0 = arith.constant 0 : i32
    return %arg0, %c0_i32 : i32, i32
  }
}

module attributes {stable_mosaic.version = 11 : i64} {
  func.func @kernel(%arg0: i32, %arg1: memref<16x32xf32, #tpu.memory_space<vmem>>, %arg2: memref<16x32xf32, #tpu.memory_space<vmem>>, %arg3: memref<1x32xf32, #tpu.memory_space<vmem>>, %arg4: memref<1x32xf32, #tpu.memory_space<vmem>>, %arg5: memref<16x32xf32, #tpu.memory_space<vmem>>) attributes {dimension_semantics = [#tpu.dimension_semantics<parallel>], iteration_bounds = array<i64: 1>, scalar_prefetch = 0 : i64, scratch_operands = 0 : i64, tpu.core_type = #tpu.core_type<tc>, window_params = [{transform_indices = @transform_0, window_bounds = array<i64: 16, 32>}, {transform_indices = @transform_1, window_bounds = array<i64: 16, 32>}, {pipeline_mode = #tpu.pipeline_mode<synchronous>, transform_indices = @transform_2, window_bounds = array<i64: 1, 32>}, {pipeline_mode = #tpu.pipeline_mode<synchronous>, transform_indices = @transform_3, window_bounds = array<i64: 1, 32>}, {transform_indices = @transform_4, window_bounds = array<i64: 16, 32>}]} {
    %c0 = arith.constant 0 : index
    %c0_0 = arith.constant 0 : index
    %0 = vector.load %arg1[%c0, %c0_0] : memref<16x32xf32, #tpu.memory_space<vmem>>, vector<16x32xf32>
    %c0_1 = arith.constant 0 : index
    %c0_2 = arith.constant 0 : index
    %1 = vector.load %arg2[%c0_1, %c0_2] : memref<16x32xf32, #tpu.memory_space<vmem>>, vector<16x32xf32>
    %2 = arith.addf %0, %1 : vector<16x32xf32>
    %cst = arith.constant dense<0.000000e+00> : vector<16xf32>
    %3 = vector.multi_reduction <add>, %2, %cst [1] : vector<16x32xf32> to vector<16xf32>
    %4 = vector.shape_cast %3 : vector<16xf32> to vector<16x1xf32>
    %cst_3 = arith.constant 3.200000e+01 : f32
    %5 = vector.broadcast %cst_3 : f32 to vector<16x1xf32>
    %6 = arith.divf %4, %5 : vector<16x1xf32>
    %7 = vector.broadcast %6 : vector<16x1xf32> to vector<16x32xf32>
    %8 = arith.subf %2, %7 : vector<16x32xf32>
    %9 = arith.mulf %8, %8 : vector<16x32xf32>
    %cst_4 = arith.constant dense<0.000000e+00> : vector<16xf32>
    %10 = vector.multi_reduction <add>, %9, %cst_4 [1] : vector<16x32xf32> to vector<16xf32>
    %11 = vector.shape_cast %10 : vector<16xf32> to vector<16x1xf32>
    %cst_5 = arith.constant 3.200000e+01 : f32
    %12 = vector.broadcast %cst_5 : f32 to vector<16x1xf32>
    %13 = arith.divf %11, %12 : vector<16x1xf32>
    %cst_6 = arith.constant 9.99999974E-6 : f32
    %14 = vector.broadcast %cst_6 : f32 to vector<16x1xf32>
    %15 = arith.addf %13, %14 : vector<16x1xf32>
    %16 = math.rsqrt %15 : vector<16x1xf32>
    %17 = vector.broadcast %16 : vector<16x1xf32> to vector<16x32xf32>
    %18 = arith.mulf %8, %17 : vector<16x32xf32>
    %c0_7 = arith.constant 0 : index
    %c0_8 = arith.constant 0 : index
    %19 = vector.load %arg3[%c0_7, %c0_8] : memref<1x32xf32, #tpu.memory_space<vmem>>, vector<1x32xf32>
    %20 = vector.broadcast %19 : vector<1x32xf32> to vector<16x32xf32>
    %21 = arith.mulf %18, %20 : vector<16x32xf32>
    %c0_9 = arith.constant 0 : index
    %c0_10 = arith.constant 0 : index
    %22 = vector.load %arg4[%c0_9, %c0_10] : memref<1x32xf32, #tpu.memory_space<vmem>>, vector<1x32xf32>
    %23 = vector.broadcast %22 : vector<1x32xf32> to vector<16x32xf32>
    %24 = arith.addf %21, %23 : vector<16x32xf32>
    %c0_11 = arith.constant 0 : index
    %c0_12 = arith.constant 0 : index
    %25 = vector.load %arg5[%c0_11, %c0_12] : memref<16x32xf32, #tpu.memory_space<vmem>>, vector<16x32xf32>
    tpu.vector_store %arg5[%c0_11, %c0_12], %24 {strides = array<i32>} : memref<16x32xf32, #tpu.memory_space<vmem>>, vector<16x32xf32>,
    return
  }
  func.func @transform_0(%arg0: i32) -> (i32, i32) {
    %c0_i32 = arith.constant 0 : i32
    %c0_i32_0 = arith.constant 0 : i32
    return %arg0, %c0_i32 : i32, i32
  }
  func.func @transform_1(%arg0: i32) -> (i32, i32) {
    %c0_i32 = arith.constant 0 : i32
    %c0_i32_0 = arith.constant 0 : i32
    return %arg0, %c0_i32 : i32, i32
  }
  func.func @transform_2(%arg0: i32) -> (i32, i32) {
    %c0_i32 = arith.constant 0 : i32
    %c0_i32_0 = arith.constant 0 : i32
    %c0_i32_1 = arith.constant 0 : i32
    return %c0_i32, %c0_i32_0 : i32, i32
  }
  func.func @transform_3(%arg0: i32) -> (i32, i32) {
    %c0_i32 = arith.constant 0 : i32
    %c0_i32_0 = arith.constant 0 : i32
    %c0_i32_1 = arith.constant 0 : i32
    return %c0_i32, %c0_i32_0 : i32, i32
  }
  func.func @transform_4(%arg0: i32) -> (i32, i32) {
    %c0_i32 = arith.constant 0 : i32
    %c0_i32_0 = arith.constant 0 : i32
    return %arg0, %c0_i32 : i32, i32
  }
}

module attributes {stable_mosaic.version = 11 : i64} {
  func.func @kernel(%arg0: i32, %arg1: memref<1x8x32xf32, #tpu.memory_space<vmem>>, %arg2: memref<1x16x32xf32, #tpu.memory_space<vmem>>, %arg3: memref<1x16x32xf32, #tpu.memory_space<vmem>>, %arg4: memref<1x1x16xf32, #tpu.memory_space<vmem>>, %arg5: memref<32x32xf32, #tpu.memory_space<vmem>>, %arg6: memref<1x32xf32, #tpu.memory_space<vmem>>, %arg7: memref<1x8x32xf32, #tpu.memory_space<vmem>>) attributes {dimension_semantics = [#tpu.dimension_semantics<parallel>], iteration_bounds = array<i64: 2>, scalar_prefetch = 0 : i64, scratch_operands = 0 : i64, tpu.core_type = #tpu.core_type<tc>, window_params = [{transform_indices = @transform_0, window_bounds = array<i64: 1, 8, 32>}, {transform_indices = @transform_1, window_bounds = array<i64: 1, 16, 32>}, {transform_indices = @transform_2, window_bounds = array<i64: 1, 16, 32>}, {transform_indices = @transform_3, window_bounds = array<i64: 1, 1, 16>}, {pipeline_mode = #tpu.pipeline_mode<synchronous>, transform_indices = @transform_4, window_bounds = array<i64: 32, 32>}, {pipeline_mode = #tpu.pipeline_mode<synchronous>, transform_indices = @transform_5, window_bounds = array<i64: 1, 32>}, {transform_indices = @transform_6, window_bounds = array<i64: 1, 8, 32>}]} {
    %c0 = arith.constant 0 : index
    %c0_0 = arith.constant 0 : index
    %c0_1 = arith.constant 0 : index
    %0 = vector.load %arg1[%c0, %c0_0, %c0_1] : memref<1x8x32xf32, #tpu.memory_space<vmem>>, vector<1x8x32xf32>
    %1 = vector.shape_cast %0 : vector<1x8x32xf32> to vector<8x32xf32>
    %c0_2 = arith.constant 0 : index
    %c0_3 = arith.constant 0 : index
    %c0_4 = arith.constant 0 : index
    %2 = vector.load %arg2[%c0_2, %c0_3, %c0_4] : memref<1x16x32xf32, #tpu.memory_space<vmem>>, vector<1x16x32xf32>
    %3 = vector.shape_cast %2 : vector<1x16x32xf32> to vector<16x32xf32>
    %c0_5 = arith.constant 0 : index
    %c0_6 = arith.constant 0 : index
    %c0_7 = arith.constant 0 : index
    %4 = vector.load %arg3[%c0_5, %c0_6, %c0_7] : memref<1x16x32xf32, #tpu.memory_space<vmem>>, vector<1x16x32xf32>
    %5 = vector.shape_cast %4 : vector<1x16x32xf32> to vector<16x32xf32>
    %c0_8 = arith.constant 0 : index
    %c0_9 = arith.constant 0 : index
    %c0_10 = arith.constant 0 : index
    %6 = vector.load %arg4[%c0_8, %c0_9, %c0_10] : memref<1x1x16xf32, #tpu.memory_space<vmem>>, vector<1x1x16xf32>
    %7 = vector.shape_cast %6 : vector<1x1x16xf32> to vector<1x16xf32>
    %cst = arith.constant 0.000000e+00 : f32
    %8 = vector.broadcast %cst : f32 to vector<8x32xf32>
    %9 = vector.extract_strided_slice %1 {offsets = [0, 0], sizes = [8, 8], strides = [1, 1]} : vector<8x32xf32> to vector<8x8xf32>
    %10 = vector.extract_strided_slice %3 {offsets = [0, 0], sizes = [16, 8], strides = [1, 1]} : vector<16x32xf32> to vector<16x8xf32>
    %cst_11 = arith.constant dense<0.000000e+00> : vector<8x16xf32>
    %11 = tpu.matmul %9, %10, %cst_11 {dimension_numbers = #tpu.dot_dimension_numbers<[1], [1], [0], [0], [0, 0, 1, 0], [], []>} : vector<8x8xf32>, vector<16x8xf32>, vector<8x16xf32> -> vector<8x16xf32>
    %cst_12 = arith.constant 0.353553385 : f32
    %12 = vector.broadcast %cst_12 : f32 to vector<8x16xf32>
    %13 = arith.mulf %11, %12 : vector<8x16xf32>
    %14 = vector.broadcast %7 : vector<1x16xf32> to vector<8x16xf32>
    %15 = arith.addf %13, %14 : vector<8x16xf32>
    %cst_13 = arith.constant dense<0xFF800000> : vector<8xf32>
    %16 = vector.multi_reduction <maximumf>, %15, %cst_13 [1] : vector<8x16xf32> to vector<8xf32>
    %17 = vector.shape_cast %16 : vector<8xf32> to vector<8x1xf32>
    %18 = vector.broadcast %17 : vector<8x1xf32> to vector<8x16xf32>
    %19 = arith.subf %15, %18 : vector<8x16xf32>
    %20 = math.exp %19 : vector<8x16xf32>
    %cst_14 = arith.constant dense<0.000000e+00> : vector<8xf32>
    %21 = vector.multi_reduction <add>, %20, %cst_14 [1] : vector<8x16xf32> to vector<8xf32>
    %22 = vector.shape_cast %21 : vector<8xf32> to vector<8x1xf32>
    %23 = vector.broadcast %22 : vector<8x1xf32> to vector<8x16xf32>
    %24 = arith.divf %20, %23 : vector<8x16xf32>
    %25 = vector.extract_strided_slice %5 {offsets = [0, 0], sizes = [16, 8], strides = [1, 1]} : vector<16x32xf32> to vector<16x8xf32>
    %cst_15 = arith.constant dense<0.000000e+00> : vector<8x8xf32>
    %26 = tpu.matmul %24, %25, %cst_15 {dimension_numbers = #tpu.dot_dimension_numbers<[1], [0], [0], [1], [0, 0, 1, 1], [], []>} : vector<8x16xf32>, vector<16x8xf32>, vector<8x8xf32> -> vector<8x8xf32>
    %c0_16 = arith.constant 0 : index
    %c0_17 = arith.constant 0 : index
    %27 = vector.load %arg5[%c0_16, %c0_17] : memref<32x32xf32, #tpu.memory_space<vmem>>, vector<8x32xf32>
    %cst_18 = arith.constant dense<0.000000e+00> : vector<8x32xf32>
    %28 = tpu.matmul %26, %27, %cst_18 {dimension_numbers = #tpu.dot_dimension_numbers<[1], [0], [0], [1], [0, 0, 1, 1], [], []>} : vector<8x8xf32>, vector<8x32xf32>, vector<8x32xf32> -> vector<8x32xf32>
    %29 = arith.addf %8, %28 : vector<8x32xf32>
    %30 = vector.extract_strided_slice %1 {offsets = [0, 8], sizes = [8, 8], strides = [1, 1]} : vector<8x32xf32> to vector<8x8xf32>
    %31 = vector.extract_strided_slice %3 {offsets = [0, 8], sizes = [16, 8], strides = [1, 1]} : vector<16x32xf32> to vector<16x8xf32>
    %cst_19 = arith.constant dense<0.000000e+00> : vector<8x16xf32>
    %32 = tpu.matmul %30, %31, %cst_19 {dimension_numbers = #tpu.dot_dimension_numbers<[1], [1], [0], [0], [0, 0, 1, 0], [], []>} : vector<8x8xf32>, vector<16x8xf32>, vector<8x16xf32> -> vector<8x16xf32>
    %cst_20 = arith.constant 0.353553385 : f32
    %33 = vector.broadcast %cst_20 : f32 to vector<8x16xf32>
    %34 = arith.mulf %32, %33 : vector<8x16xf32>
    %35 = vector.broadcast %7 : vector<1x16xf32> to vector<8x16xf32>
    %36 = arith.addf %34, %35 : vector<8x16xf32>
    %cst_21 = arith.constant dense<0xFF800000> : vector<8xf32>
    %37 = vector.multi_reduction <maximumf>, %36, %cst_21 [1] : vector<8x16xf32> to vector<8xf32>
    %38 = vector.shape_cast %37 : vector<8xf32> to vector<8x1xf32>
    %39 = vector.broadcast %38 : vector<8x1xf32> to vector<8x16xf32>
    %40 = arith.subf %36, %39 : vector<8x16xf32>
    %41 = math.exp %40 : vector<8x16xf32>
    %cst_22 = arith.constant dense<0.000000e+00> : vector<8xf32>
    %42 = vector.multi_reduction <add>, %41, %cst_22 [1] : vector<8x16xf32> to vector<8xf32>
    %43 = vector.shape_cast %42 : vector<8xf32> to vector<8x1xf32>
    %44 = vector.broadcast %43 : vector<8x1xf32> to vector<8x16xf32>
    %45 = arith.divf %41, %44 : vector<8x16xf32>
    %46 = vector.extract_strided_slice %5 {offsets = [0, 8], sizes = [16, 8], strides = [1, 1]} : vector<16x32xf32> to vector<16x8xf32>
    %cst_23 = arith.constant dense<0.000000e+00> : vector<8x8xf32>
    %47 = tpu.matmul %45, %46, %cst_23 {dimension_numbers = #tpu.dot_dimension_numbers<[1], [0], [0], [1], [0, 0, 1, 1], [], []>} : vector<8x16xf32>, vector<16x8xf32>, vector<8x8xf32> -> vector<8x8xf32>
    %c8 = arith.constant 8 : index
    %c0_24 = arith.constant 0 : index
    %48 = vector.load %arg5[%c8, %c0_24] : memref<32x32xf32, #tpu.memory_space<vmem>>, vector<8x32xf32>
    %cst_25 = arith.constant dense<0.000000e+00> : vector<8x32xf32>
    %49 = tpu.matmul %47, %48, %cst_25 {dimension_numbers = #tpu.dot_dimension_numbers<[1], [0], [0], [1], [0, 0, 1, 1], [], []>} : vector<8x8xf32>, vector<8x32xf32>, vector<8x32xf32> -> vector<8x32xf32>
    %50 = arith.addf %29, %49 : vector<8x32xf32>
    %51 = vector.extract_strided_slice %1 {offsets = [0, 16], sizes = [8, 8], strides = [1, 1]} : vector<8x32xf32> to vector<8x8xf32>
    %52 = vector.extract_strided_slice %3 {offsets = [0, 16], sizes = [16, 8], strides = [1, 1]} : vector<16x32xf32> to vector<16x8xf32>
    %cst_26 = arith.constant dense<0.000000e+00> : vector<8x16xf32>
    %53 = tpu.matmul %51, %52, %cst_26 {dimension_numbers = #tpu.dot_dimension_numbers<[1], [1], [0], [0], [0, 0, 1, 0], [], []>} : vector<8x8xf32>, vector<16x8xf32>, vector<8x16xf32> -> vector<8x16xf32>
    %cst_27 = arith.constant 0.353553385 : f32
    %54 = vector.broadcast %cst_27 : f32 to vector<8x16xf32>
    %55 = arith.mulf %53, %54 : vector<8x16xf32>
    %56 = vector.broadcast %7 : vector<1x16xf32> to vector<8x16xf32>
    %57 = arith.addf %55, %56 : vector<8x16xf32>
    %cst_28 = arith.constant dense<0xFF800000> : vector<8xf32>
    %58 = vector.multi_reduction <maximumf>, %57, %cst_28 [1] : vector<8x16xf32> to vector<8xf32>
    %59 = vector.shape_cast %58 : vector<8xf32> to vector<8x1xf32>
    %60 = vector.broadcast %59 : vector<8x1xf32> to vector<8x16xf32>
    %61 = arith.subf %57, %60 : vector<8x16xf32>
    %62 = math.exp %61 : vector<8x16xf32>
    %cst_29 = arith.constant dense<0.000000e+00> : vector<8xf32>
    %63 = vector.multi_reduction <add>, %62, %cst_29 [1] : vector<8x16xf32> to vector<8xf32>
    %64 = vector.shape_cast %63 : vector<8xf32> to vector<8x1xf32>
    %65 = vector.broadcast %64 : vector<8x1xf32> to vector<8x16xf32>
    %66 = arith.divf %62, %65 : vector<8x16xf32>
    %67 = vector.extract_strided_slice %5 {offsets = [0, 16], sizes = [16, 8], strides = [1, 1]} : vector<16x32xf32> to vector<16x8xf32>
    %cst_30 = arith.constant dense<0.000000e+00> : vector<8x8xf32>
    %68 = tpu.matmul %66, %67, %cst_30 {dimension_numbers = #tpu.dot_dimension_numbers<[1], [0], [0], [1], [0, 0, 1, 1], [], []>} : vector<8x16xf32>, vector<16x8xf32>, vector<8x8xf32> -> vector<8x8xf32>
    %c16 = arith.constant 16 : index
    %c0_31 = arith.constant 0 : index
    %69 = vector.load %arg5[%c16, %c0_31] : memref<32x32xf32, #tpu.memory_space<vmem>>, vector<8x32xf32>
    %cst_32 = arith.constant dense<0.000000e+00> : vector<8x32xf32>
    %70 = tpu.matmul %68, %69, %cst_32 {dimension_numbers = #tpu.dot_dimension_numbers<[1], [0], [0], [1], [0, 0, 1, 1], [], []>} : vector<8x8xf32>, vector<8x32xf32>, vector<8x32xf32> -> vector<8x32xf32>
    %71 = arith.addf %50, %70 : vector<8x32xf32>
    %72 = vector.extract_strided_slice %1 {offsets = [0, 24], sizes = [8, 8], strides = [1, 1]} : vector<8x32xf32> to vector<8x8xf32>
    %73 = vector.extract_strided_slice %3 {offsets = [0, 24], sizes = [16, 8], strides = [1, 1]} : vector<16x32xf32> to vector<16x8xf32>
    %cst_33 = arith.constant dense<0.000000e+00> : vector<8x16xf32>
    %74 = tpu.matmul %72, %73, %cst_33 {dimension_numbers = #tpu.dot_dimension_numbers<[1], [1], [0], [0], [0, 0, 1, 0], [], []>} : vector<8x8xf32>, vector<16x8xf32>, vector<8x16xf32> -> vector<8x16xf32>
    %cst_34 = arith.constant 0.353553385 : f32
    %75 = vector.broadcast %cst_34 : f32 to vector<8x16xf32>
    %76 = arith.mulf %74, %75 : vector<8x16xf32>
    %77 = vector.broadcast %7 : vector<1x16xf32> to vector<8x16xf32>
    %78 = arith.addf %76, %77 : vector<8x16xf32>
    %cst_35 = arith.constant dense<0xFF800000> : vector<8xf32>
    %79 = vector.multi_reduction <maximumf>, %78, %cst_35 [1] : vector<8x16xf32> to vector<8xf32>
    %80 = vector.shape_cast %79 : vector<8xf32> to vector<8x1xf32>
    %81 = vector.broadcast %80 : vector<8x1xf32> to vector<8x16xf32>
    %82 = arith.subf %78, %81 : vector<8x16xf32>
    %83 = math.exp %82 : vector<8x16xf32>
    %cst_36 = arith.constant dense<0.000000e+00> : vector<8xf32>
    %84 = vector.multi_reduction <add>, %83, %cst_36 [1] : vector<8x16xf32> to vector<8xf32>
    %85 = vector.shape_cast %84 : vector<8xf32> to vector<8x1xf32>
    %86 = vector.broadcast %85 : vector<8x1xf32> to vector<8x16xf32>
    %87 = arith.divf %83, %86 : vector<8x16xf32>
    %88 = vector.extract_strided_slice %5 {offsets = [0, 24], sizes = [16, 8], strides = [1, 1]} : vector<16x32xf32> to vector<16x8xf32>
    %cst_37 = arith.constant dense<0.000000e+00> : vector<8x8xf32>
    %89 = tpu.matmul %87, %88, %cst_37 {dimension_numbers = #tpu.dot_dimension_numbers<[1], [0], [0], [1], [0, 0, 1, 1], [], []>} : vector<8x16xf32>, vector<16x8xf32>, vector<8x8xf32> -> vector<8x8xf32>
    %c24 = arith.constant 24 : index
    %c0_38 = arith.constant 0 : index
    %90 = vector.load %arg5[%c24, %c0_38] : memref<32x32xf32, #tpu.memory_space<vmem>>, vector<8x32xf32>
    %cst_39 = arith.constant dense<0.000000e+00> : vector<8x32xf32>
    %91 = tpu.matmul %89, %90, %cst_39 {dimension_numbers = #tpu.dot_dimension_numbers<[1], [0], [0], [1], [0, 0, 1, 1], [], []>} : vector<8x8xf32>, vector<8x32xf32>, vector<8x32xf32> -> vector<8x32xf32>
    %92 = arith.addf %71, %91 : vector<8x32xf32>
    %c0_40 = arith.constant 0 : index
    %c0_41 = arith.constant 0 : index
    %93 = vector.load %arg6[%c0_40, %c0_41] : memref<1x32xf32, #tpu.memory_space<vmem>>, vector<1x32xf32>
    %94 = vector.broadcast %93 : vector<1x32xf32> to vector<8x32xf32>
    %95 = arith.addf %92, %94 : vector<8x32xf32>
    %c0_42 = arith.constant 0 : index
    %c0_43 = arith.constant 0 : index
    %c0_44 = arith.constant 0 : index
    %96 = vector.load %arg7[%c0_42, %c0_43, %c0_44] : memref<1x8x32xf32, #tpu.memory_space<vmem>>, vector<1x8x32xf32>
    %97 = vector.shape_cast %96 : vector<1x8x32xf32> to vector<8x32xf32>
    %98 = vector.shape_cast %95 : vector<8x32xf32> to vector<1x8x32xf32>
    tpu.vector_store %arg7[%c0_42, %c0_43, %c0_44], %98 {strides = array<i32>} : memref<1x8x32xf32, #tpu.memory_space<vmem>>, vector<1x8x32xf32>,
    return
  }
  func.func @transform_0(%arg0: i32) -> (i32, i32, i32) {
    %c0_i32 = arith.constant 0 : i32
    %c0_i32_0 = arith.constant 0 : i32
    %c0_i32_1 = arith.constant 0 : i32
    return %arg0, %c0_i32, %c0_i32_0 : i32, i32, i32
  }
  func.func @transform_1(%arg0: i32) -> (i32, i32, i32) {
    %c0_i32 = arith.constant 0 : i32
    %c0_i32_0 = arith.constant 0 : i32
    %c0_i32_1 = arith.constant 0 : i32
    return %arg0, %c0_i32, %c0_i32_0 : i32, i32, i32
  }
  func.func @transform_2(%arg0: i32) -> (i32, i32, i32) {
    %c0_i32 = arith.constant 0 : i32
    %c0_i32_0 = arith.constant 0 : i32
    %c0_i32_1 = arith.constant 0 : i32
    return %arg0, %c0_i32, %c0_i32_0 : i32, i32, i32
  }
  func.func @transform_3(%arg0: i32) -> (i32, i32, i32) {
    %c0_i32 = arith.constant 0 : i32
    %c0_i32_0 = arith.constant 0 : i32
    %c0_i32_1 = arith.constant 0 : i32
    return %arg0, %c0_i32, %c0_i32_0 : i32, i32, i32
  }
  func.func @transform_4(%arg0: i32) -> (i32, i32) {
    %c0_i32 = arith.constant 0 : i32
    %c0_i32_0 = arith.constant 0 : i32
    %c0_i32_1 = arith.constant 0 : i32
    return %c0_i32, %c0_i32_0 : i32, i32
  }
  func.func @transform_5(%arg0: i32) -> (i32, i32) {
    %c0_i32 = arith.constant 0 : i32
    %c0_i32_0 = arith.constant 0 : i32
    %c0_i32_1 = arith.constant 0 : i32
    return %c0_i32, %c0_i32_0 : i32, i32
  }
  func.func @transform_6(%arg0: i32) -> (i32, i32, i32) {
    %c0_i32 = arith.constant 0 : i32
    %c0_i32_0 = arith.constant 0 : i32
    %c0_i32_1 = arith.constant 0 : i32
    return %arg0, %c0_i32, %c0_i32_0 : i32, i32, i32
  }
}

module attributes {stable_mosaic.version = 11 : i64} {
  func.func @kernel(%arg0: i32, %arg1: memref<16x32xf32, #tpu.memory_space<vmem>>, %arg2: memref<32x64xf32, #tpu.memory_space<vmem>>, %arg3: memref<1x64xf32, #tpu.memory_space<vmem>>, %arg4: memref<16x64xf32, #tpu.memory_space<vmem>>) attributes {dimension_semantics = [#tpu.dimension_semantics<parallel>], iteration_bounds = array<i64: 1>, scalar_prefetch = 0 : i64, scratch_operands = 0 : i64, tpu.core_type = #tpu.core_type<tc>, window_params = [{transform_indices = @transform_0, window_bounds = array<i64: 16, 32>}, {pipeline_mode = #tpu.pipeline_mode<synchronous>, transform_indices = @transform_1, window_bounds = array<i64: 32, 64>}, {pipeline_mode = #tpu.pipeline_mode<synchronous>, transform_indices = @transform_2, window_bounds = array<i64: 1, 64>}, {transform_indices = @transform_3, window_bounds = array<i64: 16, 64>}]} {
    %c0 = arith.constant 0 : index
    %c0_0 = arith.constant 0 : index
    %0 = vector.load %arg1[%c0, %c0_0] : memref<16x32xf32, #tpu.memory_space<vmem>>, vector<16x32xf32>
    %c0_1 = arith.constant 0 : index
    %c0_2 = arith.constant 0 : index
    %1 = vector.load %arg2[%c0_1, %c0_2] : memref<32x64xf32, #tpu.memory_space<vmem>>, vector<32x64xf32>
    %cst = arith.constant dense<0.000000e+00> : vector<16x64xf32>
    %2 = tpu.matmul %0, %1, %cst {dimension_numbers = #tpu.dot_dimension_numbers<[1], [0], [0], [1], [0, 0, 1, 1], [], []>} : vector<16x32xf32>, vector<32x64xf32>, vector<16x64xf32> -> vector<16x64xf32>
    %c0_3 = arith.constant 0 : index
    %c0_4 = arith.constant 0 : index
    %3 = vector.load %arg3[%c0_3, %c0_4] : memref<1x64xf32, #tpu.memory_space<vmem>>, vector<1x64xf32>
    %4 = vector.broadcast %3 : vector<1x64xf32> to vector<16x64xf32>
    %5 = arith.addf %2, %4 : vector<16x64xf32>
    %cst_5 = arith.constant 0.000000e+00 : f32
    %6 = vector.broadcast %cst_5 : f32 to vector<16x64xf32>
    %7 = arith.maximumf %5, %6 : vector<16x64xf32>
    %c0_6 = arith.constant 0 : index
    %c0_7 = arith.constant 0 : index
    %8 = vector.load %arg4[%c0_6, %c0_7] : memref<16x64xf32, #tpu.memory_space<vmem>>, vector<16x64xf32>
    tpu.vector_store %arg4[%c0_6, %c0_7], %7 {strides = array<i32>} : memref<16x64xf32, #tpu.memory_space<vmem>>, vector<16x64xf32>,
    return
  }
  func.func @transform_0(%arg0: i32) -> (i32, i32) {
    %c0_i32 = arith.constant 0 : i32
    %c0_i32_0 = arith.constant 0 : i32
    return %arg0, %c0_i32 : i32, i32
  }
  func.func @transform_1(%arg0: i32) -> (i32, i32) {
    %c0_i32 = arith.constant 0 : i32
    %c0_i32_0 = arith.constant 0 : i32
    %c0_i32_1 = arith.constant 0 : i32
    return %c0_i32, %c0_i32_0 : i32, i32
  }
  func.func @transform_2(%arg0: i32) -> (i32, i32) {
    %c0_i32 = arith.constant 0 : i32
    %c0_i32_0 = arith.constant 0 : i32
    %c0_i32_1 = arith.constant 0 : i32
    return %c0_i32, %c0_i32_0 : i32, i32
  }
  func.func @transform_3(%arg0: i32) -> (i32, i32) {
    %c0_i32 = arith.constant 0 : i32
    %c0_i32_0 = arith.constant 0 : i32
    return %arg0, %c0_i32 : i32, i32
  }
}

module attributes {stable_mosaic.version = 11 : i64} {
  func.func @kernel(%arg0: i32, %arg1: memref<16x32xf32, #tpu.memory_space<vmem>>, %arg2: memref<16x32xf32, #tpu.memory_space<vmem>>, %arg3: memref<1x32xf32, #tpu.memory_space<vmem>>, %arg4: memref<1x32xf32, #tpu.memory_space<vmem>>, %arg5: memref<16x32xf32, #tpu.memory_space<vmem>>) attributes {dimension_semantics = [#tpu.dimension_semantics<parallel>], iteration_bounds = array<i64: 1>, scalar_prefetch = 0 : i64, scratch_operands = 0 : i64, tpu.core_type = #tpu.core_type<tc>, window_params = [{transform_indices = @transform_0, window_bounds = array<i64: 16, 32>}, {transform_indices = @transform_1, window_bounds = array<i64: 16, 32>}, {pipeline_mode = #tpu.pipeline_mode<synchronous>, transform_indices = @transform_2, window_bounds = array<i64: 1, 32>}, {pipeline_mode = #tpu.pipeline_mode<synchronous>, transform_indices = @transform_3, window_bounds = array<i64: 1, 32>}, {transform_indices = @transform_4, window_bounds = array<i64: 16, 32>}]} {
    %c0 = arith.constant 0 : index
    %c0_0 = arith.constant 0 : index
    %0 = vector.load %arg1[%c0, %c0_0] : memref<16x32xf32, #tpu.memory_space<vmem>>, vector<16x32xf32>
    %c0_1 = arith.constant 0 : index
    %c0_2 = arith.constant 0 : index
    %1 = vector.load %arg2[%c0_1, %c0_2] : memref<16x32xf32, #tpu.memory_space<vmem>>, vector<16x32xf32>
    %2 = arith.addf %0, %1 : vector<16x32xf32>
    %cst = arith.constant dense<0.000000e+00> : vector<16xf32>
    %3 = vector.multi_reduction <add>, %2, %cst [1] : vector<16x32xf32> to vector<16xf32>
    %4 = vector.shape_cast %3 : vector<16xf32> to vector<16x1xf32>
    %cst_3 = arith.constant 3.200000e+01 : f32
    %5 = vector.broadcast %cst_3 : f32 to vector<16x1xf32>
    %6 = arith.divf %4, %5 : vector<16x1xf32>
    %7 = vector.broadcast %6 : vector<16x1xf32> to vector<16x32xf32>
    %8 = arith.subf %2, %7 : vector<16x32xf32>
    %9 = arith.mulf %8, %8 : vector<16x32xf32>
    %cst_4 = arith.constant dense<0.000000e+00> : vector<16xf32>
    %10 = vector.multi_reduction <add>, %9, %cst_4 [1] : vector<16x32xf32> to vector<16xf32>
    %11 = vector.shape_cast %10 : vector<16xf32> to vector<16x1xf32>
    %cst_5 = arith.constant 3.200000e+01 : f32
    %12 = vector.broadcast %cst_5 : f32 to vector<16x1xf32>
    %13 = arith.divf %11, %12 : vector<16x1xf32>
    %cst_6 = arith.constant 9.99999974E-6 : f32
    %14 = vector.broadcast %cst_6 : f32 to vector<16x1xf32>
    %15 = arith.addf %13, %14 : vector<16x1xf32>
    %16 = math.rsqrt %15 : vector<16x1xf32>
    %17 = vector.broadcast %16 : vector<16x1xf32> to vector<16x32xf32>
    %18 = arith.mulf %8, %17 : vector<16x32xf32>
    %c0_7 = arith.constant 0 : index
    %c0_8 = arith.constant 0 : index
    %19 = vector.load %arg3[%c0_7, %c0_8] : memref<1x32xf32, #tpu.memory_space<vmem>>, vector<1x32xf32>
    %20 = vector.broadcast %19 : vector<1x32xf32> to vector<16x32xf32>
    %21 = arith.mulf %18, %20 : vector<16x32xf32>
    %c0_9 = arith.constant 0 : index
    %c0_10 = arith.constant 0 : index
    %22 = vector.load %arg4[%c0_9, %c0_10] : memref<1x32xf32, #tpu.memory_space<vmem>>, vector<1x32xf32>
    %23 = vector.broadcast %22 : vector<1x32xf32> to vector<16x32xf32>
    %24 = arith.addf %21, %23 : vector<16x32xf32>
    %c0_11 = arith.constant 0 : index
    %c0_12 = arith.constant 0 : index
    %25 = vector.load %arg5[%c0_11, %c0_12] : memref<16x32xf32, #tpu.memory_space<vmem>>, vector<16x32xf32>
    tpu.vector_store %arg5[%c0_11, %c0_12], %24 {strides = array<i32>} : memref<16x32xf32, #tpu.memory_space<vmem>>, vector<16x32xf32>,
    return
  }
  func.func @transform_0(%arg0: i32) -> (i32, i32) {
    %c0_i32 = arith.constant 0 : i32
    %c0_i32_0 = arith.constant 0 : i32
    return %arg0, %c0_i32 : i32, i32
  }
  func.func @transform_1(%arg0: i32) -> (i32, i32) {
    %c0_i32 = arith.constant 0 : i32
    %c0_i32_0 = arith.constant 0 : i32
    return %arg0, %c0_i32 : i32, i32
  }
  func.func @transform_2(%arg0: i32) -> (i32, i32) {
    %c0_i32 = arith.constant 0 : i32
    %c0_i32_0 = arith.constant 0 : i32
    %c0_i32_1 = arith.constant 0 : i32
    return %c0_i32, %c0_i32_0 : i32, i32
  }
  func.func @transform_3(%arg0: i32) -> (i32, i32) {
    %c0_i32 = arith.constant 0 : i32
    %c0_i32_0 = arith.constant 0 : i32
    %c0_i32_1 = arith.constant 0 : i32
    return %c0_i32, %c0_i32_0 : i32, i32
  }
  func.func @transform_4(%arg0: i32) -> (i32, i32) {
    %c0_i32 = arith.constant 0 : i32
    %c0_i32_0 = arith.constant 0 : i32
    return %arg0, %c0_i32 : i32, i32
  }
}

module attributes {stable_mosaic.version = 11 : i64} {
  func.func @kernel(%arg0: i32, %arg1: memref<16x64xf32, #tpu.memory_space<vmem>>, %arg2: memref<64x32xf32, #tpu.memory_space<vmem>>, %arg3: memref<1x32xf32, #tpu.memory_space<vmem>>, %arg4: memref<16x32xf32, #tpu.memory_space<vmem>>) attributes {dimension_semantics = [#tpu.dimension_semantics<parallel>], iteration_bounds = array<i64: 1>, scalar_prefetch = 0 : i64, scratch_operands = 0 : i64, tpu.core_type = #tpu.core_type<tc>, window_params = [{transform_indices = @transform_0, window_bounds = array<i64: 16, 64>}, {pipeline_mode = #tpu.pipeline_mode<synchronous>, transform_indices = @transform_1, window_bounds = array<i64: 64, 32>}, {pipeline_mode = #tpu.pipeline_mode<synchronous>, transform_indices = @transform_2, window_bounds = array<i64: 1, 32>}, {transform_indices = @transform_3, window_bounds = array<i64: 16, 32>}]} {
    %c0 = arith.constant 0 : index
    %c0_0 = arith.constant 0 : index
    %0 = vector.load %arg1[%c0, %c0_0] : memref<16x64xf32, #tpu.memory_space<vmem>>, vector<16x64xf32>
    %c0_1 = arith.constant 0 : index
    %c0_2 = arith.constant 0 : index
    %1 = vector.load %arg2[%c0_1, %c0_2] : memref<64x32xf32, #tpu.memory_space<vmem>>, vector<64x32xf32>
    %cst = arith.constant dense<0.000000e+00> : vector<16x32xf32>
    %2 = tpu.matmul %0, %1, %cst {dimension_numbers = #tpu.dot_dimension_numbers<[1], [0], [0], [1], [0, 0, 1, 1], [], []>} : vector<16x64xf32>, vector<64x32xf32>, vector<16x32xf32> -> vector<16x32xf32>
    %c0_3 = arith.constant 0 : index
    %c0_4 = arith.constant 0 : index
    %3 = vector.load %arg3[%c0_3, %c0_4] : memref<1x32xf32, #tpu.memory_space<vmem>>, vector<1x32xf32>
    %4 = vector.broadcast %3 : vector<1x32xf32> to vector<16x32xf32>
    %5 = arith.addf %2, %4 : vector<16x32xf32>
    %c0_5 = arith.constant 0 : index
    %c0_6 = arith.constant 0 : index
    %6 = vector.load %arg4[%c0_5, %c0_6] : memref<16x32xf32, #tpu.memory_space<vmem>>, vector<16x32xf32>
    tpu.vector_store %arg4[%c0_5, %c0_6], %5 {strides = array<i32>} : memref<16x32xf32, #tpu.memory_space<vmem>>, vector<16x32xf32>,
    return
  }
  func.func @transform_0(%arg0: i32) -> (i32, i32) {
    %c0_i32 = arith.constant 0 : i32
    %c0_i32_0 = arith.constant 0 : i32
    return %arg0, %c0_i32 : i32, i32
  }
  func.func @transform_1(%arg0: i32) -> (i32, i32) {
    %c0_i32 = arith.constant 0 : i32
    %c0_i32_0 = arith.constant 0 : i32
    %c0_i32_1 = arith.constant 0 : i32
    return %c0_i32, %c0_i32_0 : i32, i32
  }
  func.func @transform_2(%arg0: i32) -> (i32, i32) {
    %c0_i32 = arith.constant 0 : i32
    %c0_i32_0 = arith.constant 0 : i32
    %c0_i32_1 = arith.constant 0 : i32
    return %c0_i32, %c0_i32_0 : i32, i32
  }
  func.func @transform_3(%arg0: i32) -> (i32, i32) {
    %c0_i32 = arith.constant 0 : i32
    %c0_i32_0 = arith.constant 0 : i32
    return %arg0, %c0_i32 : i32, i32
  }
}

module attributes {stable_mosaic.version = 11 : i64} {
  func.func @kernel(%arg0: i32, %arg1: memref<32x32xf32, #tpu.memory_space<vmem>>, %arg2: memref<32x32xf32, #tpu.memory_space<vmem>>, %arg3: memref<32x32xf32, #tpu.memory_space<vmem>>, %arg4: memref<1x32xf32, #tpu.memory_space<vmem>>, %arg5: memref<32x32xf32, #tpu.memory_space<vmem>>) attributes {dimension_semantics = [#tpu.dimension_semantics<parallel>], iteration_bounds = array<i64: 1>, scalar_prefetch = 0 : i64, scratch_operands = 0 : i64, tpu.core_type = #tpu.core_type<tc>, window_params = [{transform_indices = @transform_0, window_bounds = array<i64: 32, 32>}, {transform_indices = @transform_1, window_bounds = array<i64: 32, 32>}, {pipeline_mode = #tpu.pipeline_mode<synchronous>, transform_indices = @transform_2, window_bounds = array<i64: 32, 32>}, {pipeline_mode = #tpu.pipeline_mode<synchronous>, transform_indices = @transform_3, window_bounds = array<i64: 1, 32>}, {transform_indices = @transform_4, window_bounds = array<i64: 32, 32>}]} {
    %c0 = arith.constant 0 : index
    %c0_0 = arith.constant 0 : index
    %0 = vector.load %arg1[%c0, %c0_0] : memref<32x32xf32, #tpu.memory_space<vmem>>, vector<32x32xf32>
    %c0_1 = arith.constant 0 : index
    %c0_2 = arith.constant 0 : index
    %1 = vector.load %arg2[%c0_1, %c0_2] : memref<32x32xf32, #tpu.memory_space<vmem>>, vector<32x32xf32>
    %2 = arith.addf %0, %1 : vector<32x32xf32>
    %c0_3 = arith.constant 0 : index
    %c0_4 = arith.constant 0 : index
    %3 = vector.load %arg3[%c0_3, %c0_4] : memref<32x32xf32, #tpu.memory_space<vmem>>, vector<32x32xf32>
    %cst = arith.constant dense<0.000000e+00> : vector<32x32xf32>
    %4 = tpu.matmul %2, %3, %cst {dimension_numbers = #tpu.dot_dimension_numbers<[1], [0], [0], [1], [0, 0, 1, 1], [], []>} : vector<32x32xf32>, vector<32x32xf32>, vector<32x32xf32> -> vector<32x32xf32>
    %c0_5 = arith.constant 0 : index
    %c0_6 = arith.constant 0 : index
    %5 = vector.load %arg4[%c0_5, %c0_6] : memref<1x32xf32, #tpu.memory_space<vmem>>, vector<1x32xf32>
    %6 = vector.broadcast %5 : vector<1x32xf32> to vector<32x32xf32>
    %7 = arith.addf %4, %6 : vector<32x32xf32>
    %c0_7 = arith.constant 0 : index
    %c0_8 = arith.constant 0 : index
    %8 = vector.load %arg5[%c0_7, %c0_8] : memref<32x32xf32, #tpu.memory_space<vmem>>, vector<32x32xf32>
    tpu.vector_store %arg5[%c0_7, %c0_8], %7 {strides = array<i32>} : memref<32x32xf32, #tpu.memory_space<vmem>>, vector<32x32xf32>,
    return
  }
  func.func @transform_0(%arg0: i32) -> (i32, i32) {
    %c0_i32 = arith.constant 0 : i32
    %c0_i32_0 = arith.constant 0 : i32
    return %arg0, %c0_i32 : i32, i32
  }
  func.func @transform_1(%arg0: i32) -> (i32, i32) {
    %c0_i32 = arith.constant 0 : i32
    %c0_i32_0 = arith.constant 0 : i32
    return %arg0, %c0_i32 : i32, i32
  }
  func.func @transform_2(%arg0: i32) -> (i32, i32) {
    %c0_i32 = arith.constant 0 : i32
    %c0_i32_0 = arith.constant 0 : i32
    %c0_i32_1 = arith.constant 0 : i32
    return %c0_i32, %c0_i32_0 : i32, i32
  }
  func.func @transform_3(%arg0: i32) -> (i32, i32) {
    %c0_i32 = arith.constant 0 : i32
    %c0_i32_0 = arith.constant 0 : i32
    %c0_i32_1 = arith.constant 0 : i32
    return %c0_i32, %c0_i32_0 : i32, i32
  }
  func.func @transform_4(%arg0: i32) -> (i32, i32) {
    %c0_i32 = arith.constant 0 : i32
    %c0_i32_0 = arith.constant 0 : i32
    return %arg0, %c0_i32 : i32, i32
  }
}

module attributes {stable_mosaic.version = 11 : i64} {
  func.func @kernel(%arg0: i32, %arg1: memref<32x32xf32, #tpu.memory_space<vmem>>, %arg2: memref<32x32xf32, #tpu.memory_space<vmem>>, %arg3: memref<1x32xf32, #tpu.memory_space<vmem>>, %arg4: memref<32x32xf32, #tpu.memory_space<vmem>>) attributes {dimension_semantics = [#tpu.dimension_semantics<parallel>], iteration_bounds = array<i64: 1>, scalar_prefetch = 0 : i64, scratch_operands = 0 : i64, tpu.core_type = #tpu.core_type<tc>, window_params = [{transform_indices = @transform_0, window_bounds = array<i64: 32, 32>}, {pipeline_mode = #tpu.pipeline_mode<synchronous>, transform_indices = @transform_1, window_bounds = array<i64: 32, 32>}, {pipeline_mode = #tpu.pipeline_mode<synchronous>, transform_indices = @transform_2, window_bounds = array<i64: 1, 32>}, {transform_indices = @transform_3, window_bounds = array<i64: 32, 32>}]} {
    %c0 = arith.constant 0 : index
    %c0_0 = arith.constant 0 : index
    %0 = vector.load %arg1[%c0, %c0_0] : memref<32x32xf32, #tpu.memory_space<vmem>>, vector<32x32xf32>
    %c0_1 = arith.constant 0 : index
    %c0_2 = arith.constant 0 : index
    %1 = vector.load %arg2[%c0_1, %c0_2] : memref<32x32xf32, #tpu.memory_space<vmem>>, vector<32x32xf32>
    %cst = arith.constant dense<0.000000e+00> : vector<32x32xf32>
    %2 = tpu.matmul %0, %1, %cst {dimension_numbers = #tpu.dot_dimension_numbers<[1], [0], [0], [1], [0, 0, 1, 1], [], []>} : vector<32x32xf32>, vector<32x32xf32>, vector<32x32xf32> -> vector<32x32xf32>
    %c0_3 = arith.constant 0 : index
    %c0_4 = arith.constant 0 : index
    %3 = vector.load %arg3[%c0_3, %c0_4] : memref<1x32xf32, #tpu.memory_space<vmem>>, vector<1x32xf32>
    %4 = vector.broadcast %3 : vector<1x32xf32> to vector<32x32xf32>
    %5 = arith.addf %2, %4 : vector<32x32xf32>
    %c0_5 = arith.constant 0 : index
    %c0_6 = arith.constant 0 : index
    %6 = vector.load %arg4[%c0_5, %c0_6] : memref<32x32xf32, #tpu.memory_space<vmem>>, vector<32x32xf32>
    tpu.vector_store %arg4[%c0_5, %c0_6], %5 {strides = array<i32>} : memref<32x32xf32, #tpu.memory_space<vmem>>, vector<32x32xf32>,
    return
  }
  func.func @transform_0(%arg0: i32) -> (i32, i32) {
    %c0_i32 = arith.constant 0 : i32
    %c0_i32_0 = arith.constant 0 : i32
    return %arg0, %c0_i32 : i32, i32
  }
  func.func @transform_1(%arg0: i32) -> (i32, i32) {
    %c0_i32 = arith.constant 0 : i32
    %c0_i32_0 = arith.constant 0 : i32
    %c0_i32_1 = arith.constant 0 : i32
    return %c0_i32, %c0_i32_0 : i32, i32
  }
  func.func @transform_2(%arg0: i32) -> (i32, i32) {
    %c0_i32 = arith.constant 0 : i32
    %c0_i32_0 = arith.constant 0 : i32
    %c0_i32_1 = arith.constant 0 : i32
    return %c0_i32, %c0_i32_0 : i32, i32
  }
  func.func @transform_3(%arg0: i32) -> (i32, i32) {
    %c0_i32 = arith.constant 0 : i32
    %c0_i32_0 = arith.constant 0 : i32
    return %arg0, %c0_i32 : i32, i32
  }
}

module attributes {stable_mosaic.version = 11 : i64} {
  func.func @kernel(%arg0: i32, %arg1: memref<16x32xf32, #tpu.memory_space<vmem>>, %arg2: memref<1x32xf32, #tpu.memory_space<vmem>>, %arg3: memref<1x32xf32, #tpu.memory_space<vmem>>, %arg4: memref<16x32xf32, #tpu.memory_space<vmem>>) attributes {dimension_semantics = [#tpu.dimension_semantics<parallel>], iteration_bounds = array<i64: 1>, scalar_prefetch = 0 : i64, scratch_operands = 0 : i64, tpu.core_type = #tpu.core_type<tc>, window_params = [{transform_indices = @transform_0, window_bounds = array<i64: 16, 32>}, {pipeline_mode = #tpu.pipeline_mode<synchronous>, transform_indices = @transform_1, window_bounds = array<i64: 1, 32>}, {pipeline_mode = #tpu.pipeline_mode<synchronous>, transform_indices = @transform_2, window_bounds = array<i64: 1, 32>}, {transform_indices = @transform_3, window_bounds = array<i64: 16, 32>}]} {
    %c0 = arith.constant 0 : index
    %c0_0 = arith.constant 0 : index
    %0 = vector.load %arg1[%c0, %c0_0] : memref<16x32xf32, #tpu.memory_space<vmem>>, vector<16x32xf32>
    %cst = arith.constant dense<0.000000e+00> : vector<16xf32>
    %1 = vector.multi_reduction <add>, %0, %cst [1] : vector<16x32xf32> to vector<16xf32>
    %2 = vector.shape_cast %1 : vector<16xf32> to vector<16x1xf32>
    %cst_1 = arith.constant 3.200000e+01 : f32
    %3 = vector.broadcast %cst_1 : f32 to vector<16x1xf32>
    %4 = arith.divf %2, %3 : vector<16x1xf32>
    %5 = vector.broadcast %4 : vector<16x1xf32> to vector<16x32xf32>
    %6 = arith.subf %0, %5 : vector<16x32xf32>
    %7 = arith.mulf %6, %6 : vector<16x32xf32>
    %cst_2 = arith.constant dense<0.000000e+00> : vector<16xf32>
    %8 = vector.multi_reduction <add>, %7, %cst_2 [1] : vector<16x32xf32> to vector<16xf32>
    %9 = vector.shape_cast %8 : vector<16xf32> to vector<16x1xf32>
    %cst_3 = arith.constant 3.200000e+01 : f32
    %10 = vector.broadcast %cst_3 : f32 to vector<16x1xf32>
    %11 = arith.divf %9, %10 : vector<16x1xf32>
    %cst_4 = arith.constant 9.99999974E-6 : f32
    %12 = vector.broadcast %cst_4 : f32 to vector<16x1xf32>
    %13 = arith.addf %11, %12 : vector<16x1xf32>
    %14 = math.rsqrt %13 : vector<16x1xf32>
    %15 = vector.broadcast %14 : vector<16x1xf32> to vector<16x32xf32>
    %16 = arith.mulf %6, %15 : vector<16x32xf32>
    %c0_5 = arith.constant 0 : index
    %c0_6 = arith.constant 0 : index
    %17 = vector.load %arg2[%c0_5, %c0_6] : memref<1x32xf32, #tpu.memory_space<vmem>>, vector<1x32xf32>
    %18 = vector.broadcast %17 : vector<1x32xf32> to vector<16x32xf32>
    %19 = arith.mulf %16, %18 : vector<16x32xf32>
    %c0_7 = arith.constant 0 : index
    %c0_8 = arith.constant 0 : index
    %20 = vector.load %arg3[%c0_7, %c0_8] : memref<1x32xf32, #tpu.memory_space<vmem>>, vector<1x32xf32>
    %21 = vector.broadcast %20 : vector<1x32xf32> to vector<16x32xf32>
    %22 = arith.addf %19, %21 : vector<16x32xf32>
    %c0_9 = arith.constant 0 : index
    %c0_10 = arith.constant 0 : index
    %23 = vector.load %arg4[%c0_9, %c0_10] : memref<16x32xf32, #tpu.memory_space<vmem>>, vector<16x32xf32>
    tpu.vector_store %arg4[%c0_9, %c0_10], %22 {strides = array<i32>} : memref<16x32xf32, #tpu.memory_space<vmem>>, vector<16x32xf32>,
    return
  }
  func.func @transform_0(%arg0: i32) -> (i32, i32) {
    %c0_i32 = arith.constant 0 : i32
    %c0_i32_0 = arith.constant 0 : i32
    return %arg0, %c0_i32 : i32, i32
  }
  func.func @transform_1(%arg0: i32) -> (i32, i32) {
    %c0_i32 = arith.constant 0 : i32
    %c0_i32_0 = arith.constant 0 : i32
    %c0_i32_1 = arith.constant 0 : i32
    return %c0_i32, %c0_i32_0 : i32, i32
  }
  func.func @transform_2(%arg0: i32) -> (i32, i32) {
    %c0_i32 = arith.constant 0 : i32
    %c0_i32_0 = arith.constant 0 : i32
    %c0_i32_1 = arith.constant 0 : i32
    return %c0_i32, %c0_i32_0 : i32, i32
  }
  func.func @transform_3(%arg0: i32) -> (i32, i32) {
    %c0_i32 = arith.constant 0 : i32
    %c0_i32_0 = arith.constant 0 : i32
    return %arg0, %c0_i32 : i32, i32
  }
}

</mosaic_0001>

<bundles_post_ra>
// kernel: transformer_forward.45
= control target key start
LH: loop header
LB: loop body
LE: loop exit
PB: predicated region body
PF: predicated region fallthrough
CT: control target
= control target key end

     0   :  { %8 = vsyncpa [#allocation3], 0  ;;  %s236_s0 = inlined_call_operand.hbm [shape: f32[32,32], index: 0, kind: input, shape index: {}]   ;;  %s237_s1 = inlined_call_operand.hbm [shape: f32[32,32], index: 1, kind: input, shape index: {}]   ;;  %s238_s2 = inlined_call_operand.vmem [shape: f32[1,32], index: 2, kind: input, shape index: {}]   ;;  %s239_s3 = inlined_call_operand.vmem [shape: f32[32,32], index: 3, kind: output, shape index: {}]  }
   0x1   :  { %s14_s14 = sshll.u32 %s236_s0, 4  ;;  %s15_s14 = int_to_ptr.hbm [resolvable:$true] %s14_s14 }
   0x2   :  { %9 = vsyncpa [#allocation5], 0  ;;  %s183_s15 = smov [#allocation2]   ;;  %s27_s19 = sshll.u32 %s237_s1, 4  ;;  %s28_s19 = int_to_ptr.hbm [resolvable:$true] %s27_s19 }
   0x3   :  { %s16_s16 = sshll.u32 %s183_s15, 4  ;;  %s184_s20 = smov 128   ;;  %s17_s16 = int_to_ptr.vmem [resolvable:$true] %s16_s16 }
   0x4   :  { %s185_s21 = smov 8   ;;  %s186_s22 = smov [#allocation4]  }
   0x5   :  { %22 = dma.hbm_to_vmem [thread:$0]  %s15_s14, 512, %s17_s16, [#allocation3], %s184_s20, %s184_s20, %s185_s21  }
   0x6   :  { %s29_s23 = sshll.u32 %s186_s22, 4  ;;  %s30_s23 = int_to_ptr.vmem [resolvable:$true] %s29_s23 }
   0x7   :  { %35 = dma.hbm_to_vmem [thread:$0]  %s28_s19, 512, %s30_s23, [#allocation5], %s184_s20, %s184_s20, %s185_s21  }
   0x8   :  { %179 = dma.done.wait [#allocation3], 512  }
   0x9   :  { %180 = vsyncadd [#allocation3], 4294966784 }
   0xa   :  { %181 = dma.done.wait [#allocation5], 512  }
   0xb   :  { %182 = vsyncadd [#allocation5], 4294966784  ;;  %v53_v0 = vld [vmem:[#allocation4 + $0x18] sm:$0xff]  ;;  %v52_v1 = vld [vmem:[#allocation4 + $0x10] sm:$0xff]  ;;  %vm58_vm0 = vcmask 261120  }
   0xc   :  { %115 = vmatpush.msra.mxu2 %v53_v0  ;;  %116 = vmatpush.msra.mxu3 %v53_v0  ;;  %v51_v2 = vld [vmem:[#allocation4 + $0x8] sm:$0xff]  ;;  %v50_v3 = vld [vmem:[#allocation4] sm:$0xff]  ;;  %v48_v4 = vld [vmem:[#allocation2 + $0x10] sm:$0xff] }
   0xd   :  { %83 = vmatpush.msra.mxu0 %v53_v0  ;;  %114 = vmatpush.msra.mxu1 %v53_v0  ;;  %v49_v5 = vld [vmem:[#allocation2 + $0x18] sm:$0xff]  ;;  %v46_v6 = vld [vmem:[#allocation2] sm:$0xff]  ;;  %v47_v7 = vld [vmem:[#allocation2 + $0x8] sm:$0xff] }
   0xe   :  { %118 = vmatpush.msra.mxu2 %v52_v1  ;;  %119 = vmatpush.msra.mxu3 %v52_v1  ;;  %v130_v8 = vld [vmem:[%s238_s2] ss:$0 sm:$0xff] }
   0xf   :  { %84 = vmatpush.msra.mxu0 %v52_v1  ;;  %117 = vmatpush.msra.mxu1 %v52_v1 }
  0x10   :  { %121 = vmatpush.msra.mxu2 %v51_v2  ;;  %122 = vmatpush.msra.mxu3 %v51_v2 }
  0x11   :  { %85 = vmatpush.msra.mxu0 %v51_v2  ;;  %120 = vmatpush.msra.mxu1 %v51_v2 }
  0x12   :  { %124 = vmatpush.msra.mxu2 %v50_v3  ;;  %125 = vmatpush.msra.mxu3 %v50_v3 }
  0x13   :  { %112 = vmatmul.msk.f32.vlgmr.msra.gmra.mxu2 %vm58_vm0, %v48_v4  ;;  %113 = vmatmul.msk.f32.vlgmr.msra.gmra.mxu3 %vm58_vm0, %v49_v5 }
  0x14   :  { %86 = vmatpush.msra.mxu0 %v50_v3  ;;  %123 = vmatpush.msra.mxu1 %v50_v3 }
  0x15   :  { %110 = vmatmul.msk.f32.vlgmr.msra.gmra.mxu0 %vm58_vm0, %v46_v6  ;;  %111 = vmatmul.msk.f32.vlgmr.msra.gmra.mxu1 %vm58_vm0, %v47_v7 }
  0x92   :  { %v88_v9 = vpop.f32.mrf.mxu0  ;;  %v91_v10 = vpop.f32.mrf.mxu1 }
  0x93   :  { %v89_v11 = vadd.f32 %v130_v8, %v88_v9  ;;  %v92_v12 = vadd.f32 %v130_v8, %v91_v10 }
  0x95   :  { %100 = vst.msk [vmem:[%s239_s3] sm:$0xff] %vm58_vm0, %v89_v11 }
  0x96   :  { %101 = vst.msk [vmem:[%s239_s3 + $0x8] sm:$0xff] %vm58_vm0, %v92_v12  ;;  %v94_v13 = vpop.f32.mrf.mxu2  ;;  %v97_v14 = vpop.f32.mrf.mxu3 }
  0x97   :  { %v95_v15 = vadd.f32 %v130_v8, %v94_v13  ;;  %v98_v16 = vadd.f32 %v130_v8, %v97_v14 }
  0x99   :  { %102 = vst.msk [vmem:[%s239_s3 + $0x10] sm:$0xff] %vm58_vm0, %v95_v15 }
  0x9a   :  { %103 = vst.msk [vmem:[%s239_s3 + $0x18] sm:$0xff] %vm58_vm0, %v98_v16 }
  0x9b   :  { %108 = vsyncpa [#allocation3], 1 }
  0x9c   :  { %109 = vsyncpa [#allocation5], 1 }

// kernel: transformer_forward.43
= control target key start
LH: loop header
LB: loop body
LE: loop exit
PB: predicated region body
PF: predicated region fallthrough
CT: control target
= control target key end

     0   :  { %9 = vsyncpa [#allocation3], 0  ;;  %s264_s0 = inlined_call_operand.hbm [shape: f32[32,32], index: 0, kind: input, shape index: {}]   ;;  %s265_s1 = inlined_call_operand.hbm [shape: f32[32,32], index: 1, kind: input, shape index: {}]   ;;  %s266_s2 = inlined_call_operand.vmem [shape: f32[32,32], index: 2, kind: input, shape index: {}]   ;;  %s267_s3 = inlined_call_operand.vmem [shape: f32[1,32], index: 3, kind: input, shape index: {}]   ;;  %s268_s4 = inlined_call_operand.vmem [shape: f32[32,32], index: 4, kind: output, shape index: {}]  }
   0x1   :  { %s15_s17 = sshll.u32 %s264_s0, 4  ;;  %s16_s17 = int_to_ptr.hbm [resolvable:$true] %s15_s17 }
   0x2   :  { %10 = vsyncpa [#allocation5], 0  ;;  %s194_s18 = smov [#allocation2]   ;;  %s28_s22 = sshll.u32 %s265_s1, 4  ;;  %s29_s22 = int_to_ptr.hbm [resolvable:$true] %s28_s22 }
   0x3   :  { %s17_s19 = sshll.u32 %s194_s18, 4  ;;  %s195_s23 = smov 128   ;;  %s18_s19 = int_to_ptr.vmem [resolvable:$true] %s17_s19 }
   0x4   :  { %s196_s24 = smov 8   ;;  %s197_s25 = smov [#allocation4]  }
   0x5   :  { %23 = dma.hbm_to_vmem [thread:$0]  %s16_s17, 512, %s18_s19, [#allocation3], %s195_s23, %s195_s23, %s196_s24  }
   0x6   :  { %s30_s26 = sshll.u32 %s197_s25, 4  ;;  %s31_s26 = int_to_ptr.vmem [resolvable:$true] %s30_s26 }
   0x7   :  { %36 = dma.hbm_to_vmem [thread:$0]  %s29_s22, 512, %s31_s26, [#allocation5], %s195_s23, %s195_s23, %s196_s24  }
   0x8   :  { %190 = dma.done.wait [#allocation3], 512  }
   0x9   :  { %191 = vsyncadd [#allocation3], 4294966784 }
   0xa   :  { %192 = dma.done.wait [#allocation5], 512  }
   0xb   :  { %193 = vsyncadd [#allocation5], 4294966784  ;;  %v64_v0 = vld [vmem:[%s266_s2 + $0x18] sm:$0xff]  ;;  %v63_v1 = vld [vmem:[%s266_s2 + $0x10] sm:$0xff]  ;;  %vm69_vm0 = vcmask 261120  }
   0xc   :  { %126 = vmatpush.msra.mxu2 %v64_v0  ;;  %127 = vmatpush.msra.mxu3 %v64_v0  ;;  %v62_v2 = vld [vmem:[%s266_s2 + $0x8] sm:$0xff]  ;;  %v51_v3 = vld [vmem:[#allocation2 + $0x10] sm:$0xff]  ;;  %v52_v5 = vld [vmem:[#allocation2 + $0x18] sm:$0xff] }
   0xd   :  { %v55_v4 = vld [vmem:[#allocation4 + $0x10] sm:$0xff]  ;;  %94 = vmatpush.msra.mxu0 %v64_v0  ;;  %125 = vmatpush.msra.mxu1 %v64_v0  ;;  %v56_v6 = vld [vmem:[#allocation4 + $0x18] sm:$0xff]  ;;  %v49_v7 = vld [vmem:[#allocation2] sm:$0xff] }
   0xe   :  { %129 = vmatpush.msra.mxu2 %v63_v1  ;;  %130 = vmatpush.msra.mxu3 %v63_v1  ;;  %v53_v8 = vld [vmem:[#allocation4] sm:$0xff]  ;;  %v50_v9 = vld [vmem:[#allocation2 + $0x8] sm:$0xff]  ;;  %v59_v12 = vadd.f32 %v55_v4, %v51_v3  ;;  %v60_v13 = vadd.f32 %v56_v6, %v52_v5 }
   0xf   :  { %v54_v10 = vld [vmem:[#allocation4 + $0x8] sm:$0xff]  ;;  %v61_v11 = vld [vmem:[%s266_s2] sm:$0xff]  ;;  %95 = vmatpush.msra.mxu0 %v63_v1  ;;  %128 = vmatpush.msra.mxu1 %v63_v1  ;;  %v57_v14 = vadd.f32 %v53_v8, %v49_v7 }
  0x10   :  { %132 = vmatpush.msra.mxu2 %v62_v2  ;;  %133 = vmatpush.msra.mxu3 %v62_v2  ;;  %v58_v15 = vadd.f32 %v54_v10, %v50_v9  ;;  %v141_v16 = vld [vmem:[%s267_s3] ss:$0 sm:$0xff] }
  0x11   :  { %96 = vmatpush.msra.mxu0 %v62_v2  ;;  %131 = vmatpush.msra.mxu1 %v62_v2 }
  0x12   :  { %135 = vmatpush.msra.mxu2 %v61_v11  ;;  %136 = vmatpush.msra.mxu3 %v61_v11 }
  0x13   :  { %123 = vmatmul.msk.f32.vlgmr.msra.gmra.mxu2 %vm69_vm0, %v59_v12  ;;  %124 = vmatmul.msk.f32.vlgmr.msra.gmra.mxu3 %vm69_vm0, %v60_v13 }
  0x14   :  { %97 = vmatpush.msra.mxu0 %v61_v11  ;;  %134 = vmatpush.msra.mxu1 %v61_v11 }
  0x15   :  { %121 = vmatmul.msk.f32.vlgmr.msra.gmra.mxu0 %vm69_vm0, %v57_v14  ;;  %122 = vmatmul.msk.f32.vlgmr.msra.gmra.mxu1 %vm69_vm0, %v58_v15 }
  0x92   :  { %v99_v17 = vpop.f32.mrf.mxu0  ;;  %v102_v18 = vpop.f32.mrf.mxu1 }
  0x93   :  { %v100_v19 = vadd.f32 %v141_v16, %v99_v17  ;;  %v103_v20 = vadd.f32 %v141_v16, %v102_v18 }
  0x95   :  { %111 = vst.msk [vmem:[%s268_s4] sm:$0xff] %vm69_vm0, %v100_v19 }
  0x96   :  { %112 = vst.msk [vmem:[%s268_s4 + $0x8] sm:$0xff] %vm69_vm0, %v103_v20  ;;  %v105_v21 = vpop.f32.mrf.mxu2  ;;  %v108_v22 = vpop.f32.mrf.mxu3 }
  0x97   :  { %v106_v23 = vadd.f32 %v141_v16, %v105_v21  ;;  %v109_v24 = vadd.f32 %v141_v16, %v108_v22 }
  0x99   :  { %113 = vst.msk [vmem:[%s268_s4 + $0x10] sm:$0xff] %vm69_vm0, %v106_v23 }
  0x9a   :  { %114 = vst.msk [vmem:[%s268_s4 + $0x18] sm:$0xff] %vm69_vm0, %v109_v24 }
  0x9b   :  { %119 = vsyncpa [#allocation3], 1 }
  0x9c   :  { %120 = vsyncpa [#allocation5], 1 }

// kernel: transformer_forward.44
= control target key start
LH: loop header
LB: loop body
LE: loop exit
PB: predicated region body
PF: predicated region fallthrough
CT: control target
= control target key end

     0   :  { %9 = vsyncpa [#allocation3], 0  ;;  %s296_s0 = inlined_call_operand.hbm [shape: f32[32,32], index: 0, kind: input, shape index: {}]   ;;  %s297_s1 = inlined_call_operand.hbm [shape: f32[32,32], index: 1, kind: input, shape index: {}]   ;;  %s298_s2 = inlined_call_operand.hbm [shape: f32[32,32], index: 2, kind: input, shape index: {}]   ;;  %s299_s3 = inlined_call_operand.vmem [shape: f32[1,32], index: 3, kind: input, shape index: {}]   ;;  %s300_s4 = inlined_call_operand.vmem [shape: f32[32,32], index: 4, kind: output, shape index: {}]  }
   0x1   :  { %10 = vsyncpa [#allocation5], 0  ;;  %s28_s17 = sshll.u32 %s297_s1, 4  ;;  %s234_s18 = smov [#allocation4]   ;;  %s29_s17 = int_to_ptr.hbm [resolvable:$true] %s28_s17 }
   0x2   :  { %s30_s19 = sshll.u32 %s234_s18, 4  ;;  %s15_s22 = sshll.u32 %s296_s0, 4  ;;  %s31_s19 = int_to_ptr.vmem [resolvable:$true] %s30_s19  ;;  %s16_s22 = int_to_ptr.hbm [resolvable:$true] %s15_s22 }
   0x3   :  { %s235_s23 = smov 128   ;;  %s236_s24 = smov 8  }
   0x4   :  { %36 = dma.hbm_to_vmem [thread:$0]  %s29_s17, 512, %s31_s19, [#allocation5], %s235_s23, %s235_s23, %s236_s24  }
   0x5   :  { %s237_s25 = smov [#allocation2]   ;;  %s41_s29 = sshll.u32 %s298_s2, 4  ;;  %s42_s29 = int_to_ptr.hbm [resolvable:$true] %s41_s29 }
   0x6   :  { %s17_s26 = sshll.u32 %s237_s25, 4  ;;  %s238_s1 = smov [#allocation6]   ;;  %s18_s26 = int_to_ptr.vmem [resolvable:$true] %s17_s26 }
   0x7   :  { %23 = dma.hbm_to_vmem [thread:$0]  %s16_s22, 512, %s18_s26, [#allocation3], %s235_s23, %s235_s23, %s236_s24  }
   0x8   :  { %s43_s30 = sshll.u32 %s238_s1, 4  ;;  %s44_s30 = int_to_ptr.vmem [resolvable:$true] %s43_s30 }
   0x9   :  { %49 = dma.hbm_to_vmem [thread:$0]  %s42_s29, 512, %s44_s30, [#allocation5], %s235_s23, %s235_s23, %s236_s24  }
   0xa   :  { %230 = dma.done.wait [#allocation3], 512  }
   0xb   :  { %231 = vsyncadd [#allocation3], 4294966784 }
   0xc   :  { %232 = dma.done.wait [#allocation5], 1024  }
   0xd   :  { %233 = vsyncadd [#allocation5], 4294966272  ;;  %v79_v0 = vld [vmem:[#allocation6 + $0x18] sm:$0xff]  ;;  %v78_v1 = vld [vmem:[#allocation6 + $0x10] sm:$0xff]  ;;  %vm84_vm0 = vcmask 261120  }
   0xe   :  { %141 = vmatpush.msra.mxu2 %v79_v0  ;;  %142 = vmatpush.msra.mxu3 %v79_v0  ;;  %v77_v2 = vld [vmem:[#allocation6 + $0x8] sm:$0xff]  ;;  %v66_v3 = vld [vmem:[#allocation2 + $0x10] sm:$0xff]  ;;  %v67_v5 = vld [vmem:[#allocation2 + $0x18] sm:$0xff] }
   0xf   :  { %v70_v4 = vld [vmem:[#allocation4 + $0x10] sm:$0xff]  ;;  %109 = vmatpush.msra.mxu0 %v79_v0  ;;  %140 = vmatpush.msra.mxu1 %v79_v0  ;;  %v71_v6 = vld [vmem:[#allocation4 + $0x18] sm:$0xff]  ;;  %v64_v7 = vld [vmem:[#allocation2] sm:$0xff] }
  0x10   :  { %144 = vmatpush.msra.mxu2 %v78_v1  ;;  %145 = vmatpush.msra.mxu3 %v78_v1  ;;  %v68_v8 = vld [vmem:[#allocation4] sm:$0xff]  ;;  %v65_v9 = vld [vmem:[#allocation2 + $0x8] sm:$0xff]  ;;  %v74_v12 = vadd.f32 %v70_v4, %v66_v3  ;;  %v75_v13 = vadd.f32 %v71_v6, %v67_v5 }
  0x11   :  { %v69_v10 = vld [vmem:[#allocation4 + $0x8] sm:$0xff]  ;;  %v76_v11 = vld [vmem:[#allocation6] sm:$0xff]  ;;  %110 = vmatpush.msra.mxu0 %v78_v1  ;;  %143 = vmatpush.msra.mxu1 %v78_v1  ;;  %v72_v14 = vadd.f32 %v68_v8, %v64_v7 }
  0x12   :  { %147 = vmatpush.msra.mxu2 %v77_v2  ;;  %148 = vmatpush.msra.mxu3 %v77_v2  ;;  %v73_v15 = vadd.f32 %v69_v10, %v65_v9  ;;  %v157_v16 = vld [vmem:[%s299_s3] ss:$0 sm:$0xff] }
  0x13   :  { %111 = vmatpush.msra.mxu0 %v77_v2  ;;  %146 = vmatpush.msra.mxu1 %v77_v2 }
  0x14   :  { %150 = vmatpush.msra.mxu2 %v76_v11  ;;  %151 = vmatpush.msra.mxu3 %v76_v11 }
  0x15   :  { %138 = vmatmul.msk.f32.vlgmr.msra.gmra.mxu2 %vm84_vm0, %v74_v12  ;;  %139 = vmatmul.msk.f32.vlgmr.msra.gmra.mxu3 %vm84_vm0, %v75_v13 }
  0x16   :  { %112 = vmatpush.msra.mxu0 %v76_v11  ;;  %149 = vmatpush.msra.mxu1 %v76_v11 }
  0x17   :  { %136 = vmatmul.msk.f32.vlgmr.msra.gmra.mxu0 %vm84_vm0, %v72_v14  ;;  %137 = vmatmul.msk.f32.vlgmr.msra.gmra.mxu1 %vm84_vm0, %v73_v15 }
  0x94   :  { %v114_v17 = vpop.f32.mrf.mxu0  ;;  %v117_v18 = vpop.f32.mrf.mxu1 }
  0x95   :  { %v115_v19 = vadd.f32 %v157_v16, %v114_v17  ;;  %v118_v20 = vadd.f32 %v157_v16, %v117_v18 }
  0x97   :  { %126 = vst.msk [vmem:[%s300_s4] sm:$0xff] %vm84_vm0, %v115_v19 }
  0x98   :  { %127 = vst.msk [vmem:[%s300_s4 + $0x8] sm:$0xff] %vm84_vm0, %v118_v20  ;;  %v120_v21 = vpop.f32.mrf.mxu2  ;;  %v123_v22 = vpop.f32.mrf.mxu3 }
  0x99   :  { %v121_v23 = vadd.f32 %v157_v16, %v120_v21  ;;  %v124_v24 = vadd.f32 %v157_v16, %v123_v22 }
  0x9b   :  { %128 = vst.msk [vmem:[%s300_s4 + $0x10] sm:$0xff] %vm84_vm0, %v121_v23 }
  0x9c   :  { %129 = vst.msk [vmem:[%s300_s4 + $0x18] sm:$0xff] %vm84_vm0, %v124_v24 }
  0x9d   :  { %134 = vsyncpa [#allocation3], 1 }
  0x9e   :  { %135 = vsyncpa [#allocation5], 1 }

// kernel: transformer_forward.48
= control target key start
LH: loop header
LB: loop body
LE: loop exit
PB: predicated region body
PF: predicated region fallthrough
CT: control target
= control target key end

     0   :  { %8 = vsyncpa [#allocation3], 0  ;;  %s144_s15 = smov [#allocation2]   ;;  %s145_s17 = smov 128   ;;  %s197_s0 = inlined_call_operand.vmem [shape: f32[32,32], index: 0, kind: input, shape index: {}]   ;;  %s198_s1 = inlined_call_operand.hbm [shape: f32[32,64], index: 1, kind: input, shape index: {}]   ;;  %s199_s2 = inlined_call_operand.vmem [shape: f32[1,64], index: 2, kind: input, shape index: {}]   ;;  %s200_s3 = inlined_call_operand.vmem [shape: f32[32,64], index: 3, kind: output, shape index: {}]  }
   0x1   :  { %s15_s14 = sshll.u32 %s198_s1, 4  ;;  %s17_s16 = sshll.u32 %s144_s15, 4  ;;  %s16_s14 = int_to_ptr.hbm [resolvable:$true] %s15_s14  ;;  %s18_s16 = int_to_ptr.vmem [resolvable:$true] %s17_s16 }
   0x2   :  { %s146_s18 = smov 8  }
   0x3   :  { %23 = dma.hbm_to_vmem [thread:$0]  %s16_s14, 512, %s18_s16, [#allocation3], %s145_s17, %s145_s17, %s146_s18  }
   0x4   :  { %142 = dma.done.wait [#allocation3], 512  }
   0x5   :  { %143 = vsyncadd [#allocation3], 4294966784  ;;  %v37_v0 = vld [vmem:[#allocation2 + $0x18] sm:$0xff]  ;;  %v36_v1 = vld [vmem:[#allocation2 + $0x10] sm:$0xff]  ;;  %vm42_vm0 = vcmask 261120   ;;  %vm88_vm1 = vcmask 523264  }
   0x6   :  { %103 = vmatpush.msra.mxu2 %v37_v0  ;;  %104 = vmatpush.msra.mxu3 %v37_v0  ;;  %v35_v2 = vld [vmem:[#allocation2 + $0x8] sm:$0xff]  ;;  %v34_v3 = vld [vmem:[#allocation2] sm:$0xff]  ;;  %v32_v4 = vld [vmem:[%s197_s0 + $0x10] sm:$0xff] }
   0x7   :  { %67 = vmatpush.msra.mxu0 %v37_v0  ;;  %102 = vmatpush.msra.mxu1 %v37_v0  ;;  %v33_v5 = vld [vmem:[%s197_s0 + $0x18] sm:$0xff]  ;;  %v30_v6 = vld [vmem:[%s197_s0] sm:$0xff]  ;;  %v31_v7 = vld [vmem:[%s197_s0 + $0x8] sm:$0xff] }
   0x8   :  { %106 = vmatpush.msra.mxu2 %v36_v1  ;;  %107 = vmatpush.msra.mxu3 %v36_v1  ;;  %v117_v8 = vld [vmem:[%s199_s2] ss:$0 sm:$0xff] }
   0x9   :  { %68 = vmatpush.msra.mxu0 %v36_v1  ;;  %105 = vmatpush.msra.mxu1 %v36_v1 }
   0xa   :  { %109 = vmatpush.msra.mxu2 %v35_v2  ;;  %110 = vmatpush.msra.mxu3 %v35_v2 }
   0xb   :  { %69 = vmatpush.msra.mxu0 %v35_v2  ;;  %108 = vmatpush.msra.mxu1 %v35_v2 }
   0xc   :  { %112 = vmatpush.msra.mxu2 %v34_v3  ;;  %113 = vmatpush.msra.mxu3 %v34_v3 }
   0xd   :  { %100 = vmatmul.msk.f32.vlgmr.msra.gmra.mxu2 %vm42_vm0, %v32_v4  ;;  %101 = vmatmul.msk.f32.vlgmr.msra.gmra.mxu3 %vm42_vm0, %v33_v5 }
   0xe   :  { %70 = vmatpush.msra.mxu0 %v34_v3  ;;  %111 = vmatpush.msra.mxu1 %v34_v3 }
   0xf   :  { %98 = vmatmul.msk.f32.vlgmr.msra.gmra.mxu0 %vm42_vm0, %v30_v6  ;;  %99 = vmatmul.msk.f32.vlgmr.msra.gmra.mxu1 %vm42_vm0, %v31_v7 }
  0x8c   :  { %v72_v9 = vpop.f32.mrf.mxu0  ;;  %v75_v10 = vpop.f32.mrf.mxu1 }
  0x8d   :  { %v73_v11 = vadd.f32 %v117_v8, %v72_v9  ;;  %v76_v12 = vadd.f32 %v117_v8, %v75_v10 }
  0x8f   :  { %v84_v13 = vmax.f32 %v73_v11, 0.0  ;;  %v85_v14 = vmax.f32 %v76_v12, 0.0 }
  0x90   :  { %v78_v15 = vpop.f32.mrf.mxu2  ;;  %v81_v16 = vpop.f32.mrf.mxu3 }
  0x91   :  { %89 = vst.msk [vmem:[%s200_s3] sm:$0xff] %vm88_vm1, %v84_v13  ;;  %v79_v17 = vadd.f32 %v117_v8, %v78_v15  ;;  %v82_v18 = vadd.f32 %v117_v8, %v81_v16 }
  0x92   :  { %90 = vst.msk [vmem:[%s200_s3 + $0x8] sm:$0xff] %vm88_vm1, %v85_v14 }
  0x93   :  { %v86_v19 = vmax.f32 %v79_v17, 0.0  ;;  %v87_v20 = vmax.f32 %v82_v18, 0.0 }
  0x95   :  { %91 = vst.msk [vmem:[%s200_s3 + $0x10] sm:$0xff] %vm88_vm1, %v86_v19 }
  0x96   :  { %92 = vst.msk [vmem:[%s200_s3 + $0x18] sm:$0xff] %vm88_vm1, %v87_v20 }
  0x97   :  { %97 = vsyncpa [#allocation3], 1 }

// kernel: transformer_forward.49
= control target key start
LH: loop header
LB: loop body
LE: loop exit
PB: predicated region body
PF: predicated region fallthrough
CT: control target
= control target key end

     0   :  { %vm30_vm0 = vcmask 523264   ;;  %vm72_vm1 = vcmask 261120   ;;  %s181_s1 = inlined_call_operand.vmem [shape: f32[64,32], index: 1, kind: input, shape index: {}]   ;;  %s182_s2 = inlined_call_operand.vmem [shape: f32[1,32], index: 2, kind: input, shape index: {}]   ;;  %s183_s0 = inlined_call_operand.vmem [shape: f32[32,64], index: 0, kind: input, shape index: {}]   ;;  %s184_s3 = inlined_call_operand.vmem [shape: f32[32,32], index: 3, kind: output, shape index: {}]  }
   0x1   :  { %v25_v0 = vld [vmem:[%s181_s1 + $0x38] sm:$0xff]  ;;  %v24_v1 = vld [vmem:[%s181_s1 + $0x30] sm:$0xff]  ;;  %v23_v2 = vld [vmem:[%s181_s1 + $0x28] sm:$0xff] }
   0x2   :  { %86 = vmatpush.msra.mxu2 %v25_v0  ;;  %87 = vmatpush.msra.mxu3 %v25_v0  ;;  %v22_v3 = vld [vmem:[%s181_s1 + $0x20] sm:$0xff]  ;;  %v21_v4 = vld [vmem:[%s181_s1 + $0x18] sm:$0xff]  ;;  %v20_v5 = vld [vmem:[%s181_s1 + $0x10] sm:$0xff] }
   0x3   :  { %51 = vmatpush.msra.mxu0 %v25_v0  ;;  %85 = vmatpush.msra.mxu1 %v25_v0  ;;  %v19_v6 = vld [vmem:[%s181_s1 + $0x8] sm:$0xff]  ;;  %v18_v7 = vld [vmem:[%s181_s1] sm:$0xff]  ;;  %v16_v8 = vld [vmem:[%s183_s0 + $0x10] sm:$0xff] }
   0x4   :  { %89 = vmatpush.msra.mxu2 %v24_v1  ;;  %90 = vmatpush.msra.mxu3 %v24_v1  ;;  %v17_v9 = vld [vmem:[%s183_s0 + $0x18] sm:$0xff]  ;;  %v14_v10 = vld [vmem:[%s183_s0] sm:$0xff]  ;;  %v15_v11 = vld [vmem:[%s183_s0 + $0x8] sm:$0xff] }
   0x5   :  { %52 = vmatpush.msra.mxu0 %v24_v1  ;;  %88 = vmatpush.msra.mxu1 %v24_v1  ;;  %v109_v12 = vld [vmem:[%s182_s2] ss:$0 sm:$0xff] }
   0x6   :  { %92 = vmatpush.msra.mxu2 %v23_v2  ;;  %93 = vmatpush.msra.mxu3 %v23_v2 }
   0x7   :  { %53 = vmatpush.msra.mxu0 %v23_v2  ;;  %91 = vmatpush.msra.mxu1 %v23_v2 }
   0x8   :  { %95 = vmatpush.msra.mxu2 %v22_v3  ;;  %96 = vmatpush.msra.mxu3 %v22_v3 }
   0x9   :  { %54 = vmatpush.msra.mxu0 %v22_v3  ;;  %94 = vmatpush.msra.mxu1 %v22_v3 }
   0xa   :  { %98 = vmatpush.msra.mxu2 %v21_v4  ;;  %99 = vmatpush.msra.mxu3 %v21_v4 }
   0xb   :  { %55 = vmatpush.msra.mxu0 %v21_v4  ;;  %97 = vmatpush.msra.mxu1 %v21_v4 }
   0xc   :  { %101 = vmatpush.msra.mxu2 %v20_v5  ;;  %102 = vmatpush.msra.mxu3 %v20_v5 }
   0xd   :  { %56 = vmatpush.msra.mxu0 %v20_v5  ;;  %100 = vmatpush.msra.mxu1 %v20_v5 }
   0xe   :  { %104 = vmatpush.msra.mxu2 %v19_v6  ;;  %105 = vmatpush.msra.mxu3 %v19_v6 }
   0xf   :  { %57 = vmatpush.msra.mxu0 %v19_v6  ;;  %103 = vmatpush.msra.mxu1 %v19_v6 }
  0x10   :  { %107 = vmatpush.msra.mxu2 %v18_v7  ;;  %108 = vmatpush.msra.mxu3 %v18_v7 }
  0x11   :  { %83 = vmatmul.msk.f32.vlgmr.msra.gmra.mxu2 %vm30_vm0, %v16_v8  ;;  %84 = vmatmul.msk.f32.vlgmr.msra.gmra.mxu3 %vm30_vm0, %v17_v9 }
  0x12   :  { %58 = vmatpush.msra.mxu0 %v18_v7  ;;  %106 = vmatpush.msra.mxu1 %v18_v7 }
  0x13   :  { %81 = vmatmul.msk.f32.vlgmr.msra.gmra.mxu0 %vm30_vm0, %v14_v10  ;;  %82 = vmatmul.msk.f32.vlgmr.msra.gmra.mxu1 %vm30_vm0, %v15_v11 }
  0x90   :  { %v60_v13 = vpop.f32.mrf.mxu0  ;;  %v63_v14 = vpop.f32.mrf.mxu1 }
  0x91   :  { %v61_v15 = vadd.f32 %v109_v12, %v60_v13  ;;  %v64_v16 = vadd.f32 %v109_v12, %v63_v14 }
  0x93   :  { %73 = vst.msk [vmem:[%s184_s3] sm:$0xff] %vm72_vm1, %v61_v15 }
  0x94   :  { %74 = vst.msk [vmem:[%s184_s3 + $0x8] sm:$0xff] %vm72_vm1, %v64_v16  ;;  %v66_v17 = vpop.f32.mrf.mxu2  ;;  %v69_v18 = vpop.f32.mrf.mxu3 }
  0x95   :  { %v67_v19 = vadd.f32 %v109_v12, %v66_v17  ;;  %v70_v20 = vadd.f32 %v109_v12, %v69_v18 }
  0x97   :  { %75 = vst.msk [vmem:[%s184_s3 + $0x10] sm:$0xff] %vm72_vm1, %v67_v19 }
  0x98   :  { %76 = vst.msk [vmem:[%s184_s3 + $0x18] sm:$0xff] %vm72_vm1, %v70_v20 }

// kernel: transformer_forward.47
= control target key start
LH: loop header
LB: loop body
LE: loop exit
PB: predicated region body
PF: predicated region fallthrough
CT: control target
= control target key end

     0   :  { %9 = vsyncpa [#allocation3], 0  ;;  %s208_s18 = smov [#allocation2]   ;;  %s209_s20 = smov 128   ;;  %s302_s0 = inlined_call_operand.vmem [shape: f32[32,32], index: 0, kind: input, shape index: {}]   ;;  %s303_s1 = inlined_call_operand.hbm [shape: f32[32,32], index: 1, kind: input, shape index: {}]   ;;  %s304_s2 = inlined_call_operand.vmem [shape: f32[1,32], index: 2, kind: input, shape index: {}]   ;;  %s305_s3 = inlined_call_operand.vmem [shape: f32[1,32], index: 3, kind: input, shape index: {}]   ;;  %s306_s4 = inlined_call_operand.vmem [shape: f32[32,32], index: 4, kind: output, shape index: {}]  }
   0x1   :  { %s16_s17 = sshll.u32 %s303_s1, 4  ;;  %s18_s19 = sshll.u32 %s208_s18, 4  ;;  %s17_s17 = int_to_ptr.hbm [resolvable:$true] %s16_s17  ;;  %s19_s19 = int_to_ptr.vmem [resolvable:$true] %s18_s19 }
   0x2   :  { %s210_s21 = smov 8  }
   0x3   :  { %24 = dma.hbm_to_vmem [thread:$0]  %s17_s17, 512, %s19_s19, [#allocation3], %s209_s20, %s209_s20, %s210_s21  }
   0x4   :  { %206 = dma.done.wait [#allocation3], 512  }
   0x5   :  { %207 = vsyncadd [#allocation3], 4294966784  ;;  %v35_v0 = vld [vmem:[%s302_s0 + $0x10] sm:$0xff]  ;;  %vm45_vm0 = vcmask 261120   ;;  %v33_v2 = vld [vmem:[%s302_s0] sm:$0xff]  ;;  %v211_v16 = vmov 32.0  }
   0x6   :  { %v39_v1 = vld [vmem:[#allocation2 + $0x10] sm:$0xff]  ;;  %v37_v4 = vld [vmem:[#allocation2] sm:$0xff]  ;;  %v36_v6 = vld [vmem:[%s302_s0 + $0x18] sm:$0xff]  ;;  %172 = vrcp.f32 %v211_v16 }
   0x7   :  { %v43_v3 = vadd.f32 %v39_v1, %v35_v0  ;;  %v41_v5 = vadd.f32 %v37_v4, %v33_v2  ;;  %v40_v7 = vld [vmem:[#allocation2 + $0x18] sm:$0xff]  ;;  %v34_v9 = vld [vmem:[%s302_s0 + $0x8] sm:$0xff] }
   0x8   :  { %v38_v10 = vld [vmem:[#allocation2 + $0x8] sm:$0xff]  ;;  %v44_v12 = vadd.f32 %v40_v7, %v36_v6 }
   0x9   :  { %v52_v8 = vsel %vm45_vm0, %v43_v3, 0.0  ;;  %v46_v11 = vsel %vm45_vm0, %v41_v5, 0.0  ;;  %v42_v13 = vadd.f32 %v38_v10, %v34_v9  ;;  %v171_v10 = vld [vmem:[%s305_s3] ss:$0 sm:$0xff] }
   0xa   :  { %53 = vadd.xlane.f32.xlu1 %v52_v8  ;;  %47 = vadd.xlane.f32.xlu0 %v46_v11  ;;  %v55_v14 = vsel %vm45_vm0, %v44_v12, 0.0 }
   0xb   :  { %v49_v15 = vsel %vm45_vm0, %v42_v13, 0.0 }
   0xc   :  { %v173_v17 = vpop.eup %172 }
   0xd   :  { %v59_v18 = vmul.f32 32.0, %v173_v17  ;;  %vm63_vm1 = vweird.f32 %v173_v17 }
   0xf   :  { %v60_v19 = vsub.f32 1.0, %v59_v18 }
  0x11   :  { %v61_v20 = vmul.f32 %v173_v17, %v60_v19 }
  0x12   :  { %56 = vadd.xlane.f32.xlu1 %v55_v14  ;;  %50 = vadd.xlane.f32.xlu0 %v49_v15 }
  0x13   :  { %v62_v21 = vadd.f32 %v173_v17, %v61_v20 }
  0x15   :  { %v64_v22 = vsel %vm63_vm1, %v173_v17, %v62_v21 }
  0x7d   :  { %v54_v23 = vpop.xlane.xlu1 %53  ;;  %v48_v25 = vpop.xlane.xlu0 %47 }
  0x7e   :  { %v67_v24 = vmul.f32 %v64_v22, %v54_v23  ;;  %v65_v26 = vmul.f32 %v64_v22, %v48_v25 }
  0x80   :  { %v256_v27 = vsub.f32 %v43_v3, %v67_v24  ;;  %v258_v28 = vsub.f32 %v41_v5, %v65_v26  ;;  %v170_v5 = vld [vmem:[%s304_s2] ss:$0 sm:$0xff] }
  0x82   :  { %v75_v29 = vmul.f32 %v256_v27, %v256_v27  ;;  %v73_v30 = vmul.f32 %v258_v28, %v258_v28 }
  0x84   :  { %v83_v31 = vsel %vm45_vm0, %v75_v29, 0.0  ;;  %v77_v33 = vsel %vm45_vm0, %v73_v30, 0.0 }
  0x85   :  { %v57_v32 = vpop.xlane.xlu1 %56  ;;  %84 = vadd.xlane.f32.xlu0 %v83_v31  ;;  %78 = vadd.xlane.f32.xlu2 %v77_v33  ;;  %v51_v35 = vpop.xlane.xlu0 %50 }
  0x86   :  { %v68_v34 = vmul.f32 %v64_v22, %v57_v32  ;;  %v66_v36 = vmul.f32 %v64_v22, %v51_v35 }
  0x88   :  { %v266_v37 = vsub.f32 %v44_v12, %v68_v34  ;;  %v268_v38 = vsub.f32 %v42_v13, %v66_v36 }
  0x8a   :  { %v76_v39 = vmul.f32 %v266_v37, %v266_v37  ;;  %v74_v40 = vmul.f32 %v268_v38, %v268_v38 }
  0x8c   :  { %v86_v41 = vsel %vm45_vm0, %v76_v39, 0.0  ;;  %v80_v42 = vsel %vm45_vm0, %v74_v40, 0.0 }
  0x8d   :  { %87 = vadd.xlane.f32.xlu1 %v86_v41  ;;  %81 = vadd.xlane.f32.xlu2 %v80_v42 }
  0xf8   :  { %v85_v43 = vpop.xlane.xlu0 %84  ;;  %v79_v44 = vpop.xlane.xlu2 %78 }
  0xf9   :  { %v91_v45 = vmul.f32 %v85_v43, %v64_v22  ;;  %v89_v46 = vmul.f32 %v79_v44, %v64_v22 }
  0xfb   :  { %v95_v47 = vadd.f32 1e-05, %v91_v45  ;;  %v93_v48 = vadd.f32 1e-05, %v89_v46 }
  0xfd   :  { %174 = vrsqrt.f32 %v95_v47  ;;  %vm123_vm4 = vweird.f32 %v95_v47  ;;  %vm103_vm5 = vweird.f32 %v93_v48 }
  0xfe   :  { %176 = vrsqrt.f32 %v93_v48 }
 0x100   :  { %v88_v49 = vpop.xlane.xlu1 %87  ;;  %v82_v51 = vpop.xlane.xlu2 %81 }
 0x101   :  { %v92_v50 = vmul.f32 %v88_v49, %v64_v22  ;;  %v90_v52 = vmul.f32 %v82_v51, %v64_v22 }
 0x103   :  { %v175_v53 = vpop.eup %174  ;;  %v96_v54 = vadd.f32 1e-05, %v92_v50  ;;  %v94_v57 = vadd.f32 1e-05, %v90_v52 }
 0x104   :  { %v177_v55 = vpop.eup %176  ;;  %v118_v56 = vmul.f32 %v175_v53, %v95_v47  ;;  %vm124_vm2 = vweird.f32 %v175_v53 }
 0x105   :  { %v98_v58 = vmul.f32 %v177_v55, %v93_v48  ;;  %178 = vrsqrt.f32 %v96_v54  ;;  %vm104_vm3 = vweird.f32 %v177_v55  ;;  %vm125_vm6 = vmor %vm123_vm4, %vm124_vm2  ;;  %vm133_vm10 = vweird.f32 %v96_v54 }
 0x106   :  { %v119_v59 = vmul.f32 %v175_v53, %v118_v56  ;;  %180 = vrsqrt.f32 %v94_v57  ;;  %vm105_vm7 = vmor %vm103_vm5, %vm104_vm3  ;;  %vm113_vm12 = vweird.f32 %v94_v57 }
 0x107   :  { %v99_v60 = vmul.f32 %v177_v55, %v98_v58 }
 0x108   :  { %v120_v61 = vmul.f32 0.5, %v119_v59 }
 0x109   :  { %v100_v62 = vmul.f32 0.5, %v99_v60 }
 0x10a   :  { %v121_v63 = vsub.f32 1.5, %v120_v61 }
 0x10b   :  { %v179_v0 = vpop.eup %178  ;;  %v101_v1 = vsub.f32 1.5, %v100_v62 }
 0x10c   :  { %v181_v2 = vpop.eup %180  ;;  %v122_v3 = vmul.f32 %v175_v53, %v121_v63  ;;  %v128_v4 = vmul.f32 %v179_v0, %v96_v54  ;;  %vm134_vm8 = vweird.f32 %v179_v0 }
 0x10d   :  { %v102_v6 = vmul.f32 %v177_v55, %v101_v1  ;;  %v108_v7 = vmul.f32 %v181_v2, %v94_v57  ;;  %vm114_vm9 = vweird.f32 %v181_v2  ;;  %vm135_vm11 = vmor %vm133_vm10, %vm134_vm8 }
 0x10e   :  { %v126_v8 = vsel %vm125_vm6, %v175_v53, %v122_v3  ;;  %v129_v9 = vmul.f32 %v179_v0, %v128_v4  ;;  %vm115_vm13 = vmor %vm113_vm12, %vm114_vm9 }
 0x10f   :  { %v106_v11 = vsel %vm105_vm7, %v177_v55, %v102_v6  ;;  %v139_v12 = vmul.f32 %v126_v8, %v256_v27  ;;  %v109_v13 = vmul.f32 %v181_v2, %v108_v7 }
 0x110   :  { %v137_v14 = vmul.f32 %v106_v11, %v258_v28  ;;  %v130_v15 = vmul.f32 0.5, %v129_v9 }
 0x111   :  { %v147_v16 = vmul.f32 %v170_v5, %v139_v12  ;;  %v110_v17 = vmul.f32 0.5, %v109_v13 }
 0x112   :  { %v145_v18 = vmul.f32 %v170_v5, %v137_v14  ;;  %v131_v19 = vsub.f32 1.5, %v130_v15 }
 0x113   :  { %v155_v20 = vadd.f32 %v171_v10, %v147_v16  ;;  %v111_v21 = vsub.f32 1.5, %v110_v17 }
 0x114   :  { %v153_v22 = vadd.f32 %v171_v10, %v145_v18  ;;  %v132_v23 = vmul.f32 %v179_v0, %v131_v19 }
 0x115   :  { %159 = vst.msk [vmem:[%s306_s4 + $0x10] sm:$0xff] %vm45_vm0, %v155_v20  ;;  %v112_v24 = vmul.f32 %v181_v2, %v111_v21 }
 0x116   :  { %157 = vst.msk [vmem:[%s306_s4] sm:$0xff] %vm45_vm0, %v153_v22  ;;  %v136_v25 = vsel %vm135_vm11, %v179_v0, %v132_v23 }
 0x117   :  { %v140_v26 = vmul.f32 %v136_v25, %v266_v37  ;;  %v116_v27 = vsel %vm115_vm13, %v181_v2, %v112_v24 }
 0x118   :  { %v138_v28 = vmul.f32 %v116_v27, %v268_v38 }
 0x119   :  { %v148_v29 = vmul.f32 %v170_v5, %v140_v26 }
 0x11a   :  { %v146_v30 = vmul.f32 %v170_v5, %v138_v28 }
 0x11b   :  { %v156_v31 = vadd.f32 %v171_v10, %v148_v29 }
 0x11c   :  { %v154_v32 = vadd.f32 %v171_v10, %v146_v30 }
 0x11d   :  { %160 = vst.msk [vmem:[%s306_s4 + $0x18] sm:$0xff] %vm45_vm0, %v156_v31 }
 0x11e   :  { %158 = vst.msk [vmem:[%s306_s4 + $0x8] sm:$0xff] %vm45_vm0, %v154_v32 }
 0x11f   :  { %165 = vsyncpa [#allocation3], 1 }

// kernel: transformer_forward.46
= control target key start
LH: loop header
LB: loop body
LE: loop exit
PB: predicated region body
PF: predicated region fallthrough
CT: control target
= control target key end

     0   :  { %11 = vsyncpa [#allocation3], 0  ;;  %s1273_s21 = smov 0   ;;  %s1460_s0 = inlined_call_operand.vmem [shape: f32[2,16,32], index: 0, kind: input, shape index: {}]   ;;  %s1461_s1 = inlined_call_operand.vmem [shape: f32[2,16,32], index: 1, kind: input, shape index: {}]   ;;  %s1462_s2 = inlined_call_operand.vmem [shape: f32[2,16,32], index: 2, kind: input, shape index: {}]   ;;  %s1463_s3 = inlined_call_operand.vmem [shape: f32[2,1,16], index: 3, kind: input, shape index: {}]   ;;  %s1464_s4 = inlined_call_operand.hbm [shape: f32[32,32], index: 4, kind: input, shape index: {}]   ;;  %s1465_s5 = inlined_call_operand.vmem [shape: f32[1,32], index: 5, kind: input, shape index: {}]   ;;  %s1466_s6 = inlined_call_operand.vmem [shape: f32[2,16,32], index: 6, kind: output, shape index: {}]  }
   0x1 LB: > { %s205_s24 = sshll.u32 %s1464_s4, 4  ;;  %s1064_s25 = sadd.s32 4294967295, %s1230_s21   ;;  %s1230_s21 = sphi %s1273_s21, %s17_s21   ;;  %s206_s24 = int_to_ptr.hbm [resolvable:$true] %s205_s24 }
   0x2   : > { %p1066_p0 = scmp.ge.s32.totalorder %s1230_s21, 1  ;;  %p194_p1 = scmp.lt.s32.totalorder %s1230_s21, 3 }
   0x3   : > { %p1125_p2 = scmp.eq.s32.totalorder %s1064_s25, 0  ;;  %s1232_s26 = smov [#allocation2]  }
   0x4   : > { %p195_p3 = pnand %p1066_p0, %p194_p1  ;;  %s207_s27 = sshll.u32 %s1232_s26, 4  ;;  %s208_s27 = int_to_ptr.vmem [resolvable:$true] %s207_s27 }
   0x5   : > { %s1233_s28 = smov 128   ;;  %s1234_s29 = smov 8  }
   0x6   : > { %p1121_p4 = pneg %p195_p3  ;;  %256 = sbr.rel (%p195_p3) target bundleno = 1247 (0x4df), region = 44 }
   0x8   : > { %p1122_p5 = pnand %p1125_p2, %p1121_p4 }
   0xa   : > { %1124 = dma.hbm_to_vmem [thread:$0]  (!%p1122_p5), %s206_s24, 512, %s208_s27, [#allocation3], %s1233_s28, %s1233_s28, %s1234_s29  }
   0xb   : > { %1225 = dma.done.wait (%p1125_p2), [#allocation3], 512  }
   0xc   : > { %1227 = vsyncadd (%p1125_p2), [#allocation3], 4294966784  ;;  %p300_p6 = scmp.lt.s32.totalorder %s1064_s25, 1  ;;  %vm330_vm0 = vcmask 64512   ;;  %s1235_s16 = smov 120   ;;  %vm373_vm1 = vcmask 130048  }
   0xd   : > { %s1236_s20 = smov 104   ;;  %s1237_s22 = smov 112  }
   0xe   : > { %s1470_s25 = smov (!%p300_p6, %s1064_s25), 1 }
   0xf   : > { %s1284_s30 = sshll.u32 %s1470_s25, 4  ;;  %s317_s12 = scalar_lea.vmem %s1463_s3, %s1470_s25 }
  0x10   : > { %s309_s9 = scalar_lea.vmem %s1461_s1, %s1284_s30  ;;  %s304_s15 = scalar_lea.vmem %s1460_s0, %s1284_s30  ;;  %v1324_v7 = vld [vmem:[%s317_s12] ss:$0 sm:$0xff] }
  0x11   : > { %v1297_v0 = vld [vmem:[%s309_s9 + $0x8] sm:$0xff]  ;;  %v1303_v1 = vld [vmem:[%s304_s15] sm:$0xff]  ;;  %s314_s19 = scalar_lea.vmem %s1462_s2, %s1284_s30  ;;  %s322_s27 = scalar_lea.vmem %s1466_s6, %s1284_s30 }
  0x12   : > { %458 = vrot.lane.b32.xlu0 %v1297_v0, %s1235_s16  ;;  %1079 = vmatpush.xpose.msk.msra.mxu0 %vm330_vm0, %v1297_v0  ;;  %v1305_v2 = vld [vmem:[%s309_s9] sm:$0xff]  ;;  %v1315_v3 = vld [vmem:[%s304_s15 + $0x8] sm:$0xff] }
  0x13   : > { %452 = vrot.lane.b32.xlu1 %v1303_v1, %s1235_s16  ;;  %v328_v17 = vld [vmem:[%s314_s19 + $0x8] sm:$0xff]  ;;  %v327_v18 = vld [vmem:[%s314_s19] sm:$0xff] }
  0x14   : > { %442 = vmatpush.msra.mxu1 %v328_v17  ;;  %v1346_v37 = vpack.i.bf16 %v327_v18, %v328_v17 }
  0x16   : > { %1080 = vmatpush.xpose.msk.msra.mxu0 %vm330_vm0, %v1305_v2  ;;  %443 = vmatpush.msra.mxu1 %v327_v18 }
  0x19   : > { %1081 = vmatmul.msk.f32.vlgmr.msra.gmra.mxu0 %vm330_vm0, %v1303_v1 }
  0x1a   : > { %456 = vrot.lane.b32.xlu0 %v1305_v2, %s1235_s16 }
  0x1b   : > { %454 = vrot.lane.b32.xlu1 %v1315_v3, %s1235_s16 }
  0x21   : > { %1082 = vmatmul.msk.f32.gmra.mxu0 %vm330_vm0, %v1315_v3 }
  0x84   : > { %v459_v4 = vpop.permute.xlu0 %458 }
  0x85   : > { %1085 = vmatpush.xpose.msk.msra.mxu2 %vm330_vm0, %v459_v4  ;;  %v453_v5 = vpop.permute.xlu1 %452 }
  0x8c   : > { %v457_v6 = vpop.permute.xlu0 %456 }
  0x8d   : > { %1086 = vmatpush.xpose.msk.msra.mxu2 %vm330_vm0, %v457_v6  ;;  %v455_v8 = vpop.permute.xlu1 %454 }
  0x90   : > { %1087 = vmatmul.msk.f32.vlgmr.msra.gmra.mxu2 %vm330_vm0, %v453_v5 }
  0x96   : > { %v360_v9 = vpop.f32.mrf.mxu0 }
  0x97   : > { %v366_v10 = vmul.f32 0.35355338, %v360_v9 }
  0x98   : > { %1088 = vmatmul.msk.f32.gmra.mxu2 %vm330_vm0, %v455_v8 }
  0x99   : > { %v371_v11 = vadd.f32 %v1324_v7, %v366_v10 }
  0x9b   : > { %v374_v12 = vsel %vm373_vm1, %v371_v11, -inf }
  0x9c   : > { %375 = vmax.xlane.f32.xlu2 %v374_v12 }
  0x9e   : > { %v363_v13 = vpop.f32.mrf.mxu0 }
  0x9f   : > { %v367_v14 = vmul.f32 0.35355338, %v363_v13 }
  0xa1   : > { %v372_v15 = vadd.f32 %v1324_v7, %v367_v14 }
  0xa3   : > { %v377_v16 = vsel %vm373_vm1, %v372_v15, -inf }
  0xa4   : > { %378 = vmax.xlane.f32.xlu2 %v377_v16 }
 0x10f   : > { %v376_v19 = vpop.xlane.xlu2 %375 }
 0x110   : > { %v380_v20 = vsub.f32 %v371_v11, %v376_v19 }
 0x112   : > { %v382_v21 = vmul.f32 1.442695, %v380_v20 }
 0x113   : > { %v485_v22 = vpop.f32.mrf.mxu2 }
 0x114   : > { %1158 = vpow2.f32 %v382_v21  ;;  %v491_v23 = vmul.f32 0.35355338, %v485_v22 }
 0x116   : > { %v493_v24 = vadd.f32 %v1324_v7, %v491_v23 }
 0x117   : > { %v379_v25 = vpop.xlane.xlu2 %378 }
 0x118   : > { %v381_v26 = vsub.f32 %v372_v15, %v379_v25  ;;  %v495_v27 = vsel %vm373_vm1, %v493_v24, -inf  ;;  %v451_v15 = vld [vmem:[#allocation2] sm:$0xff] }
 0x119   : > { %496 = vmax.xlane.f32.xlu2 %v495_v27 }
 0x11a   : > { %v1159_v28 = vpop.eup %1158  ;;  %v384_v29 = vmul.f32 1.442695, %v381_v26 }
 0x11b   : > { %v488_v30 = vpop.f32.mrf.mxu2  ;;  %v386_v31 = vsel %vm373_vm1, %v1159_v28, 0.0 }
 0x11c   : > { %1160 = vpow2.f32 %v384_v29  ;;  %v492_v32 = vmul.f32 0.35355338, %v488_v30  ;;  %387 = vadd.xlane.f32.xlu0 %v386_v31 }
 0x11e   : > { %v494_v33 = vadd.f32 %v1324_v7, %v492_v32 }
 0x120   : > { %v498_v34 = vsel %vm373_vm1, %v494_v33, -inf }
 0x121   : > { %499 = vmax.xlane.f32.xlu2 %v498_v34 }
 0x122   : > { %v1340_v35 = vpop.eup %1160 }
 0x123   : > { %v389_v36 = vsel %vm373_vm1, %v1340_v35, 0.0 }
 0x124   : > { %390 = vadd.xlane.f32.xlu1 %v389_v36 }
 0x130   : > { %803 = vrot.lane.b32.xlu0 %v1297_v0, %s1236_s20 }
 0x138   : > { %797 = vrot.lane.b32.xlu0 %v1303_v1, %s1236_s20 }
 0x139   : > { %1142 = vrot.lane.b32.xlu2 %v1346_v37, %s1235_s16 }
 0x13d   : > { %645 = vrot.lane.b32.xlu1 %v1297_v0, %s1237_s22 }
 0x140   : > { %799 = vrot.lane.b32.xlu0 %v1315_v3, %s1236_s20 }
 0x145   : > { %639 = vrot.lane.b32.xlu1 %v1303_v1, %s1237_s22 }
 0x18c   : > { %v497_v38 = vpop.xlane.xlu2 %496 }
 0x18d   : > { %v501_v39 = vsub.f32 %v493_v24, %v497_v38 }
 0x18f   : > { %v503_v40 = vmul.f32 1.442695, %v501_v39  ;;  %v388_v41 = vpop.xlane.xlu0 %387 }
 0x190   : > { %1162 = vrcp.f32 %v388_v41  ;;  %v403_v51 = vand.u32 2147483648, %v388_v41  ;;  %v401_v53 = vand.u32 2147483647, %v388_v41  ;;  %vm397_vm3 = vweird.f32 %v388_v41 }
 0x191   : > { %1164 = vpow2.f32 %v503_v40 }
 0x192   : > { %v404_v56 = vor.u32 1.1754944e-38, %v403_v51  ;;  %vm402_vm5 = vcmp.eq.f32.partialorder %v401_v53, 8.507059e+37 }
 0x194   : > { %v500_v42 = vpop.xlane.xlu2 %499 }
 0x195   : > { %v502_v43 = vsub.f32 %v494_v33, %v500_v42 }
 0x196   : > { %v1163_v44 = vpop.eup %1162 }
 0x197   : > { %v1358_v45 = vpop.eup %1164  ;;  %v393_v46 = vmul.f32 %v1163_v44, %v388_v41  ;;  %v505_v47 = vmul.f32 1.442695, %v502_v43  ;;  %v391_v48 = vpop.xlane.xlu1 %390  ;;  %vm398_vm2 = vweird.f32 %v1163_v44 }
 0x198   : > { %1166 = vrcp.f32 %v391_v48  ;;  %v507_v49 = vsel %vm373_vm1, %v1358_v45, 0.0  ;;  %vm399_vm4 = vmor %vm397_vm3, %vm398_vm2  ;;  %v418_v5 = vand.u32 2147483648, %v391_v48  ;;  %v416_v8 = vand.u32 2147483647, %v391_v48 }
 0x199   : > { %v394_v50 = vsub.f32 1.0, %v393_v46  ;;  %1168 = vpow2.f32 %v505_v47  ;;  %508 = vadd.xlane.f32.xlu2 %v507_v49  ;;  %vm412_vm7 = vweird.f32 %v391_v48 }
 0x19a   : > { %v419_v10 = vor.u32 1.1754944e-38, %v418_v5  ;;  %vm417_vm9 = vcmp.eq.f32.partialorder %v416_v8, 8.507059e+37 }
 0x19b   : > { %v395_v52 = vmul.f32 %v1163_v44, %v394_v50 }
 0x19c   : > { %v1143_v57 = vpop.permute.xlu2 %1142 }
 0x19d   : > { %v396_v54 = vadd.f32 %v1163_v44, %v395_v52  ;;  %v1144_v1 = vunpack.i.l.bf16 %v1143_v57  ;;  %v1145_v4 = vunpack.i.h.bf16 %v1143_v57 }
 0x19e   : > { %v1167_v55 = vpop.eup %1166 }
 0x19f   : > { %v1362_v58 = vpop.eup %1168  ;;  %v408_v59 = vmul.f32 %v1167_v55, %v391_v48  ;;  %v400_v60 = vsel %vm399_vm4, %v1163_v44, %v396_v54  ;;  %vm413_vm6 = vweird.f32 %v1167_v55  ;;  %571 = vmatpush.msra.mxu3 %v1144_v1  ;;  %v580_v48 = vld [vmem:[#allocation2 + $0x8] sm:$0xff] }
 0x1a0   : > { %v510_v61 = vsel %vm373_vm1, %v1362_v58, 0.0  ;;  %v405_v62 = vsel %vm402_vm5, %v404_v56, %v400_v60  ;;  %vm414_vm8 = vmor %vm412_vm7, %vm413_vm6  ;;  %602 = vmatpush.msrb.mxu1 %v580_v48 }
 0x1a1   : > { %v409_v63 = vsub.f32 1.0, %v408_v59  ;;  %511 = vadd.xlane.f32.xlu2 %v510_v61  ;;  %v406_v0 = vmul.f32 %v1159_v28, %v405_v62  ;;  %572 = vmatpush.msra.mxu3 %v1145_v4 }
 0x1a2   : > { %v804_v30 = vpop.permute.xlu0 %803 }
 0x1a3   : > { %v410_v6 = vmul.f32 %v1167_v55, %v409_v63  ;;  %1083 = vmatmul.msk.f32.vlgmr.msra.gmra.mxu1 %vm373_vm1, %v406_v0  ;;  %631 = vmatpush.msrb.mxu3 %v451_v15 }
 0x1a5   : > { %v411_v9 = vadd.f32 %v1167_v55, %v410_v6 }
 0x1a7   : > { %v415_v11 = vsel %vm414_vm8, %v1167_v55, %v411_v9 }
 0x1a8   : > { %v420_v12 = vsel %vm417_vm9, %v419_v10, %v415_v11 }
 0x1a9   : > { %v421_v13 = vmul.f32 %v1340_v35, %v420_v12 }
 0x1aa   : > { %v798_v46 = vpop.permute.xlu0 %797 }
 0x1ab   : > { %1084 = vmatmul.msk.f32.gmra.mxu1 %vm373_vm1, %v421_v13 }
 0x1af   : > { %v646_v14 = vpop.permute.xlu1 %645 }
 0x1b0   : > { %1095 = vmatpush.xpose.msk.msrb.mxu0 %vm330_vm0, %v646_v14 }
 0x1b2   : > { %v800_v47 = vpop.permute.xlu0 %799 }
 0x1b7   : > { %v640_v40 = vpop.permute.xlu1 %639 }
 0x1b9   : > { %801 = vrot.lane.b32.xlu2 %v1305_v2, %s1236_s20 }
 0x1c1   : > { %643 = vrot.lane.b32.xlu2 %v1305_v2, %s1237_s22 }
 0x1c9   : > { %641 = vrot.lane.b32.xlu2 %v1315_v3, %s1237_s22 }
 0x20c   : > { %v509_v16 = vpop.xlane.xlu2 %508 }
 0x20d   : > { %1170 = vrcp.f32 %v509_v16  ;;  %v524_v21 = vand.u32 2147483648, %v509_v16  ;;  %v522_v23 = vand.u32 2147483647, %v509_v16  ;;  %vm518_vm11 = vweird.f32 %v509_v16 }
 0x20f   : > { %v525_v3 = vor.u32 1.1754944e-38, %v524_v21  ;;  %vm523_vm13 = vcmp.eq.f32.partialorder %v522_v23, 8.507059e+37 }
 0x213   : > { %v1171_v17 = vpop.eup %1170 }
 0x214   : > { %v514_v18 = vmul.f32 %v1171_v17, %v509_v16  ;;  %v512_v19 = vpop.xlane.xlu2 %511  ;;  %vm519_vm10 = vweird.f32 %v1171_v17 }
 0x215   : > { %1172 = vrcp.f32 %v512_v19  ;;  %vm520_vm12 = vmor %vm518_vm11, %vm519_vm10  ;;  %v539_v32 = vand.u32 2147483648, %v512_v19  ;;  %v537_v34 = vand.u32 2147483647, %v512_v19  ;;  %vm533_vm15 = vweird.f32 %v512_v19 }
 0x216   : > { %v515_v20 = vsub.f32 1.0, %v514_v18 }
 0x217   : > { %v540_v36 = vor.u32 1.1754944e-38, %v539_v32  ;;  %vm538_vm3 = vcmp.eq.f32.partialorder %v537_v34, 8.507059e+37 }
 0x218   : > { %v516_v22 = vmul.f32 %v1171_v17, %v515_v20 }
 0x21a   : > { %v517_v2 = vadd.f32 %v1171_v17, %v516_v22 }
 0x21b   : > { %v1173_v24 = vpop.eup %1172 }
 0x21c   : > { %v529_v25 = vmul.f32 %v1173_v24, %v512_v19  ;;  %v802_v26 = vpop.permute.xlu2 %801  ;;  %v521_v27 = vsel %vm520_vm12, %v1171_v17, %v517_v2  ;;  %vm534_vm14 = vweird.f32 %v1173_v24 }
 0x21d   : > { %v526_v28 = vsel %vm523_vm13, %v525_v3, %v521_v27  ;;  %vm535_vm2 = vmor %vm533_vm15, %vm534_vm14 }
 0x21e   : > { %v530_v29 = vsub.f32 1.0, %v529_v25  ;;  %v527_v31 = vmul.f32 %v1358_v45, %v526_v28 }
 0x220   : > { %v531_v33 = vmul.f32 %v1173_v24, %v530_v29  ;;  %1089 = vmatmul.msk.f32.vlgmr.msra.gmra.mxu3 %vm373_vm1, %v527_v31  ;;  %v445_v43 = vpop.f32.mrf.mxu1  ;;  %v765_v31 = vld [vmem:[#allocation2 + $0x10] sm:$0xff] }
 0x221   : > { %1103 = vmatpush.xpose.msk.msra.mxu3 %vm330_vm0, %v804_v30  ;;  %787 = vmatpush.msra.mxu1 %v765_v31 }
 0x222   : > { %v532_v35 = vadd.f32 %v1173_v24, %v531_v33 }
 0x224   : > { %v644_v38 = vpop.permute.xlu2 %643  ;;  %v536_v39 = vsel %vm535_vm2, %v1173_v24, %v532_v35 }
 0x225   : > { %1096 = vmatpush.xpose.msk.msrb.mxu0 %vm330_vm0, %v644_v38  ;;  %1104 = vmatpush.xpose.msk.msra.mxu3 %vm330_vm0, %v802_v26  ;;  %v541_v41 = vsel %vm538_vm3, %v540_v36, %v536_v39 }
 0x226   : > { %v542_v42 = vmul.f32 %v1362_v58, %v541_v41 }
 0x228   : > { %1090 = vmatmul.msk.f32.gmra.mxu3 %vm373_vm1, %v542_v42  ;;  %1097 = vmatmul.msk.f32.vlgmr.msrb.gmra.mxu0 %vm330_vm0, %v640_v40  ;;  %v448_v45 = vpop.f32.mrf.mxu1 }
 0x22c   : > { %v642_v44 = vpop.permute.xlu2 %641 }
 0x230   : > { %1093 = vmatmul.msk.f32.vlgmr.msrb.gmra.mxu3 %vm330_vm0, %v445_v43  ;;  %1098 = vmatmul.msk.f32.gmra.mxu0 %vm330_vm0, %v642_v44 }
 0x238   : > { %1094 = vmatmul.msk.f32.gmra.mxu3 %vm330_vm0, %v448_v45 }
 0x240   : > { %1105 = vmatmul.msk.f32.vlgmr.msra.gmra.mxu3 %vm330_vm0, %v798_v46 }
 0x248   : > { %1106 = vmatmul.msk.f32.gmra.mxu3 %vm330_vm0, %v800_v47 }
 0x2a3   : > { %v574_v49 = vpop.f32.mrf.mxu3 }
 0x2a4   : > { %1091 = vmatmul.msk.f32.vlgmr.msrb.gmra.mxu1 %vm330_vm0, %v574_v49 }
 0x2a5   : > { %v672_v50 = vpop.f32.mrf.mxu0 }
 0x2a6   : > { %v678_v51 = vmul.f32 0.35355338, %v672_v50 }
 0x2a8   : > { %v680_v52 = vadd.f32 %v1324_v7, %v678_v51 }
 0x2aa   : > { %v682_v53 = vsel %vm373_vm1, %v680_v52, -inf }
 0x2ab   : > { %683 = vmax.xlane.f32.xlu1 %v682_v53  ;;  %v577_v54 = vpop.f32.mrf.mxu3 }
 0x2ac   : > { %1092 = vmatmul.msk.f32.gmra.mxu1 %vm330_vm0, %v577_v54 }
 0x2ad   : > { %v675_v55 = vpop.f32.mrf.mxu0 }
 0x2ae   : > { %v679_v56 = vmul.f32 0.35355338, %v675_v55 }
 0x2b0   : > { %v681_v57 = vadd.f32 %v1324_v7, %v679_v56 }
 0x2b2   : > { %v685_v58 = vsel %vm373_vm1, %v681_v57, -inf }
 0x2b3   : > { %686 = vmax.xlane.f32.xlu2 %v685_v58  ;;  %v1395_v59 = vpop.f32.mrf.mxu3 }
 0x2bb   : > { %v1397_v60 = vpop.f32.mrf.mxu3 }
 0x2c3   : > { %v830_v61 = vpop.f32.mrf.mxu3 }
 0x2c4   : > { %v836_v62 = vmul.f32 0.35355338, %v830_v61 }
 0x2c6   : > { %v838_v63 = vadd.f32 %v1324_v7, %v836_v62  ;;  %v923_v62 = vld [vmem:[#allocation2 + $0x18] sm:$0xff] }
 0x2c8   : > { %v840_v0 = vsel %vm373_vm1, %v838_v63, -inf }
 0x2c9   : > { %841 = vmax.xlane.f32.xlu0 %v840_v0 }
 0x2cb   : > { %v833_v1 = vpop.f32.mrf.mxu3 }
 0x2cc   : > { %v837_v4 = vmul.f32 0.35355338, %v833_v1 }
 0x2ce   : > { %v839_v5 = vadd.f32 %v1324_v7, %v837_v4 }
 0x2d0   : > { %v843_v6 = vsel %vm373_vm1, %v839_v5, -inf }
 0x2d1   : > { %844 = vmax.xlane.f32.xlu1 %v843_v6 }
 0x31e   : > { %v684_v8 = vpop.xlane.xlu1 %683 }
 0x31f   : > { %v688_v9 = vsub.f32 %v680_v52, %v684_v8 }
 0x321   : > { %v690_v10 = vmul.f32 1.442695, %v688_v9 }
 0x323   : > { %1174 = vpow2.f32 %v690_v10 }
 0x326   : > { %v687_v11 = vpop.xlane.xlu2 %686 }
 0x327   : > { %v689_v12 = vsub.f32 %v681_v57, %v687_v11 }
 0x329   : > { %v1403_v13 = vpop.eup %1174  ;;  %v692_v14 = vmul.f32 1.442695, %v689_v12 }
 0x32a   : > { %v694_v15 = vsel %vm373_vm1, %v1403_v13, 0.0 }
 0x32b   : > { %1176 = vpow2.f32 %v692_v14  ;;  %695 = vadd.xlane.f32.xlu0 %v694_v15 }
 0x331   : > { %v1407_v16 = vpop.eup %1176 }
 0x332   : > { %v697_v7 = vsel %vm373_vm1, %v1407_v16, 0.0 }
 0x333   : > { %698 = vadd.xlane.f32.xlu1 %v697_v7 }
 0x33c   : > { %v842_v17 = vpop.xlane.xlu0 %841 }
 0x33d   : > { %v846_v18 = vsub.f32 %v838_v63, %v842_v17 }
 0x33f   : > { %v848_v19 = vmul.f32 1.442695, %v846_v18 }
 0x341   : > { %1178 = vpow2.f32 %v848_v19 }
 0x344   : > { %v845_v20 = vpop.xlane.xlu1 %844 }
 0x345   : > { %v847_v21 = vsub.f32 %v839_v5, %v845_v20 }
 0x347   : > { %v1411_v22 = vpop.eup %1178  ;;  %v850_v23 = vmul.f32 1.442695, %v847_v21 }
 0x348   : > { %v852_v2 = vsel %vm373_vm1, %v1411_v22, 0.0 }
 0x349   : > { %1180 = vpow2.f32 %v850_v23  ;;  %853 = vadd.xlane.f32.xlu2 %v852_v2 }
 0x34c   : > { %1152 = vrot.lane.b32.xlu1 %v1346_v37, %s1236_s20 }
 0x34f   : > { %v1417_v24 = vpop.eup %1180 }
 0x350   : > { %v855_v3 = vsel %vm373_vm1, %v1417_v24, 0.0 }
 0x351   : > { %856 = vadd.xlane.f32.xlu0 %v855_v3 }
 0x361   : > { %1147 = vrot.lane.b32.xlu2 %v1346_v37, %s1237_s22 }
 0x39e   : > { %v696_v25 = vpop.xlane.xlu0 %695 }
 0x39f   : > { %1182 = vrcp.f32 %v696_v25  ;;  %v711_v38 = vand.u32 2147483648, %v696_v25  ;;  %vm705_vm5 = vweird.f32 %v696_v25  ;;  %v709_v41 = vand.u32 2147483647, %v696_v25 }
 0x3a1   : > { %v712_v45 = vor.u32 1.1754944e-38, %v711_v38  ;;  %vm710_vm7 = vcmp.eq.f32.partialorder %v709_v41, 8.507059e+37 }
 0x3a5   : > { %v1183_v27 = vpop.eup %1182 }
 0x3a6   : > { %v1423_v26 = vpop.xlane.xlu1 %698  ;;  %v701_v28 = vmul.f32 %v1183_v27, %v696_v25  ;;  %vm706_vm4 = vweird.f32 %v1183_v27  ;;  %v604_v25 = vpop.f32.mrf.mxu1 }
 0x3a7   : > { %1184 = vrcp.f32 %v1423_v26  ;;  %vm707_vm6 = vmor %vm705_vm5, %vm706_vm4  ;;  %vm720_vm9 = vweird.f32 %v1423_v26  ;;  %v726_v54 = vand.u32 2147483648, %v1423_v26  ;;  %v724_v56 = vand.u32 2147483647, %v1423_v26 }
 0x3a8   : > { %v702_v29 = vsub.f32 1.0, %v701_v28 }
 0x3a9   : > { %v727_v5 = vor.u32 1.1754944e-38, %v726_v54  ;;  %vm725_vm15 = vcmp.eq.f32.partialorder %v724_v56, 8.507059e+37 }
 0x3aa   : > { %v703_v32 = vmul.f32 %v1183_v27, %v702_v29  ;;  %v1157_v29 = vld [vmem:[%s1465_s5] ss:$0 sm:$0xff] }
 0x3ac   : > { %v704_v35 = vadd.f32 %v1183_v27, %v703_v32 }
 0x3ad   : > { %v1185_v30 = vpop.eup %1184 }
 0x3ae   : > { %v716_v33 = vmul.f32 %v1185_v30, %v1423_v26  ;;  %v708_v43 = vsel %vm707_vm6, %v1183_v27, %v704_v35  ;;  %vm721_vm8 = vweird.f32 %v1185_v30  ;;  %v607_v26 = vpop.f32.mrf.mxu1 }
 0x3af   : > { %v713_v51 = vsel %vm710_vm7, %v712_v45, %v708_v43  ;;  %vm1431_vm11 = vmor %vm720_vm9, %vm721_vm8 }
 0x3b0   : > { %v717_v37 = vsub.f32 1.0, %v716_v33  ;;  %v714_v61 = vmul.f32 %v1403_v13, %v713_v51 }
 0x3b2   : > { %v718_v42 = vmul.f32 %v1185_v30, %v717_v37 }
 0x3b4   : > { %v719_v53 = vadd.f32 %v1185_v30, %v718_v42 }
 0x3b6   : > { %v723_v1 = vsel %vm1431_vm11, %v1185_v30, %v719_v53 }
 0x3b7   : > { %v728_v11 = vsel %vm725_vm15, %v727_v5, %v723_v1 }
 0x3b8   : > { %v729_v17 = vmul.f32 %v1407_v16, %v728_v11 }
 0x3bc   : > { %v854_v34 = vpop.xlane.xlu2 %853 }
 0x3bd   : > { %1186 = vrcp.f32 %v854_v34  ;;  %v869_v55 = vand.u32 2147483648, %v854_v34  ;;  %v867_v58 = vand.u32 2147483647, %v854_v34  ;;  %vm863_vm12 = vweird.f32 %v854_v34 }
 0x3be   : > { %v1153_v36 = vpop.permute.xlu1 %1152 }
 0x3bf   : > { %v1155_v39 = vunpack.i.h.bf16 %v1153_v36  ;;  %v1154_v40 = vunpack.i.l.bf16 %v1153_v36  ;;  %v870_v6 = vor.u32 1.1754944e-38, %v869_v55  ;;  %vm868_vm14 = vcmp.eq.f32.partialorder %v867_v58, 8.507059e+37 }
 0x3c1   : > { %914 = vmatpush.msra.mxu0 %v1154_v40 }
 0x3c3   : > { %v1187_v44 = vpop.eup %1186  ;;  %915 = vmatpush.msra.mxu0 %v1155_v39 }
 0x3c4   : > { %v859_v46 = vmul.f32 %v1187_v44, %v854_v34  ;;  %v1148_v47 = vpop.permute.xlu2 %1147  ;;  %v857_v48 = vpop.xlane.xlu0 %856  ;;  %vm864_vm10 = vweird.f32 %v1187_v44  ;;  %v637_v34 = vadd.f32 %v1397_v60, %v607_v26 }
 0x3c5   : > { %v1150_v49 = vunpack.i.h.bf16 %v1148_v47  ;;  %v1149_v50 = vunpack.i.l.bf16 %v1148_v47  ;;  %1188 = vrcp.f32 %v857_v48  ;;  %vm865_vm13 = vmor %vm863_vm12, %vm864_vm10  ;;  %v884_v14 = vand.u32 2147483648, %v857_v48 }
 0x3c6   : > { %v860_v52 = vsub.f32 1.0, %v859_v46  ;;  %v882_v7 = vand.u32 2147483647, %v857_v48  ;;  %vm878_vm3 = vweird.f32 %v857_v48 }
 0x3c7   : > { %756 = vmatpush.msrb.mxu2 %v1149_v50  ;;  %v885_v19 = vor.u32 1.1754944e-38, %v884_v14 }
 0x3c8   : > { %v861_v57 = vmul.f32 %v1187_v44, %v860_v52  ;;  %vm883_vm5 = vcmp.eq.f32.partialorder %v882_v7, 8.507059e+37 }
 0x3c9   : > { %757 = vmatpush.msrb.mxu2 %v1150_v49 }
 0x3ca   : > { %v862_v0 = vadd.f32 %v1187_v44, %v861_v57  ;;  %1099 = vmatmul.msk.f32.vlgmr.msrb.gmra.mxu2 %vm373_vm1, %v714_v61 }
 0x3cb   : > { %v1189_v4 = vpop.eup %1188  ;;  %945 = vmatpush.msra.mxu2 %v923_v62 }
 0x3cc   : > { %v866_v8 = vsel %vm865_vm13, %v1187_v44, %v862_v0  ;;  %v874_v9 = vmul.f32 %v1189_v4, %v857_v48  ;;  %vm879_vm2 = vweird.f32 %v1189_v4 }
 0x3cd   : > { %v871_v10 = vsel %vm868_vm14, %v870_v6, %v866_v8  ;;  %vm880_vm4 = vmor %vm878_vm3, %vm879_vm2 }
 0x3ce   : > { %v875_v12 = vsub.f32 1.0, %v874_v9  ;;  %v872_v13 = vmul.f32 %v1411_v22, %v871_v10 }
 0x3d0   : > { %v876_v15 = vmul.f32 %v1189_v4, %v875_v12  ;;  %1107 = vmatmul.msk.f32.vlgmr.msra.gmra.mxu0 %vm373_vm1, %v872_v13 }
 0x3d2   : > { %v877_v18 = vadd.f32 %v1189_v4, %v876_v15  ;;  %1100 = vmatmul.msk.f32.gmra.mxu2 %vm373_vm1, %v729_v17 }
 0x3d4   : > { %v881_v20 = vsel %vm880_vm4, %v1189_v4, %v877_v18 }
 0x3d5   : > { %v886_v21 = vsel %vm883_vm5, %v885_v19, %v881_v20 }
 0x3d6   : > { %v887_v23 = vmul.f32 %v1417_v24, %v886_v21  ;;  %v634_v24 = vadd.f32 %v1395_v59, %v604_v25 }
 0x3d8   : > { %1108 = vmatmul.msk.f32.gmra.mxu0 %vm373_vm1, %v887_v23  ;;  %vm961_vm1 = vcmask 261120  }
 0x44d   : > { %v759_v22 = vpop.f32.mrf.mxu2  ;;  %v917_v2 = vpop.f32.mrf.mxu0 }
 0x44e   : > { %1101 = vmatmul.msk.f32.vlgmr.msra.gmra.mxu1 %vm330_vm0, %v759_v22  ;;  %1109 = vmatmul.msk.f32.vlgmr.msra.gmra.mxu2 %vm330_vm0, %v917_v2 }
 0x455   : > { %v762_v16 = vpop.f32.mrf.mxu2  ;;  %v920_v3 = vpop.f32.mrf.mxu0 }
 0x456   : > { %1102 = vmatmul.msk.f32.gmra.mxu1 %vm330_vm0, %v762_v16  ;;  %1110 = vmatmul.msk.f32.gmra.mxu2 %vm330_vm0, %v920_v3 }
 0x4cb   : > { %v789_v27 = vpop.f32.mrf.mxu1 }
 0x4cc   : > { %v795_v28 = vadd.f32 %v789_v27, %v634_v24 }
 0x4d1   : > { %v947_v30 = vpop.f32.mrf.mxu2 }
 0x4d2   : > { %v953_v31 = vadd.f32 %v947_v30, %v795_v28 }
 0x4d3   : > { %v792_v33 = vpop.f32.mrf.mxu1 }
 0x4d4   : > { %v959_v32 = vadd.f32 %v1157_v29, %v953_v31  ;;  %v796_v35 = vadd.f32 %v792_v33, %v637_v34 }
 0x4d6   : > { %962 = vst.msk [vmem:[%s322_s27] sm:$0xff] %vm961_vm1, %v959_v32 }
 0x4d9   : > { %v950_v37 = vpop.f32.mrf.mxu2 }
 0x4da   : > { %v954_v59 = vadd.f32 %v950_v37, %v796_v35 }
 0x4dc   : > { %v960_v36 = vadd.f32 %v1157_v29, %v954_v59 }
 0x4de   : > { %963 = vst.msk [vmem:[%s322_s27 + $0x8] sm:$0xff] %vm961_vm1, %v960_v36 }
 0x4df PF: > { %s17_s21 = sadd.s32 1, %s1230_s21  }
 0x4e0   : > { %p14_p7 = scmp.ge.s32.totalorder %s17_s21, 4  }
 0x4e2   :  { %16 = sbr.rel (!%p14_p7) target bundleno = 1 (0x1), region = 88 }
 0x4e7   :  { %985 = vsyncpa [#allocation3], 1 }
 0x4e8   :  { %987 = vsyncpa [#allocation3 + $0x1], 1 }

// kernel: transformer_forward.50
= control target key start
LH: loop header
LB: loop body
LE: loop exit
PB: predicated region body
PF: predicated region fallthrough
CT: control target
= control target key end

     0   :  { %vm29_vm0 = vcmask 261120   ;;  %v162_v16 = vmov 32.0   ;;  %s262_s0 = inlined_call_operand.vmem [shape: f32[32,32], index: 0, kind: input, shape index: {}]   ;;  %s263_s1 = inlined_call_operand.vmem [shape: f32[32,32], index: 1, kind: input, shape index: {}]   ;;  %s264_s2 = inlined_call_operand.vmem [shape: f32[1,32], index: 2, kind: input, shape index: {}]   ;;  %s265_s3 = inlined_call_operand.vmem [shape: f32[1,32], index: 3, kind: input, shape index: {}]   ;;  %s266_s4 = inlined_call_operand.vmem [shape: f32[32,32], index: 4, kind: output, shape index: {}]  }
   0x1   :  { %v19_v0 = vld [vmem:[%s262_s0 + $0x10] sm:$0xff]  ;;  %v17_v2 = vld [vmem:[%s262_s0] sm:$0xff]  ;;  %v20_v6 = vld [vmem:[%s262_s0 + $0x18] sm:$0xff]  ;;  %152 = vrcp.f32 %v162_v16 }
   0x2   :  { %v23_v1 = vld [vmem:[%s263_s1 + $0x10] sm:$0xff]  ;;  %v21_v4 = vld [vmem:[%s263_s1] sm:$0xff]  ;;  %v24_v7 = vld [vmem:[%s263_s1 + $0x18] sm:$0xff] }
   0x3   :  { %v27_v3 = vadd.f32 %v23_v1, %v19_v0  ;;  %v25_v5 = vadd.f32 %v21_v4, %v17_v2  ;;  %v18_v9 = vld [vmem:[%s262_s0 + $0x8] sm:$0xff]  ;;  %v28_v12 = vadd.f32 %v24_v7, %v20_v6 }
   0x4   :  { %v22_v10 = vld [vmem:[%s263_s1 + $0x8] sm:$0xff] }
   0x5   :  { %v36_v8 = vsel %vm29_vm0, %v27_v3, 0.0  ;;  %v30_v11 = vsel %vm29_vm0, %v25_v5, 0.0  ;;  %v26_v13 = vadd.f32 %v22_v10, %v18_v9  ;;  %v39_v14 = vsel %vm29_vm0, %v28_v12, 0.0  ;;  %v151_v10 = vld [vmem:[%s265_s3] ss:$0 sm:$0xff] }
   0x6   :  { %37 = vadd.xlane.f32.xlu1 %v36_v8  ;;  %31 = vadd.xlane.f32.xlu0 %v30_v11 }
   0x7   :  { %v33_v15 = vsel %vm29_vm0, %v26_v13, 0.0  ;;  %v153_v17 = vpop.eup %152 }
   0x8   :  { %v43_v18 = vmul.f32 32.0, %v153_v17  ;;  %vm47_vm1 = vweird.f32 %v153_v17 }
   0xa   :  { %v44_v19 = vsub.f32 1.0, %v43_v18 }
   0xc   :  { %v45_v20 = vmul.f32 %v153_v17, %v44_v19 }
   0xe   :  { %40 = vadd.xlane.f32.xlu1 %v39_v14  ;;  %34 = vadd.xlane.f32.xlu0 %v33_v15  ;;  %v46_v21 = vadd.f32 %v153_v17, %v45_v20 }
  0x10   :  { %v48_v22 = vsel %vm47_vm1, %v153_v17, %v46_v21 }
  0x79   :  { %v38_v23 = vpop.xlane.xlu1 %37  ;;  %v32_v25 = vpop.xlane.xlu0 %31 }
  0x7a   :  { %v51_v24 = vmul.f32 %v48_v22, %v38_v23  ;;  %v49_v26 = vmul.f32 %v48_v22, %v32_v25 }
  0x7c   :  { %v216_v27 = vsub.f32 %v27_v3, %v51_v24  ;;  %v218_v28 = vsub.f32 %v25_v5, %v49_v26  ;;  %v150_v5 = vld [vmem:[%s264_s2] ss:$0 sm:$0xff] }
  0x7e   :  { %v59_v29 = vmul.f32 %v216_v27, %v216_v27  ;;  %v57_v30 = vmul.f32 %v218_v28, %v218_v28 }
  0x80   :  { %v67_v31 = vsel %vm29_vm0, %v59_v29, 0.0  ;;  %v61_v33 = vsel %vm29_vm0, %v57_v30, 0.0 }
  0x81   :  { %v41_v32 = vpop.xlane.xlu1 %40  ;;  %68 = vadd.xlane.f32.xlu0 %v67_v31  ;;  %62 = vadd.xlane.f32.xlu2 %v61_v33  ;;  %v35_v35 = vpop.xlane.xlu0 %34 }
  0x82   :  { %v52_v34 = vmul.f32 %v48_v22, %v41_v32  ;;  %v50_v36 = vmul.f32 %v48_v22, %v35_v35 }
  0x84   :  { %v226_v37 = vsub.f32 %v28_v12, %v52_v34  ;;  %v228_v38 = vsub.f32 %v26_v13, %v50_v36 }
  0x86   :  { %v60_v39 = vmul.f32 %v226_v37, %v226_v37  ;;  %v58_v40 = vmul.f32 %v228_v38, %v228_v38 }
  0x88   :  { %v70_v41 = vsel %vm29_vm0, %v60_v39, 0.0  ;;  %v64_v42 = vsel %vm29_vm0, %v58_v40, 0.0 }
  0x89   :  { %71 = vadd.xlane.f32.xlu1 %v70_v41  ;;  %65 = vadd.xlane.f32.xlu2 %v64_v42 }
  0xf4   :  { %v69_v43 = vpop.xlane.xlu0 %68  ;;  %v63_v44 = vpop.xlane.xlu2 %62 }
  0xf5   :  { %v75_v45 = vmul.f32 %v69_v43, %v48_v22  ;;  %v73_v46 = vmul.f32 %v63_v44, %v48_v22 }
  0xf7   :  { %v79_v47 = vadd.f32 1e-05, %v75_v45  ;;  %v77_v48 = vadd.f32 1e-05, %v73_v46 }
  0xf9   :  { %154 = vrsqrt.f32 %v79_v47  ;;  %vm107_vm4 = vweird.f32 %v79_v47  ;;  %vm87_vm5 = vweird.f32 %v77_v48 }
  0xfa   :  { %156 = vrsqrt.f32 %v77_v48 }
  0xfc   :  { %v72_v49 = vpop.xlane.xlu1 %71  ;;  %v66_v51 = vpop.xlane.xlu2 %65 }
  0xfd   :  { %v76_v50 = vmul.f32 %v72_v49, %v48_v22  ;;  %v74_v52 = vmul.f32 %v66_v51, %v48_v22 }
  0xff   :  { %v155_v53 = vpop.eup %154  ;;  %v80_v54 = vadd.f32 1e-05, %v76_v50  ;;  %v78_v57 = vadd.f32 1e-05, %v74_v52 }
 0x100   :  { %v157_v55 = vpop.eup %156  ;;  %v102_v56 = vmul.f32 %v155_v53, %v79_v47  ;;  %vm108_vm2 = vweird.f32 %v155_v53 }
 0x101   :  { %v82_v58 = vmul.f32 %v157_v55, %v77_v48  ;;  %158 = vrsqrt.f32 %v80_v54  ;;  %vm88_vm3 = vweird.f32 %v157_v55  ;;  %vm109_vm6 = vmor %vm107_vm4, %vm108_vm2  ;;  %vm117_vm10 = vweird.f32 %v80_v54 }
 0x102   :  { %v103_v59 = vmul.f32 %v155_v53, %v102_v56  ;;  %160 = vrsqrt.f32 %v78_v57  ;;  %vm89_vm7 = vmor %vm87_vm5, %vm88_vm3  ;;  %vm97_vm12 = vweird.f32 %v78_v57 }
 0x103   :  { %v83_v60 = vmul.f32 %v157_v55, %v82_v58 }
 0x104   :  { %v104_v61 = vmul.f32 0.5, %v103_v59 }
 0x105   :  { %v84_v62 = vmul.f32 0.5, %v83_v60 }
 0x106   :  { %v105_v63 = vsub.f32 1.5, %v104_v61 }
 0x107   :  { %v159_v0 = vpop.eup %158  ;;  %v85_v1 = vsub.f32 1.5, %v84_v62 }
 0x108   :  { %v161_v2 = vpop.eup %160  ;;  %v106_v3 = vmul.f32 %v155_v53, %v105_v63  ;;  %v112_v4 = vmul.f32 %v159_v0, %v80_v54  ;;  %vm118_vm8 = vweird.f32 %v159_v0 }
 0x109   :  { %v86_v6 = vmul.f32 %v157_v55, %v85_v1  ;;  %v92_v7 = vmul.f32 %v161_v2, %v78_v57  ;;  %vm98_vm9 = vweird.f32 %v161_v2  ;;  %vm119_vm11 = vmor %vm117_vm10, %vm118_vm8 }
 0x10a   :  { %v110_v8 = vsel %vm109_vm6, %v155_v53, %v106_v3  ;;  %v113_v9 = vmul.f32 %v159_v0, %v112_v4  ;;  %vm99_vm13 = vmor %vm97_vm12, %vm98_vm9 }
 0x10b   :  { %v90_v11 = vsel %vm89_vm7, %v157_v55, %v86_v6  ;;  %v123_v12 = vmul.f32 %v110_v8, %v216_v27  ;;  %v93_v13 = vmul.f32 %v161_v2, %v92_v7 }
 0x10c   :  { %v121_v14 = vmul.f32 %v90_v11, %v218_v28  ;;  %v114_v15 = vmul.f32 0.5, %v113_v9 }
 0x10d   :  { %v131_v16 = vmul.f32 %v150_v5, %v123_v12  ;;  %v94_v17 = vmul.f32 0.5, %v93_v13 }
 0x10e   :  { %v129_v18 = vmul.f32 %v150_v5, %v121_v14  ;;  %v115_v19 = vsub.f32 1.5, %v114_v15 }
 0x10f   :  { %v139_v20 = vadd.f32 %v151_v10, %v131_v16  ;;  %v95_v21 = vsub.f32 1.5, %v94_v17 }
 0x110   :  { %v137_v22 = vadd.f32 %v151_v10, %v129_v18  ;;  %v116_v23 = vmul.f32 %v159_v0, %v115_v19 }
 0x111   :  { %143 = vst.msk [vmem:[%s266_s4 + $0x10] sm:$0xff] %vm29_vm0, %v139_v20  ;;  %v96_v24 = vmul.f32 %v161_v2, %v95_v21 }
 0x112   :  { %141 = vst.msk [vmem:[%s266_s4] sm:$0xff] %vm29_vm0, %v137_v22  ;;  %v120_v25 = vsel %vm119_vm11, %v159_v0, %v116_v23 }
 0x113   :  { %v124_v26 = vmul.f32 %v120_v25, %v226_v37  ;;  %v100_v27 = vsel %vm99_vm13, %v161_v2, %v96_v24 }
 0x114   :  { %v122_v28 = vmul.f32 %v100_v27, %v228_v38 }
 0x115   :  { %v132_v29 = vmul.f32 %v150_v5, %v124_v26 }
 0x116   :  { %v130_v30 = vmul.f32 %v150_v5, %v122_v28 }
 0x117   :  { %v140_v31 = vadd.f32 %v151_v10, %v132_v29 }
 0x118   :  { %v138_v32 = vadd.f32 %v151_v10, %v130_v30 }
 0x119   :  { %144 = vst.msk [vmem:[%s266_s4 + $0x18] sm:$0xff] %vm29_vm0, %v140_v31 }
 0x11a   :  { %142 = vst.msk [vmem:[%s266_s4 + $0x8] sm:$0xff] %vm29_vm0, %v138_v32 }

// kernel: transformer_forward.51
= control target key start
LH: loop header
LB: loop body
LE: loop exit
PB: predicated region body
PF: predicated region fallthrough
CT: control target
= control target key end

     0   :  { %9 = vsyncpa [#allocation3], 0  ;;  %s150_s18 = smov [#allocation2]   ;;  %s151_s20 = smov 128   ;;  %s228_s0 = inlined_call_operand.vmem [shape: f32[32,32], index: 0, kind: input, shape index: {}]   ;;  %s229_s1 = inlined_call_operand.hbm [shape: f32[32,32], index: 1, kind: input, shape index: {}]   ;;  %s230_s2 = inlined_call_operand.vmem [shape: f32[32,32], index: 2, kind: input, shape index: {}]   ;;  %s231_s3 = inlined_call_operand.vmem [shape: f32[1,32], index: 3, kind: input, shape index: {}]   ;;  %s232_s4 = inlined_call_operand.vmem [shape: f32[32,32], index: 4, kind: output, shape index: {}]  }
   0x1   :  { %s16_s17 = sshll.u32 %s229_s1, 4  ;;  %s18_s19 = sshll.u32 %s150_s18, 4  ;;  %s17_s17 = int_to_ptr.hbm [resolvable:$true] %s16_s17  ;;  %s19_s19 = int_to_ptr.vmem [resolvable:$true] %s18_s19 }
   0x2   :  { %s152_s21 = smov 8  }
   0x3   :  { %24 = dma.hbm_to_vmem [thread:$0]  %s17_s17, 512, %s19_s19, [#allocation3], %s151_s20, %s151_s20, %s152_s21  }
   0x4   :  { %148 = dma.done.wait [#allocation3], 512  }
   0x5   :  { %149 = vsyncadd [#allocation3], 4294966784  ;;  %v48_v0 = vld [vmem:[%s230_s2 + $0x18] sm:$0xff]  ;;  %v47_v1 = vld [vmem:[%s230_s2 + $0x10] sm:$0xff]  ;;  %vm53_vm0 = vcmask 261120  }
   0x6   :  { %109 = vmatpush.msra.mxu2 %v48_v0  ;;  %110 = vmatpush.msra.mxu3 %v48_v0  ;;  %v46_v2 = vld [vmem:[%s230_s2 + $0x8] sm:$0xff]  ;;  %v35_v3 = vld [vmem:[%s228_s0 + $0x10] sm:$0xff]  ;;  %v36_v5 = vld [vmem:[%s228_s0 + $0x18] sm:$0xff] }
   0x7   :  { %v39_v4 = vld [vmem:[#allocation2 + $0x10] sm:$0xff]  ;;  %78 = vmatpush.msra.mxu0 %v48_v0  ;;  %108 = vmatpush.msra.mxu1 %v48_v0  ;;  %v40_v6 = vld [vmem:[#allocation2 + $0x18] sm:$0xff]  ;;  %v33_v7 = vld [vmem:[%s228_s0] sm:$0xff] }
   0x8   :  { %112 = vmatpush.msra.mxu2 %v47_v1  ;;  %113 = vmatpush.msra.mxu3 %v47_v1  ;;  %v37_v8 = vld [vmem:[#allocation2] sm:$0xff]  ;;  %v34_v9 = vld [vmem:[%s228_s0 + $0x8] sm:$0xff]  ;;  %v43_v12 = vadd.f32 %v39_v4, %v35_v3  ;;  %v44_v13 = vadd.f32 %v40_v6, %v36_v5 }
   0x9   :  { %v38_v10 = vld [vmem:[#allocation2 + $0x8] sm:$0xff]  ;;  %v45_v11 = vld [vmem:[%s230_s2] sm:$0xff]  ;;  %79 = vmatpush.msra.mxu0 %v47_v1  ;;  %111 = vmatpush.msra.mxu1 %v47_v1  ;;  %v41_v14 = vadd.f32 %v37_v8, %v33_v7 }
   0xa   :  { %115 = vmatpush.msra.mxu2 %v46_v2  ;;  %116 = vmatpush.msra.mxu3 %v46_v2  ;;  %v42_v15 = vadd.f32 %v38_v10, %v34_v9  ;;  %v123_v16 = vld [vmem:[%s231_s3] ss:$0 sm:$0xff] }
   0xb   :  { %80 = vmatpush.msra.mxu0 %v46_v2  ;;  %114 = vmatpush.msra.mxu1 %v46_v2 }
   0xc   :  { %118 = vmatpush.msra.mxu2 %v45_v11  ;;  %119 = vmatpush.msra.mxu3 %v45_v11 }
   0xd   :  { %106 = vmatmul.msk.f32.vlgmr.msra.gmra.mxu2 %vm53_vm0, %v43_v12  ;;  %107 = vmatmul.msk.f32.vlgmr.msra.gmra.mxu3 %vm53_vm0, %v44_v13 }
   0xe   :  { %81 = vmatpush.msra.mxu0 %v45_v11  ;;  %117 = vmatpush.msra.mxu1 %v45_v11 }
   0xf   :  { %104 = vmatmul.msk.f32.vlgmr.msra.gmra.mxu0 %vm53_vm0, %v41_v14  ;;  %105 = vmatmul.msk.f32.vlgmr.msra.gmra.mxu1 %vm53_vm0, %v42_v15 }
  0x8c   :  { %v83_v17 = vpop.f32.mrf.mxu0  ;;  %v86_v18 = vpop.f32.mrf.mxu1 }
  0x8d   :  { %v84_v19 = vadd.f32 %v123_v16, %v83_v17  ;;  %v87_v20 = vadd.f32 %v123_v16, %v86_v18 }
  0x8f   :  { %95 = vst.msk [vmem:[%s232_s4] sm:$0xff] %vm53_vm0, %v84_v19 }
  0x90   :  { %96 = vst.msk [vmem:[%s232_s4 + $0x8] sm:$0xff] %vm53_vm0, %v87_v20  ;;  %v89_v21 = vpop.f32.mrf.mxu2  ;;  %v92_v22 = vpop.f32.mrf.mxu3 }
  0x91   :  { %v90_v23 = vadd.f32 %v123_v16, %v89_v21  ;;  %v93_v24 = vadd.f32 %v123_v16, %v92_v22 }
  0x93   :  { %97 = vst.msk [vmem:[%s232_s4 + $0x10] sm:$0xff] %vm53_vm0, %v90_v23 }
  0x94   :  { %98 = vst.msk [vmem:[%s232_s4 + $0x18] sm:$0xff] %vm53_vm0, %v93_v24 }
  0x95   :  { %103 = vsyncpa [#allocation3], 1 }

// kernel: transformer_forward.52
= control target key start
LH: loop header
LB: loop body
LE: loop exit
PB: predicated region body
PF: predicated region fallthrough
CT: control target
= control target key end

     0   :  { %9 = vsyncpa [#allocation3], 0  ;;  %s271_s0 = inlined_call_operand.vmem [shape: f32[32,32], index: 0, kind: input, shape index: {}]   ;;  %s272_s1 = inlined_call_operand.hbm [shape: f32[32,32], index: 1, kind: input, shape index: {}]   ;;  %s273_s2 = inlined_call_operand.vmem [shape: f32[32,32], index: 2, kind: input, shape index: {}]   ;;  %s274_s3 = inlined_call_operand.hbm [shape: f32[1,32], index: 3, kind: input, shape index: {}]   ;;  %s275_s4 = inlined_call_operand.vmem [shape: f32[32,32], index: 4, kind: output, shape index: {}]  }
   0x1   :  { %s17_s17 = sshll.u32 %s272_s1, 4  ;;  %s18_s17 = int_to_ptr.hbm [resolvable:$true] %s17_s17 }
   0x2   :  { %10 = vsyncpa [#allocation5], 0  ;;  %s192_s18 = smov [#allocation2]   ;;  %s33_s22 = sshll.u32 %s274_s3, 4  ;;  %s34_s22 = int_to_ptr.hbm [resolvable:$true] %s33_s22 }
   0x3   :  { %s19_s19 = sshll.u32 %s192_s18, 4  ;;  %s193_s23 = smov 128   ;;  %s20_s19 = int_to_ptr.vmem [resolvable:$true] %s19_s19 }
   0x4   :  { %s194_s24 = smov 8   ;;  %s195_s25 = smov [#allocation4]  }
   0x5   :  { %25 = dma.hbm_to_vmem [thread:$0]  %s18_s17, 512, %s20_s19, [#allocation3], %s193_s23, %s193_s23, %s194_s24  }
   0x6   :  { %s35_s26 = sshll.u32 %s195_s25, 4  ;;  %s36_s26 = int_to_ptr.vmem [resolvable:$true] %s35_s26 }
   0x7   :  { %38 = dma.hbm_to_vmem [thread:$0]  %s34_s22, 16, %s36_s26, [#allocation5]  }
   0x8   :  { %188 = dma.done.wait [#allocation3], 512  }
   0x9   :  { %189 = vsyncadd [#allocation3], 4294966784 }
   0xa   :  { %190 = dma.done.wait [#allocation5], 16  }
   0xb   :  { %191 = vsyncadd [#allocation5], 4294967280  ;;  %v62_v0 = vld [vmem:[%s273_s2 + $0x18] sm:$0xff]  ;;  %v61_v1 = vld [vmem:[%s273_s2 + $0x10] sm:$0xff]  ;;  %vm67_vm0 = vcmask 261120  }
   0xc   :  { %124 = vmatpush.msra.mxu2 %v62_v0  ;;  %125 = vmatpush.msra.mxu3 %v62_v0  ;;  %v60_v2 = vld [vmem:[%s273_s2 + $0x8] sm:$0xff]  ;;  %v49_v3 = vld [vmem:[%s271_s0 + $0x10] sm:$0xff]  ;;  %v50_v5 = vld [vmem:[%s271_s0 + $0x18] sm:$0xff] }
   0xd   :  { %v53_v4 = vld [vmem:[#allocation2 + $0x10] sm:$0xff]  ;;  %92 = vmatpush.msra.mxu0 %v62_v0  ;;  %123 = vmatpush.msra.mxu1 %v62_v0  ;;  %v54_v6 = vld [vmem:[#allocation2 + $0x18] sm:$0xff]  ;;  %v47_v7 = vld [vmem:[%s271_s0] sm:$0xff] }
   0xe   :  { %127 = vmatpush.msra.mxu2 %v61_v1  ;;  %128 = vmatpush.msra.mxu3 %v61_v1  ;;  %v51_v8 = vld [vmem:[#allocation2] sm:$0xff]  ;;  %v48_v9 = vld [vmem:[%s271_s0 + $0x8] sm:$0xff]  ;;  %v57_v12 = vadd.f32 %v53_v4, %v49_v3  ;;  %v58_v13 = vadd.f32 %v54_v6, %v50_v5 }
   0xf   :  { %v52_v10 = vld [vmem:[#allocation2 + $0x8] sm:$0xff]  ;;  %v59_v11 = vld [vmem:[%s273_s2] sm:$0xff]  ;;  %93 = vmatpush.msra.mxu0 %v61_v1  ;;  %126 = vmatpush.msra.mxu1 %v61_v1  ;;  %v55_v14 = vadd.f32 %v51_v8, %v47_v7 }
  0x10   :  { %130 = vmatpush.msra.mxu2 %v60_v2  ;;  %131 = vmatpush.msra.mxu3 %v60_v2  ;;  %v56_v15 = vadd.f32 %v52_v10, %v48_v9  ;;  %v139_v16 = vld [vmem:[#allocation4] ss:$0 sm:$0xff] }
  0x11   :  { %94 = vmatpush.msra.mxu0 %v60_v2  ;;  %129 = vmatpush.msra.mxu1 %v60_v2 }
  0x12   :  { %133 = vmatpush.msra.mxu2 %v59_v11  ;;  %134 = vmatpush.msra.mxu3 %v59_v11 }
  0x13   :  { %121 = vmatmul.msk.f32.vlgmr.msra.gmra.mxu2 %vm67_vm0, %v57_v12  ;;  %122 = vmatmul.msk.f32.vlgmr.msra.gmra.mxu3 %vm67_vm0, %v58_v13 }
  0x14   :  { %95 = vmatpush.msra.mxu0 %v59_v11  ;;  %132 = vmatpush.msra.mxu1 %v59_v11 }
  0x15   :  { %119 = vmatmul.msk.f32.vlgmr.msra.gmra.mxu0 %vm67_vm0, %v55_v14  ;;  %120 = vmatmul.msk.f32.vlgmr.msra.gmra.mxu1 %vm67_vm0, %v56_v15 }
  0x92   :  { %v97_v17 = vpop.f32.mrf.mxu0  ;;  %v100_v18 = vpop.f32.mrf.mxu1 }
  0x93   :  { %v98_v19 = vadd.f32 %v139_v16, %v97_v17  ;;  %v101_v20 = vadd.f32 %v139_v16, %v100_v18 }
  0x95   :  { %109 = vst.msk [vmem:[%s275_s4] sm:$0xff] %vm67_vm0, %v98_v19 }
  0x96   :  { %110 = vst.msk [vmem:[%s275_s4 + $0x8] sm:$0xff] %vm67_vm0, %v101_v20  ;;  %v103_v21 = vpop.f32.mrf.mxu2  ;;  %v106_v22 = vpop.f32.mrf.mxu3 }
  0x97   :  { %v104_v23 = vadd.f32 %v139_v16, %v103_v21  ;;  %v107_v24 = vadd.f32 %v139_v16, %v106_v22 }
  0x99   :  { %111 = vst.msk [vmem:[%s275_s4 + $0x10] sm:$0xff] %vm67_vm0, %v104_v23 }
  0x9a   :  { %112 = vst.msk [vmem:[%s275_s4 + $0x18] sm:$0xff] %vm67_vm0, %v107_v24 }
  0x9b   :  { %117 = vsyncpa [#allocation3], 1 }
  0x9c   :  { %118 = vsyncpa [#allocation5], 1 }

// kernel: transformer_forward.53
= control target key start
LH: loop header
LB: loop body
LE: loop exit
PB: predicated region body
PF: predicated region fallthrough
CT: control target
= control target key end

     0   :  { %8 = vsyncpa [#allocation3], 0  ;;  %s135_s15 = smov [#allocation2]   ;;  %s203_s0 = inlined_call_operand.vmem [shape: f32[32,32], index: 0, kind: input, shape index: {}]   ;;  %s204_s1 = inlined_call_operand.vmem [shape: f32[32,32], index: 1, kind: input, shape index: {}]   ;;  %s205_s2 = inlined_call_operand.hbm [shape: f32[1,32], index: 2, kind: input, shape index: {}]   ;;  %s206_s3 = inlined_call_operand.vmem [shape: f32[32,32], index: 3, kind: output, shape index: {}]  }
   0x1   :  { %s18_s14 = sshll.u32 %s205_s2, 4  ;;  %s20_s16 = sshll.u32 %s135_s15, 4  ;;  %s19_s14 = int_to_ptr.hbm [resolvable:$true] %s18_s14  ;;  %s21_s16 = int_to_ptr.vmem [resolvable:$true] %s20_s16 }
   0x2   :  { %23 = dma.hbm_to_vmem [thread:$0]  %s19_s14, 16, %s21_s16, [#allocation3]  }
   0x3   :  { %133 = dma.done.wait [#allocation3], 16  }
   0x4   :  { %134 = vsyncadd [#allocation3], 4294967280  ;;  %v35_v0 = vld [vmem:[%s204_s1 + $0x18] sm:$0xff]  ;;  %v34_v1 = vld [vmem:[%s204_s1 + $0x10] sm:$0xff]  ;;  %vm40_vm0 = vcmask 261120  }
   0x5   :  { %96 = vmatpush.msra.mxu2 %v35_v0  ;;  %97 = vmatpush.msra.mxu3 %v35_v0  ;;  %v33_v2 = vld [vmem:[%s204_s1 + $0x8] sm:$0xff]  ;;  %v32_v3 = vld [vmem:[%s204_s1] sm:$0xff]  ;;  %v30_v4 = vld [vmem:[%s203_s0 + $0x10] sm:$0xff] }
   0x6   :  { %65 = vmatpush.msra.mxu0 %v35_v0  ;;  %95 = vmatpush.msra.mxu1 %v35_v0  ;;  %v31_v5 = vld [vmem:[%s203_s0 + $0x18] sm:$0xff]  ;;  %v28_v6 = vld [vmem:[%s203_s0] sm:$0xff]  ;;  %v29_v7 = vld [vmem:[%s203_s0 + $0x8] sm:$0xff] }
   0x7   :  { %99 = vmatpush.msra.mxu2 %v34_v1  ;;  %100 = vmatpush.msra.mxu3 %v34_v1  ;;  %v108_v8 = vld [vmem:[#allocation2] ss:$0 sm:$0xff] }
   0x8   :  { %66 = vmatpush.msra.mxu0 %v34_v1  ;;  %98 = vmatpush.msra.mxu1 %v34_v1 }
   0x9   :  { %102 = vmatpush.msra.mxu2 %v33_v2  ;;  %103 = vmatpush.msra.mxu3 %v33_v2 }
   0xa   :  { %67 = vmatpush.msra.mxu0 %v33_v2  ;;  %101 = vmatpush.msra.mxu1 %v33_v2 }
   0xb   :  { %105 = vmatpush.msra.mxu2 %v32_v3  ;;  %106 = vmatpush.msra.mxu3 %v32_v3 }
   0xc   :  { %93 = vmatmul.msk.f32.vlgmr.msra.gmra.mxu2 %vm40_vm0, %v30_v4  ;;  %94 = vmatmul.msk.f32.vlgmr.msra.gmra.mxu3 %vm40_vm0, %v31_v5 }
   0xd   :  { %68 = vmatpush.msra.mxu0 %v32_v3  ;;  %104 = vmatpush.msra.mxu1 %v32_v3 }
   0xe   :  { %91 = vmatmul.msk.f32.vlgmr.msra.gmra.mxu0 %vm40_vm0, %v28_v6  ;;  %92 = vmatmul.msk.f32.vlgmr.msra.gmra.mxu1 %vm40_vm0, %v29_v7 }
  0x8b   :  { %v70_v9 = vpop.f32.mrf.mxu0  ;;  %v73_v10 = vpop.f32.mrf.mxu1 }
  0x8c   :  { %v71_v11 = vadd.f32 %v108_v8, %v70_v9  ;;  %v74_v12 = vadd.f32 %v108_v8, %v73_v10 }
  0x8e   :  { %82 = vst.msk [vmem:[%s206_s3] sm:$0xff] %vm40_vm0, %v71_v11 }
  0x8f   :  { %83 = vst.msk [vmem:[%s206_s3 + $0x8] sm:$0xff] %vm40_vm0, %v74_v12  ;;  %v76_v13 = vpop.f32.mrf.mxu2  ;;  %v79_v14 = vpop.f32.mrf.mxu3 }
  0x90   :  { %v77_v15 = vadd.f32 %v108_v8, %v76_v13  ;;  %v80_v16 = vadd.f32 %v108_v8, %v79_v14 }
  0x92   :  { %84 = vst.msk [vmem:[%s206_s3 + $0x10] sm:$0xff] %vm40_vm0, %v77_v15 }
  0x93   :  { %85 = vst.msk [vmem:[%s206_s3 + $0x18] sm:$0xff] %vm40_vm0, %v80_v16 }
  0x94   :  { %90 = vsyncpa [#allocation3], 1 }

// kernel: transformer_forward.55
= control target key start
LH: loop header
LB: loop body
LE: loop exit
PB: predicated region body
PF: predicated region fallthrough
CT: control target
= control target key end

     0   :  { %9 = vsyncpa [#allocation3], 0  ;;  %s348_s0 = inlined_call_operand.vmem [shape: f32[32,32], index: 0, kind: input, shape index: {}]   ;;  %s349_s1 = inlined_call_operand.vmem [shape: f32[32,32], index: 1, kind: input, shape index: {}]   ;;  %s350_s2 = inlined_call_operand.hbm [shape: f32[1,32], index: 2, kind: input, shape index: {}]   ;;  %s351_s3 = inlined_call_operand.hbm [shape: f32[1,32], index: 3, kind: input, shape index: {}]   ;;  %s352_s4 = inlined_call_operand.vmem [shape: f32[32,32], index: 4, kind: output, shape index: {}]  }
   0x1   :  { %s20_s17 = sshll.u32 %s350_s2, 4  ;;  %s21_s17 = int_to_ptr.hbm [resolvable:$true] %s20_s17 }
   0x2   :  { %10 = vsyncpa [#allocation5], 0  ;;  %s246_s18 = smov [#allocation2]   ;;  %s31_s22 = sshll.u32 %s351_s3, 4  ;;  %s32_s22 = int_to_ptr.hbm [resolvable:$true] %s31_s22 }
   0x3   :  { %s22_s19 = sshll.u32 %s246_s18, 4  ;;  %s247_s23 = smov [#allocation4]   ;;  %s23_s19 = int_to_ptr.vmem [resolvable:$true] %s22_s19 }
   0x4   :  { %25 = dma.hbm_to_vmem [thread:$0]  %s21_s17, 16, %s23_s19, [#allocation3]  }
   0x5   :  { %s33_s24 = sshll.u32 %s247_s23, 4  ;;  %s34_s24 = int_to_ptr.vmem [resolvable:$true] %s33_s24 }
   0x6   :  { %36 = dma.hbm_to_vmem [thread:$0]  %s32_s22, 16, %s34_s24, [#allocation5]  }
   0x7   :  { %242 = dma.done.wait [#allocation3], 16  }
   0x8   :  { %243 = vsyncadd [#allocation3], 4294967280 }
   0x9   :  { %244 = dma.done.wait [#allocation5], 16  }
   0xa   :  { %245 = vsyncadd [#allocation5], 4294967280  ;;  %v47_v0 = vld [vmem:[%s348_s0 + $0x10] sm:$0xff]  ;;  %vm57_vm0 = vcmask 261120   ;;  %v45_v2 = vld [vmem:[%s348_s0] sm:$0xff]  ;;  %v248_v16 = vmov 32.0  }
   0xb   :  { %v51_v1 = vld [vmem:[%s349_s1 + $0x10] sm:$0xff]  ;;  %v49_v4 = vld [vmem:[%s349_s1] sm:$0xff]  ;;  %v48_v6 = vld [vmem:[%s348_s0 + $0x18] sm:$0xff]  ;;  %184 = vrcp.f32 %v248_v16 }
   0xc   :  { %v55_v3 = vadd.f32 %v51_v1, %v47_v0  ;;  %v53_v5 = vadd.f32 %v49_v4, %v45_v2  ;;  %v52_v7 = vld [vmem:[%s349_s1 + $0x18] sm:$0xff]  ;;  %v46_v9 = vld [vmem:[%s348_s0 + $0x8] sm:$0xff] }
   0xd   :  { %v50_v10 = vld [vmem:[%s349_s1 + $0x8] sm:$0xff]  ;;  %v56_v12 = vadd.f32 %v52_v7, %v48_v6 }
   0xe   :  { %v64_v8 = vsel %vm57_vm0, %v55_v3, 0.0  ;;  %v58_v11 = vsel %vm57_vm0, %v53_v5, 0.0  ;;  %v54_v13 = vadd.f32 %v50_v10, %v46_v9  ;;  %v183_v10 = vld [vmem:[#allocation4] ss:$0 sm:$0xff] }
   0xf   :  { %65 = vadd.xlane.f32.xlu1 %v64_v8  ;;  %59 = vadd.xlane.f32.xlu0 %v58_v11  ;;  %v67_v14 = vsel %vm57_vm0, %v56_v12, 0.0 }
  0x10   :  { %v61_v15 = vsel %vm57_vm0, %v54_v13, 0.0 }
  0x11   :  { %v185_v17 = vpop.eup %184 }
  0x12   :  { %v71_v18 = vmul.f32 32.0, %v185_v17  ;;  %vm75_vm1 = vweird.f32 %v185_v17 }
  0x14   :  { %v72_v19 = vsub.f32 1.0, %v71_v18 }
  0x16   :  { %v73_v20 = vmul.f32 %v185_v17, %v72_v19 }
  0x17   :  { %68 = vadd.xlane.f32.xlu1 %v67_v14  ;;  %62 = vadd.xlane.f32.xlu0 %v61_v15 }
  0x18   :  { %v74_v21 = vadd.f32 %v185_v17, %v73_v20 }
  0x1a   :  { %v76_v22 = vsel %vm75_vm1, %v185_v17, %v74_v21 }
  0x82   :  { %v66_v23 = vpop.xlane.xlu1 %65  ;;  %v60_v25 = vpop.xlane.xlu0 %59 }
  0x83   :  { %v79_v24 = vmul.f32 %v76_v22, %v66_v23  ;;  %v77_v26 = vmul.f32 %v76_v22, %v60_v25 }
  0x85   :  { %v308_v27 = vsub.f32 %v55_v3, %v79_v24  ;;  %v310_v28 = vsub.f32 %v53_v5, %v77_v26  ;;  %v182_v5 = vld [vmem:[#allocation2] ss:$0 sm:$0xff] }
  0x87   :  { %v87_v29 = vmul.f32 %v308_v27, %v308_v27  ;;  %v85_v30 = vmul.f32 %v310_v28, %v310_v28 }
  0x89   :  { %v95_v31 = vsel %vm57_vm0, %v87_v29, 0.0  ;;  %v89_v33 = vsel %vm57_vm0, %v85_v30, 0.0 }
  0x8a   :  { %v69_v32 = vpop.xlane.xlu1 %68  ;;  %96 = vadd.xlane.f32.xlu0 %v95_v31  ;;  %90 = vadd.xlane.f32.xlu2 %v89_v33  ;;  %v63_v35 = vpop.xlane.xlu0 %62 }
  0x8b   :  { %v80_v34 = vmul.f32 %v76_v22, %v69_v32  ;;  %v78_v36 = vmul.f32 %v76_v22, %v63_v35 }
  0x8d   :  { %v318_v37 = vsub.f32 %v56_v12, %v80_v34  ;;  %v320_v38 = vsub.f32 %v54_v13, %v78_v36 }
  0x8f   :  { %v88_v39 = vmul.f32 %v318_v37, %v318_v37  ;;  %v86_v40 = vmul.f32 %v320_v38, %v320_v38 }
  0x91   :  { %v98_v41 = vsel %vm57_vm0, %v88_v39, 0.0  ;;  %v92_v42 = vsel %vm57_vm0, %v86_v40, 0.0 }
  0x92   :  { %99 = vadd.xlane.f32.xlu1 %v98_v41  ;;  %93 = vadd.xlane.f32.xlu2 %v92_v42 }
  0xfd   :  { %v97_v43 = vpop.xlane.xlu0 %96  ;;  %v91_v44 = vpop.xlane.xlu2 %90 }
  0xfe   :  { %v103_v45 = vmul.f32 %v97_v43, %v76_v22  ;;  %v101_v46 = vmul.f32 %v91_v44, %v76_v22 }
 0x100   :  { %v107_v47 = vadd.f32 1e-05, %v103_v45  ;;  %v105_v48 = vadd.f32 1e-05, %v101_v46 }
 0x102   :  { %186 = vrsqrt.f32 %v107_v47  ;;  %vm135_vm4 = vweird.f32 %v107_v47  ;;  %vm115_vm5 = vweird.f32 %v105_v48 }
 0x103   :  { %188 = vrsqrt.f32 %v105_v48 }
 0x105   :  { %v100_v49 = vpop.xlane.xlu1 %99  ;;  %v94_v51 = vpop.xlane.xlu2 %93 }
 0x106   :  { %v104_v50 = vmul.f32 %v100_v49, %v76_v22  ;;  %v102_v52 = vmul.f32 %v94_v51, %v76_v22 }
 0x108   :  { %v187_v53 = vpop.eup %186  ;;  %v108_v54 = vadd.f32 1e-05, %v104_v50  ;;  %v106_v57 = vadd.f32 1e-05, %v102_v52 }
 0x109   :  { %v189_v55 = vpop.eup %188  ;;  %v130_v56 = vmul.f32 %v187_v53, %v107_v47  ;;  %vm136_vm2 = vweird.f32 %v187_v53 }
 0x10a   :  { %v110_v58 = vmul.f32 %v189_v55, %v105_v48  ;;  %190 = vrsqrt.f32 %v108_v54  ;;  %vm116_vm3 = vweird.f32 %v189_v55  ;;  %vm137_vm6 = vmor %vm135_vm4, %vm136_vm2  ;;  %vm145_vm10 = vweird.f32 %v108_v54 }
 0x10b   :  { %v131_v59 = vmul.f32 %v187_v53, %v130_v56  ;;  %192 = vrsqrt.f32 %v106_v57  ;;  %vm117_vm7 = vmor %vm115_vm5, %vm116_vm3  ;;  %vm125_vm12 = vweird.f32 %v106_v57 }
 0x10c   :  { %v111_v60 = vmul.f32 %v189_v55, %v110_v58 }
 0x10d   :  { %v132_v61 = vmul.f32 0.5, %v131_v59 }
 0x10e   :  { %v112_v62 = vmul.f32 0.5, %v111_v60 }
 0x10f   :  { %v133_v63 = vsub.f32 1.5, %v132_v61 }
 0x110   :  { %v191_v0 = vpop.eup %190  ;;  %v113_v1 = vsub.f32 1.5, %v112_v62 }
 0x111   :  { %v193_v2 = vpop.eup %192  ;;  %v134_v3 = vmul.f32 %v187_v53, %v133_v63  ;;  %v140_v4 = vmul.f32 %v191_v0, %v108_v54  ;;  %vm146_vm8 = vweird.f32 %v191_v0 }
 0x112   :  { %v114_v6 = vmul.f32 %v189_v55, %v113_v1  ;;  %v120_v7 = vmul.f32 %v193_v2, %v106_v57  ;;  %vm126_vm9 = vweird.f32 %v193_v2  ;;  %vm147_vm11 = vmor %vm145_vm10, %vm146_vm8 }
 0x113   :  { %v138_v8 = vsel %vm137_vm6, %v187_v53, %v134_v3  ;;  %v141_v9 = vmul.f32 %v191_v0, %v140_v4  ;;  %vm127_vm13 = vmor %vm125_vm12, %vm126_vm9 }
 0x114   :  { %v118_v11 = vsel %vm117_vm7, %v189_v55, %v114_v6  ;;  %v151_v12 = vmul.f32 %v138_v8, %v308_v27  ;;  %v121_v13 = vmul.f32 %v193_v2, %v120_v7 }
 0x115   :  { %v149_v14 = vmul.f32 %v118_v11, %v310_v28  ;;  %v142_v15 = vmul.f32 0.5, %v141_v9 }
 0x116   :  { %v159_v16 = vmul.f32 %v182_v5, %v151_v12  ;;  %v122_v17 = vmul.f32 0.5, %v121_v13 }
 0x117   :  { %v157_v18 = vmul.f32 %v182_v5, %v149_v14  ;;  %v143_v19 = vsub.f32 1.5, %v142_v15 }
 0x118   :  { %v167_v20 = vadd.f32 %v183_v10, %v159_v16  ;;  %v123_v21 = vsub.f32 1.5, %v122_v17 }
 0x119   :  { %v165_v22 = vadd.f32 %v183_v10, %v157_v18  ;;  %v144_v23 = vmul.f32 %v191_v0, %v143_v19 }
 0x11a   :  { %171 = vst.msk [vmem:[%s352_s4 + $0x10] sm:$0xff] %vm57_vm0, %v167_v20  ;;  %v124_v24 = vmul.f32 %v193_v2, %v123_v21 }
 0x11b   :  { %169 = vst.msk [vmem:[%s352_s4] sm:$0xff] %vm57_vm0, %v165_v22  ;;  %v148_v25 = vsel %vm147_vm11, %v191_v0, %v144_v23 }
 0x11c   :  { %v152_v26 = vmul.f32 %v148_v25, %v318_v37  ;;  %v128_v27 = vsel %vm127_vm13, %v193_v2, %v124_v24 }
 0x11d   :  { %v150_v28 = vmul.f32 %v128_v27, %v320_v38 }
 0x11e   :  { %v160_v29 = vmul.f32 %v182_v5, %v152_v26 }
 0x11f   :  { %v158_v30 = vmul.f32 %v182_v5, %v150_v28 }
 0x120   :  { %v168_v31 = vadd.f32 %v183_v10, %v160_v29 }
 0x121   :  { %v166_v32 = vadd.f32 %v183_v10, %v158_v30 }
 0x122   :  { %172 = vst.msk [vmem:[%s352_s4 + $0x18] sm:$0xff] %vm57_vm0, %v168_v31 }
 0x123   :  { %170 = vst.msk [vmem:[%s352_s4 + $0x8] sm:$0xff] %vm57_vm0, %v166_v32 }
 0x124   :  { %177 = vsyncpa [#allocation3], 1 }
 0x125   :  { %178 = vsyncpa [#allocation5], 1 }

// kernel: transformer_forward.54
= control target key start
LH: loop header
LB: loop body
LE: loop exit
PB: predicated region body
PF: predicated region fallthrough
CT: control target
= control target key end

     0   :  { %11 = vsyncpa [#allocation3], 0  ;;  %s1545_s0 = inlined_call_operand.vmem [shape: f32[2,16,32], index: 0, kind: input, shape index: {}]   ;;  %s1546_s1 = inlined_call_operand.vmem [shape: f32[2,16,32], index: 1, kind: input, shape index: {}]   ;;  %s1547_s2 = inlined_call_operand.vmem [shape: f32[2,16,32], index: 2, kind: input, shape index: {}]   ;;  %s1548_s3 = inlined_call_operand.vmem [shape: f32[2,1,16], index: 3, kind: input, shape index: {}]   ;;  %s1549_s4 = inlined_call_operand.hbm [shape: f32[32,32], index: 4, kind: input, shape index: {}]   ;;  %s1550_s5 = inlined_call_operand.hbm [shape: f32[1,32], index: 5, kind: input, shape index: {}]   ;;  %s1551_s6 = inlined_call_operand.vmem [shape: f32[2,16,32], index: 6, kind: output, shape index: {}]  }
   0x1   :  { %12 = vsyncpa [#allocation5], 0  ;;  %s1345_s21 = smov 0  }
   0x2 LB: > { %s206_s24 = sshll.u32 %s1549_s4, 4  ;;  %s1089_s25 = sadd.s32 4294967295, %s1301_s21   ;;  %s1301_s21 = sphi %s1345_s21, %s18_s21   ;;  %s207_s24 = int_to_ptr.hbm [resolvable:$true] %s206_s24 }
   0x3   : > { %p1091_p0 = scmp.ge.s32.totalorder %s1301_s21, 1  ;;  %p195_p1 = scmp.lt.s32.totalorder %s1301_s21, 3 }
   0x4   : > { %p1159_p2 = scmp.eq.s32.totalorder %s1089_s25, 0  ;;  %s1303_s27 = smov [#allocation2]  }
   0x5   : > { %p1356_p3 = pnand %p1091_p0, %p195_p1  ;;  %s208_s28 = sshll.u32 %s1303_s27, 4  ;;  %s209_s28 = int_to_ptr.vmem [resolvable:$true] %s208_s28 }
   0x6   : > { %s221_s7 = sshll.u32 %s1550_s5, 4  ;;  %s1304_s8 = smov [#allocation4]   ;;  %s222_s7 = int_to_ptr.hbm [resolvable:$true] %s221_s7 }
   0x7   : > { %p1152_p4 = pneg %p1356_p3  ;;  %s223_s9 = sshll.u32 %s1304_s8, 4  ;;  %s224_s9 = int_to_ptr.vmem [resolvable:$true] %s223_s9 }
   0x8   : > { %s1305_s10 = smov 128   ;;  %s1306_s11 = smov 8  }
   0x9   : > { %p1153_p5 = pnand %p1159_p2, %p1152_p4  ;;  %266 = sbr.rel (%p1356_p3) target bundleno = 1252 (0x4e4), region = 44 }
   0xb   : > { %1155 = dma.hbm_to_vmem [thread:$0]  (!%p1153_p5), %s207_s24, 512, %s209_s28, [#allocation3], %s1305_s10, %s1305_s10, %s1306_s11  }
   0xc   : > { %1158 = dma.hbm_to_vmem [thread:$0]  (!%p1153_p5), %s222_s7, 16, %s224_s9, [#allocation5]  }
   0xe   : > { %1292 = dma.done.wait (%p1159_p2), [#allocation3], 512  }
   0xf   : > { %1294 = vsyncadd (%p1159_p2), [#allocation3], 4294966784 }
  0x10   : > { %1296 = dma.done.wait (%p1159_p2), [#allocation5], 16  }
  0x11   : > { %1298 = vsyncadd (%p1159_p2), [#allocation5], 4294967280  ;;  %p315_p6 = scmp.lt.s32.totalorder %s1089_s25, 1  ;;  %vm345_vm0 = vcmask 64512   ;;  %s1307_s23 = smov 120   ;;  %vm388_vm1 = vcmask 130048  }
  0x12   : > { %s1308_s27 = smov 104   ;;  %s1309_s28 = smov 112  }
  0x13   : > { %s1556_s25 = smov (!%p315_p6, %s1089_s25), 1 }
  0x14   : > { %s1372_s12 = sshll.u32 %s1556_s25, 4  ;;  %s332_s18 = scalar_lea.vmem %s1548_s3, %s1556_s25 }
  0x15   : > { %s324_s15 = scalar_lea.vmem %s1546_s1, %s1372_s12  ;;  %s319_s22 = scalar_lea.vmem %s1545_s0, %s1372_s12  ;;  %v1412_v7 = vld [vmem:[%s332_s18] ss:$0 sm:$0xff] }
  0x16   : > { %v1385_v0 = vld [vmem:[%s324_s15 + $0x8] sm:$0xff]  ;;  %v1391_v1 = vld [vmem:[%s319_s22] sm:$0xff]  ;;  %s329_s26 = scalar_lea.vmem %s1547_s2, %s1372_s12  ;;  %s337_s7 = scalar_lea.vmem %s1551_s6, %s1372_s12 }
  0x17   : > { %473 = vrot.lane.b32.xlu0 %v1385_v0, %s1307_s23  ;;  %1106 = vmatpush.xpose.msk.msra.mxu0 %vm345_vm0, %v1385_v0  ;;  %v1393_v2 = vld [vmem:[%s324_s15] sm:$0xff]  ;;  %v1403_v3 = vld [vmem:[%s319_s22 + $0x8] sm:$0xff] }
  0x18   : > { %467 = vrot.lane.b32.xlu1 %v1391_v1, %s1307_s23  ;;  %v343_v17 = vld [vmem:[%s329_s26 + $0x8] sm:$0xff]  ;;  %v342_v18 = vld [vmem:[%s329_s26] sm:$0xff] }
  0x19   : > { %457 = vmatpush.msra.mxu1 %v343_v17  ;;  %v1434_v37 = vpack.i.bf16 %v342_v18, %v343_v17 }
  0x1b   : > { %1107 = vmatpush.xpose.msk.msra.mxu0 %vm345_vm0, %v1393_v2  ;;  %458 = vmatpush.msra.mxu1 %v342_v18 }
  0x1e   : > { %1108 = vmatmul.msk.f32.vlgmr.msra.gmra.mxu0 %vm345_vm0, %v1391_v1 }
  0x1f   : > { %471 = vrot.lane.b32.xlu0 %v1393_v2, %s1307_s23 }
  0x20   : > { %469 = vrot.lane.b32.xlu1 %v1403_v3, %s1307_s23 }
  0x26   : > { %1109 = vmatmul.msk.f32.gmra.mxu0 %vm345_vm0, %v1403_v3 }
  0x89   : > { %v474_v4 = vpop.permute.xlu0 %473 }
  0x8a   : > { %1112 = vmatpush.xpose.msk.msra.mxu2 %vm345_vm0, %v474_v4  ;;  %v468_v5 = vpop.permute.xlu1 %467 }
  0x91   : > { %v472_v6 = vpop.permute.xlu0 %471 }
  0x92   : > { %1113 = vmatpush.xpose.msk.msra.mxu2 %vm345_vm0, %v472_v6  ;;  %v470_v8 = vpop.permute.xlu1 %469 }
  0x95   : > { %1114 = vmatmul.msk.f32.vlgmr.msra.gmra.mxu2 %vm345_vm0, %v468_v5 }
  0x9b   : > { %v375_v9 = vpop.f32.mrf.mxu0 }
  0x9c   : > { %v381_v10 = vmul.f32 0.35355338, %v375_v9 }
  0x9d   : > { %1115 = vmatmul.msk.f32.gmra.mxu2 %vm345_vm0, %v470_v8 }
  0x9e   : > { %v386_v11 = vadd.f32 %v1412_v7, %v381_v10 }
  0xa0   : > { %v389_v12 = vsel %vm388_vm1, %v386_v11, -inf }
  0xa1   : > { %390 = vmax.xlane.f32.xlu2 %v389_v12 }
  0xa3   : > { %v378_v13 = vpop.f32.mrf.mxu0 }
  0xa4   : > { %v382_v14 = vmul.f32 0.35355338, %v378_v13 }
  0xa6   : > { %v387_v15 = vadd.f32 %v1412_v7, %v382_v14 }
  0xa8   : > { %v392_v16 = vsel %vm388_vm1, %v387_v15, -inf }
  0xa9   : > { %393 = vmax.xlane.f32.xlu2 %v392_v16 }
 0x114   : > { %v391_v19 = vpop.xlane.xlu2 %390 }
 0x115   : > { %v395_v20 = vsub.f32 %v386_v11, %v391_v19 }
 0x117   : > { %v397_v21 = vmul.f32 1.442695, %v395_v20 }
 0x118   : > { %v500_v22 = vpop.f32.mrf.mxu2 }
 0x119   : > { %1195 = vpow2.f32 %v397_v21  ;;  %v506_v23 = vmul.f32 0.35355338, %v500_v22 }
 0x11b   : > { %v508_v24 = vadd.f32 %v1412_v7, %v506_v23 }
 0x11c   : > { %v394_v25 = vpop.xlane.xlu2 %393 }
 0x11d   : > { %v396_v26 = vsub.f32 %v387_v15, %v394_v25  ;;  %v510_v27 = vsel %vm388_vm1, %v508_v24, -inf  ;;  %v466_v15 = vld [vmem:[#allocation2] sm:$0xff] }
 0x11e   : > { %511 = vmax.xlane.f32.xlu2 %v510_v27 }
 0x11f   : > { %v1196_v28 = vpop.eup %1195  ;;  %v399_v29 = vmul.f32 1.442695, %v396_v26 }
 0x120   : > { %v503_v30 = vpop.f32.mrf.mxu2  ;;  %v401_v31 = vsel %vm388_vm1, %v1196_v28, 0.0 }
 0x121   : > { %1197 = vpow2.f32 %v399_v29  ;;  %v507_v32 = vmul.f32 0.35355338, %v503_v30  ;;  %402 = vadd.xlane.f32.xlu0 %v401_v31 }
 0x123   : > { %v509_v33 = vadd.f32 %v1412_v7, %v507_v32 }
 0x125   : > { %v513_v34 = vsel %vm388_vm1, %v509_v33, -inf }
 0x126   : > { %514 = vmax.xlane.f32.xlu2 %v513_v34 }
 0x127   : > { %v1428_v35 = vpop.eup %1197 }
 0x128   : > { %v404_v36 = vsel %vm388_vm1, %v1428_v35, 0.0 }
 0x129   : > { %405 = vadd.xlane.f32.xlu1 %v404_v36 }
 0x135   : > { %818 = vrot.lane.b32.xlu0 %v1385_v0, %s1308_s27 }
 0x13d   : > { %812 = vrot.lane.b32.xlu0 %v1391_v1, %s1308_s27 }
 0x13e   : > { %1179 = vrot.lane.b32.xlu2 %v1434_v37, %s1307_s23 }
 0x142   : > { %660 = vrot.lane.b32.xlu1 %v1385_v0, %s1309_s28 }
 0x145   : > { %814 = vrot.lane.b32.xlu0 %v1403_v3, %s1308_s27 }
 0x14a   : > { %654 = vrot.lane.b32.xlu1 %v1391_v1, %s1309_s28 }
 0x191   : > { %v512_v38 = vpop.xlane.xlu2 %511 }
 0x192   : > { %v516_v39 = vsub.f32 %v508_v24, %v512_v38 }
 0x194   : > { %v518_v40 = vmul.f32 1.442695, %v516_v39  ;;  %v403_v41 = vpop.xlane.xlu0 %402 }
 0x195   : > { %1199 = vrcp.f32 %v403_v41  ;;  %v418_v51 = vand.u32 2147483648, %v403_v41  ;;  %v416_v53 = vand.u32 2147483647, %v403_v41  ;;  %vm412_vm3 = vweird.f32 %v403_v41 }
 0x196   : > { %1201 = vpow2.f32 %v518_v40 }
 0x197   : > { %v419_v56 = vor.u32 1.1754944e-38, %v418_v51  ;;  %vm417_vm5 = vcmp.eq.f32.partialorder %v416_v53, 8.507059e+37 }
 0x199   : > { %v515_v42 = vpop.xlane.xlu2 %514 }
 0x19a   : > { %v517_v43 = vsub.f32 %v509_v33, %v515_v42 }
 0x19b   : > { %v1200_v44 = vpop.eup %1199 }
 0x19c   : > { %v1446_v45 = vpop.eup %1201  ;;  %v408_v46 = vmul.f32 %v1200_v44, %v403_v41  ;;  %v520_v47 = vmul.f32 1.442695, %v517_v43  ;;  %v406_v48 = vpop.xlane.xlu1 %405  ;;  %vm413_vm2 = vweird.f32 %v1200_v44 }
 0x19d   : > { %1203 = vrcp.f32 %v406_v48  ;;  %v522_v49 = vsel %vm388_vm1, %v1446_v45, 0.0  ;;  %vm414_vm4 = vmor %vm412_vm3, %vm413_vm2  ;;  %v433_v5 = vand.u32 2147483648, %v406_v48  ;;  %v431_v8 = vand.u32 2147483647, %v406_v48 }
 0x19e   : > { %v409_v50 = vsub.f32 1.0, %v408_v46  ;;  %1205 = vpow2.f32 %v520_v47  ;;  %523 = vadd.xlane.f32.xlu2 %v522_v49  ;;  %vm427_vm7 = vweird.f32 %v406_v48 }
 0x19f   : > { %v434_v10 = vor.u32 1.1754944e-38, %v433_v5  ;;  %vm432_vm9 = vcmp.eq.f32.partialorder %v431_v8, 8.507059e+37 }
 0x1a0   : > { %v410_v52 = vmul.f32 %v1200_v44, %v409_v50 }
 0x1a1   : > { %v1180_v57 = vpop.permute.xlu2 %1179 }
 0x1a2   : > { %v411_v54 = vadd.f32 %v1200_v44, %v410_v52  ;;  %v1181_v1 = vunpack.i.l.bf16 %v1180_v57  ;;  %v1182_v4 = vunpack.i.h.bf16 %v1180_v57 }
 0x1a3   : > { %v1204_v55 = vpop.eup %1203 }
 0x1a4   : > { %v1450_v58 = vpop.eup %1205  ;;  %v423_v59 = vmul.f32 %v1204_v55, %v406_v48  ;;  %v415_v60 = vsel %vm414_vm4, %v1200_v44, %v411_v54  ;;  %vm428_vm6 = vweird.f32 %v1204_v55  ;;  %586 = vmatpush.msra.mxu3 %v1181_v1  ;;  %v595_v48 = vld [vmem:[#allocation2 + $0x8] sm:$0xff] }
 0x1a5   : > { %v525_v61 = vsel %vm388_vm1, %v1450_v58, 0.0  ;;  %v420_v62 = vsel %vm417_vm5, %v419_v56, %v415_v60  ;;  %vm429_vm8 = vmor %vm427_vm7, %vm428_vm6  ;;  %617 = vmatpush.msrb.mxu1 %v595_v48 }
 0x1a6   : > { %v424_v63 = vsub.f32 1.0, %v423_v59  ;;  %526 = vadd.xlane.f32.xlu2 %v525_v61  ;;  %v421_v0 = vmul.f32 %v1196_v28, %v420_v62  ;;  %587 = vmatpush.msra.mxu3 %v1182_v4 }
 0x1a7   : > { %v819_v30 = vpop.permute.xlu0 %818 }
 0x1a8   : > { %v425_v6 = vmul.f32 %v1204_v55, %v424_v63  ;;  %1110 = vmatmul.msk.f32.vlgmr.msra.gmra.mxu1 %vm388_vm1, %v421_v0  ;;  %646 = vmatpush.msrb.mxu3 %v466_v15 }
 0x1aa   : > { %v426_v9 = vadd.f32 %v1204_v55, %v425_v6 }
 0x1ac   : > { %v430_v11 = vsel %vm429_vm8, %v1204_v55, %v426_v9 }
 0x1ad   : > { %v435_v12 = vsel %vm432_vm9, %v434_v10, %v430_v11 }
 0x1ae   : > { %v436_v13 = vmul.f32 %v1428_v35, %v435_v12 }
 0x1af   : > { %v813_v46 = vpop.permute.xlu0 %812 }
 0x1b0   : > { %1111 = vmatmul.msk.f32.gmra.mxu1 %vm388_vm1, %v436_v13 }
 0x1b4   : > { %v661_v14 = vpop.permute.xlu1 %660 }
 0x1b5   : > { %1122 = vmatpush.xpose.msk.msrb.mxu0 %vm345_vm0, %v661_v14 }
 0x1b7   : > { %v815_v47 = vpop.permute.xlu0 %814 }
 0x1bc   : > { %v655_v40 = vpop.permute.xlu1 %654 }
 0x1be   : > { %816 = vrot.lane.b32.xlu2 %v1393_v2, %s1308_s27 }
 0x1c6   : > { %658 = vrot.lane.b32.xlu2 %v1393_v2, %s1309_s28 }
 0x1ce   : > { %656 = vrot.lane.b32.xlu2 %v1403_v3, %s1309_s28 }
 0x211   : > { %v524_v16 = vpop.xlane.xlu2 %523 }
 0x212   : > { %1207 = vrcp.f32 %v524_v16  ;;  %v539_v21 = vand.u32 2147483648, %v524_v16  ;;  %v537_v23 = vand.u32 2147483647, %v524_v16  ;;  %vm533_vm11 = vweird.f32 %v524_v16 }
 0x214   : > { %v540_v3 = vor.u32 1.1754944e-38, %v539_v21  ;;  %vm538_vm13 = vcmp.eq.f32.partialorder %v537_v23, 8.507059e+37 }
 0x218   : > { %v1208_v17 = vpop.eup %1207 }
 0x219   : > { %v529_v18 = vmul.f32 %v1208_v17, %v524_v16  ;;  %v527_v19 = vpop.xlane.xlu2 %526  ;;  %vm534_vm10 = vweird.f32 %v1208_v17 }
 0x21a   : > { %1209 = vrcp.f32 %v527_v19  ;;  %vm535_vm12 = vmor %vm533_vm11, %vm534_vm10  ;;  %v554_v32 = vand.u32 2147483648, %v527_v19  ;;  %v552_v34 = vand.u32 2147483647, %v527_v19  ;;  %vm548_vm15 = vweird.f32 %v527_v19 }
 0x21b   : > { %v530_v20 = vsub.f32 1.0, %v529_v18 }
 0x21c   : > { %v555_v36 = vor.u32 1.1754944e-38, %v554_v32  ;;  %vm553_vm3 = vcmp.eq.f32.partialorder %v552_v34, 8.507059e+37 }
 0x21d   : > { %v531_v22 = vmul.f32 %v1208_v17, %v530_v20 }
 0x21f   : > { %v532_v2 = vadd.f32 %v1208_v17, %v531_v22 }
 0x220   : > { %v1210_v24 = vpop.eup %1209 }
 0x221   : > { %v544_v25 = vmul.f32 %v1210_v24, %v527_v19  ;;  %v817_v26 = vpop.permute.xlu2 %816  ;;  %v536_v27 = vsel %vm535_vm12, %v1208_v17, %v532_v2  ;;  %vm549_vm14 = vweird.f32 %v1210_v24 }
 0x222   : > { %v541_v28 = vsel %vm538_vm13, %v540_v3, %v536_v27  ;;  %vm550_vm2 = vmor %vm548_vm15, %vm549_vm14 }
 0x223   : > { %v545_v29 = vsub.f32 1.0, %v544_v25  ;;  %v542_v31 = vmul.f32 %v1446_v45, %v541_v28 }
 0x225   : > { %v546_v33 = vmul.f32 %v1210_v24, %v545_v29  ;;  %1116 = vmatmul.msk.f32.vlgmr.msra.gmra.mxu3 %vm388_vm1, %v542_v31  ;;  %v460_v43 = vpop.f32.mrf.mxu1  ;;  %v780_v31 = vld [vmem:[#allocation2 + $0x10] sm:$0xff] }
 0x226   : > { %1130 = vmatpush.xpose.msk.msra.mxu3 %vm345_vm0, %v819_v30  ;;  %802 = vmatpush.msra.mxu1 %v780_v31 }
 0x227   : > { %v547_v35 = vadd.f32 %v1210_v24, %v546_v33 }
 0x229   : > { %v659_v38 = vpop.permute.xlu2 %658  ;;  %v551_v39 = vsel %vm550_vm2, %v1210_v24, %v547_v35 }
 0x22a   : > { %1123 = vmatpush.xpose.msk.msrb.mxu0 %vm345_vm0, %v659_v38  ;;  %1131 = vmatpush.xpose.msk.msra.mxu3 %vm345_vm0, %v817_v26  ;;  %v556_v41 = vsel %vm553_vm3, %v555_v36, %v551_v39 }
 0x22b   : > { %v557_v42 = vmul.f32 %v1450_v58, %v556_v41 }
 0x22d   : > { %1117 = vmatmul.msk.f32.gmra.mxu3 %vm388_vm1, %v557_v42  ;;  %1124 = vmatmul.msk.f32.vlgmr.msrb.gmra.mxu0 %vm345_vm0, %v655_v40  ;;  %v463_v45 = vpop.f32.mrf.mxu1 }
 0x231   : > { %v657_v44 = vpop.permute.xlu2 %656 }
 0x235   : > { %1120 = vmatmul.msk.f32.vlgmr.msrb.gmra.mxu3 %vm345_vm0, %v460_v43  ;;  %1125 = vmatmul.msk.f32.gmra.mxu0 %vm345_vm0, %v657_v44 }
 0x23d   : > { %1121 = vmatmul.msk.f32.gmra.mxu3 %vm345_vm0, %v463_v45 }
 0x245   : > { %1132 = vmatmul.msk.f32.vlgmr.msra.gmra.mxu3 %vm345_vm0, %v813_v46 }
 0x24d   : > { %1133 = vmatmul.msk.f32.gmra.mxu3 %vm345_vm0, %v815_v47 }
 0x2a8   : > { %v589_v49 = vpop.f32.mrf.mxu3 }
 0x2a9   : > { %1118 = vmatmul.msk.f32.vlgmr.msrb.gmra.mxu1 %vm345_vm0, %v589_v49 }
 0x2aa   : > { %v687_v50 = vpop.f32.mrf.mxu0 }
 0x2ab   : > { %v693_v51 = vmul.f32 0.35355338, %v687_v50 }
 0x2ad   : > { %v695_v52 = vadd.f32 %v1412_v7, %v693_v51 }
 0x2af   : > { %v697_v53 = vsel %vm388_vm1, %v695_v52, -inf }
 0x2b0   : > { %698 = vmax.xlane.f32.xlu1 %v697_v53  ;;  %v592_v54 = vpop.f32.mrf.mxu3 }
 0x2b1   : > { %1119 = vmatmul.msk.f32.gmra.mxu1 %vm345_vm0, %v592_v54 }
 0x2b2   : > { %v690_v55 = vpop.f32.mrf.mxu0 }
 0x2b3   : > { %v694_v56 = vmul.f32 0.35355338, %v690_v55 }
 0x2b5   : > { %v696_v57 = vadd.f32 %v1412_v7, %v694_v56 }
 0x2b7   : > { %v700_v58 = vsel %vm388_vm1, %v696_v57, -inf }
 0x2b8   : > { %701 = vmax.xlane.f32.xlu2 %v700_v58  ;;  %v1483_v59 = vpop.f32.mrf.mxu3 }
 0x2c0   : > { %v1485_v60 = vpop.f32.mrf.mxu3 }
 0x2c8   : > { %v845_v61 = vpop.f32.mrf.mxu3 }
 0x2c9   : > { %v851_v62 = vmul.f32 0.35355338, %v845_v61 }
 0x2cb   : > { %v853_v63 = vadd.f32 %v1412_v7, %v851_v62  ;;  %v938_v62 = vld [vmem:[#allocation2 + $0x18] sm:$0xff] }
 0x2cd   : > { %v855_v0 = vsel %vm388_vm1, %v853_v63, -inf }
 0x2ce   : > { %856 = vmax.xlane.f32.xlu0 %v855_v0 }
 0x2d0   : > { %v848_v1 = vpop.f32.mrf.mxu3 }
 0x2d1   : > { %v852_v4 = vmul.f32 0.35355338, %v848_v1 }
 0x2d3   : > { %v854_v5 = vadd.f32 %v1412_v7, %v852_v4 }
 0x2d5   : > { %v858_v6 = vsel %vm388_vm1, %v854_v5, -inf }
 0x2d6   : > { %859 = vmax.xlane.f32.xlu1 %v858_v6 }
 0x323   : > { %v699_v8 = vpop.xlane.xlu1 %698 }
 0x324   : > { %v703_v9 = vsub.f32 %v695_v52, %v699_v8 }
 0x326   : > { %v705_v10 = vmul.f32 1.442695, %v703_v9 }
 0x328   : > { %1211 = vpow2.f32 %v705_v10 }
 0x32b   : > { %v702_v11 = vpop.xlane.xlu2 %701 }
 0x32c   : > { %v704_v12 = vsub.f32 %v696_v57, %v702_v11 }
 0x32e   : > { %v1491_v13 = vpop.eup %1211  ;;  %v707_v14 = vmul.f32 1.442695, %v704_v12 }
 0x32f   : > { %v709_v15 = vsel %vm388_vm1, %v1491_v13, 0.0 }
 0x330   : > { %1213 = vpow2.f32 %v707_v14  ;;  %710 = vadd.xlane.f32.xlu0 %v709_v15 }
 0x336   : > { %v1495_v16 = vpop.eup %1213 }
 0x337   : > { %v712_v7 = vsel %vm388_vm1, %v1495_v16, 0.0 }
 0x338   : > { %713 = vadd.xlane.f32.xlu1 %v712_v7 }
 0x341   : > { %v857_v17 = vpop.xlane.xlu0 %856 }
 0x342   : > { %v861_v18 = vsub.f32 %v853_v63, %v857_v17 }
 0x344   : > { %v863_v19 = vmul.f32 1.442695, %v861_v18 }
 0x346   : > { %1215 = vpow2.f32 %v863_v19 }
 0x349   : > { %v860_v20 = vpop.xlane.xlu1 %859 }
 0x34a   : > { %v862_v21 = vsub.f32 %v854_v5, %v860_v20 }
 0x34c   : > { %v1499_v22 = vpop.eup %1215  ;;  %v865_v23 = vmul.f32 1.442695, %v862_v21 }
 0x34d   : > { %v867_v2 = vsel %vm388_vm1, %v1499_v22, 0.0 }
 0x34e   : > { %1217 = vpow2.f32 %v865_v23  ;;  %868 = vadd.xlane.f32.xlu2 %v867_v2 }
 0x351   : > { %1189 = vrot.lane.b32.xlu1 %v1434_v37, %s1308_s27 }
 0x354   : > { %v1505_v24 = vpop.eup %1217 }
 0x355   : > { %v870_v3 = vsel %vm388_vm1, %v1505_v24, 0.0 }
 0x356   : > { %871 = vadd.xlane.f32.xlu0 %v870_v3 }
 0x366   : > { %1184 = vrot.lane.b32.xlu2 %v1434_v37, %s1309_s28 }
 0x3a3   : > { %v711_v25 = vpop.xlane.xlu0 %710 }
 0x3a4   : > { %1219 = vrcp.f32 %v711_v25  ;;  %v726_v38 = vand.u32 2147483648, %v711_v25  ;;  %vm720_vm5 = vweird.f32 %v711_v25  ;;  %v724_v41 = vand.u32 2147483647, %v711_v25 }
 0x3a6   : > { %v727_v45 = vor.u32 1.1754944e-38, %v726_v38  ;;  %vm725_vm7 = vcmp.eq.f32.partialorder %v724_v41, 8.507059e+37 }
 0x3aa   : > { %v1220_v27 = vpop.eup %1219 }
 0x3ab   : > { %v1511_v26 = vpop.xlane.xlu1 %713  ;;  %v716_v28 = vmul.f32 %v1220_v27, %v711_v25  ;;  %vm721_vm4 = vweird.f32 %v1220_v27  ;;  %v619_v25 = vpop.f32.mrf.mxu1 }
 0x3ac   : > { %1221 = vrcp.f32 %v1511_v26  ;;  %vm722_vm6 = vmor %vm720_vm5, %vm721_vm4  ;;  %vm735_vm9 = vweird.f32 %v1511_v26  ;;  %v741_v54 = vand.u32 2147483648, %v1511_v26  ;;  %v739_v56 = vand.u32 2147483647, %v1511_v26 }
 0x3ad   : > { %v717_v29 = vsub.f32 1.0, %v716_v28 }
 0x3ae   : > { %v742_v5 = vor.u32 1.1754944e-38, %v741_v54  ;;  %vm740_vm15 = vcmp.eq.f32.partialorder %v739_v56, 8.507059e+37 }
 0x3af   : > { %v718_v32 = vmul.f32 %v1220_v27, %v717_v29  ;;  %v1194_v29 = vld [vmem:[#allocation4] ss:$0 sm:$0xff] }
 0x3b1   : > { %v719_v35 = vadd.f32 %v1220_v27, %v718_v32 }
 0x3b2   : > { %v1222_v30 = vpop.eup %1221 }
 0x3b3   : > { %v731_v33 = vmul.f32 %v1222_v30, %v1511_v26  ;;  %v723_v43 = vsel %vm722_vm6, %v1220_v27, %v719_v35  ;;  %vm736_vm8 = vweird.f32 %v1222_v30  ;;  %v622_v26 = vpop.f32.mrf.mxu1 }
 0x3b4   : > { %v728_v51 = vsel %vm725_vm7, %v727_v45, %v723_v43  ;;  %vm1519_vm11 = vmor %vm735_vm9, %vm736_vm8 }
 0x3b5   : > { %v732_v37 = vsub.f32 1.0, %v731_v33  ;;  %v729_v61 = vmul.f32 %v1491_v13, %v728_v51 }
 0x3b7   : > { %v733_v42 = vmul.f32 %v1222_v30, %v732_v37 }
 0x3b9   : > { %v734_v53 = vadd.f32 %v1222_v30, %v733_v42 }
 0x3bb   : > { %v738_v1 = vsel %vm1519_vm11, %v1222_v30, %v734_v53 }
 0x3bc   : > { %v743_v11 = vsel %vm740_vm15, %v742_v5, %v738_v1 }
 0x3bd   : > { %v744_v17 = vmul.f32 %v1495_v16, %v743_v11 }
 0x3c1   : > { %v869_v34 = vpop.xlane.xlu2 %868 }
 0x3c2   : > { %1223 = vrcp.f32 %v869_v34  ;;  %v884_v55 = vand.u32 2147483648, %v869_v34  ;;  %v882_v58 = vand.u32 2147483647, %v869_v34  ;;  %vm878_vm12 = vweird.f32 %v869_v34 }
 0x3c3   : > { %v1190_v36 = vpop.permute.xlu1 %1189 }
 0x3c4   : > { %v1192_v39 = vunpack.i.h.bf16 %v1190_v36  ;;  %v1191_v40 = vunpack.i.l.bf16 %v1190_v36  ;;  %v885_v6 = vor.u32 1.1754944e-38, %v884_v55  ;;  %vm883_vm14 = vcmp.eq.f32.partialorder %v882_v58, 8.507059e+37 }
 0x3c6   : > { %929 = vmatpush.msra.mxu0 %v1191_v40 }
 0x3c8   : > { %v1224_v44 = vpop.eup %1223  ;;  %930 = vmatpush.msra.mxu0 %v1192_v39 }
 0x3c9   : > { %v874_v46 = vmul.f32 %v1224_v44, %v869_v34  ;;  %v1185_v47 = vpop.permute.xlu2 %1184  ;;  %v872_v48 = vpop.xlane.xlu0 %871  ;;  %vm879_vm10 = vweird.f32 %v1224_v44  ;;  %v652_v34 = vadd.f32 %v1485_v60, %v622_v26 }
 0x3ca   : > { %v1187_v49 = vunpack.i.h.bf16 %v1185_v47  ;;  %v1186_v50 = vunpack.i.l.bf16 %v1185_v47  ;;  %1225 = vrcp.f32 %v872_v48  ;;  %vm880_vm13 = vmor %vm878_vm12, %vm879_vm10  ;;  %v899_v14 = vand.u32 2147483648, %v872_v48 }
 0x3cb   : > { %v875_v52 = vsub.f32 1.0, %v874_v46  ;;  %v897_v7 = vand.u32 2147483647, %v872_v48  ;;  %vm893_vm3 = vweird.f32 %v872_v48 }
 0x3cc   : > { %771 = vmatpush.msrb.mxu2 %v1186_v50  ;;  %v900_v19 = vor.u32 1.1754944e-38, %v899_v14 }
 0x3cd   : > { %v876_v57 = vmul.f32 %v1224_v44, %v875_v52  ;;  %vm898_vm5 = vcmp.eq.f32.partialorder %v897_v7, 8.507059e+37 }
 0x3ce   : > { %772 = vmatpush.msrb.mxu2 %v1187_v49 }
 0x3cf   : > { %v877_v0 = vadd.f32 %v1224_v44, %v876_v57  ;;  %1126 = vmatmul.msk.f32.vlgmr.msrb.gmra.mxu2 %vm388_vm1, %v729_v61 }
 0x3d0   : > { %v1226_v4 = vpop.eup %1225  ;;  %960 = vmatpush.msra.mxu2 %v938_v62 }
 0x3d1   : > { %v881_v8 = vsel %vm880_vm13, %v1224_v44, %v877_v0  ;;  %v889_v9 = vmul.f32 %v1226_v4, %v872_v48  ;;  %vm894_vm2 = vweird.f32 %v1226_v4 }
 0x3d2   : > { %v886_v10 = vsel %vm883_vm14, %v885_v6, %v881_v8  ;;  %vm895_vm4 = vmor %vm893_vm3, %vm894_vm2 }
 0x3d3   : > { %v890_v12 = vsub.f32 1.0, %v889_v9  ;;  %v887_v13 = vmul.f32 %v1499_v22, %v886_v10 }
 0x3d5   : > { %v891_v15 = vmul.f32 %v1226_v4, %v890_v12  ;;  %1134 = vmatmul.msk.f32.vlgmr.msra.gmra.mxu0 %vm388_vm1, %v887_v13 }
 0x3d7   : > { %v892_v18 = vadd.f32 %v1226_v4, %v891_v15  ;;  %1127 = vmatmul.msk.f32.gmra.mxu2 %vm388_vm1, %v744_v17 }
 0x3d9   : > { %v896_v20 = vsel %vm895_vm4, %v1226_v4, %v892_v18 }
 0x3da   : > { %v901_v21 = vsel %vm898_vm5, %v900_v19, %v896_v20 }
 0x3db   : > { %v902_v23 = vmul.f32 %v1505_v24, %v901_v21  ;;  %v649_v24 = vadd.f32 %v1483_v59, %v619_v25 }
 0x3dd   : > { %1135 = vmatmul.msk.f32.gmra.mxu0 %vm388_vm1, %v902_v23  ;;  %vm976_vm1 = vcmask 261120  }
 0x452   : > { %v774_v22 = vpop.f32.mrf.mxu2  ;;  %v932_v2 = vpop.f32.mrf.mxu0 }
 0x453   : > { %1128 = vmatmul.msk.f32.vlgmr.msra.gmra.mxu1 %vm345_vm0, %v774_v22  ;;  %1136 = vmatmul.msk.f32.vlgmr.msra.gmra.mxu2 %vm345_vm0, %v932_v2 }
 0x45a   : > { %v777_v16 = vpop.f32.mrf.mxu2  ;;  %v935_v3 = vpop.f32.mrf.mxu0 }
 0x45b   : > { %1129 = vmatmul.msk.f32.gmra.mxu1 %vm345_vm0, %v777_v16  ;;  %1137 = vmatmul.msk.f32.gmra.mxu2 %vm345_vm0, %v935_v3 }
 0x4d0   : > { %v804_v27 = vpop.f32.mrf.mxu1 }
 0x4d1   : > { %v810_v28 = vadd.f32 %v804_v27, %v649_v24 }
 0x4d6   : > { %v962_v30 = vpop.f32.mrf.mxu2 }
 0x4d7   : > { %v968_v31 = vadd.f32 %v962_v30, %v810_v28 }
 0x4d8   : > { %v807_v33 = vpop.f32.mrf.mxu1 }
 0x4d9   : > { %v974_v32 = vadd.f32 %v1194_v29, %v968_v31  ;;  %v811_v35 = vadd.f32 %v807_v33, %v652_v34 }
 0x4db   : > { %977 = vst.msk [vmem:[%s337_s7] sm:$0xff] %vm976_vm1, %v974_v32 }
 0x4de   : > { %v965_v37 = vpop.f32.mrf.mxu2 }
 0x4df   : > { %v969_v36 = vadd.f32 %v965_v37, %v811_v35 }
 0x4e1   : > { %v975_v38 = vadd.f32 %v1194_v29, %v969_v36 }
 0x4e3   : > { %978 = vst.msk [vmem:[%s337_s7 + $0x8] sm:$0xff] %vm976_vm1, %v975_v38 }
 0x4e4 PF: > { %s18_s21 = sadd.s32 1, %s1301_s21  }
 0x4e5   : > { %p15_p7 = scmp.ge.s32.totalorder %s18_s21, 4  }
 0x4e7   :  { %17 = sbr.rel (!%p15_p7) target bundleno = 2 (0x2), region = 92 }
 0x4ec   :  { %1000 = vsyncpa [#allocation3], 1 }
 0x4ed   :  { %1002 = vsyncpa [#allocation3 + $0x1], 1 }
 0x4ee   :  { %1003 = vsyncpa [#allocation5], 1 }

// kernel: transformer_forward.56
= control target key start
LH: loop header
LB: loop body
LE: loop exit
PB: predicated region body
PF: predicated region fallthrough
CT: control target
= control target key end

     0   :  { %8 = vsyncpa [#allocation3], 0  ;;  %s240_s0 = inlined_call_operand.vmem [shape: f32[32,32], index: 0, kind: input, shape index: {}]   ;;  %s241_s1 = inlined_call_operand.hbm [shape: f32[32,64], index: 1, kind: input, shape index: {}]   ;;  %s242_s2 = inlined_call_operand.hbm [shape: f32[1,64], index: 2, kind: input, shape index: {}]   ;;  %s243_s3 = inlined_call_operand.vmem [shape: f32[32,64], index: 3, kind: output, shape index: {}]  }
   0x1   :  { %s16_s14 = sshll.u32 %s241_s1, 4  ;;  %s17_s14 = int_to_ptr.hbm [resolvable:$true] %s16_s14 }
   0x2   :  { %9 = vsyncpa [#allocation5], 0  ;;  %s186_s15 = smov [#allocation2]   ;;  %s30_s19 = sshll.u32 %s242_s2, 4  ;;  %s31_s19 = int_to_ptr.hbm [resolvable:$true] %s30_s19 }
   0x3   :  { %s18_s16 = sshll.u32 %s186_s15, 4  ;;  %s187_s20 = smov 128   ;;  %s19_s16 = int_to_ptr.vmem [resolvable:$true] %s18_s16 }
   0x4   :  { %s188_s21 = smov 8   ;;  %s189_s22 = smov [#allocation4]  }
   0x5   :  { %24 = dma.hbm_to_vmem [thread:$0]  %s17_s14, 512, %s19_s16, [#allocation3], %s187_s20, %s187_s20, %s188_s21  }
   0x6   :  { %s32_s23 = sshll.u32 %s189_s22, 4  ;;  %s33_s23 = int_to_ptr.vmem [resolvable:$true] %s32_s23 }
   0x7   :  { %35 = dma.hbm_to_vmem [thread:$0]  %s31_s19, 16, %s33_s23, [#allocation5]  }
   0x8   :  { %182 = dma.done.wait [#allocation3], 512  }
   0x9   :  { %183 = vsyncadd [#allocation3], 4294966784 }
   0xa   :  { %184 = dma.done.wait [#allocation5], 16  }
   0xb   :  { %185 = vsyncadd [#allocation5], 4294967280  ;;  %v51_v0 = vld [vmem:[#allocation2 + $0x18] sm:$0xff]  ;;  %v50_v1 = vld [vmem:[#allocation2 + $0x10] sm:$0xff]  ;;  %vm56_vm0 = vcmask 261120   ;;  %vm102_vm1 = vcmask 523264  }
   0xc   :  { %118 = vmatpush.msra.mxu2 %v51_v0  ;;  %119 = vmatpush.msra.mxu3 %v51_v0  ;;  %v49_v2 = vld [vmem:[#allocation2 + $0x8] sm:$0xff]  ;;  %v48_v3 = vld [vmem:[#allocation2] sm:$0xff]  ;;  %v46_v4 = vld [vmem:[%s240_s0 + $0x10] sm:$0xff] }
   0xd   :  { %81 = vmatpush.msra.mxu0 %v51_v0  ;;  %117 = vmatpush.msra.mxu1 %v51_v0  ;;  %v47_v5 = vld [vmem:[%s240_s0 + $0x18] sm:$0xff]  ;;  %v44_v6 = vld [vmem:[%s240_s0] sm:$0xff]  ;;  %v45_v7 = vld [vmem:[%s240_s0 + $0x8] sm:$0xff] }
   0xe   :  { %121 = vmatpush.msra.mxu2 %v50_v1  ;;  %122 = vmatpush.msra.mxu3 %v50_v1  ;;  %v133_v8 = vld [vmem:[#allocation4] ss:$0 sm:$0xff] }
   0xf   :  { %82 = vmatpush.msra.mxu0 %v50_v1  ;;  %120 = vmatpush.msra.mxu1 %v50_v1 }
  0x10   :  { %124 = vmatpush.msra.mxu2 %v49_v2  ;;  %125 = vmatpush.msra.mxu3 %v49_v2 }
  0x11   :  { %83 = vmatpush.msra.mxu0 %v49_v2  ;;  %123 = vmatpush.msra.mxu1 %v49_v2 }
  0x12   :  { %127 = vmatpush.msra.mxu2 %v48_v3  ;;  %128 = vmatpush.msra.mxu3 %v48_v3 }
  0x13   :  { %115 = vmatmul.msk.f32.vlgmr.msra.gmra.mxu2 %vm56_vm0, %v46_v4  ;;  %116 = vmatmul.msk.f32.vlgmr.msra.gmra.mxu3 %vm56_vm0, %v47_v5 }
  0x14   :  { %84 = vmatpush.msra.mxu0 %v48_v3  ;;  %126 = vmatpush.msra.mxu1 %v48_v3 }
  0x15   :  { %113 = vmatmul.msk.f32.vlgmr.msra.gmra.mxu0 %vm56_vm0, %v44_v6  ;;  %114 = vmatmul.msk.f32.vlgmr.msra.gmra.mxu1 %vm56_vm0, %v45_v7 }
  0x92   :  { %v86_v9 = vpop.f32.mrf.mxu0  ;;  %v89_v10 = vpop.f32.mrf.mxu1 }
  0x93   :  { %v87_v11 = vadd.f32 %v133_v8, %v86_v9  ;;  %v90_v12 = vadd.f32 %v133_v8, %v89_v10 }
  0x95   :  { %v98_v13 = vmax.f32 %v87_v11, 0.0  ;;  %v99_v14 = vmax.f32 %v90_v12, 0.0 }
  0x96   :  { %v92_v15 = vpop.f32.mrf.mxu2  ;;  %v95_v16 = vpop.f32.mrf.mxu3 }
  0x97   :  { %103 = vst.msk [vmem:[%s243_s3] sm:$0xff] %vm102_vm1, %v98_v13  ;;  %v93_v17 = vadd.f32 %v133_v8, %v92_v15  ;;  %v96_v18 = vadd.f32 %v133_v8, %v95_v16 }
  0x98   :  { %104 = vst.msk [vmem:[%s243_s3 + $0x8] sm:$0xff] %vm102_vm1, %v99_v14 }
  0x99   :  { %v100_v19 = vmax.f32 %v93_v17, 0.0  ;;  %v101_v20 = vmax.f32 %v96_v18, 0.0 }
  0x9b   :  { %105 = vst.msk [vmem:[%s243_s3 + $0x10] sm:$0xff] %vm102_vm1, %v100_v19 }
  0x9c   :  { %106 = vst.msk [vmem:[%s243_s3 + $0x18] sm:$0xff] %vm102_vm1, %v101_v20 }
  0x9d   :  { %111 = vsyncpa [#allocation3], 1 }
  0x9e   :  { %112 = vsyncpa [#allocation5], 1 }

// kernel: transformer_forward.57
= control target key start
LH: loop header
LB: loop body
LE: loop exit
PB: predicated region body
PF: predicated region fallthrough
CT: control target
= control target key end

     0   :  { %8 = vsyncpa [#allocation3], 0  ;;  %s152_s15 = smov [#allocation2]   ;;  %s224_s0 = inlined_call_operand.vmem [shape: f32[32,64], index: 0, kind: input, shape index: {}]   ;;  %s225_s1 = inlined_call_operand.vmem [shape: f32[64,32], index: 1, kind: input, shape index: {}]   ;;  %s226_s2 = inlined_call_operand.hbm [shape: f32[1,32], index: 2, kind: input, shape index: {}]   ;;  %s227_s3 = inlined_call_operand.vmem [shape: f32[32,32], index: 3, kind: output, shape index: {}]  }
   0x1   :  { %s18_s14 = sshll.u32 %s226_s2, 4  ;;  %s20_s16 = sshll.u32 %s152_s15, 4  ;;  %s19_s14 = int_to_ptr.hbm [resolvable:$true] %s18_s14  ;;  %s21_s16 = int_to_ptr.vmem [resolvable:$true] %s20_s16 }
   0x2   :  { %23 = dma.hbm_to_vmem [thread:$0]  %s19_s14, 16, %s21_s16, [#allocation3]  }
   0x3   :  { %150 = dma.done.wait [#allocation3], 16  }
   0x4   :  { %151 = vsyncadd [#allocation3], 4294967280  ;;  %v39_v0 = vld [vmem:[%s225_s1 + $0x38] sm:$0xff]  ;;  %v38_v1 = vld [vmem:[%s225_s1 + $0x30] sm:$0xff]  ;;  %vm44_vm0 = vcmask 523264   ;;  %vm86_vm1 = vcmask 261120  }
   0x5   :  { %101 = vmatpush.msra.mxu2 %v39_v0  ;;  %102 = vmatpush.msra.mxu3 %v39_v0  ;;  %v37_v2 = vld [vmem:[%s225_s1 + $0x28] sm:$0xff]  ;;  %v36_v3 = vld [vmem:[%s225_s1 + $0x20] sm:$0xff]  ;;  %v35_v4 = vld [vmem:[%s225_s1 + $0x18] sm:$0xff] }
   0x6   :  { %65 = vmatpush.msra.mxu0 %v39_v0  ;;  %100 = vmatpush.msra.mxu1 %v39_v0  ;;  %v34_v5 = vld [vmem:[%s225_s1 + $0x10] sm:$0xff]  ;;  %v33_v6 = vld [vmem:[%s225_s1 + $0x8] sm:$0xff]  ;;  %v32_v7 = vld [vmem:[%s225_s1] sm:$0xff] }
   0x7   :  { %104 = vmatpush.msra.mxu2 %v38_v1  ;;  %105 = vmatpush.msra.mxu3 %v38_v1  ;;  %v30_v8 = vld [vmem:[%s224_s0 + $0x10] sm:$0xff]  ;;  %v31_v9 = vld [vmem:[%s224_s0 + $0x18] sm:$0xff]  ;;  %v28_v10 = vld [vmem:[%s224_s0] sm:$0xff] }
   0x8   :  { %66 = vmatpush.msra.mxu0 %v38_v1  ;;  %103 = vmatpush.msra.mxu1 %v38_v1  ;;  %v29_v11 = vld [vmem:[%s224_s0 + $0x8] sm:$0xff]  ;;  %v125_v12 = vld [vmem:[#allocation2] ss:$0 sm:$0xff] }
   0x9   :  { %107 = vmatpush.msra.mxu2 %v37_v2  ;;  %108 = vmatpush.msra.mxu3 %v37_v2 }
   0xa   :  { %67 = vmatpush.msra.mxu0 %v37_v2  ;;  %106 = vmatpush.msra.mxu1 %v37_v2 }
   0xb   :  { %110 = vmatpush.msra.mxu2 %v36_v3  ;;  %111 = vmatpush.msra.mxu3 %v36_v3 }
   0xc   :  { %68 = vmatpush.msra.mxu0 %v36_v3  ;;  %109 = vmatpush.msra.mxu1 %v36_v3 }
   0xd   :  { %113 = vmatpush.msra.mxu2 %v35_v4  ;;  %114 = vmatpush.msra.mxu3 %v35_v4 }
   0xe   :  { %69 = vmatpush.msra.mxu0 %v35_v4  ;;  %112 = vmatpush.msra.mxu1 %v35_v4 }
   0xf   :  { %116 = vmatpush.msra.mxu2 %v34_v5  ;;  %117 = vmatpush.msra.mxu3 %v34_v5 }
  0x10   :  { %70 = vmatpush.msra.mxu0 %v34_v5  ;;  %115 = vmatpush.msra.mxu1 %v34_v5 }
  0x11   :  { %119 = vmatpush.msra.mxu2 %v33_v6  ;;  %120 = vmatpush.msra.mxu3 %v33_v6 }
  0x12   :  { %71 = vmatpush.msra.mxu0 %v33_v6  ;;  %118 = vmatpush.msra.mxu1 %v33_v6 }
  0x13   :  { %122 = vmatpush.msra.mxu2 %v32_v7  ;;  %123 = vmatpush.msra.mxu3 %v32_v7 }
  0x14   :  { %98 = vmatmul.msk.f32.vlgmr.msra.gmra.mxu2 %vm44_vm0, %v30_v8  ;;  %99 = vmatmul.msk.f32.vlgmr.msra.gmra.mxu3 %vm44_vm0, %v31_v9 }
  0x15   :  { %72 = vmatpush.msra.mxu0 %v32_v7  ;;  %121 = vmatpush.msra.mxu1 %v32_v7 }
  0x16   :  { %96 = vmatmul.msk.f32.vlgmr.msra.gmra.mxu0 %vm44_vm0, %v28_v10  ;;  %97 = vmatmul.msk.f32.vlgmr.msra.gmra.mxu1 %vm44_vm0, %v29_v11 }
  0x93   :  { %v74_v13 = vpop.f32.mrf.mxu0  ;;  %v77_v14 = vpop.f32.mrf.mxu1 }
  0x94   :  { %v75_v15 = vadd.f32 %v125_v12, %v74_v13  ;;  %v78_v16 = vadd.f32 %v125_v12, %v77_v14 }
  0x96   :  { %87 = vst.msk [vmem:[%s227_s3] sm:$0xff] %vm86_vm1, %v75_v15 }
  0x97   :  { %88 = vst.msk [vmem:[%s227_s3 + $0x8] sm:$0xff] %vm86_vm1, %v78_v16  ;;  %v80_v17 = vpop.f32.mrf.mxu2  ;;  %v83_v18 = vpop.f32.mrf.mxu3 }
  0x98   :  { %v81_v19 = vadd.f32 %v125_v12, %v80_v17  ;;  %v84_v20 = vadd.f32 %v125_v12, %v83_v18 }
  0x9a   :  { %89 = vst.msk [vmem:[%s227_s3 + $0x10] sm:$0xff] %vm86_vm1, %v81_v19 }
  0x9b   :  { %90 = vst.msk [vmem:[%s227_s3 + $0x18] sm:$0xff] %vm86_vm1, %v84_v20 }
  0x9c   :  { %95 = vsyncpa [#allocation3], 1 }

// kernel: transformer_forward.59
= control target key start
LH: loop header
LB: loop body
LE: loop exit
PB: predicated region body
PF: predicated region fallthrough
CT: control target
= control target key end

     0   :  { %9 = vsyncpa [#allocation3], 0  ;;  %s116_s18 = smov [#allocation2]   ;;  %s175_s0 = inlined_call_operand.vmem [shape: f32[16,32], index: 0, kind: input, shape index: {}]   ;;  %s176_s1 = inlined_call_operand.vmem [shape: f32[16,32], index: 1, kind: input, shape index: {}]   ;;  %s177_s2 = inlined_call_operand.vmem [shape: f32[32,32], index: 2, kind: input, shape index: {}]   ;;  %s178_s3 = inlined_call_operand.hbm [shape: f32[1,32], index: 3, kind: input, shape index: {}]   ;;  %s179_s4 = inlined_call_operand.vmem [shape: f32[16,32], index: 4, kind: output, shape index: {}]  }
   0x1   :  { %s21_s17 = sshll.u32 %s178_s3, 4  ;;  %s23_s19 = sshll.u32 %s116_s18, 4  ;;  %s22_s17 = int_to_ptr.hbm [resolvable:$true] %s21_s17  ;;  %s24_s19 = int_to_ptr.vmem [resolvable:$true] %s23_s19 }
   0x2   :  { %26 = dma.hbm_to_vmem [thread:$0]  %s22_s17, 16, %s24_s19, [#allocation3]  }
   0x3   :  { %114 = dma.done.wait [#allocation3], 16  }
   0x4   :  { %115 = vsyncadd [#allocation3], 4294967280  ;;  %v40_v0 = vld [vmem:[%s177_s2 + $0x18] sm:$0xff]  ;;  %v39_v1 = vld [vmem:[%s177_s2 + $0x10] sm:$0xff]  ;;  %vm45_vm0 = vcmask 261120  }
   0x5   :  { %64 = vmatpush.msra.mxu0 %v40_v0  ;;  %84 = vmatpush.msra.mxu1 %v40_v0  ;;  %v38_v2 = vld [vmem:[%s177_s2 + $0x8] sm:$0xff]  ;;  %v31_v3 = vld [vmem:[%s175_s0] sm:$0xff] }
   0x6   :  { %v33_v4 = vld [vmem:[%s176_s1] sm:$0xff]  ;;  %v32_v5 = vld [vmem:[%s175_s0 + $0x8] sm:$0xff] }
   0x7   :  { %v34_v6 = vld [vmem:[%s176_s1 + $0x8] sm:$0xff]  ;;  %65 = vmatpush.msra.mxu0 %v39_v1  ;;  %85 = vmatpush.msra.mxu1 %v39_v1  ;;  %v37_v7 = vld [vmem:[%s177_s2] sm:$0xff]  ;;  %v35_v8 = vadd.f32 %v33_v4, %v31_v3 }
   0x8   :  { %v36_v9 = vadd.f32 %v34_v6, %v32_v5  ;;  %v89_v10 = vld [vmem:[#allocation2] ss:$0 sm:$0xff] }
   0x9   :  { %66 = vmatpush.msra.mxu0 %v38_v2  ;;  %86 = vmatpush.msra.mxu1 %v38_v2 }
   0xb   :  { %67 = vmatpush.msra.mxu0 %v37_v7  ;;  %87 = vmatpush.msra.mxu1 %v37_v7 }
   0xc   :  { %82 = vmatmul.msk.f32.vlgmr.msra.gmra.mxu0 %vm45_vm0, %v35_v8  ;;  %83 = vmatmul.msk.f32.vlgmr.msra.gmra.mxu1 %vm45_vm0, %v36_v9 }
  0x89   :  { %v69_v11 = vpop.f32.mrf.mxu0  ;;  %v72_v12 = vpop.f32.mrf.mxu1 }
  0x8a   :  { %v70_v13 = vadd.f32 %v89_v10, %v69_v11  ;;  %v73_v14 = vadd.f32 %v89_v10, %v72_v12 }
  0x8c   :  { %75 = vst.msk [vmem:[%s179_s4] sm:$0xff] %vm45_vm0, %v70_v13 }
  0x8d   :  { %76 = vst.msk [vmem:[%s179_s4 + $0x8] sm:$0xff] %vm45_vm0, %v73_v14 }
  0x8e   :  { %81 = vsyncpa [#allocation3], 1 }

// kernel: transformer_forward.61
= control target key start
LH: loop header
LB: loop body
LE: loop exit
PB: predicated region body
PF: predicated region fallthrough
CT: control target
= control target key end

     0   :  { %8 = vsyncpa [#allocation3], 0  ;;  %s109_s15 = smov [#allocation2]   ;;  %s157_s0 = inlined_call_operand.vmem [shape: f32[16,32], index: 0, kind: input, shape index: {}]   ;;  %s158_s1 = inlined_call_operand.vmem [shape: f32[32,32], index: 1, kind: input, shape index: {}]   ;;  %s159_s2 = inlined_call_operand.hbm [shape: f32[1,32], index: 2, kind: input, shape index: {}]   ;;  %s160_s3 = inlined_call_operand.vmem [shape: f32[16,32], index: 3, kind: output, shape index: {}]  }
   0x1   :  { %s18_s14 = sshll.u32 %s159_s2, 4  ;;  %s20_s16 = sshll.u32 %s109_s15, 4  ;;  %s19_s14 = int_to_ptr.hbm [resolvable:$true] %s18_s14  ;;  %s21_s16 = int_to_ptr.vmem [resolvable:$true] %s20_s16 }
   0x2   :  { %23 = dma.hbm_to_vmem [thread:$0]  %s19_s14, 16, %s21_s16, [#allocation3]  }
   0x3   :  { %107 = dma.done.wait [#allocation3], 16  }
   0x4   :  { %108 = vsyncadd [#allocation3], 4294967280  ;;  %v33_v0 = vld [vmem:[%s158_s1 + $0x18] sm:$0xff]  ;;  %v32_v1 = vld [vmem:[%s158_s1 + $0x10] sm:$0xff]  ;;  %vm38_vm0 = vcmask 261120  }
   0x5   :  { %57 = vmatpush.msra.mxu0 %v33_v0  ;;  %77 = vmatpush.msra.mxu1 %v33_v0  ;;  %v31_v2 = vld [vmem:[%s158_s1 + $0x8] sm:$0xff]  ;;  %v30_v3 = vld [vmem:[%s158_s1] sm:$0xff] }
   0x6   :  { %v28_v4 = vld [vmem:[%s157_s0] sm:$0xff]  ;;  %v29_v5 = vld [vmem:[%s157_s0 + $0x8] sm:$0xff] }
   0x7   :  { %58 = vmatpush.msra.mxu0 %v32_v1  ;;  %78 = vmatpush.msra.mxu1 %v32_v1  ;;  %v82_v6 = vld [vmem:[#allocation2] ss:$0 sm:$0xff] }
   0x9   :  { %59 = vmatpush.msra.mxu0 %v31_v2  ;;  %79 = vmatpush.msra.mxu1 %v31_v2 }
   0xb   :  { %60 = vmatpush.msra.mxu0 %v30_v3  ;;  %80 = vmatpush.msra.mxu1 %v30_v3 }
   0xc   :  { %75 = vmatmul.msk.f32.vlgmr.msra.gmra.mxu0 %vm38_vm0, %v28_v4  ;;  %76 = vmatmul.msk.f32.vlgmr.msra.gmra.mxu1 %vm38_vm0, %v29_v5 }
  0x89   :  { %v62_v7 = vpop.f32.mrf.mxu0  ;;  %v65_v8 = vpop.f32.mrf.mxu1 }
  0x8a   :  { %v63_v9 = vadd.f32 %v82_v6, %v62_v7  ;;  %v66_v10 = vadd.f32 %v82_v6, %v65_v8 }
  0x8c   :  { %68 = vst.msk [vmem:[%s160_s3] sm:$0xff] %vm38_vm0, %v63_v9 }
  0x8d   :  { %69 = vst.msk [vmem:[%s160_s3 + $0x8] sm:$0xff] %vm38_vm0, %v66_v10 }
  0x8e   :  { %74 = vsyncpa [#allocation3], 1 }

// kernel: transformer_forward.64
= control target key start
LH: loop header
LB: loop body
LE: loop exit
PB: predicated region body
PF: predicated region fallthrough
CT: control target
= control target key end

     0   :  { %9 = vsyncpa [#allocation3], 0  ;;  %s215_s0 = inlined_call_operand.vmem [shape: f32[16,32], index: 0, kind: input, shape index: {}]   ;;  %s216_s1 = inlined_call_operand.vmem [shape: f32[16,32], index: 1, kind: input, shape index: {}]   ;;  %s217_s2 = inlined_call_operand.hbm [shape: f32[32,32], index: 2, kind: input, shape index: {}]   ;;  %s218_s3 = inlined_call_operand.hbm [shape: f32[1,32], index: 3, kind: input, shape index: {}]   ;;  %s219_s4 = inlined_call_operand.vmem [shape: f32[16,32], index: 4, kind: output, shape index: {}]  }
   0x1   :  { %s19_s17 = sshll.u32 %s217_s2, 4  ;;  %s20_s17 = int_to_ptr.hbm [resolvable:$true] %s19_s17 }
   0x2   :  { %10 = vsyncpa [#allocation5], 0  ;;  %s162_s18 = smov [#allocation2]   ;;  %s33_s22 = sshll.u32 %s218_s3, 4  ;;  %s34_s22 = int_to_ptr.hbm [resolvable:$true] %s33_s22 }
   0x3   :  { %s21_s19 = sshll.u32 %s162_s18, 4  ;;  %s163_s23 = smov 128   ;;  %s22_s19 = int_to_ptr.vmem [resolvable:$true] %s21_s19 }
   0x4   :  { %s164_s24 = smov 8   ;;  %s165_s25 = smov [#allocation4]  }
   0x5   :  { %27 = dma.hbm_to_vmem [thread:$0]  %s20_s17, 512, %s22_s19, [#allocation3], %s163_s23, %s163_s23, %s164_s24  }
   0x6   :  { %s35_s26 = sshll.u32 %s165_s25, 4  ;;  %s36_s26 = int_to_ptr.vmem [resolvable:$true] %s35_s26 }
   0x7   :  { %38 = dma.hbm_to_vmem [thread:$0]  %s34_s22, 16, %s36_s26, [#allocation5]  }
   0x8   :  { %158 = dma.done.wait [#allocation3], 512  }
   0x9   :  { %159 = vsyncadd [#allocation3], 4294966784 }
   0xa   :  { %160 = dma.done.wait [#allocation5], 16  }
   0xb   :  { %161 = vsyncadd [#allocation5], 4294967280  ;;  %v56_v0 = vld [vmem:[#allocation2 + $0x18] sm:$0xff]  ;;  %v55_v1 = vld [vmem:[#allocation2 + $0x10] sm:$0xff]  ;;  %vm61_vm0 = vcmask 261120  }
   0xc   :  { %80 = vmatpush.msra.mxu0 %v56_v0  ;;  %101 = vmatpush.msra.mxu1 %v56_v0  ;;  %v54_v2 = vld [vmem:[#allocation2 + $0x8] sm:$0xff]  ;;  %v47_v3 = vld [vmem:[%s215_s0] sm:$0xff] }
   0xd   :  { %v49_v4 = vld [vmem:[%s216_s1] sm:$0xff]  ;;  %v48_v5 = vld [vmem:[%s215_s0 + $0x8] sm:$0xff] }
   0xe   :  { %v50_v6 = vld [vmem:[%s216_s1 + $0x8] sm:$0xff]  ;;  %81 = vmatpush.msra.mxu0 %v55_v1  ;;  %102 = vmatpush.msra.mxu1 %v55_v1  ;;  %v53_v7 = vld [vmem:[#allocation2] sm:$0xff]  ;;  %v51_v8 = vadd.f32 %v49_v4, %v47_v3 }
   0xf   :  { %v52_v9 = vadd.f32 %v50_v6, %v48_v5  ;;  %v109_v10 = vld [vmem:[#allocation4] ss:$0 sm:$0xff] }
  0x10   :  { %82 = vmatpush.msra.mxu0 %v54_v2  ;;  %103 = vmatpush.msra.mxu1 %v54_v2 }
  0x12   :  { %83 = vmatpush.msra.mxu0 %v53_v7  ;;  %104 = vmatpush.msra.mxu1 %v53_v7 }
  0x13   :  { %99 = vmatmul.msk.f32.vlgmr.msra.gmra.mxu0 %vm61_vm0, %v51_v8  ;;  %100 = vmatmul.msk.f32.vlgmr.msra.gmra.mxu1 %vm61_vm0, %v52_v9 }
  0x90   :  { %v85_v11 = vpop.f32.mrf.mxu0  ;;  %v88_v12 = vpop.f32.mrf.mxu1 }
  0x91   :  { %v86_v13 = vadd.f32 %v109_v10, %v85_v11  ;;  %v89_v14 = vadd.f32 %v109_v10, %v88_v12 }
  0x93   :  { %91 = vst.msk [vmem:[%s219_s4] sm:$0xff] %vm61_vm0, %v86_v13 }
  0x94   :  { %92 = vst.msk [vmem:[%s219_s4 + $0x8] sm:$0xff] %vm61_vm0, %v89_v14 }
  0x95   :  { %97 = vsyncpa [#allocation3], 1 }
  0x96   :  { %98 = vsyncpa [#allocation5], 1 }

// kernel: transformer_forward.62
= control target key start
LH: loop header
LB: loop body
LE: loop exit
PB: predicated region body
PF: predicated region fallthrough
CT: control target
= control target key end

     0   :  { %11 = vsyncpa [#allocation3], 0  ;;  %s1164_s0 = inlined_call_operand.vmem [shape: f32[2,8,32], index: 0, kind: input, shape index: {}]   ;;  %s1165_s1 = inlined_call_operand.vmem [shape: f32[2,8,32], index: 1, kind: input, shape index: {}]   ;;  %s1166_s2 = inlined_call_operand.vmem [shape: f32[2,8,32], index: 2, kind: input, shape index: {}]   ;;  %s1167_s3 = inlined_call_operand.vmem [shape: f32[2,1,8], index: 3, kind: input, shape index: {}]   ;;  %s1168_s4 = inlined_call_operand.hbm [shape: f32[32,32], index: 4, kind: input, shape index: {}]   ;;  %s1169_s5 = inlined_call_operand.hbm [shape: f32[1,32], index: 5, kind: input, shape index: {}]   ;;  %s1170_s6 = inlined_call_operand.vmem [shape: f32[2,8,32], index: 6, kind: output, shape index: {}]  }
   0x1   :  { %12 = vsyncpa [#allocation5], 0  ;;  %s1065_s21 = smov 0  }
   0x2 LB: > { %s206_s24 = sshll.u32 %s1168_s4, 4  ;;  %s864_s25 = sadd.s32 4294967295, %s1021_s21   ;;  %s1021_s21 = sphi %s1065_s21, %s18_s21   ;;  %s207_s24 = int_to_ptr.hbm [resolvable:$true] %s206_s24 }
   0x3   : > { %p866_p0 = scmp.ge.s32.totalorder %s1021_s21, 1  ;;  %p195_p1 = scmp.lt.s32.totalorder %s1021_s21, 3 }
   0x4   : > { %p910_p2 = scmp.eq.s32.totalorder %s864_s25, 0  ;;  %s1023_s27 = smov [#allocation2]  }
   0x5   : > { %p1076_p3 = pnand %p866_p0, %p195_p1  ;;  %s208_s28 = sshll.u32 %s1023_s27, 4  ;;  %s209_s28 = int_to_ptr.vmem [resolvable:$true] %s208_s28 }
   0x6   : > { %s221_s7 = sshll.u32 %s1169_s5, 4  ;;  %s1024_s8 = smov [#allocation4]   ;;  %s222_s7 = int_to_ptr.hbm [resolvable:$true] %s221_s7 }
   0x7   : > { %p903_p4 = pneg %p1076_p3  ;;  %s223_s9 = sshll.u32 %s1024_s8, 4  ;;  %s224_s9 = int_to_ptr.vmem [resolvable:$true] %s223_s9 }
   0x8   : > { %s1025_s10 = smov 128   ;;  %s1026_s11 = smov 8  }
   0x9   : > { %p904_p5 = pnand %p910_p2, %p903_p4  ;;  %263 = sbr.rel (%p1076_p3) target bundleno = 1225 (0x4c9), region = 44 }
   0xb   : > { %906 = dma.hbm_to_vmem [thread:$0]  (!%p904_p5), %s207_s24, 512, %s209_s28, [#allocation3], %s1025_s10, %s1025_s10, %s1026_s11  }
   0xc   : > { %909 = dma.hbm_to_vmem [thread:$0]  (!%p904_p5), %s222_s7, 16, %s224_s9, [#allocation5]  }
   0xe   : > { %1012 = dma.done.wait (%p910_p2), [#allocation3], 512  }
   0xf   : > { %1014 = vsyncadd (%p910_p2), [#allocation3], 4294966784 }
  0x10   : > { %1016 = dma.done.wait (%p910_p2), [#allocation5], 16  }
  0x11   : > { %1018 = vsyncadd (%p910_p2), [#allocation5], 4294967280  ;;  %p308_p6 = scmp.lt.s32.totalorder %s864_s25, 1  ;;  %vm331_vm0 = vcmask 64512   ;;  %s1027_s23 = smov 120   ;;  %v410_v48 = vld [vmem:[#allocation2] sm:$0xff] }
  0x12   : > { %s1028_s28 = smov 112  }
  0x13   : > { %s1173_s25 = smov (!%p308_p6, %s864_s25), 1 }
  0x14   : > { %s1092_s12 = sshll.u32 %s1173_s25, 3  ;;  %s322_s27 = scalar_lea.vmem %s1167_s3, %s1173_s25 }
  0x15   : > { %s315_s15 = scalar_lea.vmem %s1165_s1, %s1092_s12  ;;  %s311_s18 = scalar_lea.vmem %s1164_s0, %s1092_s12  ;;  %v1124_v5 = vld [vmem:[%s322_s27] ss:$0 sm:$0xff] }
  0x16   : > { %s319_s22 = scalar_lea.vmem %s1166_s2, %s1092_s12  ;;  %v328_v0 = vld [vmem:[%s315_s15] sm:$0xff]  ;;  %s1029_s25 = smov 104  }
  0x17   : > { %413 = vrot.lane.b32.xlu0 %v328_v0, %s1027_s23  ;;  %877 = vmatpush.xpose.msk.msra.mxu0 %vm331_vm0, %v328_v0  ;;  %v1107_v1 = vld [vmem:[%s311_s18] sm:$0xff]  ;;  %s326_s7 = scalar_lea.vmem %s1170_s6, %s1092_s12 }
  0x18   : > { %v1109_v2 = vld [vmem:[%s319_s22] sm:$0xff] }
  0x19   : > { %405 = vmatpush.msra.mxu1 %v1109_v2 }
  0x1a   : > { %878 = vmatmul.msk.f32.vlgmr.msra.gmra.mxu0 %vm331_vm0, %v1107_v1 }
  0x1f   : > { %411 = vrot.lane.b32.xlu0 %v1107_v1, %s1027_s23 }
  0x27   : > { %466 = vrot.lane.b32.xlu0 %v1109_v2, %s1027_s23 }
  0x2f   : > { %541 = vrot.lane.b32.xlu0 %v328_v0, %s1028_s28 }
  0x37   : > { %539 = vrot.lane.b32.xlu0 %v1107_v1, %s1028_s28 }
  0x89   : > { %v414_v3 = vpop.permute.xlu0 %413 }
  0x8a   : > { %880 = vmatpush.xpose.msk.msra.mxu2 %vm331_vm0, %v414_v3 }
  0x91   : > { %v412_v4 = vpop.permute.xlu0 %411 }
  0x92   : > { %881 = vmatmul.msk.f32.vlgmr.msra.gmra.mxu2 %vm331_vm0, %v412_v4 }
  0x97   : > { %v355_v6 = vpop.f32.mrf.mxu0 }
  0x98   : > { %v358_v7 = vmul.f32 0.35355338, %v355_v6 }
  0x99   : > { %v467_v8 = vpop.permute.xlu0 %466 }
  0x9a   : > { %v362_v9 = vadd.f32 %v1124_v5, %v358_v7  ;;  %487 = vmatpush.msra.mxu3 %v467_v8 }
  0x9c   : > { %v363_v10 = vsel %vm331_vm0, %v362_v9, -inf  ;;  %534 = vmatpush.msrb.mxu3 %v410_v48 }
  0x9d   : > { %364 = vmax.xlane.f32.xlu1 %v363_v10 }
  0xa1   : > { %v542_v11 = vpop.permute.xlu0 %541 }
  0xa2   : > { %885 = vmatpush.xpose.msk.msrb.mxu0 %vm331_vm0, %v542_v11 }
  0xa9   : > { %v540_v12 = vpop.permute.xlu0 %539 }
  0xaa   : > { %886 = vmatmul.msk.f32.vlgmr.msrb.gmra.mxu0 %vm331_vm0, %v540_v12 }
 0x110   : > { %v365_v13 = vpop.xlane.xlu1 %364 }
 0x111   : > { %v366_v14 = vsub.f32 %v362_v9, %v365_v13 }
 0x113   : > { %v367_v15 = vmul.f32 1.442695, %v366_v14  ;;  %v492_v14 = vld [vmem:[#allocation2 + $0x8] sm:$0xff] }
 0x114   : > { %511 = vmatpush.msrb.mxu1 %v492_v14 }
 0x115   : > { %931 = vpow2.f32 %v367_v15  ;;  %v436_v16 = vpop.f32.mrf.mxu2  ;;  %v619_v15 = vld [vmem:[#allocation2 + $0x10] sm:$0xff] }
 0x116   : > { %v439_v17 = vmul.f32 0.35355338, %v436_v16 }
 0x118   : > { %v440_v18 = vadd.f32 %v1124_v5, %v439_v17 }
 0x11a   : > { %v441_v19 = vsel %vm331_vm0, %v440_v18, -inf }
 0x11b   : > { %v932_v20 = vpop.eup %931  ;;  %442 = vmax.xlane.f32.xlu2 %v441_v19 }
 0x11c   : > { %v369_v21 = vsel %vm331_vm0, %v932_v20, 0.0 }
 0x11d   : > { %370 = vadd.xlane.f32.xlu1 %v369_v21 }
 0x127   : > { %v564_v22 = vpop.f32.mrf.mxu0 }
 0x128   : > { %v567_v23 = vmul.f32 0.35355338, %v564_v22 }
 0x12a   : > { %v568_v24 = vadd.f32 %v1124_v5, %v567_v23 }
 0x12c   : > { %v569_v25 = vsel %vm331_vm0, %v568_v24, -inf }
 0x12d   : > { %570 = vmax.xlane.f32.xlu0 %v569_v25 }
 0x136   : > { %646 = vrot.lane.b32.xlu1 %v328_v0, %s1029_s25 }
 0x141   : > { %593 = vrot.lane.b32.xlu0 %v1109_v2, %s1028_s28 }
 0x18e   : > { %v443_v26 = vpop.xlane.xlu2 %442 }
 0x18f   : > { %v444_v27 = vsub.f32 %v440_v18, %v443_v26 }
 0x190   : > { %v371_v28 = vpop.xlane.xlu1 %370 }
 0x191   : > { %v445_v29 = vmul.f32 1.442695, %v444_v27  ;;  %933 = vrcp.f32 %v371_v28  ;;  %v383_v35 = vand.u32 2147483648, %v371_v28  ;;  %v381_v37 = vand.u32 2147483647, %v371_v28 }
 0x192   : > { %vm377_vm2 = vweird.f32 %v371_v28 }
 0x193   : > { %935 = vpow2.f32 %v445_v29  ;;  %v384_v39 = vor.u32 1.1754944e-38, %v383_v35  ;;  %vm382_vm4 = vcmp.eq.f32.partialorder %v381_v37, 8.507059e+37  ;;  %v724_v29 = vld [vmem:[#allocation2 + $0x18] sm:$0xff] }
 0x197   : > { %v934_v30 = vpop.eup %933 }
 0x198   : > { %v373_v31 = vmul.f32 %v934_v30, %v371_v28  ;;  %vm378_vm1 = vweird.f32 %v934_v30 }
 0x199   : > { %v936_v32 = vpop.eup %935  ;;  %vm379_vm3 = vmor %vm377_vm2, %vm378_vm1  ;;  %vm754_vm2 = vcmask 261120  }
 0x19a   : > { %v374_v33 = vsub.f32 1.0, %v373_v31  ;;  %v447_v34 = vsel %vm331_vm0, %v936_v32, 0.0 }
 0x19b   : > { %448 = vadd.xlane.f32.xlu2 %v447_v34 }
 0x19c   : > { %v375_v36 = vmul.f32 %v934_v30, %v374_v33 }
 0x19e   : > { %v376_v38 = vadd.f32 %v934_v30, %v375_v36 }
 0x1a0   : > { %v571_v40 = vpop.xlane.xlu0 %570  ;;  %v380_v41 = vsel %vm379_vm3, %v934_v30, %v376_v38 }
 0x1a1   : > { %v572_v42 = vsub.f32 %v568_v24, %v571_v40  ;;  %v385_v43 = vsel %vm382_vm4, %v384_v39, %v380_v41 }
 0x1a2   : > { %v386_v44 = vmul.f32 %v932_v20, %v385_v43 }
 0x1a3   : > { %v573_v45 = vmul.f32 1.442695, %v572_v42 }
 0x1a4   : > { %879 = vmatmul.msk.f32.vlgmr.msra.gmra.mxu1 %vm331_vm0, %v386_v44 }
 0x1a5   : > { %937 = vpow2.f32 %v573_v45  ;;  %638 = vmatpush.msra.mxu1 %v619_v15 }
 0x1a8   : > { %v647_v53 = vpop.permute.xlu1 %646 }
 0x1ab   : > { %v938_v46 = vpop.eup %937 }
 0x1ac   : > { %v575_v47 = vsel %vm331_vm0, %v938_v46, 0.0 }
 0x1ad   : > { %576 = vadd.xlane.f32.xlu1 %v575_v47 }
 0x1b3   : > { %644 = vrot.lane.b32.xlu2 %v1107_v1, %s1029_s25  ;;  %v594_v50 = vpop.permute.xlu0 %593 }
 0x1b4   : > { %614 = vmatpush.msrb.mxu2 %v594_v50 }
 0x1b6   : > { %743 = vmatpush.msra.mxu2 %v724_v29 }
 0x1c6   : > { %698 = vrot.lane.b32.xlu1 %v1109_v2, %s1029_s25 }
 0x20e   : > { %v449_v49 = vpop.xlane.xlu2 %448 }
 0x20f   : > { %939 = vrcp.f32 %v449_v49  ;;  %v461_v55 = vand.u32 2147483648, %v449_v49  ;;  %v459_v57 = vand.u32 2147483647, %v449_v49  ;;  %vm455_vm6 = vweird.f32 %v449_v49 }
 0x211   : > { %v462_v59 = vor.u32 1.1754944e-38, %v461_v55  ;;  %vm460_vm8 = vcmp.eq.f32.partialorder %v459_v57, 8.507059e+37 }
 0x215   : > { %v940_v51 = vpop.eup %939 }
 0x216   : > { %v451_v52 = vmul.f32 %v940_v51, %v449_v49  ;;  %vm456_vm5 = vweird.f32 %v940_v51  ;;  %v645_v10 = vpop.permute.xlu2 %644 }
 0x217   : > { %vm457_vm7 = vmor %vm455_vm6, %vm456_vm5 }
 0x218   : > { %v452_v54 = vsub.f32 1.0, %v451_v52 }
 0x21a   : > { %v453_v56 = vmul.f32 %v940_v51, %v452_v54 }
 0x21c   : > { %v454_v58 = vadd.f32 %v940_v51, %v453_v56 }
 0x21e   : > { %v458_v60 = vsel %vm457_vm7, %v940_v51, %v454_v58 }
 0x21f   : > { %v463_v61 = vsel %vm460_vm8, %v462_v59, %v458_v60 }
 0x220   : > { %v577_v62 = vpop.xlane.xlu1 %576  ;;  %v464_v63 = vmul.f32 %v936_v32, %v463_v61 }
 0x221   : > { %941 = vrcp.f32 %v577_v62  ;;  %v589_v2 = vand.u32 2147483648, %v577_v62  ;;  %v407_v3 = vpop.f32.mrf.mxu1  ;;  %vm583_vm9 = vweird.f32 %v577_v62  ;;  %v587_v6 = vand.u32 2147483647, %v577_v62 }
 0x222   : > { %882 = vmatmul.msk.f32.vlgmr.msra.gmra.mxu3 %vm331_vm0, %v464_v63 }
 0x223   : > { %889 = vmatpush.xpose.msk.msra.mxu3 %vm331_vm0, %v647_v53  ;;  %v590_v8 = vor.u32 1.1754944e-38, %v589_v2  ;;  %vm588_vm12 = vcmp.eq.f32.partialorder %v587_v6, 8.507059e+37 }
 0x227   : > { %v942_v0 = vpop.eup %941 }
 0x228   : > { %v579_v1 = vmul.f32 %v942_v0, %v577_v62  ;;  %vm584_vm10 = vweird.f32 %v942_v0 }
 0x229   : > { %vm585_vm11 = vmor %vm583_vm9, %vm584_vm10 }
 0x22a   : > { %v580_v4 = vsub.f32 1.0, %v579_v1  ;;  %884 = vmatmul.msk.f32.vlgmr.msrb.gmra.mxu3 %vm331_vm0, %v407_v3 }
 0x22c   : > { %v581_v7 = vmul.f32 %v942_v0, %v580_v4 }
 0x22e   : > { %v582_v9 = vadd.f32 %v942_v0, %v581_v7 }
 0x230   : > { %v586_v11 = vsel %vm585_vm11, %v942_v0, %v582_v9 }
 0x231   : > { %v591_v12 = vsel %vm588_vm12, %v590_v8, %v586_v11 }
 0x232   : > { %890 = vmatmul.msk.f32.vlgmr.msra.gmra.mxu3 %vm331_vm0, %v645_v10  ;;  %v592_v13 = vmul.f32 %v938_v46, %v591_v12  ;;  %v930_v46 = vld [vmem:[#allocation4] ss:$0 sm:$0xff] }
 0x234   : > { %887 = vmatmul.msk.f32.vlgmr.msrb.gmra.mxu2 %vm331_vm0, %v592_v13 }
 0x238   : > { %v699_v28 = vpop.permute.xlu1 %698 }
 0x239   : > { %719 = vmatpush.msra.mxu0 %v699_v28 }
 0x2a5   : > { %v489_v16 = vpop.f32.mrf.mxu3 }
 0x2a6   : > { %883 = vmatmul.msk.f32.vlgmr.msrb.gmra.mxu1 %vm331_vm0, %v489_v16 }
 0x2ad   : > { %v536_v17 = vpop.f32.mrf.mxu3 }
 0x2b5   : > { %v669_v18 = vpop.f32.mrf.mxu3 }
 0x2b6   : > { %v672_v19 = vmul.f32 0.35355338, %v669_v18 }
 0x2b7   : > { %v616_v20 = vpop.f32.mrf.mxu2 }
 0x2b8   : > { %v673_v21 = vadd.f32 %v1124_v5, %v672_v19  ;;  %888 = vmatmul.msk.f32.vlgmr.msra.gmra.mxu1 %vm331_vm0, %v616_v20 }
 0x2ba   : > { %v674_v22 = vsel %vm331_vm0, %v673_v21, -inf }
 0x2bb   : > { %675 = vmax.xlane.f32.xlu2 %v674_v22 }
 0x323   : > { %v513_v42 = vpop.f32.mrf.mxu1 }
 0x324   : > { %v537_v44 = vadd.f32 %v536_v17, %v513_v42 }
 0x32e   : > { %v676_v23 = vpop.xlane.xlu2 %675 }
 0x32f   : > { %v677_v24 = vsub.f32 %v673_v21, %v676_v23 }
 0x331   : > { %v678_v25 = vmul.f32 1.442695, %v677_v24 }
 0x333   : > { %943 = vpow2.f32 %v678_v25 }
 0x335   : > { %v640_v43 = vpop.f32.mrf.mxu1 }
 0x336   : > { %v643_v45 = vadd.f32 %v640_v43, %v537_v44 }
 0x339   : > { %v944_v26 = vpop.eup %943 }
 0x33a   : > { %v680_v27 = vsel %vm331_vm0, %v944_v26, 0.0 }
 0x33b   : > { %681 = vadd.xlane.f32.xlu2 %v680_v27 }
 0x3ae   : > { %v682_v30 = vpop.xlane.xlu2 %681 }
 0x3af   : > { %945 = vrcp.f32 %v682_v30  ;;  %v694_v33 = vand.u32 2147483648, %v682_v30  ;;  %v692_v35 = vand.u32 2147483647, %v682_v30  ;;  %vm688_vm14 = vweird.f32 %v682_v30 }
 0x3b1   : > { %v695_v37 = vor.u32 1.1754944e-38, %v694_v33  ;;  %vm693_vm1 = vcmp.eq.f32.partialorder %v692_v35, 8.507059e+37 }
 0x3b5   : > { %v946_v5 = vpop.eup %945 }
 0x3b6   : > { %v684_v31 = vmul.f32 %v946_v5, %v682_v30  ;;  %vm689_vm13 = vweird.f32 %v946_v5 }
 0x3b7   : > { %vm690_vm15 = vmor %vm688_vm14, %vm689_vm13 }
 0x3b8   : > { %v685_v32 = vsub.f32 1.0, %v684_v31 }
 0x3ba   : > { %v686_v34 = vmul.f32 %v946_v5, %v685_v32 }
 0x3bc   : > { %v687_v36 = vadd.f32 %v946_v5, %v686_v34 }
 0x3be   : > { %v691_v38 = vsel %vm690_vm15, %v946_v5, %v687_v36 }
 0x3bf   : > { %v696_v39 = vsel %vm693_vm1, %v695_v37, %v691_v38 }
 0x3c0   : > { %v697_v40 = vmul.f32 %v944_v26, %v696_v39 }
 0x3c2   : > { %891 = vmatmul.msk.f32.vlgmr.msra.gmra.mxu0 %vm331_vm0, %v697_v40 }
 0x43f   : > { %v721_v41 = vpop.f32.mrf.mxu0 }
 0x440   : > { %892 = vmatmul.msk.f32.vlgmr.msra.gmra.mxu2 %vm331_vm0, %v721_v41 }
 0x4c3   : > { %v745_v47 = vpop.f32.mrf.mxu2 }
 0x4c4   : > { %v748_v48 = vadd.f32 %v745_v47, %v643_v45 }
 0x4c6   : > { %v753_v49 = vadd.f32 %v930_v46, %v748_v48 }
 0x4c8   : > { %755 = vst.msk [vmem:[%s326_s7] sm:$0xff] %vm754_vm2, %v753_v49 }
 0x4c9 PF: > { %s18_s21 = sadd.s32 1, %s1021_s21  }
 0x4ca   : > { %p15_p7 = scmp.ge.s32.totalorder %s18_s21, 4  }
 0x4cc   :  { %17 = sbr.rel (!%p15_p7) target bundleno = 2 (0x2), region = 92 }
 0x4d1   :  { %775 = vsyncpa [#allocation3], 1 }
 0x4d2   :  { %777 = vsyncpa [#allocation3 + $0x1], 1 }
 0x4d3   :  { %778 = vsyncpa [#allocation5], 1 }

// kernel: transformer_forward.63
= control target key start
LH: loop header
LB: loop body
LE: loop exit
PB: predicated region body
PF: predicated region fallthrough
CT: control target
= control target key end

     0   :  { %9 = vsyncpa [#allocation3], 0  ;;  %s244_s0 = inlined_call_operand.vmem [shape: f32[16,32], index: 0, kind: input, shape index: {}]   ;;  %s245_s1 = inlined_call_operand.vmem [shape: f32[16,32], index: 1, kind: input, shape index: {}]   ;;  %s246_s2 = inlined_call_operand.hbm [shape: f32[1,32], index: 2, kind: input, shape index: {}]   ;;  %s247_s3 = inlined_call_operand.hbm [shape: f32[1,32], index: 3, kind: input, shape index: {}]   ;;  %s248_s4 = inlined_call_operand.vmem [shape: f32[16,32], index: 4, kind: output, shape index: {}]  }
   0x1   :  { %s20_s17 = sshll.u32 %s246_s2, 4  ;;  %s21_s17 = int_to_ptr.hbm [resolvable:$true] %s20_s17 }
   0x2   :  { %10 = vsyncpa [#allocation5], 0  ;;  %s186_s18 = smov [#allocation2]   ;;  %s31_s22 = sshll.u32 %s247_s3, 4  ;;  %s32_s22 = int_to_ptr.hbm [resolvable:$true] %s31_s22 }
   0x3   :  { %s22_s19 = sshll.u32 %s186_s18, 4  ;;  %s187_s23 = smov [#allocation4]   ;;  %s23_s19 = int_to_ptr.vmem [resolvable:$true] %s22_s19 }
   0x4   :  { %25 = dma.hbm_to_vmem [thread:$0]  %s21_s17, 16, %s23_s19, [#allocation3]  }
   0x5   :  { %s33_s24 = sshll.u32 %s187_s23, 4  ;;  %s34_s24 = int_to_ptr.vmem [resolvable:$true] %s33_s24 }
   0x6   :  { %36 = dma.hbm_to_vmem [thread:$0]  %s32_s22, 16, %s34_s24, [#allocation5]  }
   0x7   :  { %182 = dma.done.wait [#allocation3], 16  }
   0x8   :  { %183 = vsyncadd [#allocation3], 4294967280 }
   0x9   :  { %184 = dma.done.wait [#allocation5], 16  }
   0xa   :  { %185 = vsyncadd [#allocation5], 4294967280  ;;  %v45_v0 = vld [vmem:[%s244_s0] sm:$0xff]  ;;  %vm51_vm0 = vcmask 261120   ;;  %v46_v3 = vld [vmem:[%s244_s0 + $0x8] sm:$0xff]  ;;  %v188_v8 = vmov 32.0  }
   0xb   :  { %v47_v1 = vld [vmem:[%s245_s1] sm:$0xff]  ;;  %v48_v4 = vld [vmem:[%s245_s1 + $0x8] sm:$0xff]  ;;  %128 = vrcp.f32 %v188_v8 }
   0xc   :  { %v49_v2 = vadd.f32 %v47_v1, %v45_v0  ;;  %v50_v6 = vadd.f32 %v48_v4, %v46_v3  ;;  %v126_v39 = vld [vmem:[#allocation2] ss:$0 sm:$0xff]  ;;  %v127_v42 = vld [vmem:[#allocation4] ss:$0 sm:$0xff] }
   0xe   :  { %v52_v5 = vsel %vm51_vm0, %v49_v2, 0.0  ;;  %v55_v7 = vsel %vm51_vm0, %v50_v6, 0.0 }
   0xf   :  { %53 = vadd.xlane.f32.xlu0 %v52_v5 }
  0x11   :  { %v129_v9 = vpop.eup %128 }
  0x12   :  { %v59_v10 = vmul.f32 32.0, %v129_v9  ;;  %vm63_vm1 = vweird.f32 %v129_v9 }
  0x14   :  { %v60_v11 = vsub.f32 1.0, %v59_v10 }
  0x16   :  { %v61_v12 = vmul.f32 %v129_v9, %v60_v11 }
  0x17   :  { %56 = vadd.xlane.f32.xlu0 %v55_v7 }
  0x18   :  { %v62_v13 = vadd.f32 %v129_v9, %v61_v12 }
  0x1a   :  { %v64_v14 = vsel %vm63_vm1, %v129_v9, %v62_v13 }
  0x82   :  { %v54_v15 = vpop.xlane.xlu0 %53 }
  0x83   :  { %v65_v16 = vmul.f32 %v64_v14, %v54_v15 }
  0x85   :  { %v67_v17 = vsub.f32 %v49_v2, %v65_v16 }
  0x87   :  { %v69_v18 = vmul.f32 %v67_v17, %v67_v17 }
  0x89   :  { %v71_v19 = vsel %vm51_vm0, %v69_v18, 0.0 }
  0x8a   :  { %72 = vadd.xlane.f32.xlu1 %v71_v19  ;;  %v57_v20 = vpop.xlane.xlu0 %56 }
  0x8b   :  { %v66_v21 = vmul.f32 %v64_v14, %v57_v20 }
  0x8d   :  { %v68_v22 = vsub.f32 %v50_v6, %v66_v21 }
  0x8f   :  { %v70_v23 = vmul.f32 %v68_v22, %v68_v22 }
  0x91   :  { %v74_v24 = vsel %vm51_vm0, %v70_v23, 0.0 }
  0x92   :  { %75 = vadd.xlane.f32.xlu1 %v74_v24 }
  0xfd   :  { %v73_v25 = vpop.xlane.xlu1 %72 }
  0xfe   :  { %v77_v26 = vmul.f32 %v73_v25, %v64_v14 }
 0x100   :  { %v79_v27 = vadd.f32 1e-05, %v77_v26 }
 0x102   :  { %130 = vrsqrt.f32 %v79_v27  ;;  %vm87_vm3 = vweird.f32 %v79_v27 }
 0x105   :  { %v76_v28 = vpop.xlane.xlu1 %75 }
 0x106   :  { %v78_v29 = vmul.f32 %v76_v28, %v64_v14 }
 0x108   :  { %v131_v30 = vpop.eup %130  ;;  %v80_v31 = vadd.f32 1e-05, %v78_v29 }
 0x109   :  { %v82_v32 = vmul.f32 %v131_v30, %v79_v27  ;;  %vm88_vm2 = vweird.f32 %v131_v30 }
 0x10a   :  { %132 = vrsqrt.f32 %v80_v31  ;;  %vm89_vm4 = vmor %vm87_vm3, %vm88_vm2  ;;  %vm97_vm6 = vweird.f32 %v80_v31 }
 0x10b   :  { %v83_v33 = vmul.f32 %v131_v30, %v82_v32 }
 0x10d   :  { %v84_v34 = vmul.f32 0.5, %v83_v33 }
 0x10f   :  { %v85_v35 = vsub.f32 1.5, %v84_v34 }
 0x110   :  { %v133_v36 = vpop.eup %132 }
 0x111   :  { %v86_v37 = vmul.f32 %v131_v30, %v85_v35  ;;  %v92_v38 = vmul.f32 %v133_v36, %v80_v31  ;;  %vm98_vm5 = vweird.f32 %v133_v36 }
 0x112   :  { %vm99_vm7 = vmor %vm97_vm6, %vm98_vm5 }
 0x113   :  { %v90_v40 = vsel %vm89_vm4, %v131_v30, %v86_v37  ;;  %v93_v41 = vmul.f32 %v133_v36, %v92_v38 }
 0x114   :  { %v101_v43 = vmul.f32 %v90_v40, %v67_v17 }
 0x115   :  { %v94_v44 = vmul.f32 0.5, %v93_v41 }
 0x116   :  { %v107_v45 = vmul.f32 %v126_v39, %v101_v43 }
 0x117   :  { %v95_v46 = vsub.f32 1.5, %v94_v44 }
 0x118   :  { %v113_v47 = vadd.f32 %v127_v42, %v107_v45 }
 0x119   :  { %v96_v48 = vmul.f32 %v133_v36, %v95_v46 }
 0x11a   :  { %115 = vst.msk [vmem:[%s248_s4] sm:$0xff] %vm51_vm0, %v113_v47 }
 0x11b   :  { %v100_v49 = vsel %vm99_vm7, %v133_v36, %v96_v48 }
 0x11c   :  { %v102_v50 = vmul.f32 %v100_v49, %v68_v22 }
 0x11e   :  { %v108_v51 = vmul.f32 %v126_v39, %v102_v50 }
 0x120   :  { %v114_v52 = vadd.f32 %v127_v42, %v108_v51 }
 0x122   :  { %116 = vst.msk [vmem:[%s248_s4 + $0x8] sm:$0xff] %vm51_vm0, %v114_v52 }
 0x123   :  { %121 = vsyncpa [#allocation3], 1 }
 0x124   :  { %122 = vsyncpa [#allocation5], 1 }

// kernel: transformer_forward.67
= control target key start
LH: loop header
LB: loop body
LE: loop exit
PB: predicated region body
PF: predicated region fallthrough
CT: control target
= control target key end

     0   :  { %11 = vsyncpa [#allocation3], 0  ;;  %s1246_s0 = inlined_call_operand.vmem [shape: f32[2,8,32], index: 0, kind: input, shape index: {}]   ;;  %s1247_s1 = inlined_call_operand.vmem [shape: f32[2,16,32], index: 1, kind: input, shape index: {}]   ;;  %s1248_s2 = inlined_call_operand.vmem [shape: f32[2,16,32], index: 2, kind: input, shape index: {}]   ;;  %s1249_s3 = inlined_call_operand.vmem [shape: f32[2,1,16], index: 3, kind: input, shape index: {}]   ;;  %s1250_s4 = inlined_call_operand.hbm [shape: f32[32,32], index: 4, kind: input, shape index: {}]   ;;  %s1251_s5 = inlined_call_operand.hbm [shape: f32[1,32], index: 5, kind: input, shape index: {}]   ;;  %s1252_s6 = inlined_call_operand.vmem [shape: f32[2,8,32], index: 6, kind: output, shape index: {}]  }
   0x1   :  { %12 = vsyncpa [#allocation5], 0  ;;  %s1122_s21 = smov 0  }
   0x2 LB: > { %s206_s24 = sshll.u32 %s1250_s4, 4  ;;  %s898_s25 = sadd.s32 4294967295, %s1078_s21   ;;  %s1078_s21 = sphi %s1122_s21, %s18_s21   ;;  %s207_s24 = int_to_ptr.hbm [resolvable:$true] %s206_s24 }
   0x3   : > { %p900_p0 = scmp.ge.s32.totalorder %s1078_s21, 1  ;;  %p195_p1 = scmp.lt.s32.totalorder %s1078_s21, 3 }
   0x4   : > { %p952_p2 = scmp.eq.s32.totalorder %s898_s25, 0  ;;  %s1080_s27 = smov [#allocation2]  }
   0x5   : > { %p1133_p3 = pnand %p900_p0, %p195_p1  ;;  %s208_s28 = sshll.u32 %s1080_s27, 4  ;;  %s209_s28 = int_to_ptr.vmem [resolvable:$true] %s208_s28 }
   0x6   : > { %s221_s7 = sshll.u32 %s1251_s5, 4  ;;  %s1081_s8 = smov [#allocation4]   ;;  %s222_s7 = int_to_ptr.hbm [resolvable:$true] %s221_s7 }
   0x7   : > { %p945_p4 = pneg %p1133_p3  ;;  %s223_s9 = sshll.u32 %s1081_s8, 4  ;;  %s224_s9 = int_to_ptr.vmem [resolvable:$true] %s223_s9 }
   0x8   : > { %s1082_s10 = smov 128   ;;  %s1083_s11 = smov 8  }
   0x9   : > { %p946_p5 = pnand %p952_p2, %p945_p4  ;;  %265 = sbr.rel (%p1133_p3) target bundleno = 1239 (0x4d7), region = 44 }
   0xb   : > { %948 = dma.hbm_to_vmem [thread:$0]  (!%p946_p5), %s207_s24, 512, %s209_s28, [#allocation3], %s1082_s10, %s1082_s10, %s1083_s11  }
   0xc   : > { %951 = dma.hbm_to_vmem [thread:$0]  (!%p946_p5), %s222_s7, 16, %s224_s9, [#allocation5]  }
   0xe   : > { %1069 = dma.done.wait (%p952_p2), [#allocation3], 512  }
   0xf   : > { %1071 = vsyncadd (%p952_p2), [#allocation3], 4294966784 }
  0x10   : > { %1073 = dma.done.wait (%p952_p2), [#allocation5], 16  }
  0x11   : > { %1075 = vsyncadd (%p952_p2), [#allocation5], 4294967280  ;;  %p312_p6 = scmp.lt.s32.totalorder %s898_s25, 1  ;;  %vm339_vm0 = vcmask 64512   ;;  %s1084_s20 = smov 120   ;;  %vm374_vm1 = vcmask 130048  }
  0x12   : > { %s1085_s26 = smov 104   ;;  %s1086_s30 = smov 112   ;;  %v422_v45 = vld [vmem:[#allocation2] sm:$0xff]  ;;  %v512_v63 = vld [vmem:[#allocation2 + $0x8] sm:$0xff] }
  0x13   : > { %s1255_s25 = smov (!%p312_p6, %s898_s25), 1 }
  0x14   : > { %s935_s12 = sshll.u32 %s1255_s25, 4  ;;  %s907_s13 = sshll.u32 %s1255_s25, 3 }
  0x15   : > { %s320_s16 = scalar_lea.vmem %s1247_s1, %s935_s12  ;;  %s315_s19 = scalar_lea.vmem %s1246_s0, %s907_s13 }
  0x16   : > { %v335_v0 = vld [vmem:[%s320_s16 + $0x8] sm:$0xff]  ;;  %v1164_v1 = vld [vmem:[%s315_s19] sm:$0xff]  ;;  %s328_s24 = scalar_lea.vmem %s1249_s3, %s1255_s25  ;;  %s325_s29 = scalar_lea.vmem %s1248_s2, %s935_s12 }
  0x17   : > { %913 = vmatpush.xpose.msk.msra.mxu0 %vm339_vm0, %v335_v0  ;;  %427 = vrot.lane.b32.xlu0 %v335_v0, %s1084_s20  ;;  %v1167_v2 = vld [vmem:[%s320_s16] sm:$0xff]  ;;  %v337_v20 = vld [vmem:[%s325_s29 + $0x8] sm:$0xff]  ;;  %s332_s9 = scalar_lea.vmem %s1252_s6, %s907_s13 }
  0x18   : > { %423 = vrot.lane.b32.xlu1 %v1164_v1, %s1084_s20  ;;  %v1184_v6 = vld [vmem:[%s328_s24] ss:$0 sm:$0xff]  ;;  %416 = vmatpush.msra.mxu1 %v337_v20 }
  0x19   : > { %v336_v21 = vld [vmem:[%s325_s29] sm:$0xff] }
  0x1a   : > { %417 = vmatpush.msra.mxu1 %v336_v21  ;;  %v1198_v22 = vpack.i.bf16 %v336_v21, %v337_v20 }
  0x1b   : > { %914 = vmatpush.xpose.msk.msra.mxu0 %vm339_vm0, %v1167_v2 }
  0x1c   : > { %531 = vmatpush.msrb.mxu1 %v512_v63 }
  0x1e   : > { %915 = vmatmul.msk.f32.vlgmr.msra.gmra.mxu0 %vm339_vm0, %v1164_v1 }
  0x1f   : > { %425 = vrot.lane.b32.xlu0 %v1167_v2, %s1084_s20 }
  0x89   : > { %v428_v3 = vpop.permute.xlu0 %427 }
  0x8a   : > { %917 = vmatpush.xpose.msk.msra.mxu2 %vm339_vm0, %v428_v3  ;;  %v424_v5 = vpop.permute.xlu1 %423 }
  0x91   : > { %v426_v4 = vpop.permute.xlu0 %425 }
  0x92   : > { %918 = vmatpush.xpose.msk.msra.mxu2 %vm339_vm0, %v426_v4 }
  0x95   : > { %919 = vmatmul.msk.f32.vlgmr.msra.gmra.mxu2 %vm339_vm0, %v424_v5 }
  0x9b   : > { %v366_v7 = vpop.f32.mrf.mxu0 }
  0x9c   : > { %v369_v8 = vmul.f32 0.35355338, %v366_v7 }
  0x9e   : > { %v373_v9 = vadd.f32 %v1184_v6, %v369_v8 }
  0xa0   : > { %v375_v10 = vsel %vm374_vm1, %v373_v9, -inf }
  0xa1   : > { %376 = vmax.xlane.f32.xlu1 %v375_v10 }
  0xba   : > { %673 = vrot.lane.b32.xlu1 %v1167_v2, %s1085_s26 }
 0x114   : > { %v377_v11 = vpop.xlane.xlu1 %376 }
 0x115   : > { %v378_v12 = vsub.f32 %v373_v9, %v377_v11 }
 0x117   : > { %v379_v13 = vmul.f32 1.442695, %v378_v12 }
 0x118   : > { %v452_v14 = vpop.f32.mrf.mxu2 }
 0x119   : > { %988 = vpow2.f32 %v379_v13  ;;  %v455_v15 = vmul.f32 0.35355338, %v452_v14 }
 0x11b   : > { %v456_v18 = vadd.f32 %v1184_v6, %v455_v15 }
 0x11d   : > { %v457_v19 = vsel %vm374_vm1, %v456_v18, -inf }
 0x11f   : > { %v989_v16 = vpop.eup %988 }
 0x120   : > { %v381_v17 = vsel %vm374_vm1, %v989_v16, 0.0 }
 0x121   : > { %382 = vadd.xlane.f32.xlu2 %v381_v17 }
 0x129   : > { %458 = vmax.xlane.f32.xlu2 %v457_v19 }
 0x12c   : > { %v674_v61 = vpop.permute.xlu1 %673 }
 0x141   : > { %972 = vrot.lane.b32.xlu2 %v1198_v22, %s1084_s20 }
 0x149   : > { %675 = vrot.lane.b32.xlu2 %v335_v0, %s1085_s26 }
 0x151   : > { %563 = vrot.lane.b32.xlu2 %v335_v0, %s1086_s30 }
 0x159   : > { %671 = vrot.lane.b32.xlu2 %v1164_v1, %s1085_s26 }
 0x161   : > { %559 = vrot.lane.b32.xlu2 %v1164_v1, %s1086_s30 }
 0x194   : > { %v383_v23 = vpop.xlane.xlu2 %382 }
 0x195   : > { %990 = vrcp.f32 %v383_v23  ;;  %v395_v29 = vand.u32 2147483648, %v383_v23  ;;  %v393_v32 = vand.u32 2147483647, %v383_v23  ;;  %vm389_vm3 = vweird.f32 %v383_v23 }
 0x197   : > { %v396_v34 = vor.u32 1.1754944e-38, %v395_v29  ;;  %vm394_vm5 = vcmp.eq.f32.partialorder %v393_v32, 8.507059e+37 }
 0x19b   : > { %v991_v24 = vpop.eup %990 }
 0x19c   : > { %v385_v25 = vmul.f32 %v991_v24, %v383_v23  ;;  %v459_v26 = vpop.xlane.xlu2 %458  ;;  %vm390_vm2 = vweird.f32 %v991_v24 }
 0x19d   : > { %v460_v27 = vsub.f32 %v456_v18, %v459_v26  ;;  %vm391_vm4 = vmor %vm389_vm3, %vm390_vm2 }
 0x19e   : > { %v386_v28 = vsub.f32 1.0, %v385_v25 }
 0x19f   : > { %v461_v30 = vmul.f32 1.442695, %v460_v27 }
 0x1a0   : > { %v387_v31 = vmul.f32 %v991_v24, %v386_v28 }
 0x1a1   : > { %992 = vpow2.f32 %v461_v30 }
 0x1a2   : > { %v388_v33 = vadd.f32 %v991_v24, %v387_v31 }
 0x1a4   : > { %v392_v35 = vsel %vm391_vm4, %v991_v24, %v388_v33  ;;  %v973_v40 = vpop.permute.xlu2 %972 }
 0x1a5   : > { %v397_v36 = vsel %vm394_vm5, %v396_v34, %v392_v35  ;;  %v974_v42 = vunpack.i.l.bf16 %v973_v40  ;;  %v975_v43 = vunpack.i.h.bf16 %v973_v40 }
 0x1a6   : > { %v398_v37 = vmul.f32 %v989_v16, %v397_v36 }
 0x1a7   : > { %v993_v38 = vpop.eup %992  ;;  %506 = vmatpush.msra.mxu3 %v974_v42 }
 0x1a8   : > { %916 = vmatmul.msk.f32.vlgmr.msra.gmra.mxu1 %vm374_vm1, %v398_v37  ;;  %v463_v39 = vsel %vm374_vm1, %v993_v38, 0.0 }
 0x1a9   : > { %464 = vadd.xlane.f32.xlu0 %v463_v39  ;;  %507 = vmatpush.msra.mxu3 %v975_v43 }
 0x1ab   : > { %554 = vmatpush.msrb.mxu3 %v422_v45 }
 0x1ac   : > { %v676_v41 = vpop.permute.xlu2 %675 }
 0x1b4   : > { %v564_v44 = vpop.permute.xlu2 %563 }
 0x1b5   : > { %923 = vmatpush.xpose.msk.msrb.mxu0 %vm339_vm0, %v564_v44 }
 0x1bc   : > { %v672_v50 = vpop.permute.xlu2 %671 }
 0x1bd   : > { %561 = vrot.lane.b32.xlu0 %v1167_v2, %s1086_s30 }
 0x1c4   : > { %v560_v60 = vpop.permute.xlu2 %559 }
 0x21c   : > { %v465_v46 = vpop.xlane.xlu0 %464 }
 0x21d   : > { %994 = vrcp.f32 %v465_v46  ;;  %v477_v51 = vand.u32 2147483648, %v465_v46  ;;  %v475_v53 = vand.u32 2147483647, %v465_v46  ;;  %vm471_vm7 = vweird.f32 %v465_v46 }
 0x21f   : > { %v478_v55 = vor.u32 1.1754944e-38, %v477_v51  ;;  %vm476_vm9 = vcmp.eq.f32.partialorder %v475_v53, 8.507059e+37  ;;  %v758_v51 = vld [vmem:[#allocation2 + $0x18] sm:$0xff] }
 0x223   : > { %v995_v47 = vpop.eup %994 }
 0x224   : > { %v467_v48 = vmul.f32 %v995_v47, %v465_v46  ;;  %vm472_vm6 = vweird.f32 %v995_v47 }
 0x225   : > { %vm473_vm8 = vmor %vm471_vm7, %vm472_vm6  ;;  %v419_v62 = vpop.f32.mrf.mxu1 }
 0x226   : > { %v468_v49 = vsub.f32 1.0, %v467_v48 }
 0x228   : > { %v469_v52 = vmul.f32 %v995_v47, %v468_v49 }
 0x22a   : > { %v470_v54 = vadd.f32 %v995_v47, %v469_v52 }
 0x22c   : > { %v474_v56 = vsel %vm473_vm8, %v995_v47, %v470_v54 }
 0x22d   : > { %v479_v57 = vsel %vm476_vm9, %v478_v55, %v474_v56 }
 0x22e   : > { %v480_v58 = vmul.f32 %v993_v38, %v479_v57 }
 0x22f   : > { %v562_v59 = vpop.permute.xlu0 %561 }
 0x230   : > { %920 = vmatmul.msk.f32.vlgmr.msra.gmra.mxu3 %vm374_vm1, %v480_v58  ;;  %924 = vmatpush.xpose.msk.msrb.mxu0 %vm339_vm0, %v562_v59  ;;  %v987_v58 = vld [vmem:[#allocation4] ss:$0 sm:$0xff] }
 0x231   : > { %928 = vmatpush.xpose.msk.msra.mxu3 %vm339_vm0, %v676_v41 }
 0x233   : > { %925 = vmatmul.msk.f32.vlgmr.msrb.gmra.mxu0 %vm339_vm0, %v560_v60 }
 0x235   : > { %929 = vmatpush.xpose.msk.msra.mxu3 %vm339_vm0, %v674_v61 }
 0x238   : > { %922 = vmatmul.msk.f32.vlgmr.msrb.gmra.mxu3 %vm339_vm0, %v419_v62 }
 0x240   : > { %930 = vmatmul.msk.f32.vlgmr.msra.gmra.mxu3 %vm339_vm0, %v672_v50  ;;  %v646_v50 = vld [vmem:[#allocation2 + $0x10] sm:$0xff] }
 0x241   : > { %665 = vmatpush.msra.mxu1 %v646_v50 }
 0x2b0   : > { %v588_v0 = vpop.f32.mrf.mxu0 }
 0x2b1   : > { %v591_v1 = vmul.f32 0.35355338, %v588_v0 }
 0x2b3   : > { %v509_v2 = vpop.f32.mrf.mxu3  ;;  %v592_v3 = vadd.f32 %v1184_v6, %v591_v1 }
 0x2b4   : > { %921 = vmatmul.msk.f32.vlgmr.msrb.gmra.mxu1 %vm339_vm0, %v509_v2 }
 0x2b5   : > { %v593_v4 = vsel %vm374_vm1, %v592_v3, -inf }
 0x2b6   : > { %594 = vmax.xlane.f32.xlu2 %v593_v4 }
 0x2bb   : > { %v1223_v5 = vpop.f32.mrf.mxu3 }
 0x2c3   : > { %v700_v7 = vpop.f32.mrf.mxu3 }
 0x2c4   : > { %v703_v8 = vmul.f32 0.35355338, %v700_v7 }
 0x2c6   : > { %v704_v9 = vadd.f32 %v1184_v6, %v703_v8 }
 0x2c8   : > { %v705_v10 = vsel %vm374_vm1, %v704_v9, -inf }
 0x2c9   : > { %706 = vmax.xlane.f32.xlu1 %v705_v10 }
 0x2e2   : > { %977 = vrot.lane.b32.xlu1 %v1198_v22, %s1086_s30 }
 0x329   : > { %v595_v11 = vpop.xlane.xlu2 %594 }
 0x32a   : > { %v596_v12 = vsub.f32 %v592_v3, %v595_v11 }
 0x32c   : > { %v597_v13 = vmul.f32 1.442695, %v596_v12 }
 0x32e   : > { %996 = vpow2.f32 %v597_v13 }
 0x331   : > { %v533_v54 = vpop.f32.mrf.mxu1 }
 0x332   : > { %v557_v56 = vadd.f32 %v1223_v5, %v533_v54 }
 0x334   : > { %v997_v14 = vpop.eup %996 }
 0x335   : > { %v599_v15 = vsel %vm374_vm1, %v997_v14, 0.0 }
 0x336   : > { %600 = vadd.xlane.f32.xlu0 %v599_v15 }
 0x33c   : > { %v707_v16 = vpop.xlane.xlu1 %706 }
 0x33d   : > { %v708_v17 = vsub.f32 %v704_v9, %v707_v16 }
 0x33f   : > { %v709_v18 = vmul.f32 1.442695, %v708_v17 }
 0x341   : > { %998 = vpow2.f32 %v709_v18 }
 0x347   : > { %v999_v19 = vpop.eup %998 }
 0x348   : > { %v711_v6 = vsel %vm374_vm1, %v999_v19, 0.0 }
 0x349   : > { %712 = vadd.xlane.f32.xlu2 %v711_v6 }
 0x34a   : > { %982 = vrot.lane.b32.xlu0 %v1198_v22, %s1085_s26 }
 0x354   : > { %v978_v20 = vpop.permute.xlu1 %977 }
 0x355   : > { %v980_v21 = vunpack.i.h.bf16 %v978_v20  ;;  %v979_v23 = vunpack.i.l.bf16 %v978_v20 }
 0x357   : > { %640 = vmatpush.msrb.mxu2 %v979_v23 }
 0x359   : > { %641 = vmatpush.msrb.mxu2 %v980_v21 }
 0x35b   : > { %777 = vmatpush.msra.mxu2 %v758_v51 }
 0x3a9   : > { %v601_v24 = vpop.xlane.xlu0 %600 }
 0x3aa   : > { %1000 = vrcp.f32 %v601_v24  ;;  %v613_v28 = vand.u32 2147483648, %v601_v24  ;;  %v611_v30 = vand.u32 2147483647, %v601_v24  ;;  %vm607_vm11 = vweird.f32 %v601_v24 }
 0x3ac   : > { %v614_v32 = vor.u32 1.1754944e-38, %v613_v28  ;;  %vm612_vm13 = vcmp.eq.f32.partialorder %v611_v30, 8.507059e+37 }
 0x3b0   : > { %v1001_v25 = vpop.eup %1000 }
 0x3b1   : > { %v603_v26 = vmul.f32 %v1001_v25, %v601_v24  ;;  %vm608_vm10 = vweird.f32 %v1001_v25 }
 0x3b2   : > { %vm609_vm12 = vmor %vm607_vm11, %vm608_vm10 }
 0x3b3   : > { %v604_v27 = vsub.f32 1.0, %v603_v26 }
 0x3b5   : > { %v605_v29 = vmul.f32 %v1001_v25, %v604_v27 }
 0x3b7   : > { %v606_v31 = vadd.f32 %v1001_v25, %v605_v29 }
 0x3b9   : > { %v610_v22 = vsel %vm609_vm12, %v1001_v25, %v606_v31 }
 0x3ba   : > { %v615_v33 = vsel %vm612_vm13, %v614_v32, %v610_v22 }
 0x3bb   : > { %v616_v34 = vmul.f32 %v997_v14, %v615_v33 }
 0x3bc   : > { %v713_v35 = vpop.xlane.xlu2 %712  ;;  %v983_v36 = vpop.permute.xlu0 %982 }
 0x3bd   : > { %1002 = vrcp.f32 %v713_v35  ;;  %926 = vmatmul.msk.f32.vlgmr.msrb.gmra.mxu2 %vm374_vm1, %v616_v34  ;;  %v985_v37 = vunpack.i.h.bf16 %v983_v36  ;;  %v984_v38 = vunpack.i.l.bf16 %v983_v36  ;;  %v725_v42 = vand.u32 2147483648, %v713_v35 }
 0x3be   : > { %v723_v44 = vand.u32 2147483647, %v713_v35  ;;  %vm719_vm15 = vweird.f32 %v713_v35 }
 0x3bf   : > { %752 = vmatpush.msra.mxu0 %v984_v38  ;;  %v726_v46 = vor.u32 1.1754944e-38, %v725_v42 }
 0x3c0   : > { %vm724_vm3 = vcmp.eq.f32.partialorder %v723_v44, 8.507059e+37 }
 0x3c1   : > { %753 = vmatpush.msra.mxu0 %v985_v37 }
 0x3c3   : > { %v1003_v39 = vpop.eup %1002 }
 0x3c4   : > { %v715_v40 = vmul.f32 %v1003_v39, %v713_v35  ;;  %vm720_vm14 = vweird.f32 %v1003_v39 }
 0x3c5   : > { %vm721_vm2 = vmor %vm719_vm15, %vm720_vm14 }
 0x3c6   : > { %v716_v41 = vsub.f32 1.0, %v715_v40 }
 0x3c8   : > { %v717_v43 = vmul.f32 %v1003_v39, %v716_v41 }
 0x3ca   : > { %v718_v45 = vadd.f32 %v1003_v39, %v717_v43 }
 0x3cc   : > { %v722_v47 = vsel %vm721_vm2, %v1003_v39, %v718_v45 }
 0x3cd   : > { %v727_v48 = vsel %vm724_vm3, %v726_v46, %v722_v47 }
 0x3ce   : > { %v728_v49 = vmul.f32 %v999_v19, %v727_v48 }
 0x3d0   : > { %931 = vmatmul.msk.f32.vlgmr.msra.gmra.mxu0 %vm374_vm1, %v728_v49  ;;  %vm788_vm1 = vcmask 261120  }
 0x440   : > { %v643_v52 = vpop.f32.mrf.mxu2 }
 0x441   : > { %927 = vmatmul.msk.f32.vlgmr.msra.gmra.mxu1 %vm339_vm0, %v643_v52 }
 0x44d   : > { %v755_v53 = vpop.f32.mrf.mxu0 }
 0x44e   : > { %932 = vmatmul.msk.f32.vlgmr.msra.gmra.mxu2 %vm339_vm0, %v755_v53 }
 0x4be   : > { %v667_v55 = vpop.f32.mrf.mxu1 }
 0x4bf   : > { %v670_v57 = vadd.f32 %v667_v55, %v557_v56 }
 0x4d1   : > { %v779_v59 = vpop.f32.mrf.mxu2 }
 0x4d2   : > { %v782_v60 = vadd.f32 %v779_v59, %v670_v57 }
 0x4d4   : > { %v787_v61 = vadd.f32 %v987_v58, %v782_v60 }
 0x4d6   : > { %789 = vst.msk [vmem:[%s332_s9] sm:$0xff] %vm788_vm1, %v787_v61 }
 0x4d7 PF: > { %s18_s21 = sadd.s32 1, %s1078_s21  }
 0x4d8   : > { %p15_p7 = scmp.ge.s32.totalorder %s18_s21, 4  }
 0x4da   :  { %17 = sbr.rel (!%p15_p7) target bundleno = 2 (0x2), region = 92 }
 0x4df   :  { %809 = vsyncpa [#allocation3], 1 }
 0x4e0   :  { %811 = vsyncpa [#allocation3 + $0x1], 1 }
 0x4e1   :  { %812 = vsyncpa [#allocation5], 1 }

// kernel: transformer_forward.69
= control target key start
LH: loop header
LB: loop body
LE: loop exit
PB: predicated region body
PF: predicated region fallthrough
CT: control target
= control target key end

     0   :  { %8 = vsyncpa [#allocation3], 0  ;;  %s200_s0 = inlined_call_operand.vmem [shape: f32[16,32], index: 0, kind: input, shape index: {}]   ;;  %s201_s1 = inlined_call_operand.hbm [shape: f32[32,64], index: 1, kind: input, shape index: {}]   ;;  %s202_s2 = inlined_call_operand.hbm [shape: f32[1,64], index: 2, kind: input, shape index: {}]   ;;  %s203_s3 = inlined_call_operand.vmem [shape: f32[16,64], index: 3, kind: output, shape index: {}]  }
   0x1   :  { %s16_s14 = sshll.u32 %s201_s1, 4  ;;  %s17_s14 = int_to_ptr.hbm [resolvable:$true] %s16_s14 }
   0x2   :  { %9 = vsyncpa [#allocation5], 0  ;;  %s158_s15 = smov [#allocation2]   ;;  %s30_s19 = sshll.u32 %s202_s2, 4  ;;  %s31_s19 = int_to_ptr.hbm [resolvable:$true] %s30_s19 }
   0x3   :  { %s18_s16 = sshll.u32 %s158_s15, 4  ;;  %s159_s20 = smov 128   ;;  %s19_s16 = int_to_ptr.vmem [resolvable:$true] %s18_s16 }
   0x4   :  { %s160_s21 = smov 8   ;;  %s161_s22 = smov [#allocation4]  }
   0x5   :  { %24 = dma.hbm_to_vmem [thread:$0]  %s17_s14, 512, %s19_s16, [#allocation3], %s159_s20, %s159_s20, %s160_s21  }
   0x6   :  { %s32_s23 = sshll.u32 %s161_s22, 4  ;;  %s33_s23 = int_to_ptr.vmem [resolvable:$true] %s32_s23 }
   0x7   :  { %35 = dma.hbm_to_vmem [thread:$0]  %s31_s19, 16, %s33_s23, [#allocation5]  }
   0x8   :  { %154 = dma.done.wait [#allocation3], 512  }
   0x9   :  { %155 = vsyncadd [#allocation3], 4294966784 }
   0xa   :  { %156 = dma.done.wait [#allocation5], 16  }
   0xb   :  { %157 = vsyncadd [#allocation5], 4294967280  ;;  %v49_v0 = vld [vmem:[#allocation2 + $0x18] sm:$0xff]  ;;  %v48_v1 = vld [vmem:[#allocation2 + $0x10] sm:$0xff]  ;;  %vm54_vm0 = vcmask 261120   ;;  %vm86_vm1 = vcmask 523264  }
   0xc   :  { %73 = vmatpush.msra.mxu0 %v49_v0  ;;  %97 = vmatpush.msra.mxu1 %v49_v0  ;;  %v47_v2 = vld [vmem:[#allocation2 + $0x8] sm:$0xff]  ;;  %v46_v3 = vld [vmem:[#allocation2] sm:$0xff] }
   0xd   :  { %v44_v4 = vld [vmem:[%s200_s0] sm:$0xff]  ;;  %v45_v5 = vld [vmem:[%s200_s0 + $0x8] sm:$0xff] }
   0xe   :  { %74 = vmatpush.msra.mxu0 %v48_v1  ;;  %98 = vmatpush.msra.mxu1 %v48_v1  ;;  %v105_v6 = vld [vmem:[#allocation4] ss:$0 sm:$0xff] }
  0x10   :  { %75 = vmatpush.msra.mxu0 %v47_v2  ;;  %99 = vmatpush.msra.mxu1 %v47_v2 }
  0x12   :  { %76 = vmatpush.msra.mxu0 %v46_v3  ;;  %100 = vmatpush.msra.mxu1 %v46_v3 }
  0x13   :  { %95 = vmatmul.msk.f32.vlgmr.msra.gmra.mxu0 %vm54_vm0, %v44_v4  ;;  %96 = vmatmul.msk.f32.vlgmr.msra.gmra.mxu1 %vm54_vm0, %v45_v5 }
  0x90   :  { %v78_v7 = vpop.f32.mrf.mxu0  ;;  %v81_v8 = vpop.f32.mrf.mxu1 }
  0x91   :  { %v79_v9 = vadd.f32 %v105_v6, %v78_v7  ;;  %v82_v10 = vadd.f32 %v105_v6, %v81_v8 }
  0x93   :  { %v84_v11 = vmax.f32 %v79_v9, 0.0  ;;  %v85_v12 = vmax.f32 %v82_v10, 0.0 }
  0x95   :  { %87 = vst.msk [vmem:[%s203_s3] sm:$0xff] %vm86_vm1, %v84_v11 }
  0x96   :  { %88 = vst.msk [vmem:[%s203_s3 + $0x8] sm:$0xff] %vm86_vm1, %v85_v12 }
  0x97   :  { %93 = vsyncpa [#allocation3], 1 }
  0x98   :  { %94 = vsyncpa [#allocation5], 1 }

// kernel: transformer_forward.71
= control target key start
LH: loop header
LB: loop body
LE: loop exit
PB: predicated region body
PF: predicated region fallthrough
CT: control target
= control target key end

     0   :  { %vm23_vm0 = vcmask 261120   ;;  %v102_v8 = vmov 32.0   ;;  %s158_s0 = inlined_call_operand.vmem [shape: f32[16,32], index: 0, kind: input, shape index: {}]   ;;  %s159_s1 = inlined_call_operand.vmem [shape: f32[16,32], index: 1, kind: input, shape index: {}]   ;;  %s160_s2 = inlined_call_operand.vmem [shape: f32[1,32], index: 2, kind: input, shape index: {}]   ;;  %s161_s3 = inlined_call_operand.vmem [shape: f32[1,32], index: 3, kind: input, shape index: {}]   ;;  %s162_s4 = inlined_call_operand.vmem [shape: f32[16,32], index: 4, kind: output, shape index: {}]  }
   0x1   :  { %v17_v0 = vld [vmem:[%s158_s0] sm:$0xff]  ;;  %v18_v3 = vld [vmem:[%s158_s0 + $0x8] sm:$0xff]  ;;  %96 = vrcp.f32 %v102_v8 }
   0x2   :  { %v19_v1 = vld [vmem:[%s159_s1] sm:$0xff]  ;;  %v20_v4 = vld [vmem:[%s159_s1 + $0x8] sm:$0xff] }
   0x3   :  { %v21_v2 = vadd.f32 %v19_v1, %v17_v0  ;;  %v22_v6 = vadd.f32 %v20_v4, %v18_v3  ;;  %v94_v39 = vld [vmem:[%s160_s2] ss:$0 sm:$0xff] }
   0x4   :  { %v95_v42 = vld [vmem:[%s161_s3] ss:$0 sm:$0xff] }
   0x5   :  { %v24_v5 = vsel %vm23_vm0, %v21_v2, 0.0  ;;  %v27_v7 = vsel %vm23_vm0, %v22_v6, 0.0 }
   0x6   :  { %25 = vadd.xlane.f32.xlu0 %v24_v5 }
   0x7   :  { %v97_v9 = vpop.eup %96 }
   0x8   :  { %v31_v10 = vmul.f32 32.0, %v97_v9  ;;  %vm35_vm1 = vweird.f32 %v97_v9 }
   0xa   :  { %v32_v11 = vsub.f32 1.0, %v31_v10 }
   0xc   :  { %v33_v12 = vmul.f32 %v97_v9, %v32_v11 }
   0xe   :  { %28 = vadd.xlane.f32.xlu0 %v27_v7  ;;  %v34_v13 = vadd.f32 %v97_v9, %v33_v12 }
  0x10   :  { %v36_v14 = vsel %vm35_vm1, %v97_v9, %v34_v13 }
  0x79   :  { %v26_v15 = vpop.xlane.xlu0 %25 }
  0x7a   :  { %v37_v16 = vmul.f32 %v36_v14, %v26_v15 }
  0x7c   :  { %v39_v17 = vsub.f32 %v21_v2, %v37_v16 }
  0x7e   :  { %v41_v18 = vmul.f32 %v39_v17, %v39_v17 }
  0x80   :  { %v43_v19 = vsel %vm23_vm0, %v41_v18, 0.0 }
  0x81   :  { %44 = vadd.xlane.f32.xlu1 %v43_v19  ;;  %v29_v20 = vpop.xlane.xlu0 %28 }
  0x82   :  { %v38_v21 = vmul.f32 %v36_v14, %v29_v20 }
  0x84   :  { %v40_v22 = vsub.f32 %v22_v6, %v38_v21 }
  0x86   :  { %v42_v23 = vmul.f32 %v40_v22, %v40_v22 }
  0x88   :  { %v46_v24 = vsel %vm23_vm0, %v42_v23, 0.0 }
  0x89   :  { %47 = vadd.xlane.f32.xlu1 %v46_v24 }
  0xf4   :  { %v45_v25 = vpop.xlane.xlu1 %44 }
  0xf5   :  { %v49_v26 = vmul.f32 %v45_v25, %v36_v14 }
  0xf7   :  { %v51_v27 = vadd.f32 1e-05, %v49_v26 }
  0xf9   :  { %98 = vrsqrt.f32 %v51_v27  ;;  %vm59_vm3 = vweird.f32 %v51_v27 }
  0xfc   :  { %v48_v28 = vpop.xlane.xlu1 %47 }
  0xfd   :  { %v50_v29 = vmul.f32 %v48_v28, %v36_v14 }
  0xff   :  { %v99_v30 = vpop.eup %98  ;;  %v52_v31 = vadd.f32 1e-05, %v50_v29 }
 0x100   :  { %v54_v32 = vmul.f32 %v99_v30, %v51_v27  ;;  %vm60_vm2 = vweird.f32 %v99_v30 }
 0x101   :  { %100 = vrsqrt.f32 %v52_v31  ;;  %vm61_vm4 = vmor %vm59_vm3, %vm60_vm2  ;;  %vm69_vm6 = vweird.f32 %v52_v31 }
 0x102   :  { %v55_v33 = vmul.f32 %v99_v30, %v54_v32 }
 0x104   :  { %v56_v34 = vmul.f32 0.5, %v55_v33 }
 0x106   :  { %v57_v35 = vsub.f32 1.5, %v56_v34 }
 0x107   :  { %v101_v36 = vpop.eup %100 }
 0x108   :  { %v58_v37 = vmul.f32 %v99_v30, %v57_v35  ;;  %v64_v38 = vmul.f32 %v101_v36, %v52_v31  ;;  %vm70_vm5 = vweird.f32 %v101_v36 }
 0x109   :  { %vm71_vm7 = vmor %vm69_vm6, %vm70_vm5 }
 0x10a   :  { %v62_v40 = vsel %vm61_vm4, %v99_v30, %v58_v37  ;;  %v65_v41 = vmul.f32 %v101_v36, %v64_v38 }
 0x10b   :  { %v73_v43 = vmul.f32 %v62_v40, %v39_v17 }
 0x10c   :  { %v66_v44 = vmul.f32 0.5, %v65_v41 }
 0x10d   :  { %v79_v45 = vmul.f32 %v94_v39, %v73_v43 }
 0x10e   :  { %v67_v46 = vsub.f32 1.5, %v66_v44 }
 0x10f   :  { %v85_v47 = vadd.f32 %v95_v42, %v79_v45 }
 0x110   :  { %v68_v48 = vmul.f32 %v101_v36, %v67_v46 }
 0x111   :  { %87 = vst.msk [vmem:[%s162_s4] sm:$0xff] %vm23_vm0, %v85_v47 }
 0x112   :  { %v72_v49 = vsel %vm71_vm7, %v101_v36, %v68_v48 }
 0x113   :  { %v74_v50 = vmul.f32 %v72_v49, %v40_v22 }
 0x115   :  { %v80_v51 = vmul.f32 %v94_v39, %v74_v50 }
 0x117   :  { %v86_v52 = vadd.f32 %v95_v42, %v80_v51 }
 0x119   :  { %88 = vst.msk [vmem:[%s162_s4 + $0x8] sm:$0xff] %vm23_vm0, %v86_v52 }

// kernel: transformer_forward.70
= control target key start
LH: loop header
LB: loop body
LE: loop exit
PB: predicated region body
PF: predicated region fallthrough
CT: control target
= control target key end

     0   :  { %vm28_vm0 = vcmask 523264   ;;  %vm58_vm1 = vcmask 261120   ;;  %s135_s1 = inlined_call_operand.vmem [shape: f32[64,32], index: 1, kind: input, shape index: {}]   ;;  %s136_s2 = inlined_call_operand.vmem [shape: f32[1,32], index: 2, kind: input, shape index: {}]   ;;  %s137_s0 = inlined_call_operand.vmem [shape: f32[16,64], index: 0, kind: input, shape index: {}]   ;;  %s138_s3 = inlined_call_operand.vmem [shape: f32[16,32], index: 3, kind: output, shape index: {}]  }
   0x1   :  { %v23_v0 = vld [vmem:[%s135_s1 + $0x38] sm:$0xff]  ;;  %v22_v1 = vld [vmem:[%s135_s1 + $0x30] sm:$0xff]  ;;  %v21_v2 = vld [vmem:[%s135_s1 + $0x28] sm:$0xff] }
   0x2   :  { %43 = vmatpush.msra.mxu0 %v23_v0  ;;  %67 = vmatpush.msra.mxu1 %v23_v0  ;;  %v20_v3 = vld [vmem:[%s135_s1 + $0x20] sm:$0xff]  ;;  %v19_v4 = vld [vmem:[%s135_s1 + $0x18] sm:$0xff]  ;;  %v18_v5 = vld [vmem:[%s135_s1 + $0x10] sm:$0xff] }
   0x3   :  { %v17_v6 = vld [vmem:[%s135_s1 + $0x8] sm:$0xff]  ;;  %v16_v7 = vld [vmem:[%s135_s1] sm:$0xff] }
   0x4   :  { %44 = vmatpush.msra.mxu0 %v22_v1  ;;  %68 = vmatpush.msra.mxu1 %v22_v1  ;;  %v14_v8 = vld [vmem:[%s137_s0] sm:$0xff]  ;;  %v15_v9 = vld [vmem:[%s137_s0 + $0x8] sm:$0xff] }
   0x5   :  { %v75_v10 = vld [vmem:[%s136_s2] ss:$0 sm:$0xff] }
   0x6   :  { %45 = vmatpush.msra.mxu0 %v21_v2  ;;  %69 = vmatpush.msra.mxu1 %v21_v2 }
   0x8   :  { %46 = vmatpush.msra.mxu0 %v20_v3  ;;  %70 = vmatpush.msra.mxu1 %v20_v3 }
   0xa   :  { %47 = vmatpush.msra.mxu0 %v19_v4  ;;  %71 = vmatpush.msra.mxu1 %v19_v4 }
   0xc   :  { %48 = vmatpush.msra.mxu0 %v18_v5  ;;  %72 = vmatpush.msra.mxu1 %v18_v5 }
   0xe   :  { %49 = vmatpush.msra.mxu0 %v17_v6  ;;  %73 = vmatpush.msra.mxu1 %v17_v6 }
  0x10   :  { %50 = vmatpush.msra.mxu0 %v16_v7  ;;  %74 = vmatpush.msra.mxu1 %v16_v7 }
  0x11   :  { %65 = vmatmul.msk.f32.vlgmr.msra.gmra.mxu0 %vm28_vm0, %v14_v8  ;;  %66 = vmatmul.msk.f32.vlgmr.msra.gmra.mxu1 %vm28_vm0, %v15_v9 }
  0x8e   :  { %v52_v11 = vpop.f32.mrf.mxu0  ;;  %v55_v12 = vpop.f32.mrf.mxu1 }
  0x8f   :  { %v53_v13 = vadd.f32 %v75_v10, %v52_v11  ;;  %v56_v14 = vadd.f32 %v75_v10, %v55_v12 }
  0x91   :  { %59 = vst.msk [vmem:[%s138_s3] sm:$0xff] %vm58_vm1, %v53_v13 }
  0x92   :  { %60 = vst.msk [vmem:[%s138_s3 + $0x8] sm:$0xff] %vm58_vm1, %v56_v14 }

// kernel: transformer_forward.78
= control target key start
LH: loop header
LB: loop body
LE: loop exit
PB: predicated region body
PF: predicated region fallthrough
CT: control target
= control target key end

     0   :  { %9 = vsyncpa [#allocation3], 0  ;;  %s303_s0 = inlined_call_operand.vmem [shape: f32[32,32], index: 0, kind: input, shape index: {}]   ;;  %s304_s1 = inlined_call_operand.hbm [shape: f32[32,32], index: 1, kind: input, shape index: {}]   ;;  %s305_s2 = inlined_call_operand.hbm [shape: f32[32,32], index: 2, kind: input, shape index: {}]   ;;  %s306_s3 = inlined_call_operand.hbm [shape: f32[1,32], index: 3, kind: input, shape index: {}]   ;;  %s307_s4 = inlined_call_operand.vmem [shape: f32[32,32], index: 4, kind: output, shape index: {}]  }
   0x1   :  { %10 = vsyncpa [#allocation5], 0  ;;  %s30_s17 = sshll.u32 %s305_s2, 4  ;;  %s232_s18 = smov [#allocation4]   ;;  %s31_s17 = int_to_ptr.hbm [resolvable:$true] %s30_s17 }
   0x2   :  { %s32_s19 = sshll.u32 %s232_s18, 4  ;;  %s17_s22 = sshll.u32 %s304_s1, 4  ;;  %s33_s19 = int_to_ptr.vmem [resolvable:$true] %s32_s19  ;;  %s18_s22 = int_to_ptr.hbm [resolvable:$true] %s17_s22 }
   0x3   :  { %s233_s23 = smov 128   ;;  %s234_s24 = smov 8  }
   0x4   :  { %38 = dma.hbm_to_vmem [thread:$0]  %s31_s17, 512, %s33_s19, [#allocation5], %s233_s23, %s233_s23, %s234_s24  }
   0x5   :  { %s235_s25 = smov [#allocation2]   ;;  %s44_s29 = sshll.u32 %s306_s3, 4  ;;  %s45_s29 = int_to_ptr.hbm [resolvable:$true] %s44_s29 }
   0x6   :  { %s19_s26 = sshll.u32 %s235_s25, 4  ;;  %s236_s2 = smov [#allocation6]   ;;  %s20_s26 = int_to_ptr.vmem [resolvable:$true] %s19_s26 }
   0x7   :  { %25 = dma.hbm_to_vmem [thread:$0]  %s18_s22, 512, %s20_s26, [#allocation3], %s233_s23, %s233_s23, %s234_s24  }
   0x8   :  { %s46_s30 = sshll.u32 %s236_s2, 4  ;;  %s47_s30 = int_to_ptr.vmem [resolvable:$true] %s46_s30 }
   0x9   :  { %49 = dma.hbm_to_vmem [thread:$0]  %s45_s29, 16, %s47_s30, [#allocation5]  }
   0xa   :  { %228 = dma.done.wait [#allocation3], 512  }
   0xb   :  { %229 = vsyncadd [#allocation3], 4294966784 }
   0xc   :  { %230 = dma.done.wait [#allocation5], 528  }
   0xd   :  { %231 = vsyncadd [#allocation5], 4294966768  ;;  %v77_v0 = vld [vmem:[#allocation4 + $0x18] sm:$0xff]  ;;  %v76_v1 = vld [vmem:[#allocation4 + $0x10] sm:$0xff]  ;;  %vm82_vm0 = vcmask 261120  }
   0xe   :  { %139 = vmatpush.msra.mxu2 %v77_v0  ;;  %140 = vmatpush.msra.mxu3 %v77_v0  ;;  %v75_v2 = vld [vmem:[#allocation4 + $0x8] sm:$0xff]  ;;  %v64_v3 = vld [vmem:[%s303_s0 + $0x10] sm:$0xff]  ;;  %v65_v5 = vld [vmem:[%s303_s0 + $0x18] sm:$0xff] }
   0xf   :  { %v68_v4 = vld [vmem:[#allocation2 + $0x10] sm:$0xff]  ;;  %107 = vmatpush.msra.mxu0 %v77_v0  ;;  %138 = vmatpush.msra.mxu1 %v77_v0  ;;  %v69_v6 = vld [vmem:[#allocation2 + $0x18] sm:$0xff]  ;;  %v62_v7 = vld [vmem:[%s303_s0] sm:$0xff] }
  0x10   :  { %142 = vmatpush.msra.mxu2 %v76_v1  ;;  %143 = vmatpush.msra.mxu3 %v76_v1  ;;  %v66_v8 = vld [vmem:[#allocation2] sm:$0xff]  ;;  %v63_v9 = vld [vmem:[%s303_s0 + $0x8] sm:$0xff]  ;;  %v72_v12 = vadd.f32 %v68_v4, %v64_v3  ;;  %v73_v13 = vadd.f32 %v69_v6, %v65_v5 }
  0x11   :  { %v67_v10 = vld [vmem:[#allocation2 + $0x8] sm:$0xff]  ;;  %v74_v11 = vld [vmem:[#allocation4] sm:$0xff]  ;;  %108 = vmatpush.msra.mxu0 %v76_v1  ;;  %141 = vmatpush.msra.mxu1 %v76_v1  ;;  %v70_v14 = vadd.f32 %v66_v8, %v62_v7 }
  0x12   :  { %145 = vmatpush.msra.mxu2 %v75_v2  ;;  %146 = vmatpush.msra.mxu3 %v75_v2  ;;  %v71_v15 = vadd.f32 %v67_v10, %v63_v9  ;;  %v155_v16 = vld [vmem:[#allocation6] ss:$0 sm:$0xff] }
  0x13   :  { %109 = vmatpush.msra.mxu0 %v75_v2  ;;  %144 = vmatpush.msra.mxu1 %v75_v2 }
  0x14   :  { %148 = vmatpush.msra.mxu2 %v74_v11  ;;  %149 = vmatpush.msra.mxu3 %v74_v11 }
  0x15   :  { %136 = vmatmul.msk.f32.vlgmr.msra.gmra.mxu2 %vm82_vm0, %v72_v12  ;;  %137 = vmatmul.msk.f32.vlgmr.msra.gmra.mxu3 %vm82_vm0, %v73_v13 }
  0x16   :  { %110 = vmatpush.msra.mxu0 %v74_v11  ;;  %147 = vmatpush.msra.mxu1 %v74_v11 }
  0x17   :  { %134 = vmatmul.msk.f32.vlgmr.msra.gmra.mxu0 %vm82_vm0, %v70_v14  ;;  %135 = vmatmul.msk.f32.vlgmr.msra.gmra.mxu1 %vm82_vm0, %v71_v15 }
  0x94   :  { %v112_v17 = vpop.f32.mrf.mxu0  ;;  %v115_v18 = vpop.f32.mrf.mxu1 }
  0x95   :  { %v113_v19 = vadd.f32 %v155_v16, %v112_v17  ;;  %v116_v20 = vadd.f32 %v155_v16, %v115_v18 }
  0x97   :  { %124 = vst.msk [vmem:[%s307_s4] sm:$0xff] %vm82_vm0, %v113_v19 }
  0x98   :  { %125 = vst.msk [vmem:[%s307_s4 + $0x8] sm:$0xff] %vm82_vm0, %v116_v20  ;;  %v118_v21 = vpop.f32.mrf.mxu2  ;;  %v121_v22 = vpop.f32.mrf.mxu3 }
  0x99   :  { %v119_v23 = vadd.f32 %v155_v16, %v118_v21  ;;  %v122_v24 = vadd.f32 %v155_v16, %v121_v22 }
  0x9b   :  { %126 = vst.msk [vmem:[%s307_s4 + $0x10] sm:$0xff] %vm82_vm0, %v119_v23 }
  0x9c   :  { %127 = vst.msk [vmem:[%s307_s4 + $0x18] sm:$0xff] %vm82_vm0, %v122_v24 }
  0x9d   :  { %132 = vsyncpa [#allocation3], 1 }
  0x9e   :  { %133 = vsyncpa [#allocation5], 1 }

// kernel: transformer_forward.79
= control target key start
LH: loop header
LB: loop body
LE: loop exit
PB: predicated region body
PF: predicated region fallthrough
CT: control target
= control target key end

     0   :  { %8 = vsyncpa [#allocation3], 0  ;;  %s243_s0 = inlined_call_operand.vmem [shape: f32[32,32], index: 0, kind: input, shape index: {}]   ;;  %s244_s1 = inlined_call_operand.hbm [shape: f32[32,32], index: 1, kind: input, shape index: {}]   ;;  %s245_s2 = inlined_call_operand.hbm [shape: f32[1,32], index: 2, kind: input, shape index: {}]   ;;  %s246_s3 = inlined_call_operand.vmem [shape: f32[32,32], index: 3, kind: output, shape index: {}]  }
   0x1   :  { %s16_s14 = sshll.u32 %s244_s1, 4  ;;  %s17_s14 = int_to_ptr.hbm [resolvable:$true] %s16_s14 }
   0x2   :  { %9 = vsyncpa [#allocation5], 0  ;;  %s181_s15 = smov [#allocation2]   ;;  %s30_s19 = sshll.u32 %s245_s2, 4  ;;  %s31_s19 = int_to_ptr.hbm [resolvable:$true] %s30_s19 }
   0x3   :  { %s18_s16 = sshll.u32 %s181_s15, 4  ;;  %s182_s20 = smov 128   ;;  %s19_s16 = int_to_ptr.vmem [resolvable:$true] %s18_s16 }
   0x4   :  { %s183_s21 = smov 8   ;;  %s184_s22 = smov [#allocation4]  }
   0x5   :  { %24 = dma.hbm_to_vmem [thread:$0]  %s17_s14, 512, %s19_s16, [#allocation3], %s182_s20, %s182_s20, %s183_s21  }
   0x6   :  { %s32_s23 = sshll.u32 %s184_s22, 4  ;;  %s33_s23 = int_to_ptr.vmem [resolvable:$true] %s32_s23 }
   0x7   :  { %35 = dma.hbm_to_vmem [thread:$0]  %s31_s19, 16, %s33_s23, [#allocation5]  }
   0x8   :  { %177 = dma.done.wait [#allocation3], 512  }
   0x9   :  { %178 = vsyncadd [#allocation3], 4294966784 }
   0xa   :  { %179 = dma.done.wait [#allocation5], 16  }
   0xb   :  { %180 = vsyncadd [#allocation5], 4294967280  ;;  %v51_v0 = vld [vmem:[#allocation2 + $0x18] sm:$0xff]  ;;  %v50_v1 = vld [vmem:[#allocation2 + $0x10] sm:$0xff]  ;;  %vm56_vm0 = vcmask 261120  }
   0xc   :  { %113 = vmatpush.msra.mxu2 %v51_v0  ;;  %114 = vmatpush.msra.mxu3 %v51_v0  ;;  %v49_v2 = vld [vmem:[#allocation2 + $0x8] sm:$0xff]  ;;  %v48_v3 = vld [vmem:[#allocation2] sm:$0xff]  ;;  %v46_v4 = vld [vmem:[%s243_s0 + $0x10] sm:$0xff] }
   0xd   :  { %81 = vmatpush.msra.mxu0 %v51_v0  ;;  %112 = vmatpush.msra.mxu1 %v51_v0  ;;  %v47_v5 = vld [vmem:[%s243_s0 + $0x18] sm:$0xff]  ;;  %v44_v6 = vld [vmem:[%s243_s0] sm:$0xff]  ;;  %v45_v7 = vld [vmem:[%s243_s0 + $0x8] sm:$0xff] }
   0xe   :  { %116 = vmatpush.msra.mxu2 %v50_v1  ;;  %117 = vmatpush.msra.mxu3 %v50_v1  ;;  %v128_v8 = vld [vmem:[#allocation4] ss:$0 sm:$0xff] }
   0xf   :  { %82 = vmatpush.msra.mxu0 %v50_v1  ;;  %115 = vmatpush.msra.mxu1 %v50_v1 }
  0x10   :  { %119 = vmatpush.msra.mxu2 %v49_v2  ;;  %120 = vmatpush.msra.mxu3 %v49_v2 }
  0x11   :  { %83 = vmatpush.msra.mxu0 %v49_v2  ;;  %118 = vmatpush.msra.mxu1 %v49_v2 }
  0x12   :  { %122 = vmatpush.msra.mxu2 %v48_v3  ;;  %123 = vmatpush.msra.mxu3 %v48_v3 }
  0x13   :  { %110 = vmatmul.msk.f32.vlgmr.msra.gmra.mxu2 %vm56_vm0, %v46_v4  ;;  %111 = vmatmul.msk.f32.vlgmr.msra.gmra.mxu3 %vm56_vm0, %v47_v5 }
  0x14   :  { %84 = vmatpush.msra.mxu0 %v48_v3  ;;  %121 = vmatpush.msra.mxu1 %v48_v3 }
  0x15   :  { %108 = vmatmul.msk.f32.vlgmr.msra.gmra.mxu0 %vm56_vm0, %v44_v6  ;;  %109 = vmatmul.msk.f32.vlgmr.msra.gmra.mxu1 %vm56_vm0, %v45_v7 }
  0x92   :  { %v86_v9 = vpop.f32.mrf.mxu0  ;;  %v89_v10 = vpop.f32.mrf.mxu1 }
  0x93   :  { %v87_v11 = vadd.f32 %v128_v8, %v86_v9  ;;  %v90_v12 = vadd.f32 %v128_v8, %v89_v10 }
  0x95   :  { %98 = vst.msk [vmem:[%s246_s3] sm:$0xff] %vm56_vm0, %v87_v11 }
  0x96   :  { %99 = vst.msk [vmem:[%s246_s3 + $0x8] sm:$0xff] %vm56_vm0, %v90_v12  ;;  %v92_v13 = vpop.f32.mrf.mxu2  ;;  %v95_v14 = vpop.f32.mrf.mxu3 }
  0x97   :  { %v93_v15 = vadd.f32 %v128_v8, %v92_v13  ;;  %v96_v16 = vadd.f32 %v128_v8, %v95_v14 }
  0x99   :  { %100 = vst.msk [vmem:[%s246_s3 + $0x10] sm:$0xff] %vm56_vm0, %v93_v15 }
  0x9a   :  { %101 = vst.msk [vmem:[%s246_s3 + $0x18] sm:$0xff] %vm56_vm0, %v96_v16 }
  0x9b   :  { %106 = vsyncpa [#allocation3], 1 }
  0x9c   :  { %107 = vsyncpa [#allocation5], 1 }

// kernel: transformer_forward.85
= control target key start
LH: loop header
LB: loop body
LE: loop exit
PB: predicated region body
PF: predicated region fallthrough
CT: control target
= control target key end

     0   :  { %vm16_vm0 = vcmask 261120   ;;  %v95_v4 = vmov 32.0   ;;  %s140_s0 = inlined_call_operand.vmem [shape: f32[16,32], index: 0, kind: input, shape index: {}]   ;;  %s141_s1 = inlined_call_operand.vmem [shape: f32[1,32], index: 1, kind: input, shape index: {}]   ;;  %s142_s2 = inlined_call_operand.vmem [shape: f32[1,32], index: 2, kind: input, shape index: {}]   ;;  %s143_s3 = inlined_call_operand.vmem [shape: f32[16,32], index: 3, kind: output, shape index: {}]  }
   0x1   :  { %v14_v0 = vld [vmem:[%s140_s0] sm:$0xff]  ;;  %v15_v2 = vld [vmem:[%s140_s0 + $0x8] sm:$0xff]  ;;  %89 = vrcp.f32 %v95_v4 }
   0x2   :  { %v17_v1 = vsel %vm16_vm0, %v14_v0, 0.0  ;;  %v20_v3 = vsel %vm16_vm0, %v15_v2, 0.0  ;;  %v87_v35 = vld [vmem:[%s141_s1] ss:$0 sm:$0xff] }
   0x3   :  { %18 = vadd.xlane.f32.xlu0 %v17_v1  ;;  %v88_v38 = vld [vmem:[%s142_s2] ss:$0 sm:$0xff] }
   0x7   :  { %v90_v5 = vpop.eup %89 }
   0x8   :  { %v24_v6 = vmul.f32 32.0, %v90_v5  ;;  %vm28_vm1 = vweird.f32 %v90_v5 }
   0xa   :  { %v25_v7 = vsub.f32 1.0, %v24_v6 }
   0xb   :  { %21 = vadd.xlane.f32.xlu0 %v20_v3 }
   0xc   :  { %v26_v8 = vmul.f32 %v90_v5, %v25_v7 }
   0xe   :  { %v27_v9 = vadd.f32 %v90_v5, %v26_v8 }
  0x10   :  { %v29_v10 = vsel %vm28_vm1, %v90_v5, %v27_v9 }
  0x76   :  { %v19_v11 = vpop.xlane.xlu0 %18 }
  0x77   :  { %v30_v12 = vmul.f32 %v29_v10, %v19_v11 }
  0x79   :  { %v32_v13 = vsub.f32 %v14_v0, %v30_v12 }
  0x7b   :  { %v34_v14 = vmul.f32 %v32_v13, %v32_v13 }
  0x7d   :  { %v36_v15 = vsel %vm16_vm0, %v34_v14, 0.0 }
  0x7e   :  { %37 = vadd.xlane.f32.xlu1 %v36_v15  ;;  %v22_v16 = vpop.xlane.xlu0 %21 }
  0x7f   :  { %v31_v17 = vmul.f32 %v29_v10, %v22_v16 }
  0x81   :  { %v33_v18 = vsub.f32 %v15_v2, %v31_v17 }
  0x83   :  { %v35_v19 = vmul.f32 %v33_v18, %v33_v18 }
  0x85   :  { %v39_v20 = vsel %vm16_vm0, %v35_v19, 0.0 }
  0x86   :  { %40 = vadd.xlane.f32.xlu1 %v39_v20 }
  0xf1   :  { %v38_v21 = vpop.xlane.xlu1 %37 }
  0xf2   :  { %v42_v22 = vmul.f32 %v38_v21, %v29_v10 }
  0xf4   :  { %v44_v23 = vadd.f32 1e-05, %v42_v22 }
  0xf6   :  { %91 = vrsqrt.f32 %v44_v23  ;;  %vm52_vm3 = vweird.f32 %v44_v23 }
  0xf9   :  { %v41_v24 = vpop.xlane.xlu1 %40 }
  0xfa   :  { %v43_v25 = vmul.f32 %v41_v24, %v29_v10 }
  0xfc   :  { %v92_v26 = vpop.eup %91  ;;  %v45_v27 = vadd.f32 1e-05, %v43_v25 }
  0xfd   :  { %v47_v28 = vmul.f32 %v92_v26, %v44_v23  ;;  %vm53_vm2 = vweird.f32 %v92_v26 }
  0xfe   :  { %93 = vrsqrt.f32 %v45_v27  ;;  %vm54_vm4 = vmor %vm52_vm3, %vm53_vm2  ;;  %vm62_vm6 = vweird.f32 %v45_v27 }
  0xff   :  { %v48_v29 = vmul.f32 %v92_v26, %v47_v28 }
 0x101   :  { %v49_v30 = vmul.f32 0.5, %v48_v29 }
 0x103   :  { %v50_v31 = vsub.f32 1.5, %v49_v30 }
 0x104   :  { %v94_v32 = vpop.eup %93 }
 0x105   :  { %v51_v33 = vmul.f32 %v92_v26, %v50_v31  ;;  %v57_v34 = vmul.f32 %v94_v32, %v45_v27  ;;  %vm63_vm5 = vweird.f32 %v94_v32 }
 0x106   :  { %vm64_vm7 = vmor %vm62_vm6, %vm63_vm5 }
 0x107   :  { %v55_v36 = vsel %vm54_vm4, %v92_v26, %v51_v33  ;;  %v58_v37 = vmul.f32 %v94_v32, %v57_v34 }
 0x108   :  { %v66_v39 = vmul.f32 %v55_v36, %v32_v13 }
 0x109   :  { %v59_v40 = vmul.f32 0.5, %v58_v37 }
 0x10a   :  { %v72_v41 = vmul.f32 %v87_v35, %v66_v39 }
 0x10b   :  { %v60_v42 = vsub.f32 1.5, %v59_v40 }
 0x10c   :  { %v78_v43 = vadd.f32 %v88_v38, %v72_v41 }
 0x10d   :  { %v61_v44 = vmul.f32 %v94_v32, %v60_v42 }
 0x10e   :  { %80 = vst.msk [vmem:[%s143_s3] sm:$0xff] %vm16_vm0, %v78_v43 }
 0x10f   :  { %v65_v45 = vsel %vm64_vm7, %v94_v32, %v61_v44 }
 0x110   :  { %v67_v46 = vmul.f32 %v65_v45, %v33_v18 }
 0x112   :  { %v73_v47 = vmul.f32 %v87_v35, %v67_v46 }
 0x114   :  { %v79_v48 = vadd.f32 %v88_v38, %v73_v47 }
 0x116   :  { %81 = vst.msk [vmem:[%s143_s3 + $0x8] sm:$0xff] %vm16_vm0, %v79_v48 }

</bundles_post_ra>
